<compile_context>
chip_gen: v6e
topology: v6e:2x2x1
jax: 0.10.0
libtpu: 0.0.40
codegen_flags: <defaults>
</compile_context>

<pallas_src>
import numpy as np
import jax
import jax.numpy as jnp
from jax import lax
from jax.experimental import pallas as pl
from jax.experimental.pallas import tpu as pltpu

BN_EPS = 1e-5
LEAKY_SLOPE = 0.01      # nn.LeakyReLU() default negative_slope
KTAPS = 9               # 3x3 kernel taps

_VMEM = pl.BlockSpec(memory_space=pltpu.MemorySpace.VMEM)


# ------------------------------ fused kernel ------------------------------- #

def _make_encoder_kernel(num_conv):
    """Fully fused encoder kernel.

    Ref layout: [x2d, (g, w, bn) * num_conv, gfc, wfc, bfc, eps, mu, log_var, z]
      x2d : (N*H*W, Cin)           bf16, rows ordered (n, h, w)
      g   : (9, M_out, M_in)       bf16 0/1 gather matrices (im2col folded into matmul)
      w   : (9, Cin, Cout)         bf16 per-tap conv weight slices
      bn  : (2, Cout)              f32  [gamma; beta]
      gfc : (spatial, N, N*spatial) bf16 row-selection for the FC stage
      wfc : (spatial, Cout, 2*latent) bf16 fc_mu|fc_var with NCHW-flatten folded in
      bfc : (1, 2*latent)          f32  [b_mu | b_var]
      eps : (N, latent)            f32  reparameterization noise
    """
    n_in = 1 + 3 * num_conv + 4

    def kernel(*refs):
        in_refs = refs[:n_in]
        mu_ref, lv_ref, z_ref = refs[n_in:]

        a = in_refs[0][...]                              # (M0, C0) bf16
        pos = 1
        for _ in range(num_conv):
            g_ref, w_ref, bn_ref = in_refs[pos], in_refs[pos + 1], in_refs[pos + 2]
            pos += 3
            m_out = g_ref.shape[1]

            # Conv as 9 (gather @ act) @ weight-tap matmuls, f32 accumulation.
            acc = None
            for t in range(KTAPS):
                gathered = jnp.dot(g_ref[t], a, preferred_element_type=jnp.float32)
                part = jnp.dot(gathered.astype(jnp.bfloat16), w_ref[t],
                               preferred_element_type=jnp.float32)
                acc = part if acc is None else acc + part

            # BatchNorm (train-mode batch stats, biased variance), single-pass
            # sum / sum-of-squares, folded into one scale/shift. Conv bias omitted
            # on purpose: it cancels exactly under mean subtraction.
            inv_m = 1.0 / m_out
            mean = jnp.sum(acc, axis=0, keepdims=True) * inv_m
            ex2 = jnp.sum(acc * acc, axis=0, keepdims=True) * inv_m
            var = ex2 - mean * mean
            scale = bn_ref[0:1, :] * lax.rsqrt(var + BN_EPS)
            shift = bn_ref[1:2, :] - mean * scale
            y = acc * scale + shift
            y = jnp.where(y >= 0, y, LEAKY_SLOPE * y)    # LeakyReLU
            a = y.astype(jnp.bfloat16)

        # FC heads (fc_mu and fc_var fused into one matmul) + reparameterize.
        gfc_ref, wfc_ref, bfc_ref, eps_ref = in_refs[pos:pos + 4]
        spatial = gfc_ref.shape[0]
        acc = None
        for s in range(spatial):
            rows = jnp.dot(gfc_ref[s], a, preferred_element_type=jnp.float32)
            part = jnp.dot(rows.astype(jnp.bfloat16), wfc_ref[s],
                           preferred_element_type=jnp.float32)
            acc = part if acc is None else acc + part
        pre = acc + bfc_ref[...]                          # (N, 2*latent) = [mu | log_var]

        latent = mu_ref.shape[1]
        mu = pre[:, :latent]
        lv = pre[:, latent:]
        mu_ref[...] = mu
        lv_ref[...] = lv
        z_ref[...] = eps_ref[...] * jnp.exp(0.5 * lv) + mu

    return kernel


# --------------------------- one-time param prep ---------------------------- #

def _build_conv_gather(n, h, w):
    """0/1 gather matrices for a 3x3 / stride-2 / pad-1 conv.

    Returns (9, n*(h//2)*(w//2), n*h*w); G[t, r, p] = 1 iff output row r reads tap
    t = ky*3+kx from valid input row p (zero-padding rows are all-zero)."""
    hout, wout = h // 2, w // 2
    g = np.zeros((KTAPS, n * hout * wout, n * h * w), np.float32)
    nn, ho, wo = np.meshgrid(np.arange(n), np.arange(hout), np.arange(wout), indexing="ij")
    rows = (nn * hout + ho) * wout + wo
    for ky in range(3):
        for kx in range(3):
            hi = 2 * ho - 1 + ky
            wi = 2 * wo - 1 + kx
            valid = (hi >= 0) & (hi < h) & (wi >= 0) & (wi < w)
            cols = (nn * h + np.where(valid, hi, 0)) * w + np.where(valid, wi, 0)
            g[ky * 3 + kx, rows[valid], cols[valid]] = 1.0
    return g


def prepare_params(params, batch, input_size, latent_dim):
    """Re-layout weights once (no per-forward transposes/reshapes):
       - conv weights -> per-tap (Cin, Cout) bf16 slices; conv bias dropped (cancels in BN)
       - gamma/beta stacked to (2, Cout) f32
       - im2col folded into 0/1 gather matrices (bf16)
       - fc_mu/fc_var concatenated and permuted so the NCHW flatten disappears."""
    prep = {"convs": []}
    h = w = input_size
    for (wt, _b, gamma, beta) in params["convs"]:
        g = jnp.asarray(_build_conv_gather(batch, h, w), jnp.bfloat16)
        wtaps = jnp.stack([wt[:, :, ky, kx].T for ky in range(3) for kx in range(3)], 0)
        prep["convs"].append((g, wtaps.astype(jnp.bfloat16),
                              jnp.stack([gamma, beta], 0).astype(jnp.float32)))
        h, w = h // 2, w // 2

    spatial = h * w                                  # last_layer_size ** 2
    cout_last = params["convs"][-1][0].shape[0]
    wcat = jnp.concatenate([params["wmu"], params["wvar"]], axis=0)   # (2L, feat)
    prep["wfc"] = (wcat.reshape(2 * latent_dim, cout_last, spatial)
                   .transpose(2, 1, 0).astype(jnp.bfloat16))          # (spatial, C, 2L)
    gfc = np.zeros((spatial, batch, batch * spatial), np.float32)
    for s in range(spatial):
        for nn in range(batch):
            gfc[s, nn, nn * spatial + s] = 1.0
    prep["gfc"] = jnp.asarray(gfc, jnp.bfloat16)
    prep["bfc"] = jnp.concatenate([params["bmu"], params["bvar"]]).reshape(1, -1).astype(jnp.float32)
    return prep


# ------------------------------- forward call ------------------------------- #

def encoder_forward(x_nchw, prep, eps_noise):
    n, c, h, w = x_nchw.shape
    # Only runtime XLA glue: NCHW -> (N*H*W, C) rows for the first gather (tiny input tensor).
    x2d = jnp.transpose(x_nchw, (0, 2, 3, 1)).reshape(n * h * w, c).astype(jnp.bfloat16)
    latent = prep["bfc"].shape[1] // 2

    conv_args = []
    for (g, wt, bn) in prep["convs"]:
        conv_args += [g, wt, bn]
    num_in = 1 + len(conv_args) + 4

    out_sds = jax.ShapeDtypeStruct((n, latent), jnp.float32)
    return pl.pallas_call(
        _make_encoder_kernel(len(prep["convs"])),
        out_shape=(out_sds, out_sds, out_sds),
        in_specs=[_VMEM] * num_in,
        out_specs=(_VMEM, _VMEM, _VMEM),
    )(x2d, *conv_args, prep["gfc"], prep["wfc"], prep["bfc"],
      eps_noise.astype(jnp.float32))


# --------------------------- pure-JAX reference ----------------------------- #

def reference_forward(x_nchw, params, eps_noise):
    y = x_nchw
    for (w, b, gamma, beta) in params["convs"]:
        y = lax.conv_general_dilated(y, w, window_strides=(2, 2),
                                     padding=((1, 1), (1, 1)),
                                     dimension_numbers=("NCHW", "OIHW", "NCHW"))
        y = y + b[None, :, None, None]
        mean = jnp.mean(y, axis=(0, 2, 3), keepdims=True)
        var = jnp.var(y, axis=(0, 2, 3), keepdims=True)   # biased (train mode)
        y = (y - mean) * lax.rsqrt(var + BN_EPS)
        y = gamma[None, :, None, None] * y + beta[None, :, None, None]
        y = jnp.where(y >= 0, y, LEAKY_SLOPE * y)
    feat = y.reshape(y.shape[0], -1)
    mu = feat @ params["wmu"].T + params["bmu"]
    log_var = feat @ params["wvar"].T + params["bvar"]
    z = eps_noise * jnp.exp(0.5 * log_var) + mu
    return mu, log_var, z


# ---------------------------------- main ------------------------------------ #

def init_params(key, in_channels, hidden_dims, latent_dim, input_size):
    params = {"convs": []}
    cin = in_channels
    for h_dim in hidden_dims:
        key, kw, kb, kg, kbe = jax.random.split(key, 5)
        w = jax.random.normal(kw, (h_dim, cin, 3, 3), jnp.float32) * 0.1
        b = jax.random.normal(kb, (h_dim,), jnp.float32) * 0.1
        gamma = 1.0 + 0.05 * jax.random.normal(kg, (h_dim,), jnp.float32)
        beta = 0.05 * jax.random.normal(kbe, (h_dim,), jnp.float32)
        params["convs"].append((w, b, gamma, beta))
        cin = h_dim
    last = input_size // (2 ** len(hidden_dims))
    feat_dim = hidden_dims[-1] * last * last
    key, k1, k2, k3, k4 = jax.random.split(key, 5)
    params["wmu"] = jax.random.normal(k1, (latent_dim, feat_dim), jnp.float32) * 0.05
    params["bmu"] = jax.random.normal(k2, (latent_dim,), jnp.float32) * 0.05
    params["wvar"] = jax.random.normal(k3, (latent_dim, feat_dim), jnp.float32) * 0.05
    params["bvar"] = jax.random.normal(k4, (latent_dim,), jnp.float32) * 0.05
    return params


if __name__ == "__main__":
    # Encoder(in_channels=4, latent_dim=8, input_size=16, hidden_dims=[8, 16, 32]); batch = 2.
    batch, in_channels, input_size = 2, 4, 16
    hidden_dims = [8, 16, 32]
    latent_dim = 8

    key = jax.random.PRNGKey(0)
    key, kx, keps, kp = jax.random.split(key, 4)
    x = jax.random.normal(kx, (batch, in_channels, input_size, input_size), jnp.float32)
    # eps of torch.randn_like(std) is supplied deterministically from the host (glue).
    eps_noise = jax.random.normal(keps, (batch, latent_dim), jnp.float32)
    params = init_params(kp, in_channels, hidden_dims, latent_dim, input_size)
    prep = prepare_params(params, batch, input_size, latent_dim)

    fwd = jax.jit(encoder_forward)
    mu, log_var, z = fwd(x, prep, eps_noise)
    jax.block_until_ready((mu, log_var, z))

    mu_r, lv_r, z_r = reference_forward(x, params, eps_noise)
    # Kernel uses bf16 MXU operands (per perf review) with f32 accumulation; reference is f32.
    np.testing.assert_allclose(np.asarray(mu), np.asarray(mu_r), rtol=3e-2, atol=3e-2)
    np.testing.assert_allclose(np.asarray(log_var), np.asarray(lv_r), rtol=3e-2, atol=3e-2)
    np.testing.assert_allclose(np.asarray(z), np.asarray(z_r), rtol=3e-2, atol=3e-2)

    print("KERNEL_OK")
</pallas_src>

<mosaic_0001>
module attributes {stable_mosaic.version = 11 : i64} {
  func.func @kernel(%arg0: memref<512x4xbf16, #tpu.memory_space<vmem>>, %arg1: memref<9x128x512xbf16, #tpu.memory_space<vmem>>, %arg2: memref<9x4x8xbf16, #tpu.memory_space<vmem>>, %arg3: memref<2x8xf32, #tpu.memory_space<vmem>>, %arg4: memref<9x32x128xbf16, #tpu.memory_space<vmem>>, %arg5: memref<9x8x16xbf16, #tpu.memory_space<vmem>>, %arg6: memref<2x16xf32, #tpu.memory_space<vmem>>, %arg7: memref<9x8x32xbf16, #tpu.memory_space<vmem>>, %arg8: memref<9x16x32xbf16, #tpu.memory_space<vmem>>, %arg9: memref<2x32xf32, #tpu.memory_space<vmem>>, %arg10: memref<4x2x8xbf16, #tpu.memory_space<vmem>>, %arg11: memref<4x32x16xbf16, #tpu.memory_space<vmem>>, %arg12: memref<1x16xf32, #tpu.memory_space<vmem>>, %arg13: memref<2x8xf32, #tpu.memory_space<vmem>>, %arg14: memref<2x8xf32, #tpu.memory_space<vmem>>, %arg15: memref<2x8xf32, #tpu.memory_space<vmem>>, %arg16: memref<2x8xf32, #tpu.memory_space<vmem>>) attributes {dimension_semantics = [], scalar_prefetch = 0 : i64, scratch_operands = 0 : i64, tpu.core_type = #tpu.core_type<tc>} {
    %c0 = arith.constant 0 : index
    %c0_0 = arith.constant 0 : index
    %0 = vector.load %arg0[%c0, %c0_0] : memref<512x4xbf16, #tpu.memory_space<vmem>>, vector<512x4xbf16>
    %c0_1 = arith.constant 0 : index
    %c0_2 = arith.constant 0 : index
    %c0_3 = arith.constant 0 : index
    %1 = vector.load %arg1[%c0_1, %c0_2, %c0_3] : memref<9x128x512xbf16, #tpu.memory_space<vmem>>, vector<1x128x512xbf16>
    %2 = vector.shape_cast %1 : vector<1x128x512xbf16> to vector<128x512xbf16>
    %cst = arith.constant dense<0.000000e+00> : vector<128x4xf32>
    %3 = tpu.matmul %2, %0, %cst {dimension_numbers = #tpu.dot_dimension_numbers<[1], [0], [0], [1], [0, 0, 1, 1], [], []>} : vector<128x512xbf16>, vector<512x4xbf16>, vector<128x4xf32> -> vector<128x4xf32>
    %4 = arith.truncf %3 : vector<128x4xf32> to vector<128x4xbf16>
    %c0_4 = arith.constant 0 : index
    %c0_5 = arith.constant 0 : index
    %c0_6 = arith.constant 0 : index
    %5 = vector.load %arg2[%c0_4, %c0_5, %c0_6] : memref<9x4x8xbf16, #tpu.memory_space<vmem>>, vector<1x4x8xbf16>
    %6 = vector.shape_cast %5 : vector<1x4x8xbf16> to vector<4x8xbf16>
    %cst_7 = arith.constant dense<0.000000e+00> : vector<128x8xf32>
    %7 = tpu.matmul %4, %6, %cst_7 {dimension_numbers = #tpu.dot_dimension_numbers<[1], [0], [0], [1], [0, 0, 1, 1], [], []>} : vector<128x4xbf16>, vector<4x8xbf16>, vector<128x8xf32> -> vector<128x8xf32>
    %c1 = arith.constant 1 : index
    %c0_8 = arith.constant 0 : index
    %c0_9 = arith.constant 0 : index
    %8 = vector.load %arg1[%c1, %c0_8, %c0_9] : memref<9x128x512xbf16, #tpu.memory_space<vmem>>, vector<1x128x512xbf16>
    %9 = vector.shape_cast %8 : vector<1x128x512xbf16> to vector<128x512xbf16>
    %cst_10 = arith.constant dense<0.000000e+00> : vector<128x4xf32>
    %10 = tpu.matmul %9, %0, %cst_10 {dimension_numbers = #tpu.dot_dimension_numbers<[1], [0], [0], [1], [0, 0, 1, 1], [], []>} : vector<128x512xbf16>, vector<512x4xbf16>, vector<128x4xf32> -> vector<128x4xf32>
    %11 = arith.truncf %10 : vector<128x4xf32> to vector<128x4xbf16>
    %c1_11 = arith.constant 1 : index
    %c0_12 = arith.constant 0 : index
    %c0_13 = arith.constant 0 : index
    %12 = vector.load %arg2[%c1_11, %c0_12, %c0_13] : memref<9x4x8xbf16, #tpu.memory_space<vmem>>, vector<1x4x8xbf16>
    %13 = vector.shape_cast %12 : vector<1x4x8xbf16> to vector<4x8xbf16>
    %cst_14 = arith.constant dense<0.000000e+00> : vector<128x8xf32>
    %14 = tpu.matmul %11, %13, %cst_14 {dimension_numbers = #tpu.dot_dimension_numbers<[1], [0], [0], [1], [0, 0, 1, 1], [], []>} : vector<128x4xbf16>, vector<4x8xbf16>, vector<128x8xf32> -> vector<128x8xf32>
    %15 = arith.addf %7, %14 : vector<128x8xf32>
    %c2 = arith.constant 2 : index
    %c0_15 = arith.constant 0 : index
    %c0_16 = arith.constant 0 : index
    %16 = vector.load %arg1[%c2, %c0_15, %c0_16] : memref<9x128x512xbf16, #tpu.memory_space<vmem>>, vector<1x128x512xbf16>
    %17 = vector.shape_cast %16 : vector<1x128x512xbf16> to vector<128x512xbf16>
    %cst_17 = arith.constant dense<0.000000e+00> : vector<128x4xf32>
    %18 = tpu.matmul %17, %0, %cst_17 {dimension_numbers = #tpu.dot_dimension_numbers<[1], [0], [0], [1], [0, 0, 1, 1], [], []>} : vector<128x512xbf16>, vector<512x4xbf16>, vector<128x4xf32> -> vector<128x4xf32>
    %19 = arith.truncf %18 : vector<128x4xf32> to vector<128x4xbf16>
    %c2_18 = arith.constant 2 : index
    %c0_19 = arith.constant 0 : index
    %c0_20 = arith.constant 0 : index
    %20 = vector.load %arg2[%c2_18, %c0_19, %c0_20] : memref<9x4x8xbf16, #tpu.memory_space<vmem>>, vector<1x4x8xbf16>
    %21 = vector.shape_cast %20 : vector<1x4x8xbf16> to vector<4x8xbf16>
    %cst_21 = arith.constant dense<0.000000e+00> : vector<128x8xf32>
    %22 = tpu.matmul %19, %21, %cst_21 {dimension_numbers = #tpu.dot_dimension_numbers<[1], [0], [0], [1], [0, 0, 1, 1], [], []>} : vector<128x4xbf16>, vector<4x8xbf16>, vector<128x8xf32> -> vector<128x8xf32>
    %23 = arith.addf %15, %22 : vector<128x8xf32>
    %c3 = arith.constant 3 : index
    %c0_22 = arith.constant 0 : index
    %c0_23 = arith.constant 0 : index
    %24 = vector.load %arg1[%c3, %c0_22, %c0_23] : memref<9x128x512xbf16, #tpu.memory_space<vmem>>, vector<1x128x512xbf16>
    %25 = vector.shape_cast %24 : vector<1x128x512xbf16> to vector<128x512xbf16>
    %cst_24 = arith.constant dense<0.000000e+00> : vector<128x4xf32>
    %26 = tpu.matmul %25, %0, %cst_24 {dimension_numbers = #tpu.dot_dimension_numbers<[1], [0], [0], [1], [0, 0, 1, 1], [], []>} : vector<128x512xbf16>, vector<512x4xbf16>, vector<128x4xf32> -> vector<128x4xf32>
    %27 = arith.truncf %26 : vector<128x4xf32> to vector<128x4xbf16>
    %c3_25 = arith.constant 3 : index
    %c0_26 = arith.constant 0 : index
    %c0_27 = arith.constant 0 : index
    %28 = vector.load %arg2[%c3_25, %c0_26, %c0_27] : memref<9x4x8xbf16, #tpu.memory_space<vmem>>, vector<1x4x8xbf16>
    %29 = vector.shape_cast %28 : vector<1x4x8xbf16> to vector<4x8xbf16>
    %cst_28 = arith.constant dense<0.000000e+00> : vector<128x8xf32>
    %30 = tpu.matmul %27, %29, %cst_28 {dimension_numbers = #tpu.dot_dimension_numbers<[1], [0], [0], [1], [0, 0, 1, 1], [], []>} : vector<128x4xbf16>, vector<4x8xbf16>, vector<128x8xf32> -> vector<128x8xf32>
    %31 = arith.addf %23, %30 : vector<128x8xf32>
    %c4 = arith.constant 4 : index
    %c0_29 = arith.constant 0 : index
    %c0_30 = arith.constant 0 : index
    %32 = vector.load %arg1[%c4, %c0_29, %c0_30] : memref<9x128x512xbf16, #tpu.memory_space<vmem>>, vector<1x128x512xbf16>
    %33 = vector.shape_cast %32 : vector<1x128x512xbf16> to vector<128x512xbf16>
    %cst_31 = arith.constant dense<0.000000e+00> : vector<128x4xf32>
    %34 = tpu.matmul %33, %0, %cst_31 {dimension_numbers = #tpu.dot_dimension_numbers<[1], [0], [0], [1], [0, 0, 1, 1], [], []>} : vector<128x512xbf16>, vector<512x4xbf16>, vector<128x4xf32> -> vector<128x4xf32>
    %35 = arith.truncf %34 : vector<128x4xf32> to vector<128x4xbf16>
    %c4_32 = arith.constant 4 : index
    %c0_33 = arith.constant 0 : index
    %c0_34 = arith.constant 0 : index
    %36 = vector.load %arg2[%c4_32, %c0_33, %c0_34] : memref<9x4x8xbf16, #tpu.memory_space<vmem>>, vector<1x4x8xbf16>
    %37 = vector.shape_cast %36 : vector<1x4x8xbf16> to vector<4x8xbf16>
    %cst_35 = arith.constant dense<0.000000e+00> : vector<128x8xf32>
    %38 = tpu.matmul %35, %37, %cst_35 {dimension_numbers = #tpu.dot_dimension_numbers<[1], [0], [0], [1], [0, 0, 1, 1], [], []>} : vector<128x4xbf16>, vector<4x8xbf16>, vector<128x8xf32> -> vector<128x8xf32>
    %39 = arith.addf %31, %38 : vector<128x8xf32>
    %c5 = arith.constant 5 : index
    %c0_36 = arith.constant 0 : index
    %c0_37 = arith.constant 0 : index
    %40 = vector.load %arg1[%c5, %c0_36, %c0_37] : memref<9x128x512xbf16, #tpu.memory_space<vmem>>, vector<1x128x512xbf16>
    %41 = vector.shape_cast %40 : vector<1x128x512xbf16> to vector<128x512xbf16>
    %cst_38 = arith.constant dense<0.000000e+00> : vector<128x4xf32>
    %42 = tpu.matmul %41, %0, %cst_38 {dimension_numbers = #tpu.dot_dimension_numbers<[1], [0], [0], [1], [0, 0, 1, 1], [], []>} : vector<128x512xbf16>, vector<512x4xbf16>, vector<128x4xf32> -> vector<128x4xf32>
    %43 = arith.truncf %42 : vector<128x4xf32> to vector<128x4xbf16>
    %c5_39 = arith.constant 5 : index
    %c0_40 = arith.constant 0 : index
    %c0_41 = arith.constant 0 : index
    %44 = vector.load %arg2[%c5_39, %c0_40, %c0_41] : memref<9x4x8xbf16, #tpu.memory_space<vmem>>, vector<1x4x8xbf16>
    %45 = vector.shape_cast %44 : vector<1x4x8xbf16> to vector<4x8xbf16>
    %cst_42 = arith.constant dense<0.000000e+00> : vector<128x8xf32>
    %46 = tpu.matmul %43, %45, %cst_42 {dimension_numbers = #tpu.dot_dimension_numbers<[1], [0], [0], [1], [0, 0, 1, 1], [], []>} : vector<128x4xbf16>, vector<4x8xbf16>, vector<128x8xf32> -> vector<128x8xf32>
    %47 = arith.addf %39, %46 : vector<128x8xf32>
    %c6 = arith.constant 6 : index
    %c0_43 = arith.constant 0 : index
    %c0_44 = arith.constant 0 : index
    %48 = vector.load %arg1[%c6, %c0_43, %c0_44] : memref<9x128x512xbf16, #tpu.memory_space<vmem>>, vector<1x128x512xbf16>
    %49 = vector.shape_cast %48 : vector<1x128x512xbf16> to vector<128x512xbf16>
    %cst_45 = arith.constant dense<0.000000e+00> : vector<128x4xf32>
    %50 = tpu.matmul %49, %0, %cst_45 {dimension_numbers = #tpu.dot_dimension_numbers<[1], [0], [0], [1], [0, 0, 1, 1], [], []>} : vector<128x512xbf16>, vector<512x4xbf16>, vector<128x4xf32> -> vector<128x4xf32>
    %51 = arith.truncf %50 : vector<128x4xf32> to vector<128x4xbf16>
    %c6_46 = arith.constant 6 : index
    %c0_47 = arith.constant 0 : index
    %c0_48 = arith.constant 0 : index
    %52 = vector.load %arg2[%c6_46, %c0_47, %c0_48] : memref<9x4x8xbf16, #tpu.memory_space<vmem>>, vector<1x4x8xbf16>
    %53 = vector.shape_cast %52 : vector<1x4x8xbf16> to vector<4x8xbf16>
    %cst_49 = arith.constant dense<0.000000e+00> : vector<128x8xf32>
    %54 = tpu.matmul %51, %53, %cst_49 {dimension_numbers = #tpu.dot_dimension_numbers<[1], [0], [0], [1], [0, 0, 1, 1], [], []>} : vector<128x4xbf16>, vector<4x8xbf16>, vector<128x8xf32> -> vector<128x8xf32>
    %55 = arith.addf %47, %54 : vector<128x8xf32>
    %c7 = arith.constant 7 : index
    %c0_50 = arith.constant 0 : index
    %c0_51 = arith.constant 0 : index
    %56 = vector.load %arg1[%c7, %c0_50, %c0_51] : memref<9x128x512xbf16, #tpu.memory_space<vmem>>, vector<1x128x512xbf16>
    %57 = vector.shape_cast %56 : vector<1x128x512xbf16> to vector<128x512xbf16>
    %cst_52 = arith.constant dense<0.000000e+00> : vector<128x4xf32>
    %58 = tpu.matmul %57, %0, %cst_52 {dimension_numbers = #tpu.dot_dimension_numbers<[1], [0], [0], [1], [0, 0, 1, 1], [], []>} : vector<128x512xbf16>, vector<512x4xbf16>, vector<128x4xf32> -> vector<128x4xf32>
    %59 = arith.truncf %58 : vector<128x4xf32> to vector<128x4xbf16>
    %c7_53 = arith.constant 7 : index
    %c0_54 = arith.constant 0 : index
    %c0_55 = arith.constant 0 : index
    %60 = vector.load %arg2[%c7_53, %c0_54, %c0_55] : memref<9x4x8xbf16, #tpu.memory_space<vmem>>, vector<1x4x8xbf16>
    %61 = vector.shape_cast %60 : vector<1x4x8xbf16> to vector<4x8xbf16>
    %cst_56 = arith.constant dense<0.000000e+00> : vector<128x8xf32>
    %62 = tpu.matmul %59, %61, %cst_56 {dimension_numbers = #tpu.dot_dimension_numbers<[1], [0], [0], [1], [0, 0, 1, 1], [], []>} : vector<128x4xbf16>, vector<4x8xbf16>, vector<128x8xf32> -> vector<128x8xf32>
    %63 = arith.addf %55, %62 : vector<128x8xf32>
    %c8 = arith.constant 8 : index
    %c0_57 = arith.constant 0 : index
    %c0_58 = arith.constant 0 : index
    %64 = vector.load %arg1[%c8, %c0_57, %c0_58] : memref<9x128x512xbf16, #tpu.memory_space<vmem>>, vector<1x128x512xbf16>
    %65 = vector.shape_cast %64 : vector<1x128x512xbf16> to vector<128x512xbf16>
    %cst_59 = arith.constant dense<0.000000e+00> : vector<128x4xf32>
    %66 = tpu.matmul %65, %0, %cst_59 {dimension_numbers = #tpu.dot_dimension_numbers<[1], [0], [0], [1], [0, 0, 1, 1], [], []>} : vector<128x512xbf16>, vector<512x4xbf16>, vector<128x4xf32> -> vector<128x4xf32>
    %67 = arith.truncf %66 : vector<128x4xf32> to vector<128x4xbf16>
    %c8_60 = arith.constant 8 : index
    %c0_61 = arith.constant 0 : index
    %c0_62 = arith.constant 0 : index
    %68 = vector.load %arg2[%c8_60, %c0_61, %c0_62] : memref<9x4x8xbf16, #tpu.memory_space<vmem>>, vector<1x4x8xbf16>
    %69 = vector.shape_cast %68 : vector<1x4x8xbf16> to vector<4x8xbf16>
    %cst_63 = arith.constant dense<0.000000e+00> : vector<128x8xf32>
    %70 = tpu.matmul %67, %69, %cst_63 {dimension_numbers = #tpu.dot_dimension_numbers<[1], [0], [0], [1], [0, 0, 1, 1], [], []>} : vector<128x4xbf16>, vector<4x8xbf16>, vector<128x8xf32> -> vector<128x8xf32>
    %71 = arith.addf %63, %70 : vector<128x8xf32>
    %cst_64 = arith.constant dense<0.000000e+00> : vector<8xf32>
    %72 = vector.multi_reduction <add>, %71, %cst_64 [0] : vector<128x8xf32> to vector<8xf32>
    %73 = vector.shape_cast %72 : vector<8xf32> to vector<1x8xf32>
    %cst_65 = arith.constant 7.812500e-03 : f32
    %74 = vector.broadcast %cst_65 : f32 to vector<1x8xf32>
    %75 = arith.mulf %73, %74 : vector<1x8xf32>
    %76 = arith.mulf %71, %71 : vector<128x8xf32>
    %cst_66 = arith.constant dense<0.000000e+00> : vector<8xf32>
    %77 = vector.multi_reduction <add>, %76, %cst_66 [0] : vector<128x8xf32> to vector<8xf32>
    %78 = vector.shape_cast %77 : vector<8xf32> to vector<1x8xf32>
    %cst_67 = arith.constant 7.812500e-03 : f32
    %79 = vector.broadcast %cst_67 : f32 to vector<1x8xf32>
    %80 = arith.mulf %78, %79 : vector<1x8xf32>
    %81 = arith.mulf %75, %75 : vector<1x8xf32>
    %82 = arith.subf %80, %81 : vector<1x8xf32>
    %c0_68 = arith.constant 0 : index
    %c0_69 = arith.constant 0 : index
    %83 = vector.load %arg3[%c0_68, %c0_69] : memref<2x8xf32, #tpu.memory_space<vmem>>, vector<1x8xf32>
    %cst_70 = arith.constant 9.99999974E-6 : f32
    %84 = vector.broadcast %cst_70 : f32 to vector<1x8xf32>
    %85 = arith.addf %82, %84 : vector<1x8xf32>
    %86 = math.rsqrt %85 : vector<1x8xf32>
    %87 = arith.mulf %83, %86 : vector<1x8xf32>
    %c1_71 = arith.constant 1 : index
    %c0_72 = arith.constant 0 : index
    %88 = vector.load %arg3[%c1_71, %c0_72] : memref<2x8xf32, #tpu.memory_space<vmem>>, vector<1x8xf32>
    %89 = arith.mulf %75, %87 : vector<1x8xf32>
    %90 = arith.subf %88, %89 : vector<1x8xf32>
    %91 = vector.broadcast %87 : vector<1x8xf32> to vector<128x8xf32>
    %92 = arith.mulf %71, %91 : vector<128x8xf32>
    %93 = vector.broadcast %90 : vector<1x8xf32> to vector<128x8xf32>
    %94 = arith.addf %92, %93 : vector<128x8xf32>
    %cst_73 = arith.constant 0.000000e+00 : f32
    %95 = vector.broadcast %cst_73 : f32 to vector<128x8xf32>
    %96 = arith.cmpf oge, %94, %95 : vector<128x8xf32>
    %cst_74 = arith.constant 0.00999999977 : f32
    %97 = vector.broadcast %cst_74 : f32 to vector<128x8xf32>
    %98 = arith.mulf %97, %94 : vector<128x8xf32>
    %99 = arith.select %96, %94, %98 : vector<128x8xi1>, vector<128x8xf32>
    %100 = arith.truncf %99 : vector<128x8xf32> to vector<128x8xbf16>
    %c0_75 = arith.constant 0 : index
    %c0_76 = arith.constant 0 : index
    %c0_77 = arith.constant 0 : index
    %101 = vector.load %arg4[%c0_75, %c0_76, %c0_77] : memref<9x32x128xbf16, #tpu.memory_space<vmem>>, vector<1x32x128xbf16>
    %102 = vector.shape_cast %101 : vector<1x32x128xbf16> to vector<32x128xbf16>
    %cst_78 = arith.constant dense<0.000000e+00> : vector<32x8xf32>
    %103 = tpu.matmul %102, %100, %cst_78 {dimension_numbers = #tpu.dot_dimension_numbers<[1], [0], [0], [1], [0, 0, 1, 1], [], []>} : vector<32x128xbf16>, vector<128x8xbf16>, vector<32x8xf32> -> vector<32x8xf32>
    %104 = arith.truncf %103 : vector<32x8xf32> to vector<32x8xbf16>
    %c0_79 = arith.constant 0 : index
    %c0_80 = arith.constant 0 : index
    %c0_81 = arith.constant 0 : index
    %105 = vector.load %arg5[%c0_79, %c0_80, %c0_81] : memref<9x8x16xbf16, #tpu.memory_space<vmem>>, vector<1x8x16xbf16>
    %106 = vector.shape_cast %105 : vector<1x8x16xbf16> to vector<8x16xbf16>
    %cst_82 = arith.constant dense<0.000000e+00> : vector<32x16xf32>
    %107 = tpu.matmul %104, %106, %cst_82 {dimension_numbers = #tpu.dot_dimension_numbers<[1], [0], [0], [1], [0, 0, 1, 1], [], []>} : vector<32x8xbf16>, vector<8x16xbf16>, vector<32x16xf32> -> vector<32x16xf32>
    %c1_83 = arith.constant 1 : index
    %c0_84 = arith.constant 0 : index
    %c0_85 = arith.constant 0 : index
    %108 = vector.load %arg4[%c1_83, %c0_84, %c0_85] : memref<9x32x128xbf16, #tpu.memory_space<vmem>>, vector<1x32x128xbf16>
    %109 = vector.shape_cast %108 : vector<1x32x128xbf16> to vector<32x128xbf16>
    %cst_86 = arith.constant dense<0.000000e+00> : vector<32x8xf32>
    %110 = tpu.matmul %109, %100, %cst_86 {dimension_numbers = #tpu.dot_dimension_numbers<[1], [0], [0], [1], [0, 0, 1, 1], [], []>} : vector<32x128xbf16>, vector<128x8xbf16>, vector<32x8xf32> -> vector<32x8xf32>
    %111 = arith.truncf %110 : vector<32x8xf32> to vector<32x8xbf16>
    %c1_87 = arith.constant 1 : index
    %c0_88 = arith.constant 0 : index
    %c0_89 = arith.constant 0 : index
    %112 = vector.load %arg5[%c1_87, %c0_88, %c0_89] : memref<9x8x16xbf16, #tpu.memory_space<vmem>>, vector<1x8x16xbf16>
    %113 = vector.shape_cast %112 : vector<1x8x16xbf16> to vector<8x16xbf16>
    %cst_90 = arith.constant dense<0.000000e+00> : vector<32x16xf32>
    %114 = tpu.matmul %111, %113, %cst_90 {dimension_numbers = #tpu.dot_dimension_numbers<[1], [0], [0], [1], [0, 0, 1, 1], [], []>} : vector<32x8xbf16>, vector<8x16xbf16>, vector<32x16xf32> -> vector<32x16xf32>
    %115 = arith.addf %107, %114 : vector<32x16xf32>
    %c2_91 = arith.constant 2 : index
    %c0_92 = arith.constant 0 : index
    %c0_93 = arith.constant 0 : index
    %116 = vector.load %arg4[%c2_91, %c0_92, %c0_93] : memref<9x32x128xbf16, #tpu.memory_space<vmem>>, vector<1x32x128xbf16>
    %117 = vector.shape_cast %116 : vector<1x32x128xbf16> to vector<32x128xbf16>
    %cst_94 = arith.constant dense<0.000000e+00> : vector<32x8xf32>
    %118 = tpu.matmul %117, %100, %cst_94 {dimension_numbers = #tpu.dot_dimension_numbers<[1], [0], [0], [1], [0, 0, 1, 1], [], []>} : vector<32x128xbf16>, vector<128x8xbf16>, vector<32x8xf32> -> vector<32x8xf32>
    %119 = arith.truncf %118 : vector<32x8xf32> to vector<32x8xbf16>
    %c2_95 = arith.constant 2 : index
    %c0_96 = arith.constant 0 : index
    %c0_97 = arith.constant 0 : index
    %120 = vector.load %arg5[%c2_95, %c0_96, %c0_97] : memref<9x8x16xbf16, #tpu.memory_space<vmem>>, vector<1x8x16xbf16>
    %121 = vector.shape_cast %120 : vector<1x8x16xbf16> to vector<8x16xbf16>
    %cst_98 = arith.constant dense<0.000000e+00> : vector<32x16xf32>
    %122 = tpu.matmul %119, %121, %cst_98 {dimension_numbers = #tpu.dot_dimension_numbers<[1], [0], [0], [1], [0, 0, 1, 1], [], []>} : vector<32x8xbf16>, vector<8x16xbf16>, vector<32x16xf32> -> vector<32x16xf32>
    %123 = arith.addf %115, %122 : vector<32x16xf32>
    %c3_99 = arith.constant 3 : index
    %c0_100 = arith.constant 0 : index
    %c0_101 = arith.constant 0 : index
    %124 = vector.load %arg4[%c3_99, %c0_100, %c0_101] : memref<9x32x128xbf16, #tpu.memory_space<vmem>>, vector<1x32x128xbf16>
    %125 = vector.shape_cast %124 : vector<1x32x128xbf16> to vector<32x128xbf16>
    %cst_102 = arith.constant dense<0.000000e+00> : vector<32x8xf32>
    %126 = tpu.matmul %125, %100, %cst_102 {dimension_numbers = #tpu.dot_dimension_numbers<[1], [0], [0], [1], [0, 0, 1, 1], [], []>} : vector<32x128xbf16>, vector<128x8xbf16>, vector<32x8xf32> -> vector<32x8xf32>
    %127 = arith.truncf %126 : vector<32x8xf32> to vector<32x8xbf16>
    %c3_103 = arith.constant 3 : index
    %c0_104 = arith.constant 0 : index
    %c0_105 = arith.constant 0 : index
    %128 = vector.load %arg5[%c3_103, %c0_104, %c0_105] : memref<9x8x16xbf16, #tpu.memory_space<vmem>>, vector<1x8x16xbf16>
    %129 = vector.shape_cast %128 : vector<1x8x16xbf16> to vector<8x16xbf16>
    %cst_106 = arith.constant dense<0.000000e+00> : vector<32x16xf32>
    %130 = tpu.matmul %127, %129, %cst_106 {dimension_numbers = #tpu.dot_dimension_numbers<[1], [0], [0], [1], [0, 0, 1, 1], [], []>} : vector<32x8xbf16>, vector<8x16xbf16>, vector<32x16xf32> -> vector<32x16xf32>
    %131 = arith.addf %123, %130 : vector<32x16xf32>
    %c4_107 = arith.constant 4 : index
    %c0_108 = arith.constant 0 : index
    %c0_109 = arith.constant 0 : index
    %132 = vector.load %arg4[%c4_107, %c0_108, %c0_109] : memref<9x32x128xbf16, #tpu.memory_space<vmem>>, vector<1x32x128xbf16>
    %133 = vector.shape_cast %132 : vector<1x32x128xbf16> to vector<32x128xbf16>
    %cst_110 = arith.constant dense<0.000000e+00> : vector<32x8xf32>
    %134 = tpu.matmul %133, %100, %cst_110 {dimension_numbers = #tpu.dot_dimension_numbers<[1], [0], [0], [1], [0, 0, 1, 1], [], []>} : vector<32x128xbf16>, vector<128x8xbf16>, vector<32x8xf32> -> vector<32x8xf32>
    %135 = arith.truncf %134 : vector<32x8xf32> to vector<32x8xbf16>
    %c4_111 = arith.constant 4 : index
    %c0_112 = arith.constant 0 : index
    %c0_113 = arith.constant 0 : index
    %136 = vector.load %arg5[%c4_111, %c0_112, %c0_113] : memref<9x8x16xbf16, #tpu.memory_space<vmem>>, vector<1x8x16xbf16>
    %137 = vector.shape_cast %136 : vector<1x8x16xbf16> to vector<8x16xbf16>
    %cst_114 = arith.constant dense<0.000000e+00> : vector<32x16xf32>
    %138 = tpu.matmul %135, %137, %cst_114 {dimension_numbers = #tpu.dot_dimension_numbers<[1], [0], [0], [1], [0, 0, 1, 1], [], []>} : vector<32x8xbf16>, vector<8x16xbf16>, vector<32x16xf32> -> vector<32x16xf32>
    %139 = arith.addf %131, %138 : vector<32x16xf32>
    %c5_115 = arith.constant 5 : index
    %c0_116 = arith.constant 0 : index
    %c0_117 = arith.constant 0 : index
    %140 = vector.load %arg4[%c5_115, %c0_116, %c0_117] : memref<9x32x128xbf16, #tpu.memory_space<vmem>>, vector<1x32x128xbf16>
    %141 = vector.shape_cast %140 : vector<1x32x128xbf16> to vector<32x128xbf16>
    %cst_118 = arith.constant dense<0.000000e+00> : vector<32x8xf32>
    %142 = tpu.matmul %141, %100, %cst_118 {dimension_numbers = #tpu.dot_dimension_numbers<[1], [0], [0], [1], [0, 0, 1, 1], [], []>} : vector<32x128xbf16>, vector<128x8xbf16>, vector<32x8xf32> -> vector<32x8xf32>
    %143 = arith.truncf %142 : vector<32x8xf32> to vector<32x8xbf16>
    %c5_119 = arith.constant 5 : index
    %c0_120 = arith.constant 0 : index
    %c0_121 = arith.constant 0 : index
    %144 = vector.load %arg5[%c5_119, %c0_120, %c0_121] : memref<9x8x16xbf16, #tpu.memory_space<vmem>>, vector<1x8x16xbf16>
    %145 = vector.shape_cast %144 : vector<1x8x16xbf16> to vector<8x16xbf16>
    %cst_122 = arith.constant dense<0.000000e+00> : vector<32x16xf32>
    %146 = tpu.matmul %143, %145, %cst_122 {dimension_numbers = #tpu.dot_dimension_numbers<[1], [0], [0], [1], [0, 0, 1, 1], [], []>} : vector<32x8xbf16>, vector<8x16xbf16>, vector<32x16xf32> -> vector<32x16xf32>
    %147 = arith.addf %139, %146 : vector<32x16xf32>
    %c6_123 = arith.constant 6 : index
    %c0_124 = arith.constant 0 : index
    %c0_125 = arith.constant 0 : index
    %148 = vector.load %arg4[%c6_123, %c0_124, %c0_125] : memref<9x32x128xbf16, #tpu.memory_space<vmem>>, vector<1x32x128xbf16>
    %149 = vector.shape_cast %148 : vector<1x32x128xbf16> to vector<32x128xbf16>
    %cst_126 = arith.constant dense<0.000000e+00> : vector<32x8xf32>
    %150 = tpu.matmul %149, %100, %cst_126 {dimension_numbers = #tpu.dot_dimension_numbers<[1], [0], [0], [1], [0, 0, 1, 1], [], []>} : vector<32x128xbf16>, vector<128x8xbf16>, vector<32x8xf32> -> vector<32x8xf32>
    %151 = arith.truncf %150 : vector<32x8xf32> to vector<32x8xbf16>
    %c6_127 = arith.constant 6 : index
    %c0_128 = arith.constant 0 : index
    %c0_129 = arith.constant 0 : index
    %152 = vector.load %arg5[%c6_127, %c0_128, %c0_129] : memref<9x8x16xbf16, #tpu.memory_space<vmem>>, vector<1x8x16xbf16>
    %153 = vector.shape_cast %152 : vector<1x8x16xbf16> to vector<8x16xbf16>
    %cst_130 = arith.constant dense<0.000000e+00> : vector<32x16xf32>
    %154 = tpu.matmul %151, %153, %cst_130 {dimension_numbers = #tpu.dot_dimension_numbers<[1], [0], [0], [1], [0, 0, 1, 1], [], []>} : vector<32x8xbf16>, vector<8x16xbf16>, vector<32x16xf32> -> vector<32x16xf32>
    %155 = arith.addf %147, %154 : vector<32x16xf32>
    %c7_131 = arith.constant 7 : index
    %c0_132 = arith.constant 0 : index
    %c0_133 = arith.constant 0 : index
    %156 = vector.load %arg4[%c7_131, %c0_132, %c0_133] : memref<9x32x128xbf16, #tpu.memory_space<vmem>>, vector<1x32x128xbf16>
    %157 = vector.shape_cast %156 : vector<1x32x128xbf16> to vector<32x128xbf16>
    %cst_134 = arith.constant dense<0.000000e+00> : vector<32x8xf32>
    %158 = tpu.matmul %157, %100, %cst_134 {dimension_numbers = #tpu.dot_dimension_numbers<[1], [0], [0], [1], [0, 0, 1, 1], [], []>} : vector<32x128xbf16>, vector<128x8xbf16>, vector<32x8xf32> -> vector<32x8xf32>
    %159 = arith.truncf %158 : vector<32x8xf32> to vector<32x8xbf16>
    %c7_135 = arith.constant 7 : index
    %c0_136 = arith.constant 0 : index
    %c0_137 = arith.constant 0 : index
    %160 = vector.load %arg5[%c7_135, %c0_136, %c0_137] : memref<9x8x16xbf16, #tpu.memory_space<vmem>>, vector<1x8x16xbf16>
    %161 = vector.shape_cast %160 : vector<1x8x16xbf16> to vector<8x16xbf16>
    %cst_138 = arith.constant dense<0.000000e+00> : vector<32x16xf32>
    %162 = tpu.matmul %159, %161, %cst_138 {dimension_numbers = #tpu.dot_dimension_numbers<[1], [0], [0], [1], [0, 0, 1, 1], [], []>} : vector<32x8xbf16>, vector<8x16xbf16>, vector<32x16xf32> -> vector<32x16xf32>
    %163 = arith.addf %155, %162 : vector<32x16xf32>
    %c8_139 = arith.constant 8 : index
    %c0_140 = arith.constant 0 : index
    %c0_141 = arith.constant 0 : index
    %164 = vector.load %arg4[%c8_139, %c0_140, %c0_141] : memref<9x32x128xbf16, #tpu.memory_space<vmem>>, vector<1x32x128xbf16>
    %165 = vector.shape_cast %164 : vector<1x32x128xbf16> to vector<32x128xbf16>
    %cst_142 = arith.constant dense<0.000000e+00> : vector<32x8xf32>
    %166 = tpu.matmul %165, %100, %cst_142 {dimension_numbers = #tpu.dot_dimension_numbers<[1], [0], [0], [1], [0, 0, 1, 1], [], []>} : vector<32x128xbf16>, vector<128x8xbf16>, vector<32x8xf32> -> vector<32x8xf32>
    %167 = arith.truncf %166 : vector<32x8xf32> to vector<32x8xbf16>
    %c8_143 = arith.constant 8 : index
    %c0_144 = arith.constant 0 : index
    %c0_145 = arith.constant 0 : index
    %168 = vector.load %arg5[%c8_143, %c0_144, %c0_145] : memref<9x8x16xbf16, #tpu.memory_space<vmem>>, vector<1x8x16xbf16>
    %169 = vector.shape_cast %168 : vector<1x8x16xbf16> to vector<8x16xbf16>
    %cst_146 = arith.constant dense<0.000000e+00> : vector<32x16xf32>
    %170 = tpu.matmul %167, %169, %cst_146 {dimension_numbers = #tpu.dot_dimension_numbers<[1], [0], [0], [1], [0, 0, 1, 1], [], []>} : vector<32x8xbf16>, vector<8x16xbf16>, vector<32x16xf32> -> vector<32x16xf32>
    %171 = arith.addf %163, %170 : vector<32x16xf32>
    %cst_147 = arith.constant dense<0.000000e+00> : vector<16xf32>
    %172 = vector.multi_reduction <add>, %171, %cst_147 [0] : vector<32x16xf32> to vector<16xf32>
    %173 = vector.shape_cast %172 : vector<16xf32> to vector<1x16xf32>
    %cst_148 = arith.constant 3.125000e-02 : f32
    %174 = vector.broadcast %cst_148 : f32 to vector<1x16xf32>
    %175 = arith.mulf %173, %174 : vector<1x16xf32>
    %176 = arith.mulf %171, %171 : vector<32x16xf32>
    %cst_149 = arith.constant dense<0.000000e+00> : vector<16xf32>
    %177 = vector.multi_reduction <add>, %176, %cst_149 [0] : vector<32x16xf32> to vector<16xf32>
    %178 = vector.shape_cast %177 : vector<16xf32> to vector<1x16xf32>
    %cst_150 = arith.constant 3.125000e-02 : f32
    %179 = vector.broadcast %cst_150 : f32 to vector<1x16xf32>
    %180 = arith.mulf %178, %179 : vector<1x16xf32>
    %181 = arith.mulf %175, %175 : vector<1x16xf32>
    %182 = arith.subf %180, %181 : vector<1x16xf32>
    %c0_151 = arith.constant 0 : index
    %c0_152 = arith.constant 0 : index
    %183 = vector.load %arg6[%c0_151, %c0_152] : memref<2x16xf32, #tpu.memory_space<vmem>>, vector<1x16xf32>
    %cst_153 = arith.constant 9.99999974E-6 : f32
    %184 = vector.broadcast %cst_153 : f32 to vector<1x16xf32>
    %185 = arith.addf %182, %184 : vector<1x16xf32>
    %186 = math.rsqrt %185 : vector<1x16xf32>
    %187 = arith.mulf %183, %186 : vector<1x16xf32>
    %c1_154 = arith.constant 1 : index
    %c0_155 = arith.constant 0 : index
    %188 = vector.load %arg6[%c1_154, %c0_155] : memref<2x16xf32, #tpu.memory_space<vmem>>, vector<1x16xf32>
    %189 = arith.mulf %175, %187 : vector<1x16xf32>
    %190 = arith.subf %188, %189 : vector<1x16xf32>
    %191 = vector.broadcast %187 : vector<1x16xf32> to vector<32x16xf32>
    %192 = arith.mulf %171, %191 : vector<32x16xf32>
    %193 = vector.broadcast %190 : vector<1x16xf32> to vector<32x16xf32>
    %194 = arith.addf %192, %193 : vector<32x16xf32>
    %cst_156 = arith.constant 0.000000e+00 : f32
    %195 = vector.broadcast %cst_156 : f32 to vector<32x16xf32>
    %196 = arith.cmpf oge, %194, %195 : vector<32x16xf32>
    %cst_157 = arith.constant 0.00999999977 : f32
    %197 = vector.broadcast %cst_157 : f32 to vector<32x16xf32>
    %198 = arith.mulf %197, %194 : vector<32x16xf32>
    %199 = arith.select %196, %194, %198 : vector<32x16xi1>, vector<32x16xf32>
    %200 = arith.truncf %199 : vector<32x16xf32> to vector<32x16xbf16>
    %c0_158 = arith.constant 0 : index
    %c0_159 = arith.constant 0 : index
    %c0_160 = arith.constant 0 : index
    %201 = vector.load %arg7[%c0_158, %c0_159, %c0_160] : memref<9x8x32xbf16, #tpu.memory_space<vmem>>, vector<1x8x32xbf16>
    %202 = vector.shape_cast %201 : vector<1x8x32xbf16> to vector<8x32xbf16>
    %cst_161 = arith.constant dense<0.000000e+00> : vector<8x16xf32>
    %203 = tpu.matmul %202, %200, %cst_161 {dimension_numbers = #tpu.dot_dimension_numbers<[1], [0], [0], [1], [0, 0, 1, 1], [], []>} : vector<8x32xbf16>, vector<32x16xbf16>, vector<8x16xf32> -> vector<8x16xf32>
    %204 = arith.truncf %203 : vector<8x16xf32> to vector<8x16xbf16>
    %c0_162 = arith.constant 0 : index
    %c0_163 = arith.constant 0 : index
    %c0_164 = arith.constant 0 : index
    %205 = vector.load %arg8[%c0_162, %c0_163, %c0_164] : memref<9x16x32xbf16, #tpu.memory_space<vmem>>, vector<1x16x32xbf16>
    %206 = vector.shape_cast %205 : vector<1x16x32xbf16> to vector<16x32xbf16>
    %cst_165 = arith.constant dense<0.000000e+00> : vector<8x32xf32>
    %207 = tpu.matmul %204, %206, %cst_165 {dimension_numbers = #tpu.dot_dimension_numbers<[1], [0], [0], [1], [0, 0, 1, 1], [], []>} : vector<8x16xbf16>, vector<16x32xbf16>, vector<8x32xf32> -> vector<8x32xf32>
    %c1_166 = arith.constant 1 : index
    %c0_167 = arith.constant 0 : index
    %c0_168 = arith.constant 0 : index
    %208 = vector.load %arg7[%c1_166, %c0_167, %c0_168] : memref<9x8x32xbf16, #tpu.memory_space<vmem>>, vector<1x8x32xbf16>
    %209 = vector.shape_cast %208 : vector<1x8x32xbf16> to vector<8x32xbf16>
    %cst_169 = arith.constant dense<0.000000e+00> : vector<8x16xf32>
    %210 = tpu.matmul %209, %200, %cst_169 {dimension_numbers = #tpu.dot_dimension_numbers<[1], [0], [0], [1], [0, 0, 1, 1], [], []>} : vector<8x32xbf16>, vector<32x16xbf16>, vector<8x16xf32> -> vector<8x16xf32>
    %211 = arith.truncf %210 : vector<8x16xf32> to vector<8x16xbf16>
    %c1_170 = arith.constant 1 : index
    %c0_171 = arith.constant 0 : index
    %c0_172 = arith.constant 0 : index
    %212 = vector.load %arg8[%c1_170, %c0_171, %c0_172] : memref<9x16x32xbf16, #tpu.memory_space<vmem>>, vector<1x16x32xbf16>
    %213 = vector.shape_cast %212 : vector<1x16x32xbf16> to vector<16x32xbf16>
    %cst_173 = arith.constant dense<0.000000e+00> : vector<8x32xf32>
    %214 = tpu.matmul %211, %213, %cst_173 {dimension_numbers = #tpu.dot_dimension_numbers<[1], [0], [0], [1], [0, 0, 1, 1], [], []>} : vector<8x16xbf16>, vector<16x32xbf16>, vector<8x32xf32> -> vector<8x32xf32>
    %215 = arith.addf %207, %214 : vector<8x32xf32>
    %c2_174 = arith.constant 2 : index
    %c0_175 = arith.constant 0 : index
    %c0_176 = arith.constant 0 : index
    %216 = vector.load %arg7[%c2_174, %c0_175, %c0_176] : memref<9x8x32xbf16, #tpu.memory_space<vmem>>, vector<1x8x32xbf16>
    %217 = vector.shape_cast %216 : vector<1x8x32xbf16> to vector<8x32xbf16>
    %cst_177 = arith.constant dense<0.000000e+00> : vector<8x16xf32>
    %218 = tpu.matmul %217, %200, %cst_177 {dimension_numbers = #tpu.dot_dimension_numbers<[1], [0], [0], [1], [0, 0, 1, 1], [], []>} : vector<8x32xbf16>, vector<32x16xbf16>, vector<8x16xf32> -> vector<8x16xf32>
    %219 = arith.truncf %218 : vector<8x16xf32> to vector<8x16xbf16>
    %c2_178 = arith.constant 2 : index
    %c0_179 = arith.constant 0 : index
    %c0_180 = arith.constant 0 : index
    %220 = vector.load %arg8[%c2_178, %c0_179, %c0_180] : memref<9x16x32xbf16, #tpu.memory_space<vmem>>, vector<1x16x32xbf16>
    %221 = vector.shape_cast %220 : vector<1x16x32xbf16> to vector<16x32xbf16>
    %cst_181 = arith.constant dense<0.000000e+00> : vector<8x32xf32>
    %222 = tpu.matmul %219, %221, %cst_181 {dimension_numbers = #tpu.dot_dimension_numbers<[1], [0], [0], [1], [0, 0, 1, 1], [], []>} : vector<8x16xbf16>, vector<16x32xbf16>, vector<8x32xf32> -> vector<8x32xf32>
    %223 = arith.addf %215, %222 : vector<8x32xf32>
    %c3_182 = arith.constant 3 : index
    %c0_183 = arith.constant 0 : index
    %c0_184 = arith.constant 0 : index
    %224 = vector.load %arg7[%c3_182, %c0_183, %c0_184] : memref<9x8x32xbf16, #tpu.memory_space<vmem>>, vector<1x8x32xbf16>
    %225 = vector.shape_cast %224 : vector<1x8x32xbf16> to vector<8x32xbf16>
    %cst_185 = arith.constant dense<0.000000e+00> : vector<8x16xf32>
    %226 = tpu.matmul %225, %200, %cst_185 {dimension_numbers = #tpu.dot_dimension_numbers<[1], [0], [0], [1], [0, 0, 1, 1], [], []>} : vector<8x32xbf16>, vector<32x16xbf16>, vector<8x16xf32> -> vector<8x16xf32>
    %227 = arith.truncf %226 : vector<8x16xf32> to vector<8x16xbf16>
    %c3_186 = arith.constant 3 : index
    %c0_187 = arith.constant 0 : index
    %c0_188 = arith.constant 0 : index
    %228 = vector.load %arg8[%c3_186, %c0_187, %c0_188] : memref<9x16x32xbf16, #tpu.memory_space<vmem>>, vector<1x16x32xbf16>
    %229 = vector.shape_cast %228 : vector<1x16x32xbf16> to vector<16x32xbf16>
    %cst_189 = arith.constant dense<0.000000e+00> : vector<8x32xf32>
    %230 = tpu.matmul %227, %229, %cst_189 {dimension_numbers = #tpu.dot_dimension_numbers<[1], [0], [0], [1], [0, 0, 1, 1], [], []>} : vector<8x16xbf16>, vector<16x32xbf16>, vector<8x32xf32> -> vector<8x32xf32>
    %231 = arith.addf %223, %230 : vector<8x32xf32>
    %c4_190 = arith.constant 4 : index
    %c0_191 = arith.constant 0 : index
    %c0_192 = arith.constant 0 : index
    %232 = vector.load %arg7[%c4_190, %c0_191, %c0_192] : memref<9x8x32xbf16, #tpu.memory_space<vmem>>, vector<1x8x32xbf16>
    %233 = vector.shape_cast %232 : vector<1x8x32xbf16> to vector<8x32xbf16>
    %cst_193 = arith.constant dense<0.000000e+00> : vector<8x16xf32>
    %234 = tpu.matmul %233, %200, %cst_193 {dimension_numbers = #tpu.dot_dimension_numbers<[1], [0], [0], [1], [0, 0, 1, 1], [], []>} : vector<8x32xbf16>, vector<32x16xbf16>, vector<8x16xf32> -> vector<8x16xf32>
    %235 = arith.truncf %234 : vector<8x16xf32> to vector<8x16xbf16>
    %c4_194 = arith.constant 4 : index
    %c0_195 = arith.constant 0 : index
    %c0_196 = arith.constant 0 : index
    %236 = vector.load %arg8[%c4_194, %c0_195, %c0_196] : memref<9x16x32xbf16, #tpu.memory_space<vmem>>, vector<1x16x32xbf16>
    %237 = vector.shape_cast %236 : vector<1x16x32xbf16> to vector<16x32xbf16>
    %cst_197 = arith.constant dense<0.000000e+00> : vector<8x32xf32>
    %238 = tpu.matmul %235, %237, %cst_197 {dimension_numbers = #tpu.dot_dimension_numbers<[1], [0], [0], [1], [0, 0, 1, 1], [], []>} : vector<8x16xbf16>, vector<16x32xbf16>, vector<8x32xf32> -> vector<8x32xf32>
    %239 = arith.addf %231, %238 : vector<8x32xf32>
    %c5_198 = arith.constant 5 : index
    %c0_199 = arith.constant 0 : index
    %c0_200 = arith.constant 0 : index
    %240 = vector.load %arg7[%c5_198, %c0_199, %c0_200] : memref<9x8x32xbf16, #tpu.memory_space<vmem>>, vector<1x8x32xbf16>
    %241 = vector.shape_cast %240 : vector<1x8x32xbf16> to vector<8x32xbf16>
    %cst_201 = arith.constant dense<0.000000e+00> : vector<8x16xf32>
    %242 = tpu.matmul %241, %200, %cst_201 {dimension_numbers = #tpu.dot_dimension_numbers<[1], [0], [0], [1], [0, 0, 1, 1], [], []>} : vector<8x32xbf16>, vector<32x16xbf16>, vector<8x16xf32> -> vector<8x16xf32>
    %243 = arith.truncf %242 : vector<8x16xf32> to vector<8x16xbf16>
    %c5_202 = arith.constant 5 : index
    %c0_203 = arith.constant 0 : index
    %c0_204 = arith.constant 0 : index
    %244 = vector.load %arg8[%c5_202, %c0_203, %c0_204] : memref<9x16x32xbf16, #tpu.memory_space<vmem>>, vector<1x16x32xbf16>
    %245 = vector.shape_cast %244 : vector<1x16x32xbf16> to vector<16x32xbf16>
    %cst_205 = arith.constant dense<0.000000e+00> : vector<8x32xf32>
    %246 = tpu.matmul %243, %245, %cst_205 {dimension_numbers = #tpu.dot_dimension_numbers<[1], [0], [0], [1], [0, 0, 1, 1], [], []>} : vector<8x16xbf16>, vector<16x32xbf16>, vector<8x32xf32> -> vector<8x32xf32>
    %247 = arith.addf %239, %246 : vector<8x32xf32>
    %c6_206 = arith.constant 6 : index
    %c0_207 = arith.constant 0 : index
    %c0_208 = arith.constant 0 : index
    %248 = vector.load %arg7[%c6_206, %c0_207, %c0_208] : memref<9x8x32xbf16, #tpu.memory_space<vmem>>, vector<1x8x32xbf16>
    %249 = vector.shape_cast %248 : vector<1x8x32xbf16> to vector<8x32xbf16>
    %cst_209 = arith.constant dense<0.000000e+00> : vector<8x16xf32>
    %250 = tpu.matmul %249, %200, %cst_209 {dimension_numbers = #tpu.dot_dimension_numbers<[1], [0], [0], [1], [0, 0, 1, 1], [], []>} : vector<8x32xbf16>, vector<32x16xbf16>, vector<8x16xf32> -> vector<8x16xf32>
    %251 = arith.truncf %250 : vector<8x16xf32> to vector<8x16xbf16>
    %c6_210 = arith.constant 6 : index
    %c0_211 = arith.constant 0 : index
    %c0_212 = arith.constant 0 : index
    %252 = vector.load %arg8[%c6_210, %c0_211, %c0_212] : memref<9x16x32xbf16, #tpu.memory_space<vmem>>, vector<1x16x32xbf16>
    %253 = vector.shape_cast %252 : vector<1x16x32xbf16> to vector<16x32xbf16>
    %cst_213 = arith.constant dense<0.000000e+00> : vector<8x32xf32>
    %254 = tpu.matmul %251, %253, %cst_213 {dimension_numbers = #tpu.dot_dimension_numbers<[1], [0], [0], [1], [0, 0, 1, 1], [], []>} : vector<8x16xbf16>, vector<16x32xbf16>, vector<8x32xf32> -> vector<8x32xf32>
    %255 = arith.addf %247, %254 : vector<8x32xf32>
    %c7_214 = arith.constant 7 : index
    %c0_215 = arith.constant 0 : index
    %c0_216 = arith.constant 0 : index
    %256 = vector.load %arg7[%c7_214, %c0_215, %c0_216] : memref<9x8x32xbf16, #tpu.memory_space<vmem>>, vector<1x8x32xbf16>
    %257 = vector.shape_cast %256 : vector<1x8x32xbf16> to vector<8x32xbf16>
    %cst_217 = arith.constant dense<0.000000e+00> : vector<8x16xf32>
    %258 = tpu.matmul %257, %200, %cst_217 {dimension_numbers = #tpu.dot_dimension_numbers<[1], [0], [0], [1], [0, 0, 1, 1], [], []>} : vector<8x32xbf16>, vector<32x16xbf16>, vector<8x16xf32> -> vector<8x16xf32>
    %259 = arith.truncf %258 : vector<8x16xf32> to vector<8x16xbf16>
    %c7_218 = arith.constant 7 : index
    %c0_219 = arith.constant 0 : index
    %c0_220 = arith.constant 0 : index
    %260 = vector.load %arg8[%c7_218, %c0_219, %c0_220] : memref<9x16x32xbf16, #tpu.memory_space<vmem>>, vector<1x16x32xbf16>
    %261 = vector.shape_cast %260 : vector<1x16x32xbf16> to vector<16x32xbf16>
    %cst_221 = arith.constant dense<0.000000e+00> : vector<8x32xf32>
    %262 = tpu.matmul %259, %261, %cst_221 {dimension_numbers = #tpu.dot_dimension_numbers<[1], [0], [0], [1], [0, 0, 1, 1], [], []>} : vector<8x16xbf16>, vector<16x32xbf16>, vector<8x32xf32> -> vector<8x32xf32>
    %263 = arith.addf %255, %262 : vector<8x32xf32>
    %c8_222 = arith.constant 8 : index
    %c0_223 = arith.constant 0 : index
    %c0_224 = arith.constant 0 : index
    %264 = vector.load %arg7[%c8_222, %c0_223, %c0_224] : memref<9x8x32xbf16, #tpu.memory_space<vmem>>, vector<1x8x32xbf16>
    %265 = vector.shape_cast %264 : vector<1x8x32xbf16> to vector<8x32xbf16>
    %cst_225 = arith.constant dense<0.000000e+00> : vector<8x16xf32>
    %266 = tpu.matmul %265, %200, %cst_225 {dimension_numbers = #tpu.dot_dimension_numbers<[1], [0], [0], [1], [0, 0, 1, 1], [], []>} : vector<8x32xbf16>, vector<32x16xbf16>, vector<8x16xf32> -> vector<8x16xf32>
    %267 = arith.truncf %266 : vector<8x16xf32> to vector<8x16xbf16>
    %c8_226 = arith.constant 8 : index
    %c0_227 = arith.constant 0 : index
    %c0_228 = arith.constant 0 : index
    %268 = vector.load %arg8[%c8_226, %c0_227, %c0_228] : memref<9x16x32xbf16, #tpu.memory_space<vmem>>, vector<1x16x32xbf16>
    %269 = vector.shape_cast %268 : vector<1x16x32xbf16> to vector<16x32xbf16>
    %cst_229 = arith.constant dense<0.000000e+00> : vector<8x32xf32>
    %270 = tpu.matmul %267, %269, %cst_229 {dimension_numbers = #tpu.dot_dimension_numbers<[1], [0], [0], [1], [0, 0, 1, 1], [], []>} : vector<8x16xbf16>, vector<16x32xbf16>, vector<8x32xf32> -> vector<8x32xf32>
    %271 = arith.addf %263, %270 : vector<8x32xf32>
    %cst_230 = arith.constant dense<0.000000e+00> : vector<32xf32>
    %272 = vector.multi_reduction <add>, %271, %cst_230 [0] : vector<8x32xf32> to vector<32xf32>
    %273 = vector.shape_cast %272 : vector<32xf32> to vector<1x32xf32>
    %cst_231 = arith.constant 1.250000e-01 : f32
    %274 = vector.broadcast %cst_231 : f32 to vector<1x32xf32>
    %275 = arith.mulf %273, %274 : vector<1x32xf32>
    %276 = arith.mulf %271, %271 : vector<8x32xf32>
    %cst_232 = arith.constant dense<0.000000e+00> : vector<32xf32>
    %277 = vector.multi_reduction <add>, %276, %cst_232 [0] : vector<8x32xf32> to vector<32xf32>
    %278 = vector.shape_cast %277 : vector<32xf32> to vector<1x32xf32>
    %cst_233 = arith.constant 1.250000e-01 : f32
    %279 = vector.broadcast %cst_233 : f32 to vector<1x32xf32>
    %280 = arith.mulf %278, %279 : vector<1x32xf32>
    %281 = arith.mulf %275, %275 : vector<1x32xf32>
    %282 = arith.subf %280, %281 : vector<1x32xf32>
    %c0_234 = arith.constant 0 : index
    %c0_235 = arith.constant 0 : index
    %283 = vector.load %arg9[%c0_234, %c0_235] : memref<2x32xf32, #tpu.memory_space<vmem>>, vector<1x32xf32>
    %cst_236 = arith.constant 9.99999974E-6 : f32
    %284 = vector.broadcast %cst_236 : f32 to vector<1x32xf32>
    %285 = arith.addf %282, %284 : vector<1x32xf32>
    %286 = math.rsqrt %285 : vector<1x32xf32>
    %287 = arith.mulf %283, %286 : vector<1x32xf32>
    %c1_237 = arith.constant 1 : index
    %c0_238 = arith.constant 0 : index
    %288 = vector.load %arg9[%c1_237, %c0_238] : memref<2x32xf32, #tpu.memory_space<vmem>>, vector<1x32xf32>
    %289 = arith.mulf %275, %287 : vector<1x32xf32>
    %290 = arith.subf %288, %289 : vector<1x32xf32>
    %291 = vector.broadcast %287 : vector<1x32xf32> to vector<8x32xf32>
    %292 = arith.mulf %271, %291 : vector<8x32xf32>
    %293 = vector.broadcast %290 : vector<1x32xf32> to vector<8x32xf32>
    %294 = arith.addf %292, %293 : vector<8x32xf32>
    %cst_239 = arith.constant 0.000000e+00 : f32
    %295 = vector.broadcast %cst_239 : f32 to vector<8x32xf32>
    %296 = arith.cmpf oge, %294, %295 : vector<8x32xf32>
    %cst_240 = arith.constant 0.00999999977 : f32
    %297 = vector.broadcast %cst_240 : f32 to vector<8x32xf32>
    %298 = arith.mulf %297, %294 : vector<8x32xf32>
    %299 = arith.select %296, %294, %298 : vector<8x32xi1>, vector<8x32xf32>
    %300 = arith.truncf %299 : vector<8x32xf32> to vector<8x32xbf16>
    %c0_241 = arith.constant 0 : index
    %c0_242 = arith.constant 0 : index
    %c0_243 = arith.constant 0 : index
    %301 = vector.load %arg10[%c0_241, %c0_242, %c0_243] : memref<4x2x8xbf16, #tpu.memory_space<vmem>>, vector<1x2x8xbf16>
    %302 = vector.shape_cast %301 : vector<1x2x8xbf16> to vector<2x8xbf16>
    %cst_244 = arith.constant dense<0.000000e+00> : vector<2x32xf32>
    %303 = tpu.matmul %302, %300, %cst_244 {dimension_numbers = #tpu.dot_dimension_numbers<[1], [0], [0], [1], [0, 0, 1, 1], [], []>} : vector<2x8xbf16>, vector<8x32xbf16>, vector<2x32xf32> -> vector<2x32xf32>
    %304 = arith.truncf %303 : vector<2x32xf32> to vector<2x32xbf16>
    %c0_245 = arith.constant 0 : index
    %c0_246 = arith.constant 0 : index
    %c0_247 = arith.constant 0 : index
    %305 = vector.load %arg11[%c0_245, %c0_246, %c0_247] : memref<4x32x16xbf16, #tpu.memory_space<vmem>>, vector<1x32x16xbf16>
    %306 = vector.shape_cast %305 : vector<1x32x16xbf16> to vector<32x16xbf16>
    %cst_248 = arith.constant dense<0.000000e+00> : vector<2x16xf32>
    %307 = tpu.matmul %304, %306, %cst_248 {dimension_numbers = #tpu.dot_dimension_numbers<[1], [0], [0], [1], [0, 0, 1, 1], [], []>} : vector<2x32xbf16>, vector<32x16xbf16>, vector<2x16xf32> -> vector<2x16xf32>
    %c1_249 = arith.constant 1 : index
    %c0_250 = arith.constant 0 : index
    %c0_251 = arith.constant 0 : index
    %308 = vector.load %arg10[%c1_249, %c0_250, %c0_251] : memref<4x2x8xbf16, #tpu.memory_space<vmem>>, vector<1x2x8xbf16>
    %309 = vector.shape_cast %308 : vector<1x2x8xbf16> to vector<2x8xbf16>
    %cst_252 = arith.constant dense<0.000000e+00> : vector<2x32xf32>
    %310 = tpu.matmul %309, %300, %cst_252 {dimension_numbers = #tpu.dot_dimension_numbers<[1], [0], [0], [1], [0, 0, 1, 1], [], []>} : vector<2x8xbf16>, vector<8x32xbf16>, vector<2x32xf32> -> vector<2x32xf32>
    %311 = arith.truncf %310 : vector<2x32xf32> to vector<2x32xbf16>
    %c1_253 = arith.constant 1 : index
    %c0_254 = arith.constant 0 : index
    %c0_255 = arith.constant 0 : index
    %312 = vector.load %arg11[%c1_253, %c0_254, %c0_255] : memref<4x32x16xbf16, #tpu.memory_space<vmem>>, vector<1x32x16xbf16>
    %313 = vector.shape_cast %312 : vector<1x32x16xbf16> to vector<32x16xbf16>
    %cst_256 = arith.constant dense<0.000000e+00> : vector<2x16xf32>
    %314 = tpu.matmul %311, %313, %cst_256 {dimension_numbers = #tpu.dot_dimension_numbers<[1], [0], [0], [1], [0, 0, 1, 1], [], []>} : vector<2x32xbf16>, vector<32x16xbf16>, vector<2x16xf32> -> vector<2x16xf32>
    %315 = arith.addf %307, %314 : vector<2x16xf32>
    %c2_257 = arith.constant 2 : index
    %c0_258 = arith.constant 0 : index
    %c0_259 = arith.constant 0 : index
    %316 = vector.load %arg10[%c2_257, %c0_258, %c0_259] : memref<4x2x8xbf16, #tpu.memory_space<vmem>>, vector<1x2x8xbf16>
    %317 = vector.shape_cast %316 : vector<1x2x8xbf16> to vector<2x8xbf16>
    %cst_260 = arith.constant dense<0.000000e+00> : vector<2x32xf32>
    %318 = tpu.matmul %317, %300, %cst_260 {dimension_numbers = #tpu.dot_dimension_numbers<[1], [0], [0], [1], [0, 0, 1, 1], [], []>} : vector<2x8xbf16>, vector<8x32xbf16>, vector<2x32xf32> -> vector<2x32xf32>
    %319 = arith.truncf %318 : vector<2x32xf32> to vector<2x32xbf16>
    %c2_261 = arith.constant 2 : index
    %c0_262 = arith.constant 0 : index
    %c0_263 = arith.constant 0 : index
    %320 = vector.load %arg11[%c2_261, %c0_262, %c0_263] : memref<4x32x16xbf16, #tpu.memory_space<vmem>>, vector<1x32x16xbf16>
    %321 = vector.shape_cast %320 : vector<1x32x16xbf16> to vector<32x16xbf16>
    %cst_264 = arith.constant dense<0.000000e+00> : vector<2x16xf32>
    %322 = tpu.matmul %319, %321, %cst_264 {dimension_numbers = #tpu.dot_dimension_numbers<[1], [0], [0], [1], [0, 0, 1, 1], [], []>} : vector<2x32xbf16>, vector<32x16xbf16>, vector<2x16xf32> -> vector<2x16xf32>
    %323 = arith.addf %315, %322 : vector<2x16xf32>
    %c3_265 = arith.constant 3 : index
    %c0_266 = arith.constant 0 : index
    %c0_267 = arith.constant 0 : index
    %324 = vector.load %arg10[%c3_265, %c0_266, %c0_267] : memref<4x2x8xbf16, #tpu.memory_space<vmem>>, vector<1x2x8xbf16>
    %325 = vector.shape_cast %324 : vector<1x2x8xbf16> to vector<2x8xbf16>
    %cst_268 = arith.constant dense<0.000000e+00> : vector<2x32xf32>
    %326 = tpu.matmul %325, %300, %cst_268 {dimension_numbers = #tpu.dot_dimension_numbers<[1], [0], [0], [1], [0, 0, 1, 1], [], []>} : vector<2x8xbf16>, vector<8x32xbf16>, vector<2x32xf32> -> vector<2x32xf32>
    %327 = arith.truncf %326 : vector<2x32xf32> to vector<2x32xbf16>
    %c3_269 = arith.constant 3 : index
    %c0_270 = arith.constant 0 : index
    %c0_271 = arith.constant 0 : index
    %328 = vector.load %arg11[%c3_269, %c0_270, %c0_271] : memref<4x32x16xbf16, #tpu.memory_space<vmem>>, vector<1x32x16xbf16>
    %329 = vector.shape_cast %328 : vector<1x32x16xbf16> to vector<32x16xbf16>
    %cst_272 = arith.constant dense<0.000000e+00> : vector<2x16xf32>
    %330 = tpu.matmul %327, %329, %cst_272 {dimension_numbers = #tpu.dot_dimension_numbers<[1], [0], [0], [1], [0, 0, 1, 1], [], []>} : vector<2x32xbf16>, vector<32x16xbf16>, vector<2x16xf32> -> vector<2x16xf32>
    %331 = arith.addf %323, %330 : vector<2x16xf32>
    %c0_273 = arith.constant 0 : index
    %c0_274 = arith.constant 0 : index
    %332 = vector.load %arg12[%c0_273, %c0_274] : memref<1x16xf32, #tpu.memory_space<vmem>>, vector<1x16xf32>
    %333 = vector.broadcast %332 : vector<1x16xf32> to vector<2x16xf32>
    %334 = arith.addf %331, %333 : vector<2x16xf32>
    %335 = vector.extract_strided_slice %334 {offsets = [0, 0], sizes = [2, 8], strides = [1, 1]} : vector<2x16xf32> to vector<2x8xf32>
    %336 = vector.extract_strided_slice %334 {offsets = [0, 8], sizes = [2, 8], strides = [1, 1]} : vector<2x16xf32> to vector<2x8xf32>
    %c0_275 = arith.constant 0 : index
    %c0_276 = arith.constant 0 : index
    %337 = vector.load %arg14[%c0_275, %c0_276] : memref<2x8xf32, #tpu.memory_space<vmem>>, vector<2x8xf32>
    tpu.vector_store %arg14[%c0_275, %c0_276], %335 {strides = array<i32>} : memref<2x8xf32, #tpu.memory_space<vmem>>, vector<2x8xf32>,
    %c0_277 = arith.constant 0 : index
    %c0_278 = arith.constant 0 : index
    %338 = vector.load %arg15[%c0_277, %c0_278] : memref<2x8xf32, #tpu.memory_space<vmem>>, vector<2x8xf32>
    tpu.vector_store %arg15[%c0_277, %c0_278], %336 {strides = array<i32>} : memref<2x8xf32, #tpu.memory_space<vmem>>, vector<2x8xf32>,
    %c0_279 = arith.constant 0 : index
    %c0_280 = arith.constant 0 : index
    %339 = vector.load %arg13[%c0_279, %c0_280] : memref<2x8xf32, #tpu.memory_space<vmem>>, vector<2x8xf32>
    %cst_281 = arith.constant 5.000000e-01 : f32
    %340 = vector.broadcast %cst_281 : f32 to vector<2x8xf32>
    %341 = arith.mulf %340, %336 : vector<2x8xf32>
    %342 = math.exp %341 : vector<2x8xf32>
    %343 = arith.mulf %339, %342 : vector<2x8xf32>
    %344 = arith.addf %343, %335 : vector<2x8xf32>
    %c0_282 = arith.constant 0 : index
    %c0_283 = arith.constant 0 : index
    %345 = vector.load %arg16[%c0_282, %c0_283] : memref<2x8xf32, #tpu.memory_space<vmem>>, vector<2x8xf32>
    tpu.vector_store %arg16[%c0_282, %c0_283], %344 {strides = array<i32>} : memref<2x8xf32, #tpu.memory_space<vmem>>, vector<2x8xf32>,
    return
  }
}

</mosaic_0001>

<bundles_post_ra>
// kernel: encoder_forward.1
= control target key start
LH: loop header
LB: loop body
LE: loop exit
PB: predicated region body
PF: predicated region fallthrough
CT: control target
= control target key end

     0   :  { %s14028_s0 = inlined_call_operand.vmem [shape: bf16[512,4], index: 0, kind: input, shape index: {}]   ;;  %s14029_s1 = inlined_call_operand.hbm [shape: bf16[9,128,512], index: 1, kind: input, shape index: {}]   ;;  %s14030_s2 = inlined_call_operand.vmem [shape: bf16[9,4,8], index: 2, kind: input, shape index: {}]   ;;  %s14031_s3 = inlined_call_operand.hbm [shape: f32[2,8], index: 3, kind: input, shape index: {}]   ;;  %s14032_s4 = inlined_call_operand.hbm [shape: bf16[9,32,128], index: 4, kind: input, shape index: {}]   ;;  %s14033_s5 = inlined_call_operand.hbm [shape: bf16[9,8,16], index: 5, kind: input, shape index: {}]   ;;  %s14034_s6 = inlined_call_operand.hbm [shape: f32[2,16], index: 6, kind: input, shape index: {}]   ;;  %s14035_s7 = inlined_call_operand.hbm [shape: bf16[9,8,32], index: 7, kind: input, shape index: {}]   ;;  %s14036_s8 = inlined_call_operand.hbm [shape: bf16[9,16,32], index: 8, kind: input, shape index: {}]   ;;  %s14037_s9 = inlined_call_operand.hbm [shape: f32[2,32], index: 9, kind: input, shape index: {}]   ;;  %s14038_s10 = inlined_call_operand.hbm [shape: bf16[4,2,8], index: 10, kind: input, shape index: {}]   ;;  %s14039_s11 = inlined_call_operand.vmem [shape: bf16[4,32,16], index: 11, kind: input, shape index: {}]   ;;  %s14040_s12 = inlined_call_operand.hbm [shape: f32[1,16], index: 12, kind: input, shape index: {}]   ;;  %s14041_s13 = inlined_call_operand.hbm [shape: f32[2,8], index: 13, kind: input, shape index: {}]   ;;  %s14042_s14 = inlined_call_operand.hbm [shape: f32[2,8], index: 14, kind: output, shape index: {0}]   ;;  %s14043_s15 = inlined_call_operand.hbm [shape: f32[2,8], index: 15, kind: output, shape index: {1}]   ;;  %s14044_s16 = inlined_call_operand.hbm [shape: f32[2,8], index: 16, kind: output, shape index: {2}]  }
   0x1   :  { %14053 = sst [smem:[#allocation70_spill]] %s14028_s0 }
   0x2   :  { %22 = vsyncpa [#allocation3], 0 }
   0x3   :  { %23 = vsyncpa [#allocation6], 0 }
   0x4   :  { %24 = vsyncpa [#allocation9], 0 }
   0x5   :  { %25 = vsyncpa [#allocation12], 0 }
   0x6   :  { %26 = vsyncpa [#allocation15], 0 }
   0x7   :  { %27 = vsyncpa [#allocation18], 0 }
   0x8   :  { %28 = vsyncpa [#allocation4], 0 }
   0x9   :  { %29 = vsyncpa [#allocation22], 0  ;;  %s11566_s21 = smov [#allocation5]  }
   0xa   :  { %s52_s22 = sshll.u32 %s11566_s21, 4  ;;  %s53_s22 = int_to_ptr.vmem [resolvable:$true] %s52_s22 }
   0xb   :  { %s11278_s23 = scalar_lea.vmem %s53_s22, 32  ;;  %p11283_p1 = scmp.lt.s32.totalorder %s53_s22, %s53_s22 }
   0xc   :  { %p11279_p0 = scmp.ne.s32.totalorder %s53_s22, %s11278_s23  ;;  %p11284_p2 = scmp.lt.s32.totalorder %s11278_s23, %s11278_s23 }
   0xe   :  { %p11285_p3 = por %p11284_p2, %p11283_p1 }
  0x10   :  { %p11286_p4 = pnand %p11285_p3, %p11279_p0 }
  0x12   :  { %11289 = shalt.err (!%p11286_p4)
}
  0x13   :  { %55 = dma.hbm_to_vmem [thread:$0]  %s14031_s3, 32, %s53_s22, [#allocation6]  }
  0x14   :  { %s11567_s26 = smov [#allocation8]   ;;  %s11568_s28 = smov [#allocation11]  }
  0x15   :  { %s73_s27 = sshll.u32 %s11567_s26, 4  ;;  %s95_s29 = sshll.u32 %s11568_s28, 4  ;;  %s74_s27 = int_to_ptr.vmem [resolvable:$true] %s73_s27  ;;  %s96_s29 = int_to_ptr.vmem [resolvable:$true] %s95_s29 }
  0x16   :  { %s11298_s30 = scalar_lea.vmem %s74_s27, 576  ;;  %p11303_p6 = scmp.lt.s32.totalorder %s74_s27, %s74_s27 }
  0x17   :  { %p11299_p5 = scmp.ne.s32.totalorder %s74_s27, %s11298_s30  ;;  %p11304_p7 = scmp.lt.s32.totalorder %s11298_s30, %s11298_s30 }
  0x19   :  { %p11305_p8 = por %p11304_p7, %p11303_p6 }
  0x1b   :  { %p11306_p9 = pnand %p11305_p8, %p11299_p5 }
  0x1d   :  { %11309 = shalt.err (!%p11306_p9)
}
  0x1e   :  { %s11569_s0 = smov 64   ;;  %s11570_s17 = smov 4  }
  0x1f   :  { %79 = dma.hbm_to_vmem [thread:$0]  %s14033_s5, 576, %s74_s27, [#allocation9], %s11569_s0, %s11569_s0, %s11570_s17  }
  0x20   :  { %s11318_s3 = scalar_lea.vmem %s96_s29, 576  ;;  %p11323_p11 = scmp.lt.s32.totalorder %s96_s29, %s96_s29 }
  0x21   :  { %p11319_p10 = scmp.ne.s32.totalorder %s96_s29, %s11318_s3  ;;  %p11324_p12 = scmp.lt.s32.totalorder %s11318_s3, %s11318_s3 }
  0x23   :  { %p11325_p13 = por %p11324_p12, %p11323_p11 }
  0x25   :  { %p11326_p0 = pnand %p11325_p13, %p11319_p10 }
  0x27   :  { %11329 = shalt.err (!%p11326_p0)
}
  0x28   :  { %101 = dma.hbm_to_vmem [thread:$0]  %s14035_s7, 576, %s96_s29, [#allocation12], %s11569_s0, %s11569_s0, %s11570_s17  }
  0x29   :  { %s11571_s22 = smov [#allocation14]   ;;  %s11572_s24 = smov [#allocation17]  }
  0x2a   :  { %s120_s23 = sshll.u32 %s11571_s22, 4  ;;  %s144_s5 = sshll.u32 %s11572_s24, 4  ;;  %s121_s23 = int_to_ptr.vmem [resolvable:$true] %s120_s23  ;;  %s145_s5 = int_to_ptr.vmem [resolvable:$true] %s144_s5 }
  0x2b   :  { %s11338_s25 = scalar_lea.vmem %s121_s23, 32  ;;  %p11343_p2 = scmp.lt.s32.totalorder %s121_s23, %s121_s23 }
  0x2c   :  { %p11339_p1 = scmp.ne.s32.totalorder %s121_s23, %s11338_s25  ;;  %p11344_p3 = scmp.lt.s32.totalorder %s11338_s25, %s11338_s25 }
  0x2e   :  { %p11345_p4 = por %p11344_p3, %p11343_p2 }
  0x30   :  { %p11346_p5 = pnand %p11345_p4, %p11339_p1 }
  0x32   :  { %11349 = shalt.err (!%p11346_p5)
}
  0x33   :  { %123 = dma.hbm_to_vmem [thread:$0]  %s14037_s9, 32, %s121_s23, [#allocation15]  }
  0x34   :  { %s11358_s28 = scalar_lea.vmem %s145_s5, 16  ;;  %s11362_s7 = scalar_lea.vmem %s145_s5, 32 }
  0x35   :  { %p11359_p6 = scmp.ne.s32.totalorder %s145_s5, %s11358_s28  ;;  %p11363_p7 = scmp.lt.s32.totalorder %s145_s5, %s145_s5 }
  0x36   :  { %p11364_p8 = scmp.lt.s32.totalorder %s11362_s7, %s11358_s28 }
  0x38   :  { %p11365_p9 = por %p11364_p8, %p11363_p7 }
  0x3a   :  { %p11366_p10 = pnand %p11365_p9, %p11359_p6 }
  0x3c   :  { %11369 = shalt.err (!%p11366_p10)
}
  0x3d   :  { %147 = dma.hbm_to_vmem [thread:$0]  %s14040_s12, 16, %s145_s5, [#allocation18]  }
  0x3e   :  { %s11573_s18 = smov [#allocation2]  }
  0x3f   :  { %s37_s19 = sshll.u32 %s11573_s18, 4  ;;  %s38_s19 = int_to_ptr.vmem [resolvable:$true] %s37_s19 }
  0x40   :  { %s11378_s3 = scalar_lea.vmem %s38_s19, 36864  ;;  %p11383_p12 = scmp.lt.s32.totalorder %s38_s19, %s38_s19 }
  0x41   :  { %p11379_p11 = scmp.ne.s32.totalorder %s38_s19, %s11378_s3  ;;  %p11384_p13 = scmp.lt.s32.totalorder %s11378_s3, %s11378_s3 }
  0x43   :  { %p11385_p0 = por %p11384_p13, %p11383_p12 }
  0x45   :  { %p11386_p1 = pnand %p11385_p0, %p11379_p11 }
  0x47   :  { %11389 = shalt.err (!%p11386_p1)
}
  0x48   :  { %s11574_s9 = smov 256   ;;  %s11575_s20 = smov 16  }
  0x49   :  { %43 = dma.hbm_to_vmem [thread:$0]  %s14029_s1, 36864, %s38_s19, [#allocation3], %s11574_s9, %s11574_s9, %s11575_s20  }
  0x4a   :  { %s11576_s23 = smov [#allocation7]   ;;  %s11577_s12 = smov [#allocation10]  }
  0x4b   :  { %s61_s24 = sshll.u32 %s11576_s23, 4  ;;  %s86_s5 = sshll.u32 %s11577_s12, 4  ;;  %s62_s24 = int_to_ptr.vmem [resolvable:$true] %s61_s24  ;;  %s87_s5 = int_to_ptr.vmem [resolvable:$true] %s86_s5 }
  0x4c   :  { %s11398_s25 = scalar_lea.vmem %s62_s24, 2304  ;;  %p11403_p3 = scmp.lt.s32.totalorder %s62_s24, %s62_s24 }
  0x4d   :  { %p11399_p2 = scmp.ne.s32.totalorder %s62_s24, %s11398_s25  ;;  %p11404_p4 = scmp.lt.s32.totalorder %s11398_s25, %s11398_s25 }
  0x4f   :  { %p11405_p5 = por %p11404_p4, %p11403_p3 }
  0x51   :  { %p11406_p6 = pnand %p11405_p5, %p11399_p2 }
  0x53   :  { %11409 = shalt.err (!%p11406_p6)
}
  0x54   :  { %67 = dma.hbm_to_vmem [thread:$0]  %s14032_s4, 2304, %s62_s24, [#allocation6], %s11569_s0, %s11569_s0, %s11570_s17  }
  0x55   :  { %s11418_s1 = scalar_lea.vmem %s87_s5, 32  ;;  %p11423_p8 = scmp.lt.s32.totalorder %s87_s5, %s87_s5 }
  0x56   :  { %p11419_p7 = scmp.ne.s32.totalorder %s87_s5, %s11418_s1  ;;  %p11424_p9 = scmp.lt.s32.totalorder %s11418_s1, %s11418_s1 }
  0x58   :  { %p11425_p10 = por %p11424_p9, %p11423_p8 }
  0x5a   :  { %p11426_p11 = pnand %p11425_p10, %p11419_p7 }
  0x5c   :  { %11429 = shalt.err (!%p11426_p11)
}
  0x5d   :  { %89 = dma.hbm_to_vmem [thread:$0]  %s14034_s6, 32, %s87_s5, [#allocation9]  }
  0x5e   :  { %s11578_s29 = smov [#allocation13]   ;;  %s11579_s18 = smov [#allocation16]  }
  0x5f   :  { %s107_s30 = sshll.u32 %s11578_s29, 4  ;;  %s129_s19 = sshll.u32 %s11579_s18, 4  ;;  %s108_s30 = int_to_ptr.vmem [resolvable:$true] %s107_s30  ;;  %s130_s19 = int_to_ptr.vmem [resolvable:$true] %s129_s19 }
  0x60   :  { %s11438_s3 = scalar_lea.vmem %s108_s30, 1152  ;;  %p11443_p13 = scmp.lt.s32.totalorder %s108_s30, %s108_s30 }
  0x61   :  { %p11439_p12 = scmp.ne.s32.totalorder %s108_s30, %s11438_s3  ;;  %p11444_p0 = scmp.lt.s32.totalorder %s11438_s3, %s11438_s3 }
  0x63   :  { %p11445_p1 = por %p11444_p0, %p11443_p13 }
  0x65   :  { %p11446_p2 = pnand %p11445_p1, %p11439_p12 }
  0x67   :  { %11449 = shalt.err (!%p11446_p2)
}
  0x68   :  { %113 = dma.hbm_to_vmem [thread:$0]  %s14036_s8, 1152, %s108_s30, [#allocation12], %s11569_s0, %s11569_s0, %s11570_s17  }
  0x69   :  { %s11458_s6 = scalar_lea.vmem %s130_s19, 64  ;;  %p11463_p4 = scmp.lt.s32.totalorder %s130_s19, %s130_s19 }
  0x6a   :  { %p11459_p3 = scmp.ne.s32.totalorder %s130_s19, %s11458_s6  ;;  %p11464_p5 = scmp.lt.s32.totalorder %s11458_s6, %s11458_s6 }
  0x6c   :  { %p11465_p6 = por %p11464_p5, %p11463_p4 }
  0x6e   :  { %p11466_p7 = pnand %p11465_p6, %p11459_p3 }
  0x70   :  { %11469 = shalt.err (!%p11466_p7)
}
  0x71   :  { %s11580_s21 = smov 1   ;;  %s11581_s24 = smov [#allocation19]  }
  0x72   :  { %135 = dma.hbm_to_vmem [thread:$0]  %s14038_s10, 64, %s130_s19, [#allocation15], %s11575_s20, %s11575_s20, %s11580_s21  }
  0x73   :  { %s154_s12 = sshll.u32 %s11581_s24, 4  ;;  %s155_s12 = int_to_ptr.vmem [resolvable:$true] %s154_s12 }
  0x74   :  { %s11478_s5 = scalar_lea.vmem %s155_s12, 32  ;;  %p11483_p9 = scmp.lt.s32.totalorder %s155_s12, %s155_s12 }
  0x75   :  { %p11479_p8 = scmp.ne.s32.totalorder %s155_s12, %s11478_s5  ;;  %p11484_p10 = scmp.lt.s32.totalorder %s11478_s5, %s11478_s5 }
  0x77   :  { %p11485_p11 = por %p11484_p10, %p11483_p9 }
  0x79   :  { %p11486_p12 = pnand %p11485_p11, %p11479_p8 }
  0x7b   :  { %11489 = shalt.err (!%p11486_p12)
}
  0x7c   :  { %157 = dma.hbm_to_vmem [thread:$0]  %s14041_s13, 32, %s155_s12, [#allocation18]  }
  0x7d   :  { %11550 = dma.done.wait [#allocation3], 36864  }
  0x7e   :  { %11551 = vsyncadd [#allocation3], 4294930432 }
  0x7f   :  { %11552 = dma.done.wait [#allocation6], 2336  }
  0x80   :  { %11553 = vsyncadd [#allocation6], 4294964960 }
  0x81   :  { %11554 = dma.done.wait [#allocation9], 608  }
  0x82   :  { %11555 = vsyncadd [#allocation9], 4294966688 }
  0x83   :  { %11556 = dma.done.wait [#allocation12], 1728  }
  0x84   :  { %11557 = vsyncadd [#allocation12], 4294965568 }
  0x85   :  { %11558 = dma.done.wait [#allocation15], 96  }
  0x86   :  { %11559 = vsyncadd [#allocation15], 4294967200 }
  0x87   :  { %11560 = dma.done.wait [#allocation18], 48  }
  0x88   :  { %11561 = vsyncadd [#allocation18], 4294967248  ;;  %s14054_s20 = sld [smem:[#allocation70_spill]]  ;;  %v10683_v32 = vld [vmem:[#allocation2] ss:$16 sps:$4 sm:$0xff]   ;;  %vm1265_vm0 = vcmask 1041408  }
  0x89   :  { %v10685_v33 = vld [vmem:[#allocation2 + $0x4] ss:$16 sps:$4 sm:$0xff]   ;;  %v10686_v34 = vld [vmem:[#allocation2 + $0x8] ss:$16 sps:$4 sm:$0xff]   ;;  %v10688_v35 = vld [vmem:[#allocation2 + $0xc] ss:$16 sps:$4 sm:$0xff]  }
  0x8a   :  { %672 = vmatprep.mubr.bf16.mxu0 %v10685_v33  ;;  %v10689_v36 = vld [vmem:[#allocation2 + $0x24] ss:$16 sps:$4 sm:$0xff]   ;;  %769 = vmatprep.mubr.bf16.mxu1 %v10688_v35  ;;  %v10691_v37 = vld [vmem:[#allocation2 + $0x2c] ss:$16 sps:$4 sm:$0xff]   ;;  %v10693_v38 = vld [vmem:[#allocation2 + $0x20] ss:$16 sps:$4 sm:$0xff]  }
  0x8b   :  { %v10694_v39 = vld [vmem:[#allocation2 + $0x28] ss:$16 sps:$4 sm:$0xff]   ;;  %v10695_v40 = vld [vmem:[#allocation2 + $0x44] ss:$16 sps:$4 sm:$0xff]   ;;  %v10697_v41 = vld [vmem:[#allocation2 + $0x4c] ss:$16 sps:$4 sm:$0xff]  }
  0x8c   :  { %v10699_v42 = vld [vmem:[#allocation2 + $0x40] ss:$16 sps:$4 sm:$0xff]   ;;  %v10700_v43 = vld [vmem:[#allocation2 + $0x48] ss:$16 sps:$4 sm:$0xff]   ;;  %v10701_v44 = vld [vmem:[#allocation2 + $0x64] ss:$16 sps:$4 sm:$0xff]  }
  0x8d   :  { %v10703_v45 = vld [vmem:[#allocation2 + $0x6c] ss:$16 sps:$4 sm:$0xff]   ;;  %v10705_v46 = vld [vmem:[#allocation2 + $0x60] ss:$16 sps:$4 sm:$0xff]   ;;  %v10706_v47 = vld [vmem:[#allocation2 + $0x68] ss:$16 sps:$4 sm:$0xff]  }
  0x8e   :  { %v11724_v0 = vld [vmem:[%s14054_s20 + $0x78] sm:$0xff]   ;;  %v11747_v4 = vld [vmem:[%s14054_s20 + $0x70] sm:$0xff]   ;;  %v11771_v8 = vld [vmem:[%s14054_s20 + $0x68] sm:$0xff]   ;;  %vm1240_vm1 = vcmask 31744   ;;  %vm14052_vm2 = vcmask 64512  }
  0x8f   :  { %v11729_v1 = vld [vmem:[%s14054_s20 + $0xf8] sm:$0xff]   ;;  %8618 = vmatprep.subr.bf16.mxu0 %v11724_v0  ;;  %v11753_v5 = vld [vmem:[%s14054_s20 + $0xf0] sm:$0xff]   ;;  %v11777_v9 = vld [vmem:[%s14054_s20 + $0xe8] sm:$0xff]  }
  0x90   :  { %v11735_v2 = vld [vmem:[%s14054_s20 + $0x38] sm:$0xff]   ;;  %8682 = vmatprep.subr.bf16.mxu1 %v11729_v1  ;;  %v11759_v6 = vld [vmem:[%s14054_s20 + $0x30] sm:$0xff]   ;;  %v11783_v10 = vld [vmem:[%s14054_s20 + $0x28] sm:$0xff]  }
  0x91   :  { %v11741_v3 = vld [vmem:[%s14054_s20 + $0xb8] sm:$0xff]   ;;  %8619 = vmatpush3.bf16.msra.mxu0 %v11735_v2  ;;  %v11765_v7 = vld [vmem:[%s14054_s20 + $0xb0] sm:$0xff]   ;;  %v11789_v11 = vld [vmem:[%s14054_s20 + $0xa8] sm:$0xff]  }
  0x92   :  { %8683 = vmatpush3.bf16.msra.mxu1 %v11741_v3  ;;  %8620 = vmatprep.subr.bf16.mxu0 %v11747_v4  ;;  %v11795_v12 = vld [vmem:[%s14054_s20 + $0x60] sm:$0xff]   ;;  %v11819_v16 = vld [vmem:[%s14054_s20 + $0x58] sm:$0xff]   ;;  %v11843_v20 = vld [vmem:[%s14054_s20 + $0x50] sm:$0xff]  }
  0x93   :  { %8684 = vmatprep.subr.bf16.mxu1 %v11753_v5  ;;  %v11801_v13 = vld [vmem:[%s14054_s20 + $0xe0] sm:$0xff]   ;;  %v11825_v17 = vld [vmem:[%s14054_s20 + $0xd8] sm:$0xff]   ;;  %v11849_v21 = vld [vmem:[%s14054_s20 + $0xd0] sm:$0xff]  }
  0x94   :  { %v11807_v14 = vld [vmem:[%s14054_s20 + $0x20] sm:$0xff]   ;;  %v11831_v18 = vld [vmem:[%s14054_s20 + $0x18] sm:$0xff]   ;;  %v11855_v22 = vld [vmem:[%s14054_s20 + $0x10] sm:$0xff]  }
  0x95   :  { %8621 = vmatpush3.bf16.msra.mxu0 %v11759_v6  ;;  %v11813_v15 = vld [vmem:[%s14054_s20 + $0xa0] sm:$0xff]   ;;  %v11837_v19 = vld [vmem:[%s14054_s20 + $0x98] sm:$0xff]   ;;  %v11861_v23 = vld [vmem:[%s14054_s20 + $0x90] sm:$0xff]  }
  0x96   :  { %8685 = vmatpush3.bf16.msra.mxu1 %v11765_v7  ;;  %8622 = vmatprep.subr.bf16.mxu0 %v11771_v8  ;;  %v11867_v24 = vld [vmem:[%s14054_s20 + $0x48] sm:$0xff]   ;;  %v11891_v28 = vld [vmem:[%s14054_s20 + $0x40] sm:$0xff]  }
  0x97   :  { %8686 = vmatprep.subr.bf16.mxu1 %v11777_v9  ;;  %v11873_v25 = vld [vmem:[%s14054_s20 + $0xc8] sm:$0xff]   ;;  %v11897_v29 = vld [vmem:[%s14054_s20 + $0xc0] sm:$0xff]  }
  0x98   :  { %v11879_v26 = vld [vmem:[%s14054_s20 + $0x8] sm:$0xff]   ;;  %v11903_v30 = vld [vmem:[%s14054_s20] sm:$0xff]  }
  0x99   :  { %8623 = vmatpush3.bf16.msra.mxu0 %v11783_v10  ;;  %v11885_v27 = vld [vmem:[%s14054_s20 + $0x88] sm:$0xff]   ;;  %v11909_v31 = vld [vmem:[%s14054_s20 + $0x80] sm:$0xff]  }
  0x9a   :  { %8687 = vmatpush3.bf16.msra.mxu1 %v11789_v11  ;;  %8624 = vmatprep.subr.bf16.mxu0 %v11795_v12  ;;  %v10707_v48 = vld [vmem:[#allocation2 + $0x84] ss:$16 sps:$4 sm:$0xff]   ;;  %v10709_v49 = vld [vmem:[#allocation2 + $0x8c] ss:$16 sps:$4 sm:$0xff]   ;;  %v10711_v50 = vld [vmem:[#allocation2 + $0x80] ss:$16 sps:$4 sm:$0xff]  }
  0x9b   :  { %8688 = vmatprep.subr.bf16.mxu1 %v11801_v13  ;;  %v10712_v51 = vld [vmem:[#allocation2 + $0x88] ss:$16 sps:$4 sm:$0xff]   ;;  %v10713_v52 = vld [vmem:[#allocation2 + $0xa4] ss:$16 sps:$4 sm:$0xff]   ;;  %v10715_v53 = vld [vmem:[#allocation2 + $0xac] ss:$16 sps:$4 sm:$0xff]  }
  0x9c   :  { %v10717_v54 = vld [vmem:[#allocation2 + $0xa0] ss:$16 sps:$4 sm:$0xff]   ;;  %v10718_v55 = vld [vmem:[#allocation2 + $0xa8] ss:$16 sps:$4 sm:$0xff]   ;;  %v10719_v56 = vld [vmem:[#allocation2 + $0xc4] ss:$16 sps:$4 sm:$0xff]  }
  0x9d   :  { %8625 = vmatpush3.bf16.msra.mxu0 %v11807_v14  ;;  %v10721_v57 = vld [vmem:[#allocation2 + $0xcc] ss:$16 sps:$4 sm:$0xff]   ;;  %v10723_v58 = vld [vmem:[#allocation2 + $0xc0] ss:$16 sps:$4 sm:$0xff]   ;;  %v10724_v59 = vld [vmem:[#allocation2 + $0xc8] ss:$16 sps:$4 sm:$0xff]  }
  0x9e   :  { %8689 = vmatpush3.bf16.msra.mxu1 %v11813_v15  ;;  %8626 = vmatprep.subr.bf16.mxu0 %v11819_v16  ;;  %v10725_v60 = vld [vmem:[#allocation2 + $0xe4] ss:$16 sps:$4 sm:$0xff]   ;;  %v10727_v61 = vld [vmem:[#allocation2 + $0xec] ss:$16 sps:$4 sm:$0xff]   ;;  %v10729_v62 = vld [vmem:[#allocation2 + $0xe0] ss:$16 sps:$4 sm:$0xff]  }
  0x9f   :  { %8690 = vmatprep.subr.bf16.mxu1 %v11825_v17  ;;  %v10730_v63 = vld [vmem:[#allocation2 + $0xe8] ss:$16 sps:$4 sm:$0xff]  }
  0xa0   :  { %v10778_v33 = vld [vmem:[#allocation2 + $0x1e8] ss:$16 sps:$4 sm:$0xff]  }
  0xa1   :  { %8627 = vmatpush3.bf16.msra.mxu0 %v11831_v18 }
  0xa2   :  { %8691 = vmatpush3.bf16.msra.mxu1 %v11837_v19  ;;  %8628 = vmatprep.subr.bf16.mxu0 %v11843_v20 }
  0xa3   :  { %8692 = vmatprep.subr.bf16.mxu1 %v11849_v21 }
  0xa5   :  { %8629 = vmatpush3.bf16.msra.mxu0 %v11855_v22 }
  0xa6   :  { %8693 = vmatpush3.bf16.msra.mxu1 %v11861_v23  ;;  %8630 = vmatprep.subr.bf16.mxu0 %v11867_v24 }
  0xa7   :  { %8694 = vmatprep.subr.bf16.mxu1 %v11873_v25 }
  0xa9   :  { %8631 = vmatpush3.bf16.msra.mxu0 %v11879_v26 }
  0xaa   :  { %8695 = vmatpush3.bf16.msra.mxu1 %v11885_v27  ;;  %8632 = vmatprep.subr.bf16.mxu0 %v11891_v28 }
  0xab   :  { %8696 = vmatprep.subr.bf16.mxu1 %v11897_v29 }
  0xad   :  { %8633 = vmatpush3.bf16.msra.mxu0 %v11903_v30 }
  0xae   :  { %8697 = vmatpush3.bf16.msra.mxu1 %v11909_v31  ;;  %8746 = vmatprep.subr.bf16.mxu0 %v11724_v0  ;;  %v10733_v0 = vld [vmem:[#allocation2 + $0x104] ss:$16 sps:$4 sm:$0xff]  }
  0xaf   :  { %8810 = vmatprep.subr.bf16.mxu1 %v11729_v1 }
  0xb0   :  { %673 = vmatmul.mubr.bf16.vlgmr.msra.gmra.mxu0 %v10683_v32  ;;  %v10777_v32 = vld [vmem:[#allocation2 + $0x1e0] ss:$16 sps:$4 sm:$0xff]  }
  0xb1   :  { %770 = vmatmul.mubr.bf16.vlgmr.msra.gmra.mxu1 %v10686_v34  ;;  %680 = vmatprep.mubr.bf16.mxu0 %v10689_v36  ;;  %v8222_v34 = vld [vmem:[%s14030_s2 + $0x2] sm:$0x3]  ;;  %v11959_v36 = vld [vmem:[%s14054_s20 + $0x78] sm:$0xff]  }
  0xb2   :  { %777 = vmatprep.mubr.bf16.mxu1 %v10691_v37  ;;  %8747 = vmatpush3.bf16.msra.mxu0 %v11735_v2  ;;  %v10736_v2 = vld [vmem:[#allocation2 + $0x10c] ss:$16 sps:$4 sm:$0xff]   ;;  %v1267_v35 = vsel %vm1265_vm0, %v8222_v34, 0 }
  0xb3   :  { %8811 = vmatpush3.bf16.msra.mxu1 %v11741_v3  ;;  %8748 = vmatprep.subr.bf16.mxu0 %v11747_v4  ;;  %v10731_v3 = vld [vmem:[#allocation2 + $0x100] ss:$16 sps:$4 sm:$0xff]   ;;  %v10734_v4 = vld [vmem:[#allocation2 + $0x108] ss:$16 sps:$4 sm:$0xff]  }
  0xb4   :  { %8812 = vmatprep.subr.bf16.mxu1 %v11753_v5  ;;  %v10737_v5 = vld [vmem:[#allocation2 + $0x124] ss:$16 sps:$4 sm:$0xff]  }
  0xb6   :  { %8749 = vmatpush3.bf16.msra.mxu0 %v11759_v6  ;;  %v10739_v6 = vld [vmem:[#allocation2 + $0x12c] ss:$16 sps:$4 sm:$0xff]  }
  0xb7   :  { %8813 = vmatpush3.bf16.msra.mxu1 %v11765_v7  ;;  %8750 = vmatprep.subr.bf16.mxu0 %v11771_v8  ;;  %v10741_v7 = vld [vmem:[#allocation2 + $0x120] ss:$16 sps:$4 sm:$0xff]   ;;  %v10742_v8 = vld [vmem:[#allocation2 + $0x128] ss:$16 sps:$4 sm:$0xff]  }
  0xb8   :  { %681 = vmatmul.mubr.bf16.gmra.mxu0 %v10693_v38  ;;  %8814 = vmatprep.subr.bf16.mxu1 %v11777_v9  ;;  %v10743_v9 = vld [vmem:[#allocation2 + $0x144] ss:$16 sps:$4 sm:$0xff]  }
  0xb9   :  { %778 = vmatmul.mubr.bf16.gmra.mxu1 %v10694_v39  ;;  %688 = vmatprep.mubr.bf16.mxu0 %v10695_v40 }
  0xba   :  { %785 = vmatprep.mubr.bf16.mxu1 %v10697_v41  ;;  %8751 = vmatpush3.bf16.msra.mxu0 %v11783_v10  ;;  %v10745_v10 = vld [vmem:[#allocation2 + $0x14c] ss:$16 sps:$4 sm:$0xff]  }
  0xbb   :  { %8815 = vmatpush3.bf16.msra.mxu1 %v11789_v11  ;;  %8752 = vmatprep.subr.bf16.mxu0 %v11795_v12  ;;  %v10747_v11 = vld [vmem:[#allocation2 + $0x140] ss:$16 sps:$4 sm:$0xff]   ;;  %v10748_v12 = vld [vmem:[#allocation2 + $0x148] ss:$16 sps:$4 sm:$0xff]  }
  0xbc   :  { %8816 = vmatprep.subr.bf16.mxu1 %v11801_v13  ;;  %v10749_v13 = vld [vmem:[#allocation2 + $0x164] ss:$16 sps:$4 sm:$0xff]  }
  0xbe   :  { %8753 = vmatpush3.bf16.msra.mxu0 %v11807_v14  ;;  %v10751_v14 = vld [vmem:[#allocation2 + $0x16c] ss:$16 sps:$4 sm:$0xff]  }
  0xbf   :  { %8817 = vmatpush3.bf16.msra.mxu1 %v11813_v15  ;;  %8754 = vmatprep.subr.bf16.mxu0 %v11819_v16  ;;  %v842_v15 = vld [vmem:[%s14030_s2] sm:$0x3] }
  0xc0   :  { %689 = vmatmul.mubr.bf16.gmra.mxu0 %v10699_v42  ;;  %8818 = vmatprep.subr.bf16.mxu1 %v11825_v17  ;;  %v10753_v16 = vld [vmem:[#allocation2 + $0x160] ss:$16 sps:$4 sm:$0xff]   ;;  %v1391_v17 = vsel %vm1265_vm0, %v842_v15, 0 }
  0xc1   :  { %786 = vmatmul.mubr.bf16.gmra.mxu1 %v10700_v43  ;;  %696 = vmatprep.mubr.bf16.mxu0 %v10701_v44 }
  0xc2   :  { %793 = vmatprep.mubr.bf16.mxu1 %v10703_v45  ;;  %8755 = vmatpush3.bf16.msra.mxu0 %v11831_v18  ;;  %v10754_v18 = vld [vmem:[#allocation2 + $0x168] ss:$16 sps:$4 sm:$0xff]  }
  0xc3   :  { %8819 = vmatpush3.bf16.msra.mxu1 %v11837_v19  ;;  %8756 = vmatprep.subr.bf16.mxu0 %v11843_v20  ;;  %v10755_v19 = vld [vmem:[#allocation2 + $0x184] ss:$16 sps:$4 sm:$0xff]   ;;  %v10757_v20 = vld [vmem:[#allocation2 + $0x18c] ss:$16 sps:$4 sm:$0xff]  }
  0xc4   :  { %8820 = vmatprep.subr.bf16.mxu1 %v11849_v21  ;;  %v10759_v21 = vld [vmem:[#allocation2 + $0x180] ss:$16 sps:$4 sm:$0xff]  }
  0xc6   :  { %8757 = vmatpush3.bf16.msra.mxu0 %v11855_v22  ;;  %v10760_v22 = vld [vmem:[#allocation2 + $0x188] ss:$16 sps:$4 sm:$0xff]  }
  0xc7   :  { %8821 = vmatpush3.bf16.msra.mxu1 %v11861_v23  ;;  %8758 = vmatprep.subr.bf16.mxu0 %v11867_v24  ;;  %v10761_v23 = vld [vmem:[#allocation2 + $0x1a4] ss:$16 sps:$4 sm:$0xff]   ;;  %v10763_v24 = vld [vmem:[#allocation2 + $0x1ac] ss:$16 sps:$4 sm:$0xff]  }
  0xc8   :  { %697 = vmatmul.mubr.bf16.gmra.mxu0 %v10705_v46  ;;  %8822 = vmatprep.subr.bf16.mxu1 %v11873_v25  ;;  %v10765_v25 = vld [vmem:[#allocation2 + $0x1a0] ss:$16 sps:$4 sm:$0xff]  }
  0xc9   :  { %794 = vmatmul.mubr.bf16.gmra.mxu1 %v10706_v47  ;;  %704 = vmatprep.mubr.bf16.mxu0 %v10707_v48 }
  0xca   :  { %801 = vmatprep.mubr.bf16.mxu1 %v10709_v49  ;;  %8759 = vmatpush3.bf16.msra.mxu0 %v11879_v26  ;;  %v10766_v26 = vld [vmem:[#allocation2 + $0x1a8] ss:$16 sps:$4 sm:$0xff]  }
  0xcb   :  { %8823 = vmatpush3.bf16.msra.mxu1 %v11885_v27  ;;  %8760 = vmatprep.subr.bf16.mxu0 %v11891_v28  ;;  %v10767_v27 = vld [vmem:[#allocation2 + $0x1c4] ss:$16 sps:$4 sm:$0xff]   ;;  %v10769_v28 = vld [vmem:[#allocation2 + $0x1cc] ss:$16 sps:$4 sm:$0xff]  }
  0xcc   :  { %8824 = vmatprep.subr.bf16.mxu1 %v11897_v29  ;;  %v10772_v29 = vld [vmem:[#allocation2 + $0x1c8] ss:$16 sps:$4 sm:$0xff]  }
  0xce   :  { %8761 = vmatpush3.bf16.msra.mxu0 %v11903_v30  ;;  %v10773_v30 = vld [vmem:[#allocation2 + $0x1e4] ss:$16 sps:$4 sm:$0xff]  }
  0xcf   :  { %8825 = vmatpush3.bf16.msra.mxu1 %v11909_v31  ;;  %v10775_v31 = vld [vmem:[#allocation2 + $0x1ec] ss:$16 sps:$4 sm:$0xff]   ;;  %10611 = vmatprep.subr.msk.bf16.mxu0 %vm1265_vm0, %v8222_v34 }
  0xd0   :  { %705 = vmatmul.mubr.bf16.gmra.mxu0 %v10711_v50  ;;  %10612 = vmatprep.subr.msk.bf16.mxu1 %vm1265_vm0, %v842_v15  ;;  %v11967_v15 = vld [vmem:[%s14054_s20 + $0xb8] sm:$0xff]  }
  0xd1   :  { %802 = vmatmul.mubr.bf16.gmra.mxu1 %v10712_v51  ;;  %712 = vmatprep.mubr.bf16.mxu0 %v10713_v52 }
  0xd2   :  { %809 = vmatprep.mubr.bf16.mxu1 %v10715_v53 }
  0xd8   :  { %713 = vmatmul.mubr.bf16.gmra.mxu0 %v10717_v54 }
  0xd9   :  { %810 = vmatmul.mubr.bf16.gmra.mxu1 %v10718_v55  ;;  %720 = vmatprep.mubr.bf16.mxu0 %v10719_v56 }
  0xda   :  { %817 = vmatprep.mubr.bf16.mxu1 %v10721_v57 }
  0xe0   :  { %721 = vmatmul.mubr.bf16.gmra.mxu0 %v10723_v58 }
  0xe1   :  { %818 = vmatmul.mubr.bf16.gmra.mxu1 %v10724_v59  ;;  %728 = vmatprep.mubr.bf16.mxu0 %v10725_v60 }
  0xe2   :  { %825 = vmatprep.mubr.bf16.mxu1 %v10727_v61 }
  0xe8   :  { %729 = vmatmul.mubr.bf16.gmra.mxu0 %v10729_v62 }
  0xe9   :  { %826 = vmatmul.mubr.bf16.gmra.mxu1 %v10730_v63  ;;  %1068 = vmatprep.mubr.bf16.mxu0 %v10733_v0 }
  0xea   :  { %1165 = vmatprep.mubr.bf16.mxu1 %v10736_v2 }
  0xf0   :  { %1069 = vmatmul.mubr.bf16.vlgmr.msra.gmra.mxu0 %v10731_v3 }
  0xf1   :  { %1166 = vmatmul.mubr.bf16.vlgmr.msra.gmra.mxu1 %v10734_v4  ;;  %1076 = vmatprep.mubr.bf16.mxu0 %v10737_v5 }
  0xf2   :  { %1173 = vmatprep.mubr.bf16.mxu1 %v10739_v6  ;;  %10052 = vmatpush3.bf16.msra.mxu1 %v1391_v17 }
  0xf3   :  { %8956 = vmatprep.subr.bf16.mxu1 %v11729_v1  ;;  %v10771_v1 = vld [vmem:[#allocation2 + $0x1c0] ss:$16 sps:$4 sm:$0xff]   ;;  %10034 = vmatpush3.bf16.msra.mxu0 %v1267_v35 }
  0xf4   :  { %8892 = vmatprep.subr.bf16.mxu0 %v11959_v36 }
  0xf8   :  { %1077 = vmatmul.mubr.bf16.gmra.mxu0 %v10741_v7 }
  0xf9   :  { %1174 = vmatmul.mubr.bf16.gmra.mxu1 %v10742_v8  ;;  %1084 = vmatprep.mubr.bf16.mxu0 %v10743_v9 }
  0xfa   :  { %1181 = vmatprep.mubr.bf16.mxu1 %v10745_v10 }
 0x100   :  { %1085 = vmatmul.mubr.bf16.gmra.mxu0 %v10747_v11 }
 0x101   :  { %1182 = vmatmul.mubr.bf16.gmra.mxu1 %v10748_v12  ;;  %1092 = vmatprep.mubr.bf16.mxu0 %v10749_v13 }
 0x102   :  { %1189 = vmatprep.mubr.bf16.mxu1 %v10751_v14 }
 0x108   :  { %1093 = vmatmul.mubr.bf16.gmra.mxu0 %v10753_v16 }
 0x109   :  { %1190 = vmatmul.mubr.bf16.gmra.mxu1 %v10754_v18  ;;  %1100 = vmatprep.mubr.bf16.mxu0 %v10755_v19  ;;  %v11973_v18 = vld [vmem:[%s14054_s20 + $0xf0] sm:$0xff]  }
 0x10a   :  { %1197 = vmatprep.mubr.bf16.mxu1 %v10757_v20 }
 0x110   :  { %1101 = vmatmul.mubr.bf16.gmra.mxu0 %v10759_v21 }
 0x111   :  { %1198 = vmatmul.mubr.bf16.gmra.mxu1 %v10760_v22  ;;  %1108 = vmatprep.mubr.bf16.mxu0 %v10761_v23 }
 0x112   :  { %1205 = vmatprep.mubr.bf16.mxu1 %v10763_v24  ;;  %v11979_v24 = vld [vmem:[%s14054_s20 + $0xb0] sm:$0xff]  }
 0x118   :  { %1109 = vmatmul.mubr.bf16.gmra.mxu0 %v10765_v25 }
 0x119   :  { %1206 = vmatmul.mubr.bf16.gmra.mxu1 %v10766_v26  ;;  %1116 = vmatprep.mubr.bf16.mxu0 %v10767_v27  ;;  %v11985_v27 = vld [vmem:[%s14054_s20 + $0xe8] sm:$0xff]  }
 0x11a   :  { %1213 = vmatprep.mubr.bf16.mxu1 %v10769_v28 }
 0x120   :  { %1117 = vmatmul.mubr.bf16.gmra.mxu0 %v10771_v1 }
 0x121   :  { %1214 = vmatmul.mubr.bf16.gmra.mxu1 %v10772_v29  ;;  %1124 = vmatprep.mubr.bf16.mxu0 %v10773_v30 }
 0x122   :  { %1221 = vmatprep.mubr.bf16.mxu1 %v10775_v31 }
 0x128   :  { %1125 = vmatmul.mubr.bf16.gmra.mxu0 %v10777_v32 }
 0x129   :  { %1222 = vmatmul.mubr.bf16.gmra.mxu1 %v10778_v33  ;;  %v11992_v33 = vld [vmem:[%s14054_s20 + $0xa8] sm:$0xff]  }
 0x170   :  { %v8634_v37 = vpop.f32.mrf.mxu0 }
 0x171   :  { %v8698_v38 = vpop.f32.mrf.mxu1 }
 0x172   :  { %v8635_v39 = vpop.f32.mrf.mxu0 }
 0x173   :  { %v8699_v40 = vpop.f32.mrf.mxu1  ;;  %v8636_v43 = vadd.f32 %v8635_v39, %v8634_v37  ;;  %v11998_v37 = vld [vmem:[%s14054_s20 + $0xe0] sm:$0xff]  }
 0x174   :  { %v8637_v41 = vpop.f32.mrf.mxu0  ;;  %v8700_v44 = vadd.f32 %v8699_v40, %v8698_v38 }
 0x175   :  { %v8701_v42 = vpop.f32.mrf.mxu1 }
 0x176   :  { %v8638_v45 = vpop.f32.mrf.mxu0  ;;  %v772_v51 = vadd.f32 %v8700_v44, %v8636_v43  ;;  %v12004_v43 = vld [vmem:[%s14054_s20 + $0xa0] sm:$0xff]  }
 0x177   :  { %v8639_v46 = vadd.f32 %v8638_v45, %v8637_v41  ;;  %v8702_v47 = vpop.f32.mrf.mxu1 }
 0x178   :  { %v8703_v48 = vadd.f32 %v8702_v47, %v8701_v42  ;;  %v8640_v49 = vpop.f32.mrf.mxu0 }
 0x179   :  { %v8704_v50 = vpop.f32.mrf.mxu1 }
 0x17a   :  { %v775_v52 = vadd.f32 %v8703_v48, %v8639_v46  ;;  %v8641_v53 = vpop.f32.mrf.mxu0  ;;  %v12010_v46 = vld [vmem:[%s14054_s20 + $0xd8] sm:$0xff]  }
 0x17b   :  { %v8705_v54 = vpop.f32.mrf.mxu1  ;;  %v8642_v58 = vadd.f32 %v8641_v53, %v8640_v49  ;;  %v12017_v53 = vld [vmem:[%s14054_s20 + $0x98] sm:$0xff]  }
 0x17c   :  { %v834_v55 = vpack.c.bf16 %v775_v52, %v772_v51  ;;  %v8643_v56 = vpop.f32.mrf.mxu0  ;;  %v8706_v59 = vadd.f32 %v8705_v54, %v8704_v50 }
 0x17d   :  { %v8707_v57 = vpop.f32.mrf.mxu1 }
 0x17e   :  { %10053 = vmatprep.mubr.msk.bf16.mxu1 %vm1240_vm1, %v834_v55  ;;  %v8644_v60 = vpop.f32.mrf.mxu0  ;;  %v780_v3 = vadd.f32 %v8706_v59, %v8642_v58 }
 0x17f   :  { %v8645_v61 = vadd.f32 %v8644_v60, %v8643_v56  ;;  %v8708_v62 = vpop.f32.mrf.mxu1  ;;  %v12023_v56 = vld [vmem:[%s14054_s20 + $0xd0] sm:$0xff]  }
 0x180   :  { %v8709_v63 = vadd.f32 %v8708_v62, %v8707_v57  ;;  %v8646_v0 = vpop.f32.mrf.mxu0  ;;  %v12029_v62 = vld [vmem:[%s14054_s20 + $0x90] sm:$0xff]  }
 0x181   :  { %v8710_v2 = vpop.f32.mrf.mxu1 }
 0x182   :  { %v783_v4 = vadd.f32 %v8709_v63, %v8645_v61  ;;  %v8647_v5 = vpop.f32.mrf.mxu0 }
 0x183   :  { %v8711_v6 = vpop.f32.mrf.mxu1  ;;  %v8648_v10 = vadd.f32 %v8647_v5, %v8646_v0 }
 0x184   :  { %v835_v7 = vpack.c.bf16 %v783_v4, %v780_v3  ;;  %v8649_v8 = vpop.f32.mrf.mxu0  ;;  %v8712_v11 = vadd.f32 %v8711_v6, %v8710_v2  ;;  %v12035_v2 = vld [vmem:[%s14054_s20 + $0xc8] sm:$0xff]  }
 0x185   :  { %v8713_v9 = vpop.f32.mrf.mxu1 }
 0x186   :  { %10054 = vmatmul.mubr.msk.bf16.vlgmr.msra.gmra.mxu1 %vm1240_vm1, %v835_v7  ;;  %v8650_v12 = vpop.f32.mrf.mxu0  ;;  %v788_v20 = vadd.f32 %v8712_v11, %v8648_v10 }
 0x187   :  { %v8651_v13 = vadd.f32 %v8650_v12, %v8649_v8  ;;  %v8714_v14 = vpop.f32.mrf.mxu1  ;;  %8957 = vmatpush3.bf16.msra.mxu1 %v11967_v15  ;;  %v12048_v12 = vld [vmem:[%s14054_s20 + $0xc0] sm:$0xff]  }
 0x188   :  { %v8715_v16 = vadd.f32 %v8714_v14, %v8713_v9  ;;  %v8652_v17 = vpop.f32.mrf.mxu0  ;;  %8958 = vmatprep.subr.bf16.mxu1 %v11973_v18  ;;  %v12042_v9 = vld [vmem:[%s14054_s20 + $0x88] sm:$0xff]  }
 0x189   :  { %v8716_v19 = vpop.f32.mrf.mxu1 }
 0x18a   :  { %v791_v21 = vadd.f32 %v8715_v16, %v8651_v13  ;;  %v8653_v22 = vpop.f32.mrf.mxu0 }
 0x18b   :  { %v8717_v23 = vpop.f32.mrf.mxu1  ;;  %8959 = vmatpush3.bf16.msra.mxu1 %v11979_v24  ;;  %v8654_v1 = vadd.f32 %v8653_v22, %v8652_v17 }
 0x18c   :  { %v836_v25 = vpack.c.bf16 %v791_v21, %v788_v20  ;;  %v8655_v26 = vpop.f32.mrf.mxu0  ;;  %8960 = vmatprep.subr.bf16.mxu1 %v11985_v27  ;;  %v8718_v29 = vadd.f32 %v8717_v23, %v8716_v19  ;;  %v12054_v20 = vld [vmem:[%s14054_s20 + $0x80] sm:$0xff]  }
 0x18d   :  { %v8719_v28 = vpop.f32.mrf.mxu1 }
 0x18e   :  { %10057 = vmatprep.mubr.msk.bf16.mxu1 %vm1240_vm1, %v836_v25  ;;  %v8656_v30 = vpop.f32.mrf.mxu0  ;;  %v796_v39 = vadd.f32 %v8718_v29, %v8654_v1 }
 0x18f   :  { %v8657_v31 = vadd.f32 %v8656_v30, %v8655_v26  ;;  %v8720_v32 = vpop.f32.mrf.mxu1  ;;  %8961 = vmatpush3.bf16.msra.mxu1 %v11992_v33 }
 0x190   :  { %v8721_v34 = vadd.f32 %v8720_v32, %v8719_v28  ;;  %v8658_v35 = vpop.f32.mrf.mxu0  ;;  %8962 = vmatprep.subr.bf16.mxu1 %v11998_v37 }
 0x191   :  { %v8722_v38 = vpop.f32.mrf.mxu1 }
 0x192   :  { %v799_v40 = vadd.f32 %v8721_v34, %v8657_v31  ;;  %v8659_v41 = vpop.f32.mrf.mxu0 }
 0x193   :  { %v8723_v42 = vpop.f32.mrf.mxu1  ;;  %8963 = vmatpush3.bf16.msra.mxu1 %v12004_v43  ;;  %v8660_v48 = vadd.f32 %v8659_v41, %v8658_v35 }
 0x194   :  { %v837_v44 = vpack.c.bf16 %v799_v40, %v796_v39  ;;  %v8661_v45 = vpop.f32.mrf.mxu0  ;;  %8964 = vmatprep.subr.bf16.mxu1 %v12010_v46  ;;  %v8724_v49 = vadd.f32 %v8723_v42, %v8722_v38 }
 0x195   :  { %v8725_v47 = vpop.f32.mrf.mxu1 }
 0x196   :  { %10058 = vmatmul.mubr.msk.bf16.gmra.mxu1 %vm1240_vm1, %v837_v44  ;;  %v8662_v50 = vpop.f32.mrf.mxu0  ;;  %v804_v58 = vadd.f32 %v8724_v49, %v8660_v48 }
 0x197   :  { %v8663_v51 = vadd.f32 %v8662_v50, %v8661_v45  ;;  %v8726_v52 = vpop.f32.mrf.mxu1  ;;  %8965 = vmatpush3.bf16.msra.mxu1 %v12017_v53 }
 0x198   :  { %v8727_v54 = vadd.f32 %v8726_v52, %v8725_v47  ;;  %v8664_v55 = vpop.f32.mrf.mxu0  ;;  %8966 = vmatprep.subr.bf16.mxu1 %v12023_v56 }
 0x199   :  { %v8728_v57 = vpop.f32.mrf.mxu1 }
 0x19a   :  { %v807_v59 = vadd.f32 %v8727_v54, %v8663_v51  ;;  %v8665_v60 = vpop.f32.mrf.mxu0 }
 0x19b   :  { %v8729_v61 = vpop.f32.mrf.mxu1  ;;  %8967 = vmatpush3.bf16.msra.mxu1 %v12029_v62  ;;  %v8666_v4 = vadd.f32 %v8665_v60, %v8664_v55 }
 0x19c   :  { %v838_v63 = vpack.c.bf16 %v807_v59, %v804_v58  ;;  %v8667_v0 = vpop.f32.mrf.mxu0  ;;  %8968 = vmatprep.subr.bf16.mxu1 %v12035_v2  ;;  %v8730_v5 = vadd.f32 %v8729_v61, %v8728_v57  ;;  %v10781_v58 = vld [vmem:[#allocation2 + $0x20c] ss:$16 sps:$4 sm:$0xff]  }
 0x19d   :  { %v8731_v3 = vpop.f32.mrf.mxu1 }
 0x19e   :  { %10061 = vmatprep.mubr.msk.bf16.mxu1 %vm1240_vm1, %v838_v63  ;;  %v8668_v6 = vpop.f32.mrf.mxu0  ;;  %v812_v14 = vadd.f32 %v8730_v5, %v8666_v4 }
 0x19f   :  { %v8669_v7 = vadd.f32 %v8668_v6, %v8667_v0  ;;  %v8732_v8 = vpop.f32.mrf.mxu1  ;;  %8969 = vmatpush3.bf16.msra.mxu1 %v12042_v9 }
 0x1a0   :  { %v8733_v10 = vadd.f32 %v8732_v8, %v8731_v3  ;;  %v8670_v11 = vpop.f32.mrf.mxu0  ;;  %8970 = vmatprep.subr.bf16.mxu1 %v12048_v12 }
 0x1a1   :  { %v8734_v13 = vpop.f32.mrf.mxu1 }
 0x1a2   :  { %v815_v16 = vadd.f32 %v8733_v10, %v8669_v7  ;;  %v8671_v17 = vpop.f32.mrf.mxu0 }
 0x1a3   :  { %v8735_v19 = vpop.f32.mrf.mxu1  ;;  %8971 = vmatpush3.bf16.msra.mxu1 %v12054_v20  ;;  %v8672_v25 = vadd.f32 %v8671_v17, %v8670_v11  ;;  %v10785_v17 = vld [vmem:[#allocation2 + $0x22c] ss:$16 sps:$4 sm:$0xff]  }
 0x1a4   :  { %v839_v21 = vpack.c.bf16 %v815_v16, %v812_v14  ;;  %v8673_v22 = vpop.f32.mrf.mxu0  ;;  %9029 = vmatprep.subr.bf16.mxu1 %v11959_v36  ;;  %v8736_v26 = vadd.f32 %v8735_v19, %v8734_v13  ;;  %v10779_v14 = vld [vmem:[#allocation2 + $0x208] ss:$16 sps:$4 sm:$0xff]  }
 0x1a5   :  { %v8737_v23 = vpop.f32.mrf.mxu1 }
 0x1a6   :  { %10062 = vmatmul.mubr.msk.bf16.gmra.mxu1 %vm1240_vm1, %v839_v21  ;;  %v8674_v28 = vpop.f32.mrf.mxu0  ;;  %v820_v34 = vadd.f32 %v8736_v26, %v8672_v25 }
 0x1a7   :  { %v8675_v1 = vadd.f32 %v8674_v28, %v8673_v22  ;;  %v8738_v29 = vpop.f32.mrf.mxu1 }
 0x1a8   :  { %v8739_v30 = vadd.f32 %v8738_v29, %v8737_v23  ;;  %v8676_v31 = vpop.f32.mrf.mxu0  ;;  %v12065_v29 = vld [vmem:[%s14054_s20 + $0x38] sm:$0xff]  }
 0x1a9   :  { %v8740_v32 = vpop.f32.mrf.mxu1 }
 0x1aa   :  { %v823_v35 = vadd.f32 %v8739_v30, %v8675_v1  ;;  %v8677_v38 = vpop.f32.mrf.mxu0 }
 0x1ab   :  { %v8741_v39 = vpop.f32.mrf.mxu1  ;;  %v8678_v44 = vadd.f32 %v8677_v38, %v8676_v31 }
 0x1ac   :  { %v840_v40 = vpack.c.bf16 %v823_v35, %v820_v34  ;;  %v8679_v41 = vpop.f32.mrf.mxu0  ;;  %v8742_v36 = vadd.f32 %v8741_v39, %v8740_v32  ;;  %v12071_v32 = vld [vmem:[%s14054_s20 + $0x70] sm:$0xff]  }
 0x1ad   :  { %v8743_v42 = vpop.f32.mrf.mxu1 }
 0x1ae   :  { %10065 = vmatprep.mubr.msk.bf16.mxu1 %vm1240_vm1, %v840_v40  ;;  %v8680_v45 = vpop.f32.mrf.mxu0  ;;  %v828_v52 = vadd.f32 %v8742_v36, %v8678_v44  ;;  %v10787_v40 = vld [vmem:[#allocation2 + $0x228] ss:$16 sps:$4 sm:$0xff]   ;;  %v12077_v44 = vld [vmem:[%s14054_s20 + $0x30] sm:$0xff]  }
 0x1af   :  { %v8681_v47 = vadd.f32 %v8680_v45, %v8679_v41  ;;  %v8744_v48 = vpop.f32.mrf.mxu1 }
 0x1b0   :  { %v8745_v49 = vadd.f32 %v8744_v48, %v8743_v42  ;;  %v8762_v50 = vpop.f32.mrf.mxu0  ;;  %v10791_v42 = vld [vmem:[#allocation2 + $0x24c] ss:$16 sps:$4 sm:$0xff]  }
 0x1b1   :  { %v8826_v51 = vpop.f32.mrf.mxu1 }
 0x1b2   :  { %v831_v54 = vadd.f32 %v8745_v49, %v8681_v47  ;;  %v8763_v55 = vpop.f32.mrf.mxu0  ;;  %v12083_v47 = vld [vmem:[%s14054_s20 + $0x68] sm:$0xff]  }
 0x1b3   :  { %v8827_v57 = vpop.f32.mrf.mxu1  ;;  %v8764_v63 = vadd.f32 %v8763_v55, %v8762_v50 }
 0x1b4   :  { %v841_v59 = vpack.c.bf16 %v831_v54, %v828_v52  ;;  %v8765_v60 = vpop.f32.mrf.mxu0  ;;  %v8828_v0 = vadd.f32 %v8827_v57, %v8826_v51 }
 0x1b5   :  { %v8829_v61 = vpop.f32.mrf.mxu1 }
 0x1b6   :  { %10066 = vmatmul.mubr.msk.bf16.gmra.mxu1 %vm1240_vm1, %v841_v59  ;;  %v8766_v3 = vpop.f32.mrf.mxu0  ;;  %v1168_v10 = vadd.f32 %v8828_v0, %v8764_v63 }
 0x1b7   :  { %v8767_v4 = vadd.f32 %v8766_v3, %v8765_v60  ;;  %v8830_v5 = vpop.f32.mrf.mxu1  ;;  %1812 = vmatprep.mubr.bf16.mxu1 %v10781_v58  ;;  %v12092_v58 = vld [vmem:[%s14054_s20 + $0x28] sm:$0xff]   ;;  %v12098_v60 = vld [vmem:[%s14054_s20 + $0x60] sm:$0xff]  }
 0x1b8   :  { %v8831_v6 = vadd.f32 %v8830_v5, %v8829_v61  ;;  %v8768_v7 = vpop.f32.mrf.mxu0  ;;  %v10793_v3 = vld [vmem:[#allocation2 + $0x248] ss:$16 sps:$4 sm:$0xff]   ;;  %v10797_v5 = vld [vmem:[#allocation2 + $0x26c] ss:$16 sps:$4 sm:$0xff]  }
 0x1b9   :  { %v8832_v8 = vpop.f32.mrf.mxu1 }
 0x1ba   :  { %v1171_v11 = vadd.f32 %v8831_v6, %v8767_v4  ;;  %v8769_v13 = vpop.f32.mrf.mxu0 }
 0x1bb   :  { %v8833_v16 = vpop.f32.mrf.mxu1  ;;  %v8770_v23 = vadd.f32 %v8769_v13, %v8768_v7 }
 0x1bc   :  { %v1230_v19 = vpack.c.bf16 %v1171_v11, %v1168_v10  ;;  %v8771_v21 = vpop.f32.mrf.mxu0  ;;  %v8834_v25 = vadd.f32 %v8833_v16, %v8832_v8  ;;  %v12106_v8 = vld [vmem:[%s14054_s20 + $0x20] sm:$0xff]   ;;  %v12112_v11 = vld [vmem:[%s14054_s20 + $0x58] sm:$0xff]  }
 0x1bd   :  { %v8835_v22 = vpop.f32.mrf.mxu1 }
 0x1be   :  { %10035 = vmatprep.mubr.msk.bf16.mxu0 %vm1240_vm1, %v1230_v19  ;;  %v8772_v26 = vpop.f32.mrf.mxu0  ;;  %1813 = vmatmul.mubr.bf16.vlgmr.msra.gmra.mxu1 %v10779_v14  ;;  %v1176_v35 = vadd.f32 %v8834_v25, %v8770_v23  ;;  %v12121_v23 = vld [vmem:[%s14054_s20 + $0x18] sm:$0xff]  }
 0x1bf   :  { %v8773_v28 = vadd.f32 %v8772_v26, %v8771_v21  ;;  %v8836_v1 = vpop.f32.mrf.mxu1  ;;  %1820 = vmatprep.mubr.bf16.mxu1 %v10785_v17  ;;  %9030 = vmatpush3.bf16.msra.mxu1 %v12065_v29  ;;  %v12127_v26 = vld [vmem:[%s14054_s20 + $0x50] sm:$0xff]  }
 0x1c0   :  { %v8837_v30 = vadd.f32 %v8836_v1, %v8835_v22  ;;  %v8774_v31 = vpop.f32.mrf.mxu0  ;;  %9031 = vmatprep.subr.bf16.mxu1 %v12071_v32 }
 0x1c1   :  { %v8838_v34 = vpop.f32.mrf.mxu1 }
 0x1c2   :  { %v1179_v38 = vadd.f32 %v8837_v30, %v8773_v28  ;;  %v8775_v39 = vpop.f32.mrf.mxu0 }
 0x1c3   :  { %v8839_v41 = vpop.f32.mrf.mxu1  ;;  %9032 = vmatpush3.bf16.msra.mxu1 %v12077_v44  ;;  %v8776_v49 = vadd.f32 %v8775_v39, %v8774_v31  ;;  %v10799_v31 = vld [vmem:[#allocation2 + $0x268] ss:$16 sps:$4 sm:$0xff]  }
 0x1c4   :  { %v1231_v36 = vpack.c.bf16 %v1179_v38, %v1176_v35  ;;  %v8777_v45 = vpop.f32.mrf.mxu0  ;;  %9033 = vmatprep.subr.bf16.mxu1 %v12083_v47  ;;  %v8840_v50 = vadd.f32 %v8839_v41, %v8838_v34  ;;  %v10803_v35 = vld [vmem:[#allocation2 + $0x28c] ss:$16 sps:$4 sm:$0xff]  }
 0x1c5   :  { %v8841_v48 = vpop.f32.mrf.mxu1 }
 0x1c6   :  { %10036 = vmatmul.mubr.msk.bf16.vlgmr.msra.gmra.mxu0 %vm1240_vm1, %v1231_v36  ;;  %v8778_v51 = vpop.f32.mrf.mxu0  ;;  %1821 = vmatmul.mubr.bf16.gmra.mxu1 %v10787_v40  ;;  %v1184_v61 = vadd.f32 %v8840_v50, %v8776_v49  ;;  %v12135_v40 = vld [vmem:[%s14054_s20 + $0x10] sm:$0xff]  }
 0x1c7   :  { %v8779_v52 = vadd.f32 %v8778_v51, %v8777_v45  ;;  %v8842_v54 = vpop.f32.mrf.mxu1  ;;  %8893 = vmatpush3.bf16.msra.mxu0 %v12065_v29  ;;  %1828 = vmatprep.mubr.bf16.mxu1 %v10791_v42  ;;  %v12141_v42 = vld [vmem:[%s14054_s20 + $0x48] sm:$0xff]  }
 0x1c8   :  { %v8843_v55 = vadd.f32 %v8842_v54, %v8841_v48  ;;  %v8780_v57 = vpop.f32.mrf.mxu0  ;;  %8894 = vmatprep.subr.bf16.mxu0 %v12071_v32  ;;  %9034 = vmatpush3.bf16.msra.mxu1 %v12092_v58  ;;  %v12150_v54 = vld [vmem:[%s14054_s20 + $0x8] sm:$0xff]  }
 0x1c9   :  { %v8844_v59 = vpop.f32.mrf.mxu1  ;;  %9035 = vmatprep.subr.bf16.mxu1 %v12098_v60 }
 0x1ca   :  { %v1187_v63 = vadd.f32 %v8843_v55, %v8779_v52  ;;  %v8781_v0 = vpop.f32.mrf.mxu0 }
 0x1cb   :  { %v8845_v4 = vpop.f32.mrf.mxu1  ;;  %8895 = vmatpush3.bf16.msra.mxu0 %v12077_v44  ;;  %v8782_v13 = vadd.f32 %v8781_v0, %v8780_v57  ;;  %v12156_v57 = vld [vmem:[%s14054_s20 + $0x40] sm:$0xff]   ;;  %v10805_v0 = vld [vmem:[#allocation2 + $0x288] ss:$16 sps:$4 sm:$0xff]  }
 0x1cc   :  { %v1232_v6 = vpack.c.bf16 %v1187_v63, %v1184_v61  ;;  %v8783_v7 = vpop.f32.mrf.mxu0  ;;  %8896 = vmatprep.subr.bf16.mxu0 %v12083_v47  ;;  %9036 = vmatpush3.bf16.msra.mxu1 %v12106_v8  ;;  %v8846_v14 = vadd.f32 %v8845_v4, %v8844_v59  ;;  %v10809_v4 = vld [vmem:[#allocation2 + $0x2ac] ss:$16 sps:$4 sm:$0xff]  }
 0x1cd   :  { %v8847_v10 = vpop.f32.mrf.mxu1  ;;  %9037 = vmatprep.subr.bf16.mxu1 %v12112_v11 }
 0x1ce   :  { %10039 = vmatprep.mubr.msk.bf16.mxu0 %vm1240_vm1, %v1232_v6  ;;  %v8784_v16 = vpop.f32.mrf.mxu0  ;;  %1829 = vmatmul.mubr.bf16.gmra.mxu1 %v10793_v3  ;;  %v1192_v28 = vadd.f32 %v8846_v14, %v8782_v13 }
 0x1cf   :  { %v8785_v17 = vadd.f32 %v8784_v16, %v8783_v7  ;;  %v8848_v19 = vpop.f32.mrf.mxu1  ;;  %8897 = vmatpush3.bf16.msra.mxu0 %v12092_v58  ;;  %1836 = vmatprep.mubr.bf16.mxu1 %v10797_v5  ;;  %v12164_v7 = vld [vmem:[%s14054_s20] sm:$0xff]  }
 0x1d0   :  { %v8849_v21 = vadd.f32 %v8848_v19, %v8847_v10  ;;  %v8786_v22 = vpop.f32.mrf.mxu0  ;;  %8898 = vmatprep.subr.bf16.mxu0 %v12098_v60  ;;  %9038 = vmatpush3.bf16.msra.mxu1 %v12121_v23  ;;  %14055 = vst [vmem:[#allocation32_spill] sm:$0xff] %v12164_v7 }
 0x1d1   :  { %v8850_v25 = vpop.f32.mrf.mxu1  ;;  %9039 = vmatprep.subr.bf16.mxu1 %v12127_v26 }
 0x1d2   :  { %v1195_v1 = vadd.f32 %v8849_v21, %v8785_v17  ;;  %v8787_v30 = vpop.f32.mrf.mxu0 }
 0x1d3   :  { %v8851_v34 = vpop.f32.mrf.mxu1  ;;  %8899 = vmatpush3.bf16.msra.mxu0 %v12106_v8  ;;  %v8788_v36 = vadd.f32 %v8787_v30, %v8786_v22 }
 0x1d4   :  { %v1233_v38 = vpack.c.bf16 %v1195_v1, %v1192_v28  ;;  %v8789_v39 = vpop.f32.mrf.mxu0  ;;  %8900 = vmatprep.subr.bf16.mxu0 %v12112_v11  ;;  %9040 = vmatpush3.bf16.msra.mxu1 %v12135_v40  ;;  %v8852_v45 = vadd.f32 %v8851_v34, %v8850_v25 }
 0x1d5   :  { %v8853_v41 = vpop.f32.mrf.mxu1  ;;  %9041 = vmatprep.subr.bf16.mxu1 %v12141_v42 }
 0x1d6   :  { %10040 = vmatmul.mubr.msk.bf16.gmra.mxu0 %vm1240_vm1, %v1233_v38  ;;  %v8790_v48 = vpop.f32.mrf.mxu0  ;;  %1837 = vmatmul.mubr.bf16.gmra.mxu1 %v10799_v31  ;;  %v1200_v59 = vadd.f32 %v8852_v45, %v8788_v36  ;;  %v10811_v31 = vld [vmem:[#allocation2 + $0x2a8] ss:$16 sps:$4 sm:$0xff]  }
 0x1d7   :  { %v8791_v49 = vadd.f32 %v8790_v48, %v8789_v39  ;;  %v8854_v50 = vpop.f32.mrf.mxu1  ;;  %8901 = vmatpush3.bf16.msra.mxu0 %v12121_v23  ;;  %1844 = vmatprep.mubr.bf16.mxu1 %v10803_v35  ;;  %v10815_v35 = vld [vmem:[#allocation2 + $0x2cc] ss:$16 sps:$4 sm:$0xff]  }
 0x1d8   :  { %v8855_v51 = vadd.f32 %v8854_v50, %v8853_v41  ;;  %v8792_v52 = vpop.f32.mrf.mxu0  ;;  %8902 = vmatprep.subr.bf16.mxu0 %v12127_v26  ;;  %9042 = vmatpush3.bf16.msra.mxu1 %v12150_v54 }
 0x1d9   :  { %v8856_v55 = vpop.f32.mrf.mxu1  ;;  %9043 = vmatprep.subr.bf16.mxu1 %v12156_v57 }
 0x1da   :  { %v1203_v61 = vadd.f32 %v8855_v51, %v8791_v49  ;;  %v8793_v63 = vpop.f32.mrf.mxu0 }
 0x1db   :  { %v8857_v3 = vpop.f32.mrf.mxu1  ;;  %8903 = vmatpush3.bf16.msra.mxu0 %v12135_v40  ;;  %v8794_v13 = vadd.f32 %v8793_v63, %v8792_v52 }
 0x1dc   :  { %v1234_v5 = vpack.c.bf16 %v1203_v61, %v1200_v59  ;;  %v8795_v6 = vpop.f32.mrf.mxu0  ;;  %8904 = vmatprep.subr.bf16.mxu0 %v12141_v42  ;;  %9044 = vmatpush3.bf16.msra.mxu1 %v12164_v7  ;;  %v8858_v14 = vadd.f32 %v8857_v3, %v8856_v55 }
 0x1dd   :  { %v8859_v10 = vpop.f32.mrf.mxu1 }
 0x1de   :  { %10043 = vmatprep.mubr.msk.bf16.mxu0 %vm1240_vm1, %v1234_v5  ;;  %v8796_v16 = vpop.f32.mrf.mxu0  ;;  %1845 = vmatmul.mubr.bf16.gmra.mxu1 %v10805_v0  ;;  %v1208_v28 = vadd.f32 %v8858_v14, %v8794_v13  ;;  %v10817_v0 = vld [vmem:[#allocation2 + $0x2c8] ss:$16 sps:$4 sm:$0xff]  }
 0x1df   :  { %v8797_v17 = vadd.f32 %v8796_v16, %v8795_v6  ;;  %v8860_v19 = vpop.f32.mrf.mxu1  ;;  %8905 = vmatpush3.bf16.msra.mxu0 %v12150_v54  ;;  %1852 = vmatprep.mubr.bf16.mxu1 %v10809_v4  ;;  %v10821_v4 = vld [vmem:[#allocation2 + $0x2ec] ss:$16 sps:$4 sm:$0xff]  }
 0x1e0   :  { %v8861_v21 = vadd.f32 %v8860_v19, %v8859_v10  ;;  %v8798_v22 = vpop.f32.mrf.mxu0  ;;  %8906 = vmatprep.subr.bf16.mxu0 %v12156_v57 }
 0x1e1   :  { %v8862_v25 = vpop.f32.mrf.mxu1 }
 0x1e2   :  { %v1211_v1 = vadd.f32 %v8861_v21, %v8797_v17  ;;  %v8799_v30 = vpop.f32.mrf.mxu0 }
 0x1e3   :  { %v8863_v34 = vpop.f32.mrf.mxu1  ;;  %8907 = vmatpush3.bf16.msra.mxu0 %v12164_v7  ;;  %v8800_v36 = vadd.f32 %v8799_v30, %v8798_v22 }
 0x1e4   :  { %v1235_v38 = vpack.c.bf16 %v1211_v1, %v1208_v28  ;;  %v8801_v39 = vpop.f32.mrf.mxu0  ;;  %v8864_v45 = vadd.f32 %v8863_v34, %v8862_v25  ;;  %v10823_v28 = vld [vmem:[#allocation2 + $0x2e8] ss:$16 sps:$4 sm:$0xff]   ;;  %v10784_v1 = vld [vmem:[#allocation2 + $0x204] ss:$16 sps:$4 sm:$0xff]  }
 0x1e5   :  { %v8865_v41 = vpop.f32.mrf.mxu1  ;;  %v10788_v34 = vld [vmem:[#allocation2 + $0x224] ss:$16 sps:$4 sm:$0xff]  }
 0x1e6   :  { %10044 = vmatmul.mubr.msk.bf16.gmra.mxu0 %vm1240_vm1, %v1235_v38  ;;  %v8802_v48 = vpop.f32.mrf.mxu0  ;;  %1853 = vmatmul.mubr.bf16.gmra.mxu1 %v10811_v31  ;;  %v1216_v59 = vadd.f32 %v8864_v45, %v8800_v36  ;;  %v10782_v31 = vld [vmem:[#allocation2 + $0x200] ss:$16 sps:$4 sm:$0xff]   ;;  %v10794_v38 = vld [vmem:[#allocation2 + $0x244] ss:$16 sps:$4 sm:$0xff]  }
 0x1e7   :  { %v8803_v49 = vadd.f32 %v8802_v48, %v8801_v39  ;;  %v8866_v50 = vpop.f32.mrf.mxu1  ;;  %1860 = vmatprep.mubr.bf16.mxu1 %v10815_v35  ;;  %v10790_v35 = vld [vmem:[#allocation2 + $0x220] ss:$16 sps:$4 sm:$0xff]   ;;  %v10806_v45 = vld [vmem:[#allocation2 + $0x284] ss:$16 sps:$4 sm:$0xff]  }
 0x1e8   :  { %v8867_v51 = vadd.f32 %v8866_v50, %v8865_v41  ;;  %v8804_v52 = vpop.f32.mrf.mxu0  ;;  %v10796_v39 = vld [vmem:[#allocation2 + $0x240] ss:$16 sps:$4 sm:$0xff]   ;;  %v10800_v41 = vld [vmem:[#allocation2 + $0x264] ss:$16 sps:$4 sm:$0xff]  }
 0x1e9   :  { %v8868_v55 = vpop.f32.mrf.mxu1  ;;  %v10802_v36 = vld [vmem:[#allocation2 + $0x260] ss:$16 sps:$4 sm:$0xff]  }
 0x1ea   :  { %v1219_v61 = vadd.f32 %v8867_v51, %v8803_v49  ;;  %v8805_v63 = vpop.f32.mrf.mxu0  ;;  %v10808_v48 = vld [vmem:[#allocation2 + $0x280] ss:$16 sps:$4 sm:$0xff]   ;;  %v10812_v49 = vld [vmem:[#allocation2 + $0x2a4] ss:$16 sps:$4 sm:$0xff]  }
 0x1eb   :  { %v8869_v3 = vpop.f32.mrf.mxu1  ;;  %v8806_v13 = vadd.f32 %v8805_v63, %v8804_v52  ;;  %v10814_v50 = vld [vmem:[#allocation2 + $0x2a0] ss:$16 sps:$4 sm:$0xff]   ;;  %v10818_v51 = vld [vmem:[#allocation2 + $0x2c4] ss:$16 sps:$4 sm:$0xff]  }
 0x1ec   :  { %v1236_v5 = vpack.c.bf16 %v1219_v61, %v1216_v59  ;;  %v8807_v6 = vpop.f32.mrf.mxu0  ;;  %v8870_v14 = vadd.f32 %v8869_v3, %v8868_v55  ;;  %v10820_v52 = vld [vmem:[#allocation2 + $0x2c0] ss:$16 sps:$4 sm:$0xff]   ;;  %v10824_v55 = vld [vmem:[#allocation2 + $0x2e4] ss:$16 sps:$4 sm:$0xff]  }
 0x1ed   :  { %v8871_v10 = vpop.f32.mrf.mxu1  ;;  %v10826_v59 = vld [vmem:[#allocation2 + $0x2e0] ss:$16 sps:$4 sm:$0xff]   ;;  %v8271_v61 = vld [vmem:[%s14030_s2 + $0x4] sm:$0x3] }
 0x1ee   :  { %10047 = vmatprep.mubr.msk.bf16.mxu0 %vm1240_vm1, %v1236_v5  ;;  %v8808_v16 = vpop.f32.mrf.mxu0  ;;  %1861 = vmatmul.mubr.bf16.gmra.mxu1 %v10817_v0  ;;  %v1224_v22 = vadd.f32 %v8870_v14, %v8806_v13  ;;  %v1912_v63 = vsel %vm1265_vm0, %v8271_v61, 0  ;;  %v12182_v0 = vld [vmem:[%s14054_s20 + $0xf8] sm:$0xff]  }
 0x1ef   :  { %v8809_v17 = vadd.f32 %v8808_v16, %v8807_v6  ;;  %v8872_v19 = vpop.f32.mrf.mxu1  ;;  %1868 = vmatprep.mubr.bf16.mxu1 %v10821_v4  ;;  %10613 = vmatprep.subr.msk.bf16.mxu0 %vm1265_vm0, %v8271_v61  ;;  %14056 = vst [vmem:[#allocation33_spill] sm:$0xff] %v12182_v0 }
 0x1f0   :  { %v8873_v21 = vadd.f32 %v8872_v19, %v8871_v10 }
 0x1f2   :  { %v1227_v25 = vadd.f32 %v8873_v21, %v8809_v17 }
 0x1f4   :  { %v1237_v30 = vpack.c.bf16 %v1227_v25, %v1224_v22 }
 0x1f6   :  { %10048 = vmatmul.mubr.msk.bf16.gmra.mxu0 %vm1240_vm1, %v1237_v30  ;;  %1869 = vmatmul.mubr.bf16.gmra.mxu1 %v10823_v28 }
 0x1f7   :  { %1715 = vmatprep.mubr.bf16.mxu0 %v10784_v1 }
 0x1fe   :  { %1716 = vmatmul.mubr.bf16.vlgmr.msra.gmra.mxu0 %v10782_v31 }
 0x1ff   :  { %1723 = vmatprep.mubr.bf16.mxu0 %v10788_v34  ;;  %10070 = vmatpush3.bf16.msra.mxu0 %v1912_v63  ;;  %v10841_v63 = vld [vmem:[#allocation2 + $0x344] ss:$16 sps:$4 sm:$0xff]  }
 0x200   :  { %9093 = vmatprep.subr.bf16.mxu0 %v12182_v0 }
 0x206   :  { %1724 = vmatmul.mubr.bf16.gmra.mxu0 %v10790_v35  ;;  %v10829_v35 = vld [vmem:[#allocation2 + $0x304] ss:$16 sps:$4 sm:$0xff]  }
 0x207   :  { %1731 = vmatprep.mubr.bf16.mxu0 %v10794_v38  ;;  %v10827_v38 = vld [vmem:[#allocation2 + $0x300] ss:$16 sps:$4 sm:$0xff]   ;;  %2252 = vmatprep.mubr.bf16.mxu1 %v10829_v35 }
 0x208   :  { %2253 = vmatmul.mubr.bf16.vlgmr.msra.gmra.mxu1 %v10827_v38  ;;  %v10839_v35 = vld [vmem:[#allocation2 + $0x340] ss:$16 sps:$4 sm:$0xff]  }
 0x20e   :  { %1732 = vmatmul.mubr.bf16.gmra.mxu0 %v10796_v39 }
 0x20f   :  { %1739 = vmatprep.mubr.bf16.mxu0 %v10800_v41 }
 0x216   :  { %1740 = vmatmul.mubr.bf16.gmra.mxu0 %v10802_v36 }
 0x217   :  { %1747 = vmatprep.mubr.bf16.mxu0 %v10806_v45 }
 0x21e   :  { %1748 = vmatmul.mubr.bf16.gmra.mxu0 %v10808_v48 }
 0x21f   :  { %1755 = vmatprep.mubr.bf16.mxu0 %v10812_v49 }
 0x226   :  { %1756 = vmatmul.mubr.bf16.gmra.mxu0 %v10814_v50 }
 0x227   :  { %1763 = vmatprep.mubr.bf16.mxu0 %v10818_v51  ;;  %v10835_v51 = vld [vmem:[#allocation2 + $0x324] ss:$16 sps:$4 sm:$0xff]  }
 0x228   :  { %2260 = vmatprep.mubr.bf16.mxu1 %v10835_v51 }
 0x22e   :  { %1764 = vmatmul.mubr.bf16.gmra.mxu0 %v10820_v52 }
 0x22f   :  { %1771 = vmatprep.mubr.bf16.mxu0 %v10824_v55  ;;  %v10833_v55 = vld [vmem:[#allocation2 + $0x320] ss:$16 sps:$4 sm:$0xff]  }
 0x230   :  { %2261 = vmatmul.mubr.bf16.gmra.mxu1 %v10833_v55  ;;  %v10847_v55 = vld [vmem:[#allocation2 + $0x364] ss:$16 sps:$4 sm:$0xff]  }
 0x231   :  { %2268 = vmatprep.mubr.bf16.mxu1 %v10841_v63 }
 0x236   :  { %1772 = vmatmul.mubr.bf16.gmra.mxu0 %v10826_v59 }
 0x238   :  { %2269 = vmatmul.mubr.bf16.gmra.mxu1 %v10839_v35  ;;  %v10853_v35 = vld [vmem:[#allocation2 + $0x384] ss:$16 sps:$4 sm:$0xff]  }
 0x239   :  { %2276 = vmatprep.mubr.bf16.mxu1 %v10847_v55 }
 0x246   :  { %v10055_v3 = vpop.f32.mrf.mxu1 }
 0x248   :  { %v1427_v4 = vpop.f32.mrf.mxu1 }
 0x24a   :  { %v10056_v5 = vpop.f32.mrf.mxu1 }
 0x24c   :  { %v12185_v6 = vpop.f32.mrf.mxu1 }
 0x24d   :  { %14057 = vst [vmem:[#allocation34_spill] sm:$0xff] %v12185_v6  ;;  %v10851_v6 = vld [vmem:[#allocation2 + $0x380] ss:$16 sps:$4 sm:$0xff]  }
 0x256   :  { %v10059_v10 = vpop.f32.mrf.mxu1 }
 0x258   :  { %v1443_v13 = vpop.f32.mrf.mxu1 }
 0x25a   :  { %v10060_v14 = vpop.f32.mrf.mxu1 }
 0x25c   :  { %v12187_v16 = vpop.f32.mrf.mxu1 }
 0x25d   :  { %14058 = vst [vmem:[#allocation35_spill] sm:$0xff] %v12187_v16 }
 0x266   :  { %v10063_v17 = vpop.f32.mrf.mxu1 }
 0x268   :  { %v1459_v19 = vpop.f32.mrf.mxu1 }
 0x26a   :  { %v10064_v21 = vpop.f32.mrf.mxu1 }
 0x26c   :  { %v12189_v22 = vpop.f32.mrf.mxu1 }
 0x26d   :  { %14059 = vst [vmem:[#allocation36_spill] sm:$0xff] %v12189_v22  ;;  %v10845_v22 = vld [vmem:[#allocation2 + $0x360] ss:$16 sps:$4 sm:$0xff]  }
 0x26e   :  { %2277 = vmatmul.mubr.bf16.gmra.mxu1 %v10845_v22 }
 0x26f   :  { %2284 = vmatprep.mubr.bf16.mxu1 %v10853_v35  ;;  %v10865_v35 = vld [vmem:[#allocation2 + $0x3c4] ss:$16 sps:$4 sm:$0xff]  }
 0x276   :  { %v12191_v25 = vpop.f32.mrf.mxu1  ;;  %2285 = vmatmul.mubr.bf16.gmra.mxu1 %v10851_v6 }
 0x278   :  { %v12193_v28 = vpop.f32.mrf.mxu1 }
 0x27a   :  { %v12195_v1 = vpop.f32.mrf.mxu1 }
 0x27c   :  { %v12197_v30 = vpop.f32.mrf.mxu1 }
 0x27d   :  { %14060 = vst [vmem:[#allocation37_spill] sm:$0xff] %v12197_v30 }
 0x27e   :  { %v12199_v31 = vpop.f32.mrf.mxu1 }
 0x280   :  { %v12201_v34 = vpop.f32.mrf.mxu1 }
 0x282   :  { %v12203_v41 = vpop.f32.mrf.mxu1 }
 0x284   :  { %v12209_v50 = vpop.f32.mrf.mxu1 }
 0x286   :  { %v10037_v39 = vpop.f32.mrf.mxu0  ;;  %v12213_v59 = vpop.f32.mrf.mxu1 }
 0x287   :  { %v12205_v36 = vadd.f32 %v10055_v3, %v10037_v39 }
 0x288   :  { %v1303_v45 = vpop.f32.mrf.mxu0  ;;  %v12215_v61 = vpop.f32.mrf.mxu1 }
 0x289   :  { %14061 = vst [vmem:[#allocation38_spill] sm:$0xff] %v12205_v36  ;;  %v12207_v48 = vadd.f32 %v1427_v4, %v1303_v45 }
 0x28a   :  { %v10038_v49 = vpop.f32.mrf.mxu0  ;;  %v12219_v38 = vpop.f32.mrf.mxu1 }
 0x28b   :  { %14062 = vst [vmem:[#allocation39_spill] sm:$0xff] %v12207_v48  ;;  %v12211_v52 = vadd.f32 %v10056_v5, %v10038_v49 }
 0x28c   :  { %v12217_v3 = vpop.f32.mrf.mxu0  ;;  %v12225_v51 = vpop.f32.mrf.mxu1 }
 0x28d   :  { %14063 = vst [vmem:[#allocation40_spill] sm:$0xff] %v12211_v52  ;;  %14064 = vst [vmem:[#allocation41_spill] sm:$0xff] %v12217_v3  ;;  %v10859_v3 = vld [vmem:[#allocation2 + $0x3a4] ss:$16 sps:$4 sm:$0xff]  }
 0x28e   :  { %v12229_v16 = vpop.f32.mrf.mxu1  ;;  %2292 = vmatprep.mubr.bf16.mxu1 %v10859_v3 }
 0x290   :  { %v12231_v63 = vpop.f32.mrf.mxu1 }
 0x296   :  { %v10041_v4 = vpop.f32.mrf.mxu0 }
 0x297   :  { %v12221_v39 = vadd.f32 %v10059_v10, %v10041_v4  ;;  %v12235_v4 = vpop.f32.mrf.mxu1 }
 0x298   :  { %v1319_v5 = vpop.f32.mrf.mxu0 }
 0x299   :  { %14065 = vst [vmem:[#allocation42_spill] sm:$0xff] %v12221_v39  ;;  %v12223_v45 = vadd.f32 %v1443_v13, %v1319_v5  ;;  %v12241_v22 = vpop.f32.mrf.mxu1  ;;  %v10863_v39 = vld [vmem:[#allocation2 + $0x3c0] ss:$16 sps:$4 sm:$0xff]  }
 0x29a   :  { %v10042_v49 = vpop.f32.mrf.mxu0 }
 0x29b   :  { %14066 = vst [vmem:[#allocation43_spill] sm:$0xff] %v12223_v45  ;;  %v12227_v30 = vadd.f32 %v10060_v14, %v10042_v49  ;;  %v10857_v45 = vld [vmem:[#allocation2 + $0x3a0] ss:$16 sps:$4 sm:$0xff]  }
 0x29c   :  { %v12233_v10 = vpop.f32.mrf.mxu0  ;;  %2293 = vmatmul.mubr.bf16.gmra.mxu1 %v10857_v45 }
 0x29d   :  { %14067 = vst [vmem:[#allocation44_spill] sm:$0xff] %v12227_v30  ;;  %14068 = vst [vmem:[#allocation45_spill] sm:$0xff] %v12233_v10  ;;  %v12245_v10 = vpop.f32.mrf.mxu1  ;;  %2300 = vmatprep.mubr.bf16.mxu1 %v10865_v35 }
 0x29f   :  { %v12247_v6 = vpop.f32.mrf.mxu1 }
 0x2a4   :  { %2301 = vmatmul.mubr.bf16.gmra.mxu1 %v10863_v39 }
 0x2a6   :  { %v10045_v13 = vpop.f32.mrf.mxu0 }
 0x2a7   :  { %v12237_v5 = vadd.f32 %v10063_v17, %v10045_v13  ;;  %v12251_v13 = vpop.f32.mrf.mxu1 }
 0x2a8   :  { %v1335_v14 = vpop.f32.mrf.mxu0 }
 0x2a9   :  { %14069 = vst [vmem:[#allocation46_spill] sm:$0xff] %v12237_v5  ;;  %v12239_v49 = vadd.f32 %v1459_v19, %v1335_v14  ;;  %v10869_v5 = vld [vmem:[#allocation2 + $0x3e0] ss:$16 sps:$4 sm:$0xff]  }
 0x2aa   :  { %v10046_v55 = vpop.f32.mrf.mxu0 }
 0x2ab   :  { %14070 = vst [vmem:[#allocation47_spill] sm:$0xff] %v12239_v49  ;;  %v12243_v30 = vadd.f32 %v10064_v21, %v10046_v55  ;;  %v8994_v55 = vpop.f32.mrf.mxu1 }
 0x2ac   :  { %v12249_v17 = vpop.f32.mrf.mxu0 }
 0x2ad   :  { %14071 = vst [vmem:[#allocation48_spill] sm:$0xff] %v12243_v30  ;;  %14072 = vst [vmem:[#allocation49_spill] sm:$0xff] %v12249_v17  ;;  %v10871_v30 = vld [vmem:[#allocation2 + $0x3e4] ss:$16 sps:$4 sm:$0xff]   ;;  %v12264_v35 = vpop.f32.mrf.mxu1 }
 0x2ae   :  { %2308 = vmatprep.mubr.bf16.mxu1 %v10871_v30 }
 0x2af   :  { %2309 = vmatmul.mubr.bf16.gmra.mxu1 %v10869_v5 }
 0x2b6   :  { %v10049_v19 = vpop.f32.mrf.mxu0 }
 0x2b7   :  { %v12254_v14 = vadd.f32 %v12191_v25, %v10049_v19 }
 0x2b8   :  { %v1351_v21 = vpop.f32.mrf.mxu0 }
 0x2b9   :  { %14073 = vst [vmem:[#allocation50_spill] sm:$0xff] %v12254_v14  ;;  %v12257_v3 = vadd.f32 %v12193_v28, %v1351_v21  ;;  %v12266_v14 = vpop.f32.mrf.mxu1 }
 0x2ba   :  { %v10050_v45 = vpop.f32.mrf.mxu0 }
 0x2bb   :  { %14074 = vst [vmem:[#allocation51_spill] sm:$0xff] %v12257_v3  ;;  %v12260_v49 = vadd.f32 %v12195_v1, %v10050_v45  ;;  %v8974_v3 = vadd.f32 %v12201_v34, %v12199_v31  ;;  %v8977_v1 = vadd.f32 %v12209_v50, %v12203_v41  ;;  %v8983_v31 = vadd.f32 %v12225_v51, %v12219_v38 }
 0x2bc   :  { %v12262_v17 = vpop.f32.mrf.mxu0 }
 0x2bd   :  { %14075 = vst [vmem:[#allocation52_spill] sm:$0xff] %v12260_v49  ;;  %14076 = vst [vmem:[#allocation53_spill] sm:$0xff] %v12262_v17  ;;  %v8999_v17 = vpop.f32.mrf.mxu1 }
 0x2be   :  { %v8908_v39 = vpop.f32.mrf.mxu0 }
 0x2bf   :  { %v9000_v0 = vpop.f32.mrf.mxu1 }
 0x2c0   :  { %v8909_v25 = vpop.f32.mrf.mxu0 }
 0x2c1   :  { %v8910_v28 = vadd.f32 %v8909_v25, %v8908_v39  ;;  %v8980_v25 = vadd.f32 %v12215_v61, %v12213_v59  ;;  %v12277_v50 = vpop.f32.mrf.mxu1  ;;  %v8986_v59 = vadd.f32 %v12231_v63, %v12229_v16  ;;  %v8995_v63 = vadd.f32 %v8994_v55, %v12251_v13 }
 0x2c2   :  { %v8911_v19 = vpop.f32.mrf.mxu0 }
 0x2c3   :  { %v1815_v30 = vadd.f32 %v8974_v3, %v8910_v28 }
 0x2c4   :  { %v8912_v21 = vpop.f32.mrf.mxu0 }
 0x2c5   :  { %v8913_v45 = vadd.f32 %v8912_v21, %v8911_v19 }
 0x2c6   :  { %v8914_v49 = vpop.f32.mrf.mxu0 }
 0x2c7   :  { %v1818_v5 = vadd.f32 %v8977_v1, %v8913_v45  ;;  %v9003_v45 = vpop.f32.mrf.mxu1 }
 0x2c8   :  { %v8915_v52 = vpop.f32.mrf.mxu0 }
 0x2c9   :  { %v1877_v48 = vpack.c.bf16 %v1818_v5, %v1815_v30  ;;  %v8916_v7 = vadd.f32 %v8915_v52, %v8914_v49  ;;  %v9005_v38 = vpop.f32.mrf.mxu1 }
 0x2ca   :  { %v8917_v36 = vpop.f32.mrf.mxu0 }
 0x2cb   :  { %10071 = vmatprep.mubr.msk.bf16.mxu0 %vm1240_vm1, %v1877_v48  ;;  %v1823_v3 = vadd.f32 %v8980_v25, %v8916_v7 }
 0x2cc   :  { %v8918_v39 = vpop.f32.mrf.mxu0 }
 0x2cd   :  { %v8919_v34 = vadd.f32 %v8918_v39, %v8917_v36  ;;  %v8989_v36 = vadd.f32 %v12241_v22, %v12235_v4  ;;  %v9006_v39 = vpop.f32.mrf.mxu1 }
 0x2ce   :  { %v8920_v41 = vpop.f32.mrf.mxu0 }
 0x2cf   :  { %v1826_v19 = vadd.f32 %v8983_v31, %v8919_v34  ;;  %v9008_v22 = vpop.f32.mrf.mxu1 }
 0x2d0   :  { %v8921_v28 = vpop.f32.mrf.mxu0 }
 0x2d1   :  { %v1878_v21 = vpack.c.bf16 %v1826_v19, %v1823_v3  ;;  %v8922_v52 = vadd.f32 %v8921_v28, %v8920_v41 }
 0x2d2   :  { %v8923_v1 = vpop.f32.mrf.mxu0 }
 0x2d3   :  { %10072 = vmatmul.mubr.msk.bf16.vlgmr.msra.gmra.mxu0 %vm1240_vm1, %v1878_v21  ;;  %v1831_v51 = vadd.f32 %v8986_v59, %v8922_v52 }
 0x2d4   :  { %v8924_v48 = vpop.f32.mrf.mxu0  ;;  %9094 = vmatpush3.bf16.msra.mxu0 %v11967_v15 }
 0x2d5   :  { %v8925_v61 = vadd.f32 %v8924_v48, %v8923_v1  ;;  %9095 = vmatprep.subr.bf16.mxu0 %v11973_v18  ;;  %v8992_v18 = vadd.f32 %v12247_v6, %v12245_v10  ;;  %v9001_v6 = vadd.f32 %v9000_v0, %v8999_v17  ;;  %v9007_v0 = vadd.f32 %v9006_v39, %v9005_v38 }
 0x2d6   :  { %v8926_v7 = vpop.f32.mrf.mxu0 }
 0x2d7   :  { %v1834_v49 = vadd.f32 %v8989_v36, %v8925_v61 }
 0x2d8   :  { %v8927_v30 = vpop.f32.mrf.mxu0  ;;  %9096 = vmatpush3.bf16.msra.mxu0 %v11979_v24 }
 0x2d9   :  { %v1879_v5 = vpack.c.bf16 %v1834_v49, %v1831_v51  ;;  %9097 = vmatprep.subr.bf16.mxu0 %v11985_v27  ;;  %v8928_v25 = vadd.f32 %v8927_v30, %v8926_v7  ;;  %v12311_v7 = vld [vmem:[%s14054_s20 + $0x78] sm:$0xff]  }
 0x2da   :  { %v8929_v15 = vpop.f32.mrf.mxu0 }
 0x2db   :  { %10075 = vmatprep.mubr.msk.bf16.mxu0 %vm1240_vm1, %v1879_v5  ;;  %v1839_v31 = vadd.f32 %v8992_v18, %v8928_v25 }
 0x2dc   :  { %v8930_v16 = vpop.f32.mrf.mxu0  ;;  %9098 = vmatpush3.bf16.msra.mxu0 %v11992_v33  ;;  %v9009_v33 = vpop.f32.mrf.mxu1 }
 0x2dd   :  { %v8931_v4 = vadd.f32 %v8930_v16, %v8929_v15  ;;  %9099 = vmatprep.subr.bf16.mxu0 %v11998_v37  ;;  %v8998_v37 = vadd.f32 %v12266_v14, %v12264_v35  ;;  %v9010_v38 = vadd.f32 %v9009_v33, %v9008_v22  ;;  %v10832_v22 = vld [vmem:[#allocation2 + $0x30c] ss:$16 sps:$4 sm:$0xff]   ;;  %v10830_v33 = vld [vmem:[#allocation2 + $0x308] ss:$16 sps:$4 sm:$0xff]  }
 0x2de   :  { %v8932_v24 = vpop.f32.mrf.mxu0 }
 0x2df   :  { %v1842_v27 = vadd.f32 %v8995_v63, %v8931_v4 }
 0x2e0   :  { %v8933_v34 = vpop.f32.mrf.mxu0  ;;  %9100 = vmatpush3.bf16.msra.mxu0 %v12004_v43  ;;  %v9011_v43 = vpop.f32.mrf.mxu1 }
 0x2e1   :  { %v1880_v41 = vpack.c.bf16 %v1842_v27, %v1839_v31  ;;  %9101 = vmatprep.subr.bf16.mxu0 %v12010_v46  ;;  %v8934_v19 = vadd.f32 %v8933_v34, %v8932_v24 }
 0x2e2   :  { %v8935_v3 = vpop.f32.mrf.mxu0  ;;  %v9012_v48 = vpop.f32.mrf.mxu1 }
 0x2e3   :  { %10076 = vmatmul.mubr.msk.bf16.gmra.mxu0 %vm1240_vm1, %v1880_v41  ;;  %v1847_v28 = vadd.f32 %v8998_v37, %v8934_v19  ;;  %v9013_v51 = vadd.f32 %v9012_v48, %v9011_v43  ;;  %v10838_v19 = vld [vmem:[#allocation2 + $0x32c] ss:$16 sps:$4 sm:$0xff]   ;;  %v10877_v43 = vld [vmem:[#allocation2 + $0x404] ss:$16 sps:$4 sm:$0xff]  }
 0x2e4   :  { %v8936_v10 = vpop.f32.mrf.mxu0  ;;  %9102 = vmatpush3.bf16.msra.mxu0 %v12017_v53  ;;  %v9014_v59 = vpop.f32.mrf.mxu1  ;;  %v10844_v37 = vld [vmem:[#allocation2 + $0x34c] ss:$16 sps:$4 sm:$0xff]  }
 0x2e5   :  { %v8937_v13 = vadd.f32 %v8936_v10, %v8935_v3  ;;  %9103 = vmatprep.subr.bf16.mxu0 %v12023_v56  ;;  %v9004_v56 = vadd.f32 %v9003_v45, %v12277_v50  ;;  %v10836_v10 = vld [vmem:[#allocation2 + $0x328] ss:$16 sps:$4 sm:$0xff]  }
 0x2e6   :  { %v8938_v55 = vpop.f32.mrf.mxu0  ;;  %v9015_v50 = vpop.f32.mrf.mxu1 }
 0x2e7   :  { %v1850_v21 = vadd.f32 %v9001_v6, %v8937_v13  ;;  %v9016_v24 = vadd.f32 %v9015_v50, %v9014_v59  ;;  %v10842_v6 = vld [vmem:[#allocation2 + $0x348] ss:$16 sps:$4 sm:$0xff]   ;;  %v10850_v13 = vld [vmem:[#allocation2 + $0x36c] ss:$16 sps:$4 sm:$0xff]  }
 0x2e8   :  { %v8939_v46 = vpop.f32.mrf.mxu0  ;;  %9104 = vmatpush3.bf16.msra.mxu0 %v12029_v62  ;;  %v9017_v30 = vpop.f32.mrf.mxu1 }
 0x2e9   :  { %v1881_v1 = vpack.c.bf16 %v1850_v21, %v1847_v28  ;;  %9105 = vmatprep.subr.bf16.mxu0 %v12035_v2  ;;  %v8940_v53 = vadd.f32 %v8939_v46, %v8938_v55  ;;  %v10875_v28 = vld [vmem:[#allocation2 + $0x400] ss:$16 sps:$4 sm:$0xff]  }
 0x2ea   :  { %v8941_v52 = vpop.f32.mrf.mxu0  ;;  %v9018_v16 = vpop.f32.mrf.mxu1 }
 0x2eb   :  { %10079 = vmatprep.mubr.msk.bf16.mxu0 %vm1240_vm1, %v1881_v1  ;;  %v1855_v62 = vadd.f32 %v9004_v56, %v8940_v53  ;;  %v9019_v31 = vadd.f32 %v9018_v16, %v9017_v30  ;;  %v14079_v1 = vld [vmem:[#allocation38_spill] sm:$0xff]  ;;  %v14080_v53 = vld [vmem:[#allocation39_spill] sm:$0xff] }
 0x2ec   :  { %v8942_v14 = vpop.f32.mrf.mxu0  ;;  %9106 = vmatpush3.bf16.msra.mxu0 %v12042_v9  ;;  %v14084_v30 = vld [vmem:[#allocation43_spill] sm:$0xff] }
 0x2ed   :  { %v8943_v17 = vadd.f32 %v8942_v14, %v8941_v52  ;;  %9107 = vmatprep.subr.bf16.mxu0 %v12048_v12 }
 0x2ee   :  { %v8944_v35 = vpop.f32.mrf.mxu0 }
 0x2ef   :  { %v1858_v36 = vadd.f32 %v9007_v0, %v8943_v17  ;;  %v10883_v17 = vld [vmem:[#allocation2 + $0x424] ss:$16 sps:$4 sm:$0xff]  }
 0x2f0   :  { %v8945_v61 = vpop.f32.mrf.mxu0  ;;  %9108 = vmatpush3.bf16.msra.mxu0 %v12054_v20 }
 0x2f1   :  { %v1882_v2 = vpack.c.bf16 %v1858_v36, %v1855_v62  ;;  %9166 = vmatprep.subr.bf16.mxu0 %v12311_v7  ;;  %v8946_v45 = vadd.f32 %v8945_v61, %v8944_v35  ;;  %v14081_v35 = vld [vmem:[#allocation40_spill] sm:$0xff]  ;;  %v10881_v62 = vld [vmem:[#allocation2 + $0x420] ss:$16 sps:$4 sm:$0xff]  }
 0x2f2   :  { %v8947_v9 = vpop.f32.mrf.mxu0 }
 0x2f3   :  { %10080 = vmatmul.mubr.msk.bf16.gmra.mxu0 %vm1240_vm1, %v1882_v2  ;;  %v1863_v20 = vadd.f32 %v9010_v38, %v8946_v45  ;;  %v10889_v2 = vld [vmem:[#allocation2 + $0x444] ss:$16 sps:$4 sm:$0xff]  }
 0x2f4   :  { %v8948_v12 = vpop.f32.mrf.mxu0  ;;  %v14083_v38 = vld [vmem:[#allocation42_spill] sm:$0xff] }
 0x2f5   :  { %v8949_v49 = vadd.f32 %v8948_v12, %v8947_v9  ;;  %v10887_v9 = vld [vmem:[#allocation2 + $0x440] ss:$16 sps:$4 sm:$0xff]  }
 0x2f6   :  { %v8950_v5 = vpop.f32.mrf.mxu0 }
 0x2f7   :  { %v1866_v15 = vadd.f32 %v9013_v51, %v8949_v49 }
 0x2f8   :  { %v8951_v39 = vpop.f32.mrf.mxu0 }
 0x2f9   :  { %v1883_v25 = vpack.c.bf16 %v1866_v15, %v1863_v20  ;;  %v8952_v63 = vadd.f32 %v8951_v39, %v8950_v5  ;;  %v10895_v39 = vld [vmem:[#allocation2 + $0x464] ss:$16 sps:$4 sm:$0xff]  }
 0x2fa   :  { %v8953_v18 = vpop.f32.mrf.mxu0 }
 0x2fb   :  { %10083 = vmatprep.mubr.msk.bf16.mxu0 %vm1240_vm1, %v1883_v25  ;;  %v1871_v34 = vadd.f32 %v9016_v24, %v8952_v63  ;;  %v14085_v25 = vld [vmem:[#allocation44_spill] sm:$0xff] }
 0x2fc   :  { %v8954_v4 = vpop.f32.mrf.mxu0  ;;  %v10901_v24 = vld [vmem:[#allocation2 + $0x484] ss:$16 sps:$4 sm:$0xff]  }
 0x2fd   :  { %v8955_v27 = vadd.f32 %v8954_v4, %v8953_v18  ;;  %v10893_v18 = vld [vmem:[#allocation2 + $0x460] ss:$16 sps:$4 sm:$0xff]  }
 0x2ff   :  { %v1874_v41 = vadd.f32 %v9019_v31, %v8955_v27  ;;  %v10899_v31 = vld [vmem:[#allocation2 + $0x480] ss:$16 sps:$4 sm:$0xff]  }
 0x301   :  { %v1884_v3 = vpack.c.bf16 %v1874_v41, %v1871_v34 }
 0x303   :  { %10084 = vmatmul.mubr.msk.bf16.gmra.mxu0 %vm1240_vm1, %v1884_v3 }
 0x304   :  { %2349 = vmatprep.mubr.bf16.mxu0 %v10832_v22  ;;  %v14087_v22 = vld [vmem:[#allocation46_spill] sm:$0xff] }
 0x30b   :  { %2350 = vmatmul.mubr.bf16.vlgmr.msra.gmra.mxu0 %v10830_v33 }
 0x30c   :  { %2357 = vmatprep.mubr.bf16.mxu0 %v10838_v19  ;;  %9167 = vmatpush3.bf16.msra.mxu0 %v12065_v29  ;;  %v10848_v29 = vld [vmem:[#allocation2 + $0x368] ss:$16 sps:$4 sm:$0xff]   ;;  %v14088_v19 = vld [vmem:[#allocation47_spill] sm:$0xff] }
 0x30d   :  { %9168 = vmatprep.subr.bf16.mxu0 %v12071_v32  ;;  %v10856_v32 = vld [vmem:[#allocation2 + $0x38c] ss:$16 sps:$4 sm:$0xff]  }
 0x310   :  { %9169 = vmatpush3.bf16.msra.mxu0 %v12077_v44  ;;  %v10854_v44 = vld [vmem:[#allocation2 + $0x388] ss:$16 sps:$4 sm:$0xff]  }
 0x311   :  { %9170 = vmatprep.subr.bf16.mxu0 %v12083_v47  ;;  %v10862_v47 = vld [vmem:[#allocation2 + $0x3ac] ss:$16 sps:$4 sm:$0xff]  }
 0x313   :  { %2358 = vmatmul.mubr.bf16.gmra.mxu0 %v10836_v10 }
 0x314   :  { %2365 = vmatprep.mubr.bf16.mxu0 %v10844_v37  ;;  %9171 = vmatpush3.bf16.msra.mxu0 %v12092_v58  ;;  %v14077_v58 = vld [vmem:[#allocation32_spill] sm:$0xff] }
 0x315   :  { %9172 = vmatprep.subr.bf16.mxu0 %v12098_v60  ;;  %v10860_v60 = vld [vmem:[#allocation2 + $0x3a8] ss:$16 sps:$4 sm:$0xff]  }
 0x318   :  { %9173 = vmatpush3.bf16.msra.mxu0 %v12106_v8  ;;  %v10868_v8 = vld [vmem:[#allocation2 + $0x3cc] ss:$16 sps:$4 sm:$0xff]  }
 0x319   :  { %9174 = vmatprep.subr.bf16.mxu0 %v12112_v11  ;;  %v10866_v11 = vld [vmem:[#allocation2 + $0x3c8] ss:$16 sps:$4 sm:$0xff]  }
 0x31b   :  { %2366 = vmatmul.mubr.bf16.gmra.mxu0 %v10842_v6 }
 0x31c   :  { %2373 = vmatprep.mubr.bf16.mxu0 %v10850_v13  ;;  %9175 = vmatpush3.bf16.msra.mxu0 %v12121_v23  ;;  %v10874_v23 = vld [vmem:[#allocation2 + $0x3ec] ss:$16 sps:$4 sm:$0xff]   ;;  %v10907_v13 = vld [vmem:[#allocation2 + $0x4a4] ss:$16 sps:$4 sm:$0xff]  }
 0x31d   :  { %9176 = vmatprep.subr.bf16.mxu0 %v12127_v26  ;;  %v10872_v26 = vld [vmem:[#allocation2 + $0x3e8] ss:$16 sps:$4 sm:$0xff]  }
 0x320   :  { %9177 = vmatpush3.bf16.msra.mxu0 %v12135_v40  ;;  %v8312_v40 = vld [vmem:[%s14030_s2 + $0x6] sm:$0x3] }
 0x321   :  { %9178 = vmatprep.subr.bf16.mxu0 %v12141_v42  ;;  %10614 = vmatprep.subr.msk.bf16.mxu1 %vm1265_vm0, %v8312_v40  ;;  %v2449_v42 = vsel %vm1265_vm0, %v8312_v40, 0  ;;  %v14091_v40 = vld [vmem:[#allocation50_spill] sm:$0xff] }
 0x322   :  { %10088 = vmatpush3.bf16.msra.mxu1 %v2449_v42 }
 0x323   :  { %2374 = vmatmul.mubr.bf16.gmra.mxu0 %v10848_v29  ;;  %v14089_v29 = vld [vmem:[#allocation48_spill] sm:$0xff] }
 0x324   :  { %2381 = vmatprep.mubr.bf16.mxu0 %v10856_v32  ;;  %9179 = vmatpush3.bf16.msra.mxu0 %v12150_v54  ;;  %v14078_v54 = vld [vmem:[#allocation33_spill] sm:$0xff] }
 0x325   :  { %9180 = vmatprep.subr.bf16.mxu0 %v12156_v57  ;;  %9230 = vmatprep.subr.bf16.mxu1 %v14078_v54  ;;  %v12338_v57 = vpop.f32.mrf.mxu1 }
 0x327   :  { %v12340_v55 = vpop.f32.mrf.mxu1 }
 0x328   :  { %9181 = vmatpush3.bf16.msra.mxu0 %v14077_v58 }
 0x329   :  { %v12342_v46 = vpop.f32.mrf.mxu1 }
 0x32b   :  { %2382 = vmatmul.mubr.bf16.gmra.mxu0 %v10854_v44  ;;  %v12350_v0 = vpop.f32.mrf.mxu1  ;;  %v10905_v44 = vld [vmem:[#allocation2 + $0x4a0] ss:$16 sps:$4 sm:$0xff]  }
 0x32c   :  { %2389 = vmatprep.mubr.bf16.mxu0 %v10862_v47 }
 0x32d   :  { %v12355_v36 = vpop.f32.mrf.mxu1 }
 0x32f   :  { %v12357_v61 = vpop.f32.mrf.mxu1 }
 0x331   :  { %v12361_v12 = vpop.f32.mrf.mxu1 }
 0x333   :  { %2390 = vmatmul.mubr.bf16.gmra.mxu0 %v10860_v60  ;;  %v12369_v15 = vpop.f32.mrf.mxu1  ;;  %v10913_v60 = vld [vmem:[#allocation2 + $0x4c4] ss:$16 sps:$4 sm:$0xff]  }
 0x334   :  { %2397 = vmatprep.mubr.bf16.mxu0 %v10868_v8  ;;  %v10911_v8 = vld [vmem:[#allocation2 + $0x4c0] ss:$16 sps:$4 sm:$0xff]  }
 0x335   :  { %v12374_v63 = vpop.f32.mrf.mxu1 }
 0x337   :  { %v12376_v4 = vpop.f32.mrf.mxu1 }
 0x339   :  { %v12380_v41 = vpop.f32.mrf.mxu1 }
 0x33b   :  { %2398 = vmatmul.mubr.bf16.gmra.mxu0 %v10866_v11  ;;  %v12388_v6 = vpop.f32.mrf.mxu1 }
 0x33c   :  { %2405 = vmatprep.mubr.bf16.mxu0 %v10874_v23 }
 0x33d   :  { %v12393_v47 = vpop.f32.mrf.mxu1 }
 0x33f   :  { %v12395_v58 = vpop.f32.mrf.mxu1 }
 0x343   :  { %2406 = vmatmul.mubr.bf16.gmra.mxu0 %v10872_v26  ;;  %v12399_v26 = vpop.f32.mrf.mxu1 }
 0x344   :  { %2789 = vmatprep.mubr.bf16.mxu0 %v10877_v43  ;;  %v14092_v43 = vld [vmem:[#allocation51_spill] sm:$0xff] }
 0x34b   :  { %2790 = vmatmul.mubr.bf16.vlgmr.msra.gmra.mxu0 %v10875_v28 }
 0x34c   :  { %2797 = vmatprep.mubr.bf16.mxu0 %v10883_v17  ;;  %v10917_v17 = vld [vmem:[#allocation2 + $0x4e0] ss:$16 sps:$4 sm:$0xff]  }
 0x353   :  { %2798 = vmatmul.mubr.bf16.gmra.mxu0 %v10881_v62 }
 0x354   :  { %2805 = vmatprep.mubr.bf16.mxu0 %v10889_v2 }
 0x35b   :  { %2806 = vmatmul.mubr.bf16.gmra.mxu0 %v10887_v9 }
 0x35c   :  { %2813 = vmatprep.mubr.bf16.mxu0 %v10895_v39  ;;  %v9050_v39 = vadd.f32 %v12350_v0, %v12342_v46 }
 0x363   :  { %2814 = vmatmul.mubr.bf16.gmra.mxu0 %v10893_v18 }
 0x364   :  { %2821 = vmatprep.mubr.bf16.mxu0 %v10901_v24 }
 0x36b   :  { %2822 = vmatmul.mubr.bf16.gmra.mxu0 %v10899_v31 }
 0x36c   :  { %2829 = vmatprep.mubr.bf16.mxu0 %v10907_v13 }
 0x373   :  { %2830 = vmatmul.mubr.bf16.gmra.mxu0 %v10905_v44 }
 0x374   :  { %2837 = vmatprep.mubr.bf16.mxu0 %v10913_v60 }
 0x37b   :  { %2838 = vmatmul.mubr.bf16.gmra.mxu0 %v10911_v8 }
 0x393   :  { %v10073_v21 = vpop.f32.mrf.mxu0 }
 0x394   :  { %v12345_v52 = vadd.f32 %v10073_v21, %v14079_v1  ;;  %v12407_v1 = vpop.f32.mrf.mxu1 }
 0x395   :  { %v1948_v48 = vpop.f32.mrf.mxu0 }
 0x396   :  { %v12348_v14 = vadd.f32 %v1948_v48, %v14080_v53  ;;  %v10919_v48 = vld [vmem:[#allocation2 + $0x4e4] ss:$16 sps:$4 sm:$0xff]   ;;  %v12414_v2 = vpop.f32.mrf.mxu1 }
 0x397   :  { %v10074_v56 = vpop.f32.mrf.mxu0  ;;  %v14093_v53 = vld [vmem:[#allocation52_spill] sm:$0xff]  ;;  %2845 = vmatprep.mubr.bf16.mxu0 %v10919_v48 }
 0x398   :  { %v12353_v59 = vadd.f32 %v10074_v56, %v14081_v35  ;;  %2846 = vmatmul.mubr.bf16.gmra.mxu0 %v10917_v17 }
 0x399   :  { %v12359_v50 = vpop.f32.mrf.mxu0 }
 0x39a   :  { %14082 = vst [vmem:[#allocation32_spill] sm:$0xff] %v12359_v50  ;;  %v10955_v50 = vld [vmem:[#allocation2 + $0x5a4] ss:$16 sps:$4 sm:$0xff]  }
 0x3a3   :  { %v10077_v45 = vpop.f32.mrf.mxu0 }
 0x3a4   :  { %v12364_v51 = vadd.f32 %v10077_v45, %v14083_v38  ;;  %v12416_v38 = vpop.f32.mrf.mxu1 }
 0x3a5   :  { %v1964_v49 = vpop.f32.mrf.mxu0 }
 0x3a6   :  { %v12367_v5 = vadd.f32 %v1964_v49, %v14084_v30  ;;  %v12422_v24 = vpop.f32.mrf.mxu1 }
 0x3a7   :  { %v10078_v20 = vpop.f32.mrf.mxu0 }
 0x3a8   :  { %v12372_v16 = vadd.f32 %v10078_v20, %v14085_v25  ;;  %v9047_v20 = vadd.f32 %v12340_v55, %v12338_v57  ;;  %v9053_v57 = vadd.f32 %v12357_v61, %v12355_v36  ;;  %v9056_v55 = vadd.f32 %v12369_v15, %v12361_v12  ;;  %v12439_v36 = vld [vmem:[%s14054_s20 + $0xb8] sm:$0xff]  }
 0x3a9   :  { %v12378_v27 = vpop.f32.mrf.mxu0  ;;  %v9059_v61 = vadd.f32 %v12376_v4, %v12374_v63  ;;  %v9062_v12 = vadd.f32 %v12388_v6, %v12380_v41  ;;  %v12455_v63 = vld [vmem:[%s14054_s20 + $0xb0] sm:$0xff]   ;;  %v12461_v41 = vld [vmem:[%s14054_s20 + $0xe8] sm:$0xff]  }
 0x3aa   :  { %14086 = vst [vmem:[#allocation33_spill] sm:$0xff] %v12378_v27 }
 0x3b3   :  { %v10081_v34 = vpop.f32.mrf.mxu0 }
 0x3b4   :  { %v12383_v3 = vadd.f32 %v10081_v34, %v14087_v22 }
 0x3b5   :  { %v1980_v33 = vpop.f32.mrf.mxu0 }
 0x3b6   :  { %v12386_v10 = vadd.f32 %v1980_v33, %v14088_v19 }
 0x3b7   :  { %v10082_v37 = vpop.f32.mrf.mxu0 }
 0x3b8   :  { %v12391_v32 = vadd.f32 %v10082_v37, %v14089_v29  ;;  %v12424_v37 = vpop.f32.mrf.mxu1 }
 0x3b9   :  { %v12397_v11 = vpop.f32.mrf.mxu0 }
 0x3ba   :  { %14090 = vst [vmem:[#allocation38_spill] sm:$0xff] %v12397_v11  ;;  %v12431_v44 = vpop.f32.mrf.mxu1  ;;  %v10941_v11 = vld [vmem:[#allocation2 + $0x560] ss:$16 sps:$4 sm:$0xff]  }
 0x3c3   :  { %v10085_v23 = vpop.f32.mrf.mxu0 }
 0x3c4   :  { %v12402_v42 = vadd.f32 %v10085_v23, %v14091_v40 }
 0x3c5   :  { %v1996_v54 = vpop.f32.mrf.mxu0 }
 0x3c6   :  { %v12405_v28 = vadd.f32 %v1996_v54, %v14092_v43  ;;  %v12433_v43 = vpop.f32.mrf.mxu1 }
 0x3c7   :  { %v10086_v21 = vpop.f32.mrf.mxu0 }
 0x3c8   :  { %v12410_v56 = vadd.f32 %v10086_v21, %v14093_v53  ;;  %v12449_v53 = vld [vmem:[%s14054_s20 + $0xf0] sm:$0xff]  }
 0x3c9   :  { %v12412_v35 = vpop.f32.mrf.mxu0 }
 0x3ca   :  { %14094 = vst [vmem:[#allocation39_spill] sm:$0xff] %v12412_v35 }
 0x3cb   :  { %v9109_v62 = vpop.f32.mrf.mxu0 }
 0x3cd   :  { %v9110_v9 = vpop.f32.mrf.mxu0 }
 0x3ce   :  { %v9111_v49 = vadd.f32 %v9110_v9, %v9109_v62  ;;  %v9078_v62 = vpop.f32.mrf.mxu1 }
 0x3cf   :  { %v9112_v45 = vpop.f32.mrf.mxu0 }
 0x3d0   :  { %v2352_v31 = vadd.f32 %v9111_v49, %v9047_v20 }
 0x3d1   :  { %v9113_v30 = vpop.f32.mrf.mxu0 }
 0x3d2   :  { %v9114_v25 = vadd.f32 %v9113_v30, %v9112_v45  ;;  %v9079_v30 = vpop.f32.mrf.mxu1 }
 0x3d3   :  { %v9115_v18 = vpop.f32.mrf.mxu0 }
 0x3d4   :  { %v2355_v34 = vadd.f32 %v9114_v25, %v9050_v39  ;;  %v12468_v25 = vld [vmem:[%s14054_s20 + $0xa8] sm:$0xff]  }
 0x3d5   :  { %v9116_v22 = vpop.f32.mrf.mxu0 }
 0x3d6   :  { %v2414_v33 = vpack.c.bf16 %v2355_v34, %v2352_v31  ;;  %v9117_v13 = vadd.f32 %v9116_v22, %v9115_v18  ;;  %v9065_v18 = vadd.f32 %v12395_v58, %v12393_v47  ;;  %v9068_v31 = vadd.f32 %v12407_v1, %v12399_v26  ;;  %v12478_v22 = vld [vmem:[%s14054_s20 + $0xe0] sm:$0xff]   ;;  %v12490_v26 = vld [vmem:[%s14054_s20 + $0xd8] sm:$0xff]  }
 0x3d7   :  { %v9118_v19 = vpop.f32.mrf.mxu0  ;;  %v12484_v47 = vld [vmem:[%s14054_s20 + $0xa0] sm:$0xff]  }
 0x3d8   :  { %10089 = vmatprep.mubr.msk.bf16.mxu1 %vm1240_vm1, %v2414_v33  ;;  %v2360_v60 = vadd.f32 %v9117_v13, %v9053_v57 }
 0x3d9   :  { %v9119_v29 = vpop.f32.mrf.mxu0 }
 0x3da   :  { %v9120_v46 = vadd.f32 %v9119_v29, %v9118_v19  ;;  %v9081_v19 = vpop.f32.mrf.mxu1 }
 0x3db   :  { %v9121_v0 = vpop.f32.mrf.mxu0 }
 0x3dc   :  { %v2363_v8 = vadd.f32 %v9120_v46, %v9056_v55  ;;  %v9082_v55 = vpop.f32.mrf.mxu1 }
 0x3dd   :  { %v9122_v23 = vpop.f32.mrf.mxu0 }
 0x3de   :  { %v2415_v40 = vpack.c.bf16 %v2363_v8, %v2360_v60  ;;  %v9123_v21 = vadd.f32 %v9122_v23, %v9121_v0  ;;  %v12497_v60 = vld [vmem:[%s14054_s20 + $0x98] sm:$0xff]   ;;  %v9071_v8 = vadd.f32 %v12416_v38, %v12414_v2  ;;  %v9074_v23 = vadd.f32 %v12424_v37, %v12422_v24  ;;  %v12513_v2 = vld [vmem:[%s14054_s20 + $0x90] sm:$0xff]   ;;  %v12519_v24 = vld [vmem:[%s14054_s20 + $0xc8] sm:$0xff]  }
 0x3df   :  { %v9124_v54 = vpop.f32.mrf.mxu0 }
 0x3e0   :  { %10090 = vmatmul.mubr.msk.bf16.vlgmr.msra.gmra.mxu1 %vm1240_vm1, %v2415_v40  ;;  %v2368_v9 = vadd.f32 %v9123_v21, %v9059_v61 }
 0x3e1   :  { %v9125_v48 = vpop.f32.mrf.mxu0  ;;  %9231 = vmatpush3.bf16.msra.mxu1 %v12439_v36 }
 0x3e2   :  { %v9126_v15 = vadd.f32 %v9125_v48, %v9124_v54  ;;  %9232 = vmatprep.subr.bf16.mxu1 %v12449_v53  ;;  %v12507_v54 = vld [vmem:[%s14054_s20 + $0xd0] sm:$0xff]   ;;  %v9084_v48 = vpop.f32.mrf.mxu1 }
 0x3e3   :  { %v9127_v17 = vpop.f32.mrf.mxu0 }
 0x3e4   :  { %v2371_v45 = vadd.f32 %v9126_v15, %v9062_v12 }
 0x3e5   :  { %v9128_v49 = vpop.f32.mrf.mxu0  ;;  %9233 = vmatpush3.bf16.msra.mxu1 %v12455_v63 }
 0x3e6   :  { %v2416_v4 = vpack.c.bf16 %v2371_v45, %v2368_v9  ;;  %9234 = vmatprep.subr.bf16.mxu1 %v12461_v41  ;;  %v9129_v20 = vadd.f32 %v9128_v49, %v9127_v17  ;;  %v9085_v17 = vpop.f32.mrf.mxu1  ;;  %v12526_v49 = vld [vmem:[%s14054_s20 + $0x88] sm:$0xff]  }
 0x3e7   :  { %v9130_v6 = vpop.f32.mrf.mxu0 }
 0x3e8   :  { %10093 = vmatprep.mubr.msk.bf16.mxu1 %vm1240_vm1, %v2416_v4  ;;  %v2376_v13 = vadd.f32 %v9129_v20, %v9065_v18  ;;  %v9077_v4 = vadd.f32 %v12433_v43, %v12431_v44 }
 0x3e9   :  { %v9131_v39 = vpop.f32.mrf.mxu0  ;;  %9235 = vmatpush3.bf16.msra.mxu1 %v12468_v25 }
 0x3ea   :  { %v9132_v34 = vadd.f32 %v9131_v39, %v9130_v6  ;;  %9236 = vmatprep.subr.bf16.mxu1 %v12478_v22  ;;  %v9080_v6 = vadd.f32 %v9079_v30, %v9078_v62  ;;  %v12534_v39 = vld [vmem:[%s14054_s20 + $0xc0] sm:$0xff]  }
 0x3eb   :  { %v9133_v33 = vpop.f32.mrf.mxu0 }
 0x3ec   :  { %v2379_v29 = vadd.f32 %v9132_v34, %v9068_v31  ;;  %v9087_v31 = vpop.f32.mrf.mxu1 }
 0x3ed   :  { %v9134_v57 = vpop.f32.mrf.mxu0  ;;  %9237 = vmatpush3.bf16.msra.mxu1 %v12484_v47 }
 0x3ee   :  { %v2417_v58 = vpack.c.bf16 %v2379_v29, %v2376_v13  ;;  %9238 = vmatprep.subr.bf16.mxu1 %v12490_v26  ;;  %v9135_v46 = vadd.f32 %v9134_v57, %v9133_v33  ;;  %v12540_v29 = vld [vmem:[%s14054_s20 + $0x80] sm:$0xff]   ;;  %v9088_v43 = vpop.f32.mrf.mxu1 }
 0x3ef   :  { %v9136_v1 = vpop.f32.mrf.mxu0 }
 0x3f0   :  { %10094 = vmatmul.mubr.msk.bf16.gmra.mxu1 %vm1240_vm1, %v2417_v58  ;;  %v2384_v61 = vadd.f32 %v9135_v46, %v9071_v8  ;;  %v9083_v58 = vadd.f32 %v9082_v55, %v9081_v19  ;;  %v10880_v19 = vld [vmem:[#allocation2 + $0x40c] ss:$16 sps:$4 sm:$0xff]  }
 0x3f1   :  { %v9137_v0 = vpop.f32.mrf.mxu0  ;;  %9239 = vmatpush3.bf16.msra.mxu1 %v12497_v60 }
 0x3f2   :  { %v9138_v40 = vadd.f32 %v9137_v0, %v9136_v1  ;;  %9240 = vmatprep.subr.bf16.mxu1 %v12507_v54  ;;  %v9086_v1 = vadd.f32 %v9085_v17, %v9084_v48  ;;  %v9090_v0 = vpop.f32.mrf.mxu1  ;;  %v10878_v48 = vld [vmem:[#allocation2 + $0x408] ss:$16 sps:$4 sm:$0xff]   ;;  %v10886_v17 = vld [vmem:[#allocation2 + $0x42c] ss:$16 sps:$4 sm:$0xff]  }
 0x3f3   :  { %v9139_v21 = vpop.f32.mrf.mxu0 }
 0x3f4   :  { %v2387_v12 = vadd.f32 %v9138_v40, %v9074_v23 }
 0x3f5   :  { %v9140_v15 = vpop.f32.mrf.mxu0  ;;  %9241 = vmatpush3.bf16.msra.mxu1 %v12513_v2 }
 0x3f6   :  { %v2418_v38 = vpack.c.bf16 %v2387_v12, %v2384_v61  ;;  %9242 = vmatprep.subr.bf16.mxu1 %v12519_v24  ;;  %v9141_v9 = vadd.f32 %v9140_v15, %v9139_v21  ;;  %v9091_v12 = vpop.f32.mrf.mxu1 }
 0x3f7   :  { %v9142_v37 = vpop.f32.mrf.mxu0 }
 0x3f8   :  { %10097 = vmatprep.mubr.msk.bf16.mxu1 %vm1240_vm1, %v2418_v38  ;;  %v2392_v34 = vadd.f32 %v9141_v9, %v9077_v4  ;;  %v9092_v9 = vadd.f32 %v9091_v12, %v9090_v0  ;;  %v10896_v0 = vld [vmem:[#allocation2 + $0x468] ss:$16 sps:$4 sm:$0xff]  }
 0x3f9   :  { %v9143_v45 = vpop.f32.mrf.mxu0  ;;  %9243 = vmatpush3.bf16.msra.mxu1 %v12526_v49  ;;  %v10902_v12 = vld [vmem:[#allocation2 + $0x488] ss:$16 sps:$4 sm:$0xff]  }
 0x3fa   :  { %v9144_v20 = vadd.f32 %v9143_v45, %v9142_v37  ;;  %9244 = vmatprep.subr.bf16.mxu1 %v12534_v39  ;;  %v9089_v37 = vadd.f32 %v9088_v43, %v9087_v31  ;;  %v10884_v31 = vld [vmem:[#allocation2 + $0x428] ss:$16 sps:$4 sm:$0xff]   ;;  %v12580_v43 = vld [vmem:[%s14054_s20 + $0x60] sm:$0xff]  }
 0x3fb   :  { %v9145_v18 = vpop.f32.mrf.mxu0 }
 0x3fc   :  { %v2395_v33 = vadd.f32 %v9144_v20, %v9080_v6  ;;  %v12550_v20 = vld [vmem:[%s14054_s20 + $0x38] sm:$0xff]  }
 0x3fd   :  { %v9146_v13 = vpop.f32.mrf.mxu0  ;;  %9245 = vmatpush3.bf16.msra.mxu1 %v12540_v29 }
 0x3fe   :  { %v2419_v44 = vpack.c.bf16 %v2395_v33, %v2392_v34  ;;  %9303 = vmatprep.subr.bf16.mxu1 %v12311_v7  ;;  %v9147_v30 = vadd.f32 %v9146_v13, %v9145_v18  ;;  %v12556_v18 = vld [vmem:[%s14054_s20 + $0x70] sm:$0xff]   ;;  %v10892_v34 = vld [vmem:[#allocation2 + $0x44c] ss:$16 sps:$4 sm:$0xff]  }
 0x3ff   :  { %v9148_v62 = vpop.f32.mrf.mxu0  ;;  %v12562_v33 = vld [vmem:[%s14054_s20 + $0x30] sm:$0xff]   ;;  %v12568_v13 = vld [vmem:[%s14054_s20 + $0x68] sm:$0xff]  }
 0x400   :  { %10098 = vmatmul.mubr.msk.bf16.gmra.mxu1 %vm1240_vm1, %v2419_v44  ;;  %v2400_v23 = vadd.f32 %v9147_v30, %v9083_v58  ;;  %v12574_v44 = vld [vmem:[%s14054_s20 + $0x28] sm:$0xff]   ;;  %v12592_v58 = vld [vmem:[%s14054_s20 + $0x58] sm:$0xff]  }
 0x401   :  { %v9149_v57 = vpop.f32.mrf.mxu0  ;;  %v10898_v30 = vld [vmem:[#allocation2 + $0x46c] ss:$16 sps:$4 sm:$0xff]  }
 0x402   :  { %v9150_v46 = vadd.f32 %v9149_v57, %v9148_v62  ;;  %v10890_v62 = vld [vmem:[#allocation2 + $0x448] ss:$16 sps:$4 sm:$0xff]   ;;  %v12586_v57 = vld [vmem:[%s14054_s20 + $0x20] sm:$0xff]  }
 0x403   :  { %v9151_v8 = vpop.f32.mrf.mxu0 }
 0x404   :  { %v2403_v40 = vadd.f32 %v9150_v46, %v9086_v1  ;;  %v12598_v1 = vld [vmem:[%s14054_s20 + $0x18] sm:$0xff]   ;;  %v12604_v46 = vld [vmem:[%s14054_s20 + $0x50] sm:$0xff]  }
 0x405   :  { %v9152_v21 = vpop.f32.mrf.mxu0 }
 0x406   :  { %v2420_v61 = vpack.c.bf16 %v2403_v40, %v2400_v23  ;;  %v9153_v38 = vadd.f32 %v9152_v21, %v9151_v8  ;;  %v10904_v8 = vld [vmem:[#allocation2 + $0x48c] ss:$16 sps:$4 sm:$0xff]   ;;  %v12610_v23 = vld [vmem:[%s14054_s20 + $0x10] sm:$0xff]  }
 0x407   :  { %v9154_v15 = vpop.f32.mrf.mxu0  ;;  %v12616_v40 = vld [vmem:[%s14054_s20 + $0x48] sm:$0xff]  }
 0x408   :  { %10101 = vmatprep.mubr.msk.bf16.mxu1 %vm1240_vm1, %v2420_v61  ;;  %v2408_v4 = vadd.f32 %v9153_v38, %v9089_v37  ;;  %v12622_v21 = vld [vmem:[%s14054_s20 + $0x8] sm:$0xff]   ;;  %v12628_v61 = vld [vmem:[%s14054_s20 + $0x40] sm:$0xff]  }
 0x409   :  { %v9155_v7 = vpop.f32.mrf.mxu0  ;;  %v12634_v38 = vld [vmem:[%s14054_s20] sm:$0xff]   ;;  %v10916_v37 = vld [vmem:[#allocation2 + $0x4cc] ss:$16 sps:$4 sm:$0xff]  }
 0x40a   :  { %v9156_v45 = vadd.f32 %v9155_v7, %v9154_v15  ;;  %v10910_v15 = vld [vmem:[#allocation2 + $0x4ac] ss:$16 sps:$4 sm:$0xff]   ;;  %14095 = vst [vmem:[#allocation40_spill] sm:$0xff] %v12634_v38  ;;  %v10908_v7 = vld [vmem:[#allocation2 + $0x4a8] ss:$16 sps:$4 sm:$0xff]  }
 0x40c   :  { %v2411_v6 = vadd.f32 %v9156_v45, %v9092_v9  ;;  %v10914_v9 = vld [vmem:[#allocation2 + $0x4c8] ss:$16 sps:$4 sm:$0xff]   ;;  %v10922_v45 = vld [vmem:[#allocation2 + $0x4ec] ss:$16 sps:$4 sm:$0xff]  }
 0x40e   :  { %v2421_v55 = vpack.c.bf16 %v2411_v6, %v2408_v4  ;;  %v10920_v4 = vld [vmem:[#allocation2 + $0x4e8] ss:$16 sps:$4 sm:$0xff]  }
 0x40f   :  { %v8353_v6 = vld [vmem:[%s14030_s2 + $0x8] sm:$0x3] }
 0x410   :  { %10102 = vmatmul.mubr.msk.bf16.gmra.mxu1 %vm1240_vm1, %v2421_v55  ;;  %10615 = vmatprep.subr.msk.bf16.mxu0 %vm1265_vm0, %v8353_v6  ;;  %v12645_v55 = vld [vmem:[%s14054_s20 + $0xf8] sm:$0xff]  }
 0x411   :  { %2886 = vmatprep.mubr.bf16.mxu1 %v10880_v19  ;;  %v2986_v19 = vsel %vm1265_vm0, %v8353_v6, 0  ;;  %14096 = vst [vmem:[#allocation42_spill] sm:$0xff] %v12645_v55 }
 0x412   :  { %10106 = vmatpush3.bf16.msra.mxu0 %v2986_v19  ;;  %v10935_v19 = vld [vmem:[#allocation2 + $0x540] ss:$16 sps:$4 sm:$0xff]  }
 0x413   :  { %9367 = vmatprep.subr.bf16.mxu0 %v12645_v55 }
 0x418   :  { %2887 = vmatmul.mubr.bf16.vlgmr.msra.gmra.mxu1 %v10878_v48  ;;  %v12648_v48 = vpop.f32.mrf.mxu0 }
 0x419   :  { %2894 = vmatprep.mubr.bf16.mxu1 %v10886_v17  ;;  %9304 = vmatpush3.bf16.msra.mxu1 %v12550_v20 }
 0x41a   :  { %9305 = vmatprep.subr.bf16.mxu1 %v12556_v18  ;;  %v12650_v17 = vpop.f32.mrf.mxu0 }
 0x41d   :  { %9306 = vmatpush3.bf16.msra.mxu1 %v12562_v33 }
 0x41e   :  { %9307 = vmatprep.subr.bf16.mxu1 %v12568_v13 }
 0x420   :  { %2895 = vmatmul.mubr.bf16.gmra.mxu1 %v10884_v31  ;;  %v10925_v31 = vld [vmem:[#allocation2 + $0x504] ss:$16 sps:$4 sm:$0xff]  }
 0x421   :  { %2902 = vmatprep.mubr.bf16.mxu1 %v10892_v34  ;;  %9308 = vmatpush3.bf16.msra.mxu1 %v12574_v44  ;;  %v10923_v34 = vld [vmem:[#allocation2 + $0x500] ss:$16 sps:$4 sm:$0xff]  }
 0x422   :  { %9309 = vmatprep.subr.bf16.mxu1 %v12580_v43 }
 0x425   :  { %9310 = vmatpush3.bf16.msra.mxu1 %v12586_v57 }
 0x426   :  { %9311 = vmatprep.subr.bf16.mxu1 %v12592_v58 }
 0x428   :  { %2903 = vmatmul.mubr.bf16.gmra.mxu1 %v10890_v62 }
 0x429   :  { %2910 = vmatprep.mubr.bf16.mxu1 %v10898_v30  ;;  %9312 = vmatpush3.bf16.msra.mxu1 %v12598_v1  ;;  %v12652_v30 = vpop.f32.mrf.mxu0 }
 0x42a   :  { %9313 = vmatprep.subr.bf16.mxu1 %v12604_v46 }
 0x42d   :  { %9314 = vmatpush3.bf16.msra.mxu1 %v12610_v23 }
 0x42e   :  { %9315 = vmatprep.subr.bf16.mxu1 %v12616_v40 }
 0x430   :  { %2911 = vmatmul.mubr.bf16.gmra.mxu1 %v10896_v0 }
 0x431   :  { %2918 = vmatprep.mubr.bf16.mxu1 %v10904_v8  ;;  %9316 = vmatpush3.bf16.msra.mxu1 %v12622_v21 }
 0x432   :  { %9317 = vmatprep.subr.bf16.mxu1 %v12628_v61 }
 0x435   :  { %9318 = vmatpush3.bf16.msra.mxu1 %v12634_v38 }
 0x438   :  { %2919 = vmatmul.mubr.bf16.gmra.mxu1 %v10902_v12 }
 0x439   :  { %2926 = vmatprep.mubr.bf16.mxu1 %v10910_v15 }
 0x440   :  { %2927 = vmatmul.mubr.bf16.gmra.mxu1 %v10908_v7  ;;  %v12660_v7 = vpop.f32.mrf.mxu0 }
 0x441   :  { %2934 = vmatprep.mubr.bf16.mxu1 %v10916_v37  ;;  %v10931_v37 = vld [vmem:[#allocation2 + $0x524] ss:$16 sps:$4 sm:$0xff]  }
 0x448   :  { %2935 = vmatmul.mubr.bf16.gmra.mxu1 %v10914_v9 }
 0x449   :  { %2942 = vmatprep.mubr.bf16.mxu1 %v10922_v45  ;;  %v10929_v45 = vld [vmem:[#allocation2 + $0x520] ss:$16 sps:$4 sm:$0xff]  }
 0x450   :  { %2943 = vmatmul.mubr.bf16.gmra.mxu1 %v10920_v4  ;;  %v12665_v4 = vpop.f32.mrf.mxu0 }
 0x451   :  { %3326 = vmatprep.mubr.bf16.mxu1 %v10925_v31 }
 0x452   :  { %v12667_v6 = vpop.f32.mrf.mxu0 }
 0x458   :  { %3327 = vmatmul.mubr.bf16.vlgmr.msra.gmra.mxu1 %v10923_v34  ;;  %v12671_v34 = vpop.f32.mrf.mxu0 }
 0x459   :  { %3334 = vmatprep.mubr.bf16.mxu1 %v10931_v37 }
 0x45a   :  { %v12679_v37 = vpop.f32.mrf.mxu0 }
 0x460   :  { %3335 = vmatmul.mubr.bf16.gmra.mxu1 %v10929_v45  ;;  %v10943_v45 = vld [vmem:[#allocation2 + $0x564] ss:$16 sps:$4 sm:$0xff]  }
 0x4a0   :  { %v10091_v62 = vpop.f32.mrf.mxu1 }
 0x4a1   :  { %v12655_v0 = vadd.f32 %v10091_v62, %v12345_v52  ;;  %v10937_v52 = vld [vmem:[#allocation2 + $0x544] ss:$16 sps:$4 sm:$0xff]  }
 0x4a2   :  { %v2485_v8 = vpop.f32.mrf.mxu1  ;;  %3342 = vmatprep.mubr.bf16.mxu1 %v10937_v52  ;;  %v12684_v52 = vpop.f32.mrf.mxu0 }
 0x4a3   :  { %14097 = vst [vmem:[#allocation43_spill] sm:$0xff] %v12655_v0  ;;  %v12658_v12 = vadd.f32 %v2485_v8, %v12348_v14  ;;  %3343 = vmatmul.mubr.bf16.gmra.mxu1 %v10935_v19 }
 0x4a4   :  { %v10092_v15 = vpop.f32.mrf.mxu1  ;;  %3350 = vmatprep.mubr.bf16.mxu1 %v10943_v45  ;;  %v12686_v19 = vpop.f32.mrf.mxu0 }
 0x4a5   :  { %14098 = vst [vmem:[#allocation44_spill] sm:$0xff] %v12658_v12  ;;  %v12663_v9 = vadd.f32 %v10092_v15, %v12353_v59 }
 0x4a6   :  { %v12669_v31 = vpop.f32.mrf.mxu1 }
 0x4a7   :  { %14099 = vst [vmem:[#allocation46_spill] sm:$0xff] %v12663_v9  ;;  %14100 = vst [vmem:[#allocation47_spill] sm:$0xff] %v12669_v31 }
 0x4ab   :  { %3351 = vmatmul.mubr.bf16.gmra.mxu1 %v10941_v11 }
 0x4b0   :  { %v10095_v14 = vpop.f32.mrf.mxu1 }
 0x4b1   :  { %v12674_v62 = vadd.f32 %v10095_v14, %v12364_v51  ;;  %v10949_v51 = vld [vmem:[#allocation2 + $0x584] ss:$16 sps:$4 sm:$0xff]   ;;  %v10947_v14 = vld [vmem:[#allocation2 + $0x580] ss:$16 sps:$4 sm:$0xff]  }
 0x4b2   :  { %v2501_v59 = vpop.f32.mrf.mxu1  ;;  %3358 = vmatprep.mubr.bf16.mxu1 %v10949_v51 }
 0x4b3   :  { %14101 = vst [vmem:[#allocation48_spill] sm:$0xff] %v12674_v62  ;;  %v12677_v8 = vadd.f32 %v2501_v59, %v12367_v5  ;;  %3359 = vmatmul.mubr.bf16.gmra.mxu1 %v10947_v14  ;;  %v12690_v59 = vpop.f32.mrf.mxu0  ;;  %v10965_v62 = vld [vmem:[#allocation2 + $0x5e0] ss:$16 sps:$4 sm:$0xff]  }
 0x4b4   :  { %v10096_v15 = vpop.f32.mrf.mxu1  ;;  %3366 = vmatprep.mubr.bf16.mxu1 %v10955_v50 }
 0x4b5   :  { %14102 = vst [vmem:[#allocation50_spill] sm:$0xff] %v12677_v8  ;;  %v12682_v35 = vadd.f32 %v10096_v15, %v12372_v16  ;;  %v12698_v45 = vpop.f32.mrf.mxu0 }
 0x4b6   :  { %v12688_v27 = vpop.f32.mrf.mxu1 }
 0x4b7   :  { %14103 = vst [vmem:[#allocation51_spill] sm:$0xff] %v12682_v35  ;;  %14104 = vst [vmem:[#allocation52_spill] sm:$0xff] %v12688_v27  ;;  %v10953_v27 = vld [vmem:[#allocation2 + $0x5a0] ss:$16 sps:$4 sm:$0xff]   ;;  %v12703_v51 = vpop.f32.mrf.mxu0 }
 0x4b9   :  { %v12705_v14 = vpop.f32.mrf.mxu0 }
 0x4bb   :  { %3367 = vmatmul.mubr.bf16.gmra.mxu1 %v10953_v27 }
 0x4c0   :  { %v10099_v5 = vpop.f32.mrf.mxu1 }
 0x4c1   :  { %v12693_v31 = vadd.f32 %v10099_v5, %v12383_v3  ;;  %v10961_v3 = vld [vmem:[#allocation2 + $0x5c4] ss:$16 sps:$4 sm:$0xff]   ;;  %v10959_v5 = vld [vmem:[#allocation2 + $0x5c0] ss:$16 sps:$4 sm:$0xff]  }
 0x4c2   :  { %v2517_v16 = vpop.f32.mrf.mxu1  ;;  %3374 = vmatprep.mubr.bf16.mxu1 %v10961_v3 }
 0x4c3   :  { %14105 = vst [vmem:[#allocation54_spill] sm:$0xff] %v12693_v31  ;;  %v12696_v15 = vadd.f32 %v2517_v16, %v12386_v10  ;;  %3375 = vmatmul.mubr.bf16.gmra.mxu1 %v10959_v5  ;;  %v12709_v16 = vpop.f32.mrf.mxu0 }
 0x4c4   :  { %v10100_v11 = vpop.f32.mrf.mxu1 }
 0x4c5   :  { %14106 = vst [vmem:[#allocation55_spill] sm:$0xff] %v12696_v15  ;;  %v12701_v35 = vadd.f32 %v10100_v11, %v12391_v32  ;;  %v9204_v11 = vpop.f32.mrf.mxu0 }
 0x4c6   :  { %v12707_v31 = vpop.f32.mrf.mxu1 }
 0x4c7   :  { %14107 = vst [vmem:[#allocation56_spill] sm:$0xff] %v12701_v35  ;;  %14108 = vst [vmem:[#allocation57_spill] sm:$0xff] %v12707_v31  ;;  %v10967_v35 = vld [vmem:[#allocation2 + $0x5e4] ss:$16 sps:$4 sm:$0xff]   ;;  %v12722_v5 = vpop.f32.mrf.mxu0 }
 0x4c8   :  { %3382 = vmatprep.mubr.bf16.mxu1 %v10967_v35 }
 0x4cb   :  { %3383 = vmatmul.mubr.bf16.gmra.mxu1 %v10965_v62 }
 0x4d0   :  { %v10103_v10 = vpop.f32.mrf.mxu1 }
 0x4d1   :  { %v12712_v15 = vadd.f32 %v10103_v10, %v12402_v42 }
 0x4d2   :  { %v2533_v32 = vpop.f32.mrf.mxu1 }
 0x4d3   :  { %14109 = vst [vmem:[#allocation58_spill] sm:$0xff] %v12712_v15  ;;  %v12715_v50 = vadd.f32 %v2533_v32, %v12405_v28  ;;  %v12724_v15 = vpop.f32.mrf.mxu0 }
 0x4d4   :  { %v10104_v27 = vpop.f32.mrf.mxu1 }
 0x4d5   :  { %14110 = vst [vmem:[#allocation59_spill] sm:$0xff] %v12715_v50  ;;  %v12718_v8 = vadd.f32 %v10104_v27, %v12410_v56  ;;  %v9184_v50 = vadd.f32 %v12650_v17, %v12648_v48  ;;  %v9187_v56 = vadd.f32 %v12660_v7, %v12652_v30  ;;  %v9193_v48 = vadd.f32 %v12679_v37, %v12671_v34 }
 0x4d6   :  { %v12720_v31 = vpop.f32.mrf.mxu1 }
 0x4d7   :  { %14111 = vst [vmem:[#allocation60_spill] sm:$0xff] %v12718_v8  ;;  %14112 = vst [vmem:[#allocation61_spill] sm:$0xff] %v12720_v31  ;;  %v9209_v31 = vpop.f32.mrf.mxu0 }
 0x4d8   :  { %v9246_v3 = vpop.f32.mrf.mxu1 }
 0x4d9   :  { %v9210_v55 = vpop.f32.mrf.mxu0 }
 0x4da   :  { %v9247_v42 = vpop.f32.mrf.mxu1 }
 0x4db   :  { %v9248_v28 = vadd.f32 %v9247_v42, %v9246_v3  ;;  %v9190_v42 = vadd.f32 %v12667_v6, %v12665_v4  ;;  %v12735_v7 = vpop.f32.mrf.mxu0  ;;  %v9196_v4 = vadd.f32 %v12686_v19, %v12684_v52  ;;  %v9205_v19 = vadd.f32 %v9204_v11, %v12709_v16 }
 0x4dc   :  { %v9249_v10 = vpop.f32.mrf.mxu1 }
 0x4dd   :  { %v2889_v35 = vadd.f32 %v9248_v28, %v9184_v50 }
 0x4de   :  { %v9250_v32 = vpop.f32.mrf.mxu1 }
 0x4df   :  { %v9251_v27 = vadd.f32 %v9250_v32, %v9249_v10 }
 0x4e0   :  { %v9252_v8 = vpop.f32.mrf.mxu1 }
 0x4e1   :  { %v2892_v62 = vadd.f32 %v9251_v27, %v9187_v56  ;;  %v9213_v27 = vpop.f32.mrf.mxu0 }
 0x4e2   :  { %v9253_v9 = vpop.f32.mrf.mxu1 }
 0x4e3   :  { %v2951_v12 = vpack.c.bf16 %v2892_v62, %v2889_v35  ;;  %v9254_v38 = vadd.f32 %v9253_v9, %v9252_v8  ;;  %v9215_v34 = vpop.f32.mrf.mxu0 }
 0x4e4   :  { %v9255_v0 = vpop.f32.mrf.mxu1 }
 0x4e5   :  { %10107 = vmatprep.mubr.msk.bf16.mxu0 %vm1240_vm1, %v2951_v12  ;;  %v2897_v50 = vadd.f32 %v9254_v38, %v9190_v42 }
 0x4e6   :  { %v9256_v3 = vpop.f32.mrf.mxu1 }
 0x4e7   :  { %v9257_v17 = vadd.f32 %v9256_v3, %v9255_v0  ;;  %v9199_v0 = vadd.f32 %v12698_v45, %v12690_v59  ;;  %v9216_v3 = vpop.f32.mrf.mxu0 }
 0x4e8   :  { %v9258_v30 = vpop.f32.mrf.mxu1 }
 0x4e9   :  { %v2900_v10 = vadd.f32 %v9257_v17, %v9193_v48  ;;  %v9218_v45 = vpop.f32.mrf.mxu0 }
 0x4ea   :  { %v9259_v28 = vpop.f32.mrf.mxu1 }
 0x4eb   :  { %v2952_v32 = vpack.c.bf16 %v2900_v10, %v2897_v50  ;;  %v9260_v9 = vadd.f32 %v9259_v28, %v9258_v30 }
 0x4ec   :  { %v9261_v56 = vpop.f32.mrf.mxu1 }
 0x4ed   :  { %10108 = vmatmul.mubr.msk.bf16.vlgmr.msra.gmra.mxu0 %vm1240_vm1, %v2952_v32  ;;  %v2905_v8 = vadd.f32 %v9260_v9, %v9196_v4 }
 0x4ee   :  { %v9262_v12 = vpop.f32.mrf.mxu1  ;;  %9368 = vmatpush3.bf16.msra.mxu0 %v12439_v36 }
 0x4ef   :  { %v9263_v6 = vadd.f32 %v9262_v12, %v9261_v56  ;;  %9369 = vmatprep.subr.bf16.mxu0 %v12449_v53  ;;  %v9202_v53 = vadd.f32 %v12705_v14, %v12703_v51  ;;  %v9211_v14 = vadd.f32 %v9210_v55, %v9209_v31  ;;  %v9217_v55 = vadd.f32 %v9216_v3, %v9215_v34 }
 0x4f0   :  { %v9264_v38 = vpop.f32.mrf.mxu1 }
 0x4f1   :  { %v2908_v37 = vadd.f32 %v9263_v6, %v9199_v0 }
 0x4f2   :  { %v9265_v35 = vpop.f32.mrf.mxu1  ;;  %9370 = vmatpush3.bf16.msra.mxu0 %v12455_v63 }
 0x4f3   :  { %v2953_v62 = vpack.c.bf16 %v2908_v37, %v2905_v8  ;;  %9371 = vmatprep.subr.bf16.mxu0 %v12461_v41  ;;  %v9266_v42 = vadd.f32 %v9265_v35, %v9264_v38  ;;  %v12769_v38 = vld [vmem:[%s14054_s20 + $0x78] sm:$0xff]  }
 0x4f4   :  { %v9267_v36 = vpop.f32.mrf.mxu1 }
 0x4f5   :  { %10111 = vmatprep.mubr.msk.bf16.mxu0 %vm1240_vm1, %v2953_v62  ;;  %v2913_v48 = vadd.f32 %v9266_v42, %v9202_v53 }
 0x4f6   :  { %v9268_v52 = vpop.f32.mrf.mxu1  ;;  %9372 = vmatpush3.bf16.msra.mxu0 %v12468_v25  ;;  %v9219_v25 = vpop.f32.mrf.mxu0 }
 0x4f7   :  { %v9269_v59 = vadd.f32 %v9268_v52, %v9267_v36  ;;  %9373 = vmatprep.subr.bf16.mxu0 %v12478_v22  ;;  %v9208_v22 = vadd.f32 %v12724_v15, %v12722_v5  ;;  %v9220_v34 = vadd.f32 %v9219_v25, %v9218_v45  ;;  %v10928_v45 = vld [vmem:[#allocation2 + $0x50c] ss:$16 sps:$4 sm:$0xff]   ;;  %v10926_v25 = vld [vmem:[#allocation2 + $0x508] ss:$16 sps:$4 sm:$0xff]  }
 0x4f8   :  { %v9270_v63 = vpop.f32.mrf.mxu1 }
 0x4f9   :  { %v2916_v41 = vadd.f32 %v9269_v59, %v9205_v19 }
 0x4fa   :  { %v9271_v17 = vpop.f32.mrf.mxu1  ;;  %9374 = vmatpush3.bf16.msra.mxu0 %v12484_v47  ;;  %v9221_v47 = vpop.f32.mrf.mxu0 }
 0x4fb   :  { %v2954_v30 = vpack.c.bf16 %v2916_v41, %v2913_v48  ;;  %9375 = vmatprep.subr.bf16.mxu0 %v12490_v26  ;;  %v9272_v10 = vadd.f32 %v9271_v17, %v9270_v63 }
 0x4fc   :  { %v9273_v50 = vpop.f32.mrf.mxu1  ;;  %v9222_v12 = vpop.f32.mrf.mxu0 }
 0x4fd   :  { %10112 = vmatmul.mubr.msk.bf16.gmra.mxu0 %vm1240_vm1, %v2954_v30  ;;  %v2921_v28 = vadd.f32 %v9272_v10, %v9208_v22  ;;  %v9223_v8 = vadd.f32 %v9222_v12, %v9221_v47  ;;  %v10934_v10 = vld [vmem:[#allocation2 + $0x52c] ss:$16 sps:$4 sm:$0xff]   ;;  %v10973_v47 = vld [vmem:[#allocation2 + $0x604] ss:$16 sps:$4 sm:$0xff]  }
 0x4fe   :  { %v9274_v51 = vpop.f32.mrf.mxu1  ;;  %9376 = vmatpush3.bf16.msra.mxu0 %v12497_v60  ;;  %v9224_v4 = vpop.f32.mrf.mxu0  ;;  %v10940_v22 = vld [vmem:[#allocation2 + $0x54c] ss:$16 sps:$4 sm:$0xff]  }
 0x4ff   :  { %v9275_v16 = vadd.f32 %v9274_v51, %v9273_v50  ;;  %9377 = vmatprep.subr.bf16.mxu0 %v12507_v54  ;;  %v9214_v54 = vadd.f32 %v9213_v27, %v12735_v7  ;;  %v10932_v51 = vld [vmem:[#allocation2 + $0x528] ss:$16 sps:$4 sm:$0xff]  }
 0x500   :  { %v9276_v11 = vpop.f32.mrf.mxu1 }
 0x501   :  { %v2924_v32 = vadd.f32 %v9275_v16, %v9211_v14  ;;  %v10938_v14 = vld [vmem:[#allocation2 + $0x548] ss:$16 sps:$4 sm:$0xff]   ;;  %v10946_v16 = vld [vmem:[#allocation2 + $0x56c] ss:$16 sps:$4 sm:$0xff]  }
 0x502   :  { %v9277_v26 = vpop.f32.mrf.mxu1  ;;  %9378 = vmatpush3.bf16.msra.mxu0 %v12513_v2 }
 0x503   :  { %v2955_v56 = vpack.c.bf16 %v2924_v32, %v2921_v28  ;;  %9379 = vmatprep.subr.bf16.mxu0 %v12519_v24  ;;  %v9278_v60 = vadd.f32 %v9277_v26, %v9276_v11  ;;  %v10971_v28 = vld [vmem:[#allocation2 + $0x600] ss:$16 sps:$4 sm:$0xff]  }
 0x504   :  { %v9279_v9 = vpop.f32.mrf.mxu1 }
 0x505   :  { %10115 = vmatprep.mubr.msk.bf16.mxu0 %vm1240_vm1, %v2955_v56  ;;  %v2929_v2 = vadd.f32 %v9278_v60, %v9214_v54  ;;  %v14115_v56 = vld [vmem:[#allocation43_spill] sm:$0xff]  ;;  %v14116_v60 = vld [vmem:[#allocation44_spill] sm:$0xff] }
 0x506   :  { %v9280_v15 = vpop.f32.mrf.mxu1  ;;  %9380 = vmatpush3.bf16.msra.mxu0 %v12526_v49  ;;  %v9225_v49 = vpop.f32.mrf.mxu0 }
 0x507   :  { %v9281_v31 = vadd.f32 %v9280_v15, %v9279_v9  ;;  %9381 = vmatprep.subr.bf16.mxu0 %v12534_v39  ;;  %v9226_v63 = vadd.f32 %v9225_v49, %v9224_v4  ;;  %v10983_v49 = vld [vmem:[#allocation2 + $0x640] ss:$16 sps:$4 sm:$0xff]  }
 0x508   :  { %v9282_v5 = vpop.f32.mrf.mxu1  ;;  %v9227_v35 = vpop.f32.mrf.mxu0 }
 0x509   :  { %v2932_v0 = vadd.f32 %v9281_v31, %v9217_v55  ;;  %v10979_v31 = vld [vmem:[#allocation2 + $0x624] ss:$16 sps:$4 sm:$0xff]  }
 0x50a   :  { %v9283_v6 = vpop.f32.mrf.mxu1  ;;  %9382 = vmatpush3.bf16.msra.mxu0 %v12540_v29  ;;  %v9228_v52 = vpop.f32.mrf.mxu0 }
 0x50b   :  { %v2956_v24 = vpack.c.bf16 %v2932_v0, %v2929_v2  ;;  %9440 = vmatprep.subr.bf16.mxu0 %v12769_v38  ;;  %v9284_v27 = vadd.f32 %v9283_v6, %v9282_v5  ;;  %v9229_v48 = vadd.f32 %v9228_v52, %v9227_v35  ;;  %v14117_v5 = vld [vmem:[#allocation46_spill] sm:$0xff]  ;;  %v10977_v2 = vld [vmem:[#allocation2 + $0x620] ss:$16 sps:$4 sm:$0xff]  }
 0x50c   :  { %v9285_v7 = vpop.f32.mrf.mxu1  ;;  %v14120_v35 = vld [vmem:[#allocation50_spill] sm:$0xff] }
 0x50d   :  { %10116 = vmatmul.mubr.msk.bf16.gmra.mxu0 %vm1240_vm1, %v2956_v24  ;;  %v2937_v29 = vadd.f32 %v9284_v27, %v9220_v34  ;;  %v10985_v24 = vld [vmem:[#allocation2 + $0x644] ss:$16 sps:$4 sm:$0xff]  }
 0x50e   :  { %v9286_v39 = vpop.f32.mrf.mxu1  ;;  %v14119_v34 = vld [vmem:[#allocation48_spill] sm:$0xff] }
 0x50f   :  { %v9287_v37 = vadd.f32 %v9286_v39, %v9285_v7 }
 0x510   :  { %v9288_v62 = vpop.f32.mrf.mxu1 }
 0x511   :  { %v2940_v36 = vadd.f32 %v9287_v37, %v9223_v8 }
 0x512   :  { %v9289_v3 = vpop.f32.mrf.mxu1 }
 0x513   :  { %v2957_v42 = vpack.c.bf16 %v2940_v36, %v2937_v29  ;;  %v9290_v19 = vadd.f32 %v9289_v3, %v9288_v62  ;;  %v10991_v3 = vld [vmem:[#allocation2 + $0x664] ss:$16 sps:$4 sm:$0xff]  }
 0x514   :  { %v9291_v53 = vpop.f32.mrf.mxu1 }
 0x515   :  { %10119 = vmatprep.mubr.msk.bf16.mxu0 %vm1240_vm1, %v2957_v42  ;;  %v2945_v17 = vadd.f32 %v9290_v19, %v9226_v63  ;;  %v14121_v42 = vld [vmem:[#allocation51_spill] sm:$0xff]  ;;  %v10997_v63 = vld [vmem:[#allocation2 + $0x684] ss:$16 sps:$4 sm:$0xff]  }
 0x516   :  { %v9292_v59 = vpop.f32.mrf.mxu1 }
 0x517   :  { %v9293_v41 = vadd.f32 %v9292_v59, %v9291_v53  ;;  %v10989_v53 = vld [vmem:[#allocation2 + $0x660] ss:$16 sps:$4 sm:$0xff]  }
 0x519   :  { %v2948_v30 = vadd.f32 %v9293_v41, %v9229_v48  ;;  %v10995_v48 = vld [vmem:[#allocation2 + $0x680] ss:$16 sps:$4 sm:$0xff]  }
 0x51b   :  { %v2958_v50 = vpack.c.bf16 %v2948_v30, %v2945_v17 }
 0x51d   :  { %10120 = vmatmul.mubr.msk.bf16.gmra.mxu0 %vm1240_vm1, %v2958_v50 }
 0x51e   :  { %3423 = vmatprep.mubr.bf16.mxu0 %v10928_v45  ;;  %v14123_v45 = vld [vmem:[#allocation54_spill] sm:$0xff] }
 0x525   :  { %3424 = vmatmul.mubr.bf16.vlgmr.msra.gmra.mxu0 %v10926_v25 }
 0x526   :  { %3431 = vmatprep.mubr.bf16.mxu0 %v10934_v10  ;;  %9441 = vmatpush3.bf16.msra.mxu0 %v12550_v20  ;;  %v10944_v20 = vld [vmem:[#allocation2 + $0x568] ss:$16 sps:$4 sm:$0xff]   ;;  %v14124_v10 = vld [vmem:[#allocation55_spill] sm:$0xff] }
 0x527   :  { %9442 = vmatprep.subr.bf16.mxu0 %v12556_v18  ;;  %v10952_v18 = vld [vmem:[#allocation2 + $0x58c] ss:$16 sps:$4 sm:$0xff]  }
 0x52a   :  { %9443 = vmatpush3.bf16.msra.mxu0 %v12562_v33  ;;  %v10950_v33 = vld [vmem:[#allocation2 + $0x588] ss:$16 sps:$4 sm:$0xff]  }
 0x52b   :  { %9444 = vmatprep.subr.bf16.mxu0 %v12568_v13  ;;  %v10958_v13 = vld [vmem:[#allocation2 + $0x5ac] ss:$16 sps:$4 sm:$0xff]  }
 0x52d   :  { %3432 = vmatmul.mubr.bf16.gmra.mxu0 %v10932_v51 }
 0x52e   :  { %3439 = vmatprep.mubr.bf16.mxu0 %v10940_v22  ;;  %9445 = vmatpush3.bf16.msra.mxu0 %v12574_v44  ;;  %v14113_v44 = vld [vmem:[#allocation40_spill] sm:$0xff] }
 0x52f   :  { %9446 = vmatprep.subr.bf16.mxu0 %v12580_v43  ;;  %v10956_v43 = vld [vmem:[#allocation2 + $0x5a8] ss:$16 sps:$4 sm:$0xff]  }
 0x532   :  { %9447 = vmatpush3.bf16.msra.mxu0 %v12586_v57  ;;  %v10964_v57 = vld [vmem:[#allocation2 + $0x5cc] ss:$16 sps:$4 sm:$0xff]  }
 0x533   :  { %9448 = vmatprep.subr.bf16.mxu0 %v12592_v58  ;;  %v10962_v58 = vld [vmem:[#allocation2 + $0x5c8] ss:$16 sps:$4 sm:$0xff]  }
 0x535   :  { %3440 = vmatmul.mubr.bf16.gmra.mxu0 %v10938_v14 }
 0x536   :  { %3447 = vmatprep.mubr.bf16.mxu0 %v10946_v16  ;;  %9449 = vmatpush3.bf16.msra.mxu0 %v12598_v1  ;;  %v10970_v1 = vld [vmem:[#allocation2 + $0x5ec] ss:$16 sps:$4 sm:$0xff]   ;;  %v11003_v16 = vld [vmem:[#allocation2 + $0x6a4] ss:$16 sps:$4 sm:$0xff]  }
 0x537   :  { %9450 = vmatprep.subr.bf16.mxu0 %v12604_v46  ;;  %v10968_v46 = vld [vmem:[#allocation2 + $0x5e8] ss:$16 sps:$4 sm:$0xff]  }
 0x53a   :  { %9451 = vmatpush3.bf16.msra.mxu0 %v12610_v23  ;;  %v8394_v23 = vld [vmem:[%s14030_s2 + $0xa] sm:$0x3] }
 0x53b   :  { %9452 = vmatprep.subr.bf16.mxu0 %v12616_v40  ;;  %10616 = vmatprep.subr.msk.bf16.mxu1 %vm1265_vm0, %v8394_v23  ;;  %v3523_v40 = vsel %vm1265_vm0, %v8394_v23, 0  ;;  %v14127_v23 = vld [vmem:[#allocation58_spill] sm:$0xff] }
 0x53c   :  { %10124 = vmatpush3.bf16.msra.mxu1 %v3523_v40 }
 0x53d   :  { %3448 = vmatmul.mubr.bf16.gmra.mxu0 %v10944_v20  ;;  %v14125_v20 = vld [vmem:[#allocation56_spill] sm:$0xff] }
 0x53e   :  { %3455 = vmatprep.mubr.bf16.mxu0 %v10952_v18  ;;  %9453 = vmatpush3.bf16.msra.mxu0 %v12622_v21  ;;  %v14114_v21 = vld [vmem:[#allocation42_spill] sm:$0xff] }
 0x53f   :  { %9454 = vmatprep.subr.bf16.mxu0 %v12628_v61  ;;  %9504 = vmatprep.subr.bf16.mxu1 %v14114_v21  ;;  %v12796_v61 = vpop.f32.mrf.mxu1 }
 0x541   :  { %v12798_v11 = vpop.f32.mrf.mxu1 }
 0x542   :  { %9455 = vmatpush3.bf16.msra.mxu0 %v14113_v44 }
 0x543   :  { %v12800_v26 = vpop.f32.mrf.mxu1 }
 0x545   :  { %3456 = vmatmul.mubr.bf16.gmra.mxu0 %v10950_v33  ;;  %v12808_v55 = vpop.f32.mrf.mxu1  ;;  %v11001_v33 = vld [vmem:[#allocation2 + $0x6a0] ss:$16 sps:$4 sm:$0xff]  }
 0x546   :  { %3463 = vmatprep.mubr.bf16.mxu0 %v10958_v13 }
 0x547   :  { %v12813_v0 = vpop.f32.mrf.mxu1 }
 0x549   :  { %v12815_v6 = vpop.f32.mrf.mxu1 }
 0x54b   :  { %v12819_v39 = vpop.f32.mrf.mxu1 }
 0x54d   :  { %3464 = vmatmul.mubr.bf16.gmra.mxu0 %v10956_v43  ;;  %v12827_v36 = vpop.f32.mrf.mxu1  ;;  %v11009_v43 = vld [vmem:[#allocation2 + $0x6c4] ss:$16 sps:$4 sm:$0xff]  }
 0x54e   :  { %3471 = vmatprep.mubr.bf16.mxu0 %v10964_v57  ;;  %v11007_v57 = vld [vmem:[#allocation2 + $0x6c0] ss:$16 sps:$4 sm:$0xff]  }
 0x555   :  { %3472 = vmatmul.mubr.bf16.gmra.mxu0 %v10962_v58 }
 0x556   :  { %3479 = vmatprep.mubr.bf16.mxu0 %v10970_v1 }
 0x55d   :  { %3480 = vmatmul.mubr.bf16.gmra.mxu0 %v10968_v46 }
 0x55e   :  { %3863 = vmatprep.mubr.bf16.mxu0 %v10973_v47  ;;  %v14128_v47 = vld [vmem:[#allocation59_spill] sm:$0xff] }
 0x563   :  { %v12832_v19 = vpop.f32.mrf.mxu1 }
 0x565   :  { %3864 = vmatmul.mubr.bf16.vlgmr.msra.gmra.mxu0 %v10971_v28  ;;  %v12834_v59 = vpop.f32.mrf.mxu1 }
 0x566   :  { %3871 = vmatprep.mubr.bf16.mxu0 %v10979_v31  ;;  %v11013_v31 = vld [vmem:[#allocation2 + $0x6e0] ss:$16 sps:$4 sm:$0xff]  }
 0x567   :  { %v12838_v30 = vpop.f32.mrf.mxu1 }
 0x569   :  { %v12846_v14 = vpop.f32.mrf.mxu1 }
 0x56b   :  { %v12851_v13 = vpop.f32.mrf.mxu1 }
 0x56d   :  { %3872 = vmatmul.mubr.bf16.gmra.mxu0 %v10977_v2  ;;  %v12853_v44 = vpop.f32.mrf.mxu1 }
 0x56e   :  { %3879 = vmatprep.mubr.bf16.mxu0 %v10985_v24 }
 0x56f   :  { %v12857_v46 = vpop.f32.mrf.mxu1 }
 0x575   :  { %3880 = vmatmul.mubr.bf16.gmra.mxu0 %v10983_v49 }
 0x576   :  { %3887 = vmatprep.mubr.bf16.mxu0 %v10991_v3  ;;  %v9324_v3 = vadd.f32 %v12808_v55, %v12800_v26 }
 0x57d   :  { %3888 = vmatmul.mubr.bf16.gmra.mxu0 %v10989_v53 }
 0x57e   :  { %3895 = vmatprep.mubr.bf16.mxu0 %v10997_v63 }
 0x585   :  { %3896 = vmatmul.mubr.bf16.gmra.mxu0 %v10995_v48 }
 0x586   :  { %3903 = vmatprep.mubr.bf16.mxu0 %v11003_v16 }
 0x58d   :  { %3904 = vmatmul.mubr.bf16.gmra.mxu0 %v11001_v33 }
 0x58e   :  { %3911 = vmatprep.mubr.bf16.mxu0 %v11009_v43 }
 0x595   :  { %3912 = vmatmul.mubr.bf16.gmra.mxu0 %v11007_v57 }
 0x5ad   :  { %v10109_v32 = vpop.f32.mrf.mxu0 }
 0x5ae   :  { %v12803_v9 = vadd.f32 %v10109_v32, %v14115_v56  ;;  %v12865_v56 = vpop.f32.mrf.mxu1 }
 0x5af   :  { %v3022_v12 = vpop.f32.mrf.mxu0 }
 0x5b0   :  { %v12806_v15 = vadd.f32 %v3022_v12, %v14116_v60  ;;  %v11015_v12 = vld [vmem:[#allocation2 + $0x6e4] ss:$16 sps:$4 sm:$0xff]   ;;  %v12872_v24 = vpop.f32.mrf.mxu1 }
 0x5b1   :  { %v10110_v54 = vpop.f32.mrf.mxu0  ;;  %v14129_v60 = vld [vmem:[#allocation60_spill] sm:$0xff]  ;;  %3919 = vmatprep.mubr.bf16.mxu0 %v11015_v12 }
 0x5b2   :  { %v12811_v4 = vadd.f32 %v10110_v54, %v14117_v5  ;;  %3920 = vmatmul.mubr.bf16.gmra.mxu0 %v11013_v31 }
 0x5b3   :  { %v12817_v7 = vpop.f32.mrf.mxu0 }
 0x5b4   :  { %14118 = vst [vmem:[#allocation40_spill] sm:$0xff] %v12817_v7  ;;  %v11051_v7 = vld [vmem:[#allocation2 + $0x7a4] ss:$16 sps:$4 sm:$0xff]  }
 0x5bd   :  { %v10113_v27 = vpop.f32.mrf.mxu0 }
 0x5be   :  { %v12822_v8 = vadd.f32 %v10113_v27, %v14119_v34  ;;  %v12874_v34 = vpop.f32.mrf.mxu1 }
 0x5bf   :  { %v3038_v37 = vpop.f32.mrf.mxu0 }
 0x5c0   :  { %v12825_v62 = vadd.f32 %v3038_v37, %v14120_v35  ;;  %v12880_v63 = vpop.f32.mrf.mxu1 }
 0x5c1   :  { %v10114_v29 = vpop.f32.mrf.mxu0 }
 0x5c2   :  { %v12830_v52 = vadd.f32 %v10114_v29, %v14121_v42  ;;  %v9321_v29 = vadd.f32 %v12798_v11, %v12796_v61  ;;  %v9327_v61 = vadd.f32 %v12815_v6, %v12813_v0  ;;  %v9330_v11 = vadd.f32 %v12827_v36, %v12819_v39  ;;  %v12897_v0 = vld [vmem:[%s14054_s20 + $0xb8] sm:$0xff]  }
 0x5c3   :  { %v12836_v41 = vpop.f32.mrf.mxu0  ;;  %v9333_v6 = vadd.f32 %v12834_v59, %v12832_v19  ;;  %v9336_v39 = vadd.f32 %v12846_v14, %v12838_v30  ;;  %v12913_v19 = vld [vmem:[%s14054_s20 + $0xb0] sm:$0xff]   ;;  %v12919_v30 = vld [vmem:[%s14054_s20 + $0xe8] sm:$0xff]  }
 0x5c4   :  { %14122 = vst [vmem:[#allocation42_spill] sm:$0xff] %v12836_v41 }
 0x5cd   :  { %v10117_v17 = vpop.f32.mrf.mxu0 }
 0x5ce   :  { %v12841_v50 = vadd.f32 %v10117_v17, %v14123_v45 }
 0x5cf   :  { %v3054_v25 = vpop.f32.mrf.mxu0 }
 0x5d0   :  { %v12844_v51 = vadd.f32 %v3054_v25, %v14124_v10 }
 0x5d1   :  { %v10118_v22 = vpop.f32.mrf.mxu0 }
 0x5d2   :  { %v12849_v18 = vadd.f32 %v10118_v22, %v14125_v20  ;;  %v12882_v22 = vpop.f32.mrf.mxu1 }
 0x5d3   :  { %v12855_v58 = vpop.f32.mrf.mxu0 }
 0x5d4   :  { %14126 = vst [vmem:[#allocation43_spill] sm:$0xff] %v12855_v58  ;;  %v12889_v33 = vpop.f32.mrf.mxu1  ;;  %v11037_v58 = vld [vmem:[#allocation2 + $0x760] ss:$16 sps:$4 sm:$0xff]  }
 0x5dd   :  { %v10121_v1 = vpop.f32.mrf.mxu0 }
 0x5de   :  { %v12860_v40 = vadd.f32 %v10121_v1, %v14127_v23 }
 0x5df   :  { %v3070_v21 = vpop.f32.mrf.mxu0 }
 0x5e0   :  { %v12863_v28 = vadd.f32 %v3070_v21, %v14128_v47  ;;  %v12891_v47 = vpop.f32.mrf.mxu1 }
 0x5e1   :  { %v10122_v32 = vpop.f32.mrf.mxu0 }
 0x5e2   :  { %v12868_v54 = vadd.f32 %v10122_v32, %v14129_v60  ;;  %v12907_v60 = vld [vmem:[%s14054_s20 + $0xf0] sm:$0xff]  }
 0x5e3   :  { %v12870_v5 = vpop.f32.mrf.mxu0 }
 0x5e4   :  { %14130 = vst [vmem:[#allocation44_spill] sm:$0xff] %v12870_v5 }
 0x5e5   :  { %v9383_v2 = vpop.f32.mrf.mxu0 }
 0x5e7   :  { %v9384_v49 = vpop.f32.mrf.mxu0 }
 0x5e8   :  { %v9385_v37 = vadd.f32 %v9384_v49, %v9383_v2  ;;  %v9352_v2 = vpop.f32.mrf.mxu1 }
 0x5e9   :  { %v9386_v27 = vpop.f32.mrf.mxu0 }
 0x5ea   :  { %v3426_v48 = vadd.f32 %v9385_v37, %v9321_v29 }
 0x5eb   :  { %v9387_v35 = vpop.f32.mrf.mxu0 }
 0x5ec   :  { %v9388_v42 = vadd.f32 %v9387_v35, %v9386_v27  ;;  %v9353_v35 = vpop.f32.mrf.mxu1 }
 0x5ed   :  { %v9389_v53 = vpop.f32.mrf.mxu0 }
 0x5ee   :  { %v3429_v17 = vadd.f32 %v9388_v42, %v9324_v3  ;;  %v12926_v42 = vld [vmem:[%s14054_s20 + $0xa8] sm:$0xff]  }
 0x5ef   :  { %v9390_v45 = vpop.f32.mrf.mxu0 }
 0x5f0   :  { %v3488_v25 = vpack.c.bf16 %v3429_v17, %v3426_v48  ;;  %v9391_v16 = vadd.f32 %v9390_v45, %v9389_v53  ;;  %v9339_v53 = vadd.f32 %v12853_v44, %v12851_v13  ;;  %v9342_v48 = vadd.f32 %v12865_v56, %v12857_v46  ;;  %v12936_v45 = vld [vmem:[%s14054_s20 + $0xe0] sm:$0xff]   ;;  %v12948_v46 = vld [vmem:[%s14054_s20 + $0xd8] sm:$0xff]  }
 0x5f1   :  { %v9392_v10 = vpop.f32.mrf.mxu0  ;;  %v12942_v13 = vld [vmem:[%s14054_s20 + $0xa0] sm:$0xff]  }
 0x5f2   :  { %10125 = vmatprep.mubr.msk.bf16.mxu1 %vm1240_vm1, %v3488_v25  ;;  %v3434_v43 = vadd.f32 %v9391_v16, %v9327_v61 }
 0x5f3   :  { %v9393_v20 = vpop.f32.mrf.mxu0 }
 0x5f4   :  { %v9394_v26 = vadd.f32 %v9393_v20, %v9392_v10  ;;  %v9355_v10 = vpop.f32.mrf.mxu1 }
 0x5f5   :  { %v9395_v55 = vpop.f32.mrf.mxu0 }
 0x5f6   :  { %v3437_v57 = vadd.f32 %v9394_v26, %v9330_v11  ;;  %v9356_v11 = vpop.f32.mrf.mxu1 }
 0x5f7   :  { %v9396_v1 = vpop.f32.mrf.mxu0 }
 0x5f8   :  { %v3489_v23 = vpack.c.bf16 %v3437_v57, %v3434_v43  ;;  %v9397_v32 = vadd.f32 %v9396_v1, %v9395_v55  ;;  %v12955_v43 = vld [vmem:[%s14054_s20 + $0x98] sm:$0xff]   ;;  %v9345_v57 = vadd.f32 %v12874_v34, %v12872_v24  ;;  %v9348_v1 = vadd.f32 %v12882_v22, %v12880_v63  ;;  %v12971_v24 = vld [vmem:[%s14054_s20 + $0x90] sm:$0xff]   ;;  %v12977_v63 = vld [vmem:[%s14054_s20 + $0xc8] sm:$0xff]  }
 0x5f9   :  { %v9398_v21 = vpop.f32.mrf.mxu0 }
 0x5fa   :  { %10126 = vmatmul.mubr.msk.bf16.vlgmr.msra.gmra.mxu1 %vm1240_vm1, %v3489_v23  ;;  %v3442_v49 = vadd.f32 %v9397_v32, %v9333_v6 }
 0x5fb   :  { %v9399_v12 = vpop.f32.mrf.mxu0  ;;  %9505 = vmatpush3.bf16.msra.mxu1 %v12897_v0 }
 0x5fc   :  { %v9400_v36 = vadd.f32 %v9399_v12, %v9398_v21  ;;  %9506 = vmatprep.subr.bf16.mxu1 %v12907_v60  ;;  %v12965_v21 = vld [vmem:[%s14054_s20 + $0xd0] sm:$0xff]   ;;  %v9358_v12 = vpop.f32.mrf.mxu1 }
 0x5fd   :  { %v9401_v31 = vpop.f32.mrf.mxu0 }
 0x5fe   :  { %v3445_v27 = vadd.f32 %v9400_v36, %v9336_v39 }
 0x5ff   :  { %v9402_v37 = vpop.f32.mrf.mxu0  ;;  %9507 = vmatpush3.bf16.msra.mxu1 %v12913_v19 }
 0x600   :  { %v3490_v59 = vpack.c.bf16 %v3445_v27, %v3442_v49  ;;  %9508 = vmatprep.subr.bf16.mxu1 %v12919_v30  ;;  %v9403_v29 = vadd.f32 %v9402_v37, %v9401_v31  ;;  %v9359_v31 = vpop.f32.mrf.mxu1  ;;  %v12984_v37 = vld [vmem:[%s14054_s20 + $0x88] sm:$0xff]  }
 0x601   :  { %v9404_v14 = vpop.f32.mrf.mxu0 }
 0x602   :  { %10129 = vmatprep.mubr.msk.bf16.mxu1 %vm1240_vm1, %v3490_v59  ;;  %v3450_v16 = vadd.f32 %v9403_v29, %v9339_v53  ;;  %v9351_v59 = vadd.f32 %v12891_v47, %v12889_v33 }
 0x603   :  { %v9405_v3 = vpop.f32.mrf.mxu0  ;;  %9509 = vmatpush3.bf16.msra.mxu1 %v12926_v42 }
 0x604   :  { %v9406_v17 = vadd.f32 %v9405_v3, %v9404_v14  ;;  %9510 = vmatprep.subr.bf16.mxu1 %v12936_v45  ;;  %v9354_v14 = vadd.f32 %v9353_v35, %v9352_v2  ;;  %v12992_v3 = vld [vmem:[%s14054_s20 + $0xc0] sm:$0xff]  }
 0x605   :  { %v9407_v25 = vpop.f32.mrf.mxu0 }
 0x606   :  { %v3453_v20 = vadd.f32 %v9406_v17, %v9342_v48  ;;  %v9361_v48 = vpop.f32.mrf.mxu1 }
 0x607   :  { %v9408_v61 = vpop.f32.mrf.mxu0  ;;  %9511 = vmatpush3.bf16.msra.mxu1 %v12942_v13 }
 0x608   :  { %v3491_v44 = vpack.c.bf16 %v3453_v20, %v3450_v16  ;;  %9512 = vmatprep.subr.bf16.mxu1 %v12948_v46  ;;  %v9409_v26 = vadd.f32 %v9408_v61, %v9407_v25  ;;  %v12998_v20 = vld [vmem:[%s14054_s20 + $0x80] sm:$0xff]   ;;  %v9362_v47 = vpop.f32.mrf.mxu1 }
 0x609   :  { %v9410_v56 = vpop.f32.mrf.mxu0 }
 0x60a   :  { %10130 = vmatmul.mubr.msk.bf16.gmra.mxu1 %vm1240_vm1, %v3491_v44  ;;  %v3458_v6 = vadd.f32 %v9409_v26, %v9345_v57  ;;  %v9357_v44 = vadd.f32 %v9356_v11, %v9355_v10  ;;  %v10976_v10 = vld [vmem:[#allocation2 + $0x60c] ss:$16 sps:$4 sm:$0xff]  }
 0x60b   :  { %v9411_v55 = vpop.f32.mrf.mxu0  ;;  %9513 = vmatpush3.bf16.msra.mxu1 %v12955_v43 }
 0x60c   :  { %v9412_v23 = vadd.f32 %v9411_v55, %v9410_v56  ;;  %9514 = vmatprep.subr.bf16.mxu1 %v12965_v21  ;;  %v9360_v56 = vadd.f32 %v9359_v31, %v9358_v12  ;;  %v9364_v55 = vpop.f32.mrf.mxu1  ;;  %v10974_v12 = vld [vmem:[#allocation2 + $0x608] ss:$16 sps:$4 sm:$0xff]   ;;  %v10982_v31 = vld [vmem:[#allocation2 + $0x62c] ss:$16 sps:$4 sm:$0xff]  }
 0x60d   :  { %v9413_v32 = vpop.f32.mrf.mxu0 }
 0x60e   :  { %v3461_v39 = vadd.f32 %v9412_v23, %v9348_v1 }
 0x60f   :  { %v9414_v36 = vpop.f32.mrf.mxu0  ;;  %9515 = vmatpush3.bf16.msra.mxu1 %v12971_v24 }
 0x610   :  { %v3492_v34 = vpack.c.bf16 %v3461_v39, %v3458_v6  ;;  %9516 = vmatprep.subr.bf16.mxu1 %v12977_v63  ;;  %v9415_v49 = vadd.f32 %v9414_v36, %v9413_v32  ;;  %v9365_v39 = vpop.f32.mrf.mxu1 }
 0x611   :  { %v9416_v22 = vpop.f32.mrf.mxu0 }
 0x612   :  { %10133 = vmatprep.mubr.msk.bf16.mxu1 %vm1240_vm1, %v3492_v34  ;;  %v3466_v17 = vadd.f32 %v9415_v49, %v9351_v59  ;;  %v9366_v49 = vadd.f32 %v9365_v39, %v9364_v55  ;;  %v10992_v55 = vld [vmem:[#allocation2 + $0x668] ss:$16 sps:$4 sm:$0xff]  }
 0x613   :  { %v9417_v27 = vpop.f32.mrf.mxu0  ;;  %9517 = vmatpush3.bf16.msra.mxu1 %v12984_v37  ;;  %v10998_v39 = vld [vmem:[#allocation2 + $0x688] ss:$16 sps:$4 sm:$0xff]  }
 0x614   :  { %v9418_v29 = vadd.f32 %v9417_v27, %v9416_v22  ;;  %9518 = vmatprep.subr.bf16.mxu1 %v12992_v3  ;;  %v9363_v22 = vadd.f32 %v9362_v47, %v9361_v48  ;;  %v10980_v48 = vld [vmem:[#allocation2 + $0x628] ss:$16 sps:$4 sm:$0xff]   ;;  %v13038_v47 = vld [vmem:[%s14054_s20 + $0x60] sm:$0xff]  }
 0x615   :  { %v9419_v53 = vpop.f32.mrf.mxu0 }
 0x616   :  { %v3469_v25 = vadd.f32 %v9418_v29, %v9354_v14  ;;  %v13008_v29 = vld [vmem:[%s14054_s20 + $0x38] sm:$0xff]  }
 0x617   :  { %v9420_v16 = vpop.f32.mrf.mxu0  ;;  %9519 = vmatpush3.bf16.msra.mxu1 %v12998_v20 }
 0x618   :  { %v3493_v33 = vpack.c.bf16 %v3469_v25, %v3466_v17  ;;  %9577 = vmatprep.subr.bf16.mxu1 %v12769_v38  ;;  %v9421_v35 = vadd.f32 %v9420_v16, %v9419_v53  ;;  %v13014_v53 = vld [vmem:[%s14054_s20 + $0x70] sm:$0xff]   ;;  %v10988_v17 = vld [vmem:[#allocation2 + $0x64c] ss:$16 sps:$4 sm:$0xff]  }
 0x619   :  { %v9422_v2 = vpop.f32.mrf.mxu0  ;;  %v13020_v25 = vld [vmem:[%s14054_s20 + $0x30] sm:$0xff]   ;;  %v13026_v16 = vld [vmem:[%s14054_s20 + $0x68] sm:$0xff]  }
 0x61a   :  { %10134 = vmatmul.mubr.msk.bf16.gmra.mxu1 %vm1240_vm1, %v3493_v33  ;;  %v3474_v1 = vadd.f32 %v9421_v35, %v9357_v44  ;;  %v13032_v33 = vld [vmem:[%s14054_s20 + $0x28] sm:$0xff]   ;;  %v13050_v44 = vld [vmem:[%s14054_s20 + $0x58] sm:$0xff]  }
 0x61b   :  { %v9423_v61 = vpop.f32.mrf.mxu0  ;;  %v10994_v35 = vld [vmem:[#allocation2 + $0x66c] ss:$16 sps:$4 sm:$0xff]  }
 0x61c   :  { %v9424_v26 = vadd.f32 %v9423_v61, %v9422_v2  ;;  %v10986_v2 = vld [vmem:[#allocation2 + $0x648] ss:$16 sps:$4 sm:$0xff]   ;;  %v13044_v61 = vld [vmem:[%s14054_s20 + $0x20] sm:$0xff]  }
 0x61d   :  { %v9425_v57 = vpop.f32.mrf.mxu0 }
 0x61e   :  { %v3477_v23 = vadd.f32 %v9424_v26, %v9360_v56  ;;  %v13056_v56 = vld [vmem:[%s14054_s20 + $0x18] sm:$0xff]   ;;  %v13062_v26 = vld [vmem:[%s14054_s20 + $0x50] sm:$0xff]  }
 0x61f   :  { %v9426_v32 = vpop.f32.mrf.mxu0 }
 0x620   :  { %v3494_v6 = vpack.c.bf16 %v3477_v23, %v3474_v1  ;;  %v9427_v34 = vadd.f32 %v9426_v32, %v9425_v57  ;;  %v11000_v57 = vld [vmem:[#allocation2 + $0x68c] ss:$16 sps:$4 sm:$0xff]   ;;  %v13068_v1 = vld [vmem:[%s14054_s20 + $0x10] sm:$0xff]  }
 0x621   :  { %v9428_v36 = vpop.f32.mrf.mxu0  ;;  %v13074_v23 = vld [vmem:[%s14054_s20 + $0x48] sm:$0xff]  }
 0x622   :  { %10137 = vmatprep.mubr.msk.bf16.mxu1 %vm1240_vm1, %v3494_v6  ;;  %v3482_v59 = vadd.f32 %v9427_v34, %v9363_v22  ;;  %v13080_v32 = vld [vmem:[%s14054_s20 + $0x8] sm:$0xff]   ;;  %v13086_v6 = vld [vmem:[%s14054_s20 + $0x40] sm:$0xff]  }
 0x623   :  { %v9429_v38 = vpop.f32.mrf.mxu0  ;;  %v13092_v34 = vld [vmem:[%s14054_s20] sm:$0xff]   ;;  %v11012_v22 = vld [vmem:[#allocation2 + $0x6cc] ss:$16 sps:$4 sm:$0xff]  }
 0x624   :  { %v9430_v27 = vadd.f32 %v9429_v38, %v9428_v36  ;;  %v11006_v36 = vld [vmem:[#allocation2 + $0x6ac] ss:$16 sps:$4 sm:$0xff]   ;;  %14131 = vst [vmem:[#allocation46_spill] sm:$0xff] %v13092_v34  ;;  %v11004_v38 = vld [vmem:[#allocation2 + $0x6a8] ss:$16 sps:$4 sm:$0xff]  }
 0x626   :  { %v3485_v14 = vadd.f32 %v9430_v27, %v9366_v49  ;;  %v11010_v49 = vld [vmem:[#allocation2 + $0x6c8] ss:$16 sps:$4 sm:$0xff]   ;;  %v11018_v27 = vld [vmem:[#allocation2 + $0x6ec] ss:$16 sps:$4 sm:$0xff]  }
 0x628   :  { %v3495_v11 = vpack.c.bf16 %v3485_v14, %v3482_v59  ;;  %v11016_v59 = vld [vmem:[#allocation2 + $0x6e8] ss:$16 sps:$4 sm:$0xff]   ;;  %v8435_v14 = vld [vmem:[%s14030_s2 + $0xc] sm:$0x3] }
 0x629   :  { %10617 = vmatprep.subr.msk.bf16.mxu0 %vm1265_vm0, %v8435_v14 }
 0x62a   :  { %10138 = vmatmul.mubr.msk.bf16.gmra.mxu1 %vm1240_vm1, %v3495_v11  ;;  %v13103_v11 = vld [vmem:[%s14054_s20 + $0xf8] sm:$0xff]  }
 0x62b   :  { %3960 = vmatprep.mubr.bf16.mxu1 %v10976_v10  ;;  %v4060_v10 = vsel %vm1265_vm0, %v8435_v14, 0  ;;  %14132 = vst [vmem:[#allocation48_spill] sm:$0xff] %v13103_v11 }
 0x62c   :  { %10142 = vmatpush3.bf16.msra.mxu0 %v4060_v10  ;;  %v11031_v10 = vld [vmem:[#allocation2 + $0x740] ss:$16 sps:$4 sm:$0xff]  }
 0x62d   :  { %9641 = vmatprep.subr.bf16.mxu0 %v13103_v11 }
 0x632   :  { %3961 = vmatmul.mubr.bf16.vlgmr.msra.gmra.mxu1 %v10974_v12  ;;  %v13106_v12 = vpop.f32.mrf.mxu0 }
 0x633   :  { %3968 = vmatprep.mubr.bf16.mxu1 %v10982_v31  ;;  %9578 = vmatpush3.bf16.msra.mxu1 %v13008_v29 }
 0x634   :  { %9579 = vmatprep.subr.bf16.mxu1 %v13014_v53  ;;  %v13108_v31 = vpop.f32.mrf.mxu0 }
 0x637   :  { %9580 = vmatpush3.bf16.msra.mxu1 %v13020_v25 }
 0x638   :  { %9581 = vmatprep.subr.bf16.mxu1 %v13026_v16 }
 0x63a   :  { %3969 = vmatmul.mubr.bf16.gmra.mxu1 %v10980_v48  ;;  %v11021_v48 = vld [vmem:[#allocation2 + $0x704] ss:$16 sps:$4 sm:$0xff]  }
 0x63b   :  { %3976 = vmatprep.mubr.bf16.mxu1 %v10988_v17  ;;  %9582 = vmatpush3.bf16.msra.mxu1 %v13032_v33  ;;  %v11019_v17 = vld [vmem:[#allocation2 + $0x700] ss:$16 sps:$4 sm:$0xff]  }
 0x63c   :  { %9583 = vmatprep.subr.bf16.mxu1 %v13038_v47 }
 0x63f   :  { %9584 = vmatpush3.bf16.msra.mxu1 %v13044_v61 }
 0x640   :  { %9585 = vmatprep.subr.bf16.mxu1 %v13050_v44 }
 0x642   :  { %3977 = vmatmul.mubr.bf16.gmra.mxu1 %v10986_v2 }
 0x643   :  { %3984 = vmatprep.mubr.bf16.mxu1 %v10994_v35  ;;  %9586 = vmatpush3.bf16.msra.mxu1 %v13056_v56  ;;  %v13110_v35 = vpop.f32.mrf.mxu0 }
 0x644   :  { %9587 = vmatprep.subr.bf16.mxu1 %v13062_v26 }
 0x647   :  { %9588 = vmatpush3.bf16.msra.mxu1 %v13068_v1 }
 0x648   :  { %9589 = vmatprep.subr.bf16.mxu1 %v13074_v23 }
 0x64a   :  { %3985 = vmatmul.mubr.bf16.gmra.mxu1 %v10992_v55 }
 0x64b   :  { %3992 = vmatprep.mubr.bf16.mxu1 %v11000_v57  ;;  %9590 = vmatpush3.bf16.msra.mxu1 %v13080_v32 }
 0x64c   :  { %9591 = vmatprep.subr.bf16.mxu1 %v13086_v6 }
 0x64f   :  { %9592 = vmatpush3.bf16.msra.mxu1 %v13092_v34 }
 0x652   :  { %3993 = vmatmul.mubr.bf16.gmra.mxu1 %v10998_v39 }
 0x653   :  { %4000 = vmatprep.mubr.bf16.mxu1 %v11006_v36 }
 0x65a   :  { %4001 = vmatmul.mubr.bf16.gmra.mxu1 %v11004_v38  ;;  %v13118_v38 = vpop.f32.mrf.mxu0 }
 0x65b   :  { %4008 = vmatprep.mubr.bf16.mxu1 %v11012_v22  ;;  %v11027_v22 = vld [vmem:[#allocation2 + $0x724] ss:$16 sps:$4 sm:$0xff]  }
 0x662   :  { %4009 = vmatmul.mubr.bf16.gmra.mxu1 %v11010_v49 }
 0x663   :  { %4016 = vmatprep.mubr.bf16.mxu1 %v11018_v27  ;;  %v11025_v27 = vld [vmem:[#allocation2 + $0x720] ss:$16 sps:$4 sm:$0xff]  }
 0x66a   :  { %4017 = vmatmul.mubr.bf16.gmra.mxu1 %v11016_v59  ;;  %v13123_v59 = vpop.f32.mrf.mxu0 }
 0x66b   :  { %4400 = vmatprep.mubr.bf16.mxu1 %v11021_v48 }
 0x66c   :  { %v13125_v14 = vpop.f32.mrf.mxu0 }
 0x672   :  { %4401 = vmatmul.mubr.bf16.vlgmr.msra.gmra.mxu1 %v11019_v17  ;;  %v13129_v17 = vpop.f32.mrf.mxu0 }
 0x673   :  { %4408 = vmatprep.mubr.bf16.mxu1 %v11027_v22 }
 0x674   :  { %v13137_v22 = vpop.f32.mrf.mxu0 }
 0x67a   :  { %4409 = vmatmul.mubr.bf16.gmra.mxu1 %v11025_v27  ;;  %v11039_v27 = vld [vmem:[#allocation2 + $0x764] ss:$16 sps:$4 sm:$0xff]  }
 0x6ba   :  { %v10127_v2 = vpop.f32.mrf.mxu1 }
 0x6bb   :  { %v13113_v55 = vadd.f32 %v10127_v2, %v12803_v9  ;;  %v11033_v9 = vld [vmem:[#allocation2 + $0x744] ss:$16 sps:$4 sm:$0xff]  }
 0x6bc   :  { %v3559_v57 = vpop.f32.mrf.mxu1  ;;  %4416 = vmatprep.mubr.bf16.mxu1 %v11033_v9  ;;  %v13142_v9 = vpop.f32.mrf.mxu0 }
 0x6bd   :  { %14133 = vst [vmem:[#allocation50_spill] sm:$0xff] %v13113_v55  ;;  %v13116_v39 = vadd.f32 %v3559_v57, %v12806_v15  ;;  %4417 = vmatmul.mubr.bf16.gmra.mxu1 %v11031_v10 }
 0x6be   :  { %v10128_v36 = vpop.f32.mrf.mxu1  ;;  %4424 = vmatprep.mubr.bf16.mxu1 %v11039_v27  ;;  %v13144_v10 = vpop.f32.mrf.mxu0 }
 0x6bf   :  { %14134 = vst [vmem:[#allocation51_spill] sm:$0xff] %v13116_v39  ;;  %v13121_v49 = vadd.f32 %v10128_v36, %v12811_v4 }
 0x6c0   :  { %v13127_v48 = vpop.f32.mrf.mxu1 }
 0x6c1   :  { %14135 = vst [vmem:[#allocation54_spill] sm:$0xff] %v13121_v49  ;;  %14136 = vst [vmem:[#allocation55_spill] sm:$0xff] %v13127_v48 }
 0x6c5   :  { %4425 = vmatmul.mubr.bf16.gmra.mxu1 %v11037_v58 }
 0x6ca   :  { %v10131_v15 = vpop.f32.mrf.mxu1 }
 0x6cb   :  { %v13132_v2 = vadd.f32 %v10131_v15, %v12822_v8  ;;  %v11045_v8 = vld [vmem:[#allocation2 + $0x784] ss:$16 sps:$4 sm:$0xff]   ;;  %v11043_v15 = vld [vmem:[#allocation2 + $0x780] ss:$16 sps:$4 sm:$0xff]  }
 0x6cc   :  { %v3575_v4 = vpop.f32.mrf.mxu1  ;;  %4432 = vmatprep.mubr.bf16.mxu1 %v11045_v8 }
 0x6cd   :  { %14137 = vst [vmem:[#allocation56_spill] sm:$0xff] %v13132_v2  ;;  %v13135_v57 = vadd.f32 %v3575_v4, %v12825_v62  ;;  %4433 = vmatmul.mubr.bf16.gmra.mxu1 %v11043_v15  ;;  %v13148_v4 = vpop.f32.mrf.mxu0  ;;  %v11061_v2 = vld [vmem:[#allocation2 + $0x7e0] ss:$16 sps:$4 sm:$0xff]  }
 0x6ce   :  { %v10132_v36 = vpop.f32.mrf.mxu1  ;;  %4440 = vmatprep.mubr.bf16.mxu1 %v11051_v7 }
 0x6cf   :  { %14138 = vst [vmem:[#allocation58_spill] sm:$0xff] %v13135_v57  ;;  %v13140_v5 = vadd.f32 %v10132_v36, %v12830_v52  ;;  %v13156_v27 = vpop.f32.mrf.mxu0 }
 0x6d0   :  { %v13146_v41 = vpop.f32.mrf.mxu1 }
 0x6d1   :  { %14139 = vst [vmem:[#allocation59_spill] sm:$0xff] %v13140_v5  ;;  %14140 = vst [vmem:[#allocation60_spill] sm:$0xff] %v13146_v41  ;;  %v11049_v41 = vld [vmem:[#allocation2 + $0x7a0] ss:$16 sps:$4 sm:$0xff]   ;;  %v13161_v8 = vpop.f32.mrf.mxu0 }
 0x6d3   :  { %v13163_v15 = vpop.f32.mrf.mxu0 }
 0x6d5   :  { %4441 = vmatmul.mubr.bf16.gmra.mxu1 %v11049_v41 }
 0x6da   :  { %v10135_v62 = vpop.f32.mrf.mxu1 }
 0x6db   :  { %v13151_v48 = vadd.f32 %v10135_v62, %v12841_v50  ;;  %v11057_v50 = vld [vmem:[#allocation2 + $0x7c4] ss:$16 sps:$4 sm:$0xff]   ;;  %v11055_v62 = vld [vmem:[#allocation2 + $0x7c0] ss:$16 sps:$4 sm:$0xff]  }
 0x6dc   :  { %v3591_v52 = vpop.f32.mrf.mxu1  ;;  %4448 = vmatprep.mubr.bf16.mxu1 %v11057_v50 }
 0x6dd   :  { %14141 = vst [vmem:[#allocation62_spill] sm:$0xff] %v13151_v48  ;;  %v13154_v36 = vadd.f32 %v3591_v52, %v12844_v51  ;;  %4449 = vmatmul.mubr.bf16.gmra.mxu1 %v11055_v62  ;;  %v13167_v52 = vpop.f32.mrf.mxu0 }
 0x6de   :  { %v10136_v58 = vpop.f32.mrf.mxu1 }
 0x6df   :  { %14142 = vst [vmem:[#allocation63_spill] sm:$0xff] %v13154_v36  ;;  %v13159_v5 = vadd.f32 %v10136_v58, %v12849_v18  ;;  %v9478_v58 = vpop.f32.mrf.mxu0 }
 0x6e0   :  { %v13165_v48 = vpop.f32.mrf.mxu1 }
 0x6e1   :  { %14143 = vst [vmem:[#allocation64_spill] sm:$0xff] %v13159_v5  ;;  %14144 = vst [vmem:[#allocation65_spill] sm:$0xff] %v13165_v48  ;;  %v11063_v5 = vld [vmem:[#allocation2 + $0x7e4] ss:$16 sps:$4 sm:$0xff]   ;;  %v13180_v62 = vpop.f32.mrf.mxu0 }
 0x6e2   :  { %4456 = vmatprep.mubr.bf16.mxu1 %v11063_v5 }
 0x6e5   :  { %4457 = vmatmul.mubr.bf16.gmra.mxu1 %v11061_v2 }
 0x6ea   :  { %v10139_v51 = vpop.f32.mrf.mxu1 }
 0x6eb   :  { %v13170_v36 = vadd.f32 %v10139_v51, %v12860_v40 }
 0x6ec   :  { %v3607_v18 = vpop.f32.mrf.mxu1 }
 0x6ed   :  { %14145 = vst [vmem:[#allocation66_spill] sm:$0xff] %v13170_v36  ;;  %v13173_v7 = vadd.f32 %v3607_v18, %v12863_v28  ;;  %v13182_v36 = vpop.f32.mrf.mxu0 }
 0x6ee   :  { %v10140_v41 = vpop.f32.mrf.mxu1 }
 0x6ef   :  { %14146 = vst [vmem:[#allocation67_spill] sm:$0xff] %v13173_v7  ;;  %v13176_v57 = vadd.f32 %v10140_v41, %v12868_v54  ;;  %v9458_v7 = vadd.f32 %v13108_v31, %v13106_v12  ;;  %v9461_v54 = vadd.f32 %v13118_v38, %v13110_v35  ;;  %v9467_v12 = vadd.f32 %v13137_v22, %v13129_v17 }
 0x6f0   :  { %v13178_v48 = vpop.f32.mrf.mxu1 }
 0x6f1   :  { %14147 = vst [vmem:[#allocation68_spill] sm:$0xff] %v13176_v57  ;;  %14148 = vst [vmem:[#allocation69_spill] sm:$0xff] %v13178_v48  ;;  %v9483_v48 = vpop.f32.mrf.mxu0 }
 0x6f2   :  { %v9520_v50 = vpop.f32.mrf.mxu1 }
 0x6f3   :  { %v9484_v11 = vpop.f32.mrf.mxu0 }
 0x6f4   :  { %v9521_v40 = vpop.f32.mrf.mxu1 }
 0x6f5   :  { %v9522_v28 = vadd.f32 %v9521_v40, %v9520_v50  ;;  %v9464_v40 = vadd.f32 %v13125_v14, %v13123_v59  ;;  %v13193_v38 = vpop.f32.mrf.mxu0  ;;  %v9470_v59 = vadd.f32 %v13144_v10, %v13142_v9  ;;  %v9479_v10 = vadd.f32 %v9478_v58, %v13167_v52 }
 0x6f6   :  { %v9523_v51 = vpop.f32.mrf.mxu1 }
 0x6f7   :  { %v3963_v5 = vadd.f32 %v9522_v28, %v9458_v7 }
 0x6f8   :  { %v9524_v18 = vpop.f32.mrf.mxu1 }
 0x6f9   :  { %v9525_v41 = vadd.f32 %v9524_v18, %v9523_v51 }
 0x6fa   :  { %v9526_v57 = vpop.f32.mrf.mxu1 }
 0x6fb   :  { %v3966_v2 = vadd.f32 %v9525_v41, %v9461_v54  ;;  %v9487_v41 = vpop.f32.mrf.mxu0 }
 0x6fc   :  { %v9527_v49 = vpop.f32.mrf.mxu1 }
 0x6fd   :  { %v4025_v39 = vpack.c.bf16 %v3966_v2, %v3963_v5  ;;  %v9528_v34 = vadd.f32 %v9527_v49, %v9526_v57  ;;  %v9489_v17 = vpop.f32.mrf.mxu0 }
 0x6fe   :  { %v9529_v55 = vpop.f32.mrf.mxu1 }
 0x6ff   :  { %10143 = vmatprep.mubr.msk.bf16.mxu0 %vm1240_vm1, %v4025_v39  ;;  %v3971_v7 = vadd.f32 %v9528_v34, %v9464_v40 }
 0x700   :  { %v9530_v50 = vpop.f32.mrf.mxu1 }
 0x701   :  { %v9531_v31 = vadd.f32 %v9530_v50, %v9529_v55  ;;  %v9473_v55 = vadd.f32 %v13156_v27, %v13148_v4  ;;  %v9490_v50 = vpop.f32.mrf.mxu0 }
 0x702   :  { %v9532_v35 = vpop.f32.mrf.mxu1 }
 0x703   :  { %v3974_v51 = vadd.f32 %v9531_v31, %v9467_v12  ;;  %v9492_v27 = vpop.f32.mrf.mxu0 }
 0x704   :  { %v9533_v28 = vpop.f32.mrf.mxu1 }
 0x705   :  { %v4026_v18 = vpack.c.bf16 %v3974_v51, %v3971_v7  ;;  %v9534_v49 = vadd.f32 %v9533_v28, %v9532_v35 }
 0x706   :  { %v9535_v54 = vpop.f32.mrf.mxu1 }
 0x707   :  { %10144 = vmatmul.mubr.msk.bf16.vlgmr.msra.gmra.mxu0 %vm1240_vm1, %v4026_v18  ;;  %v3979_v57 = vadd.f32 %v9534_v49, %v9470_v59 }
 0x708   :  { %v9536_v39 = vpop.f32.mrf.mxu1  ;;  %9642 = vmatpush3.bf16.msra.mxu0 %v12897_v0 }
 0x709   :  { %v9537_v14 = vadd.f32 %v9536_v39, %v9535_v54  ;;  %9643 = vmatprep.subr.bf16.mxu0 %v12907_v60  ;;  %v9476_v60 = vadd.f32 %v13163_v15, %v13161_v8  ;;  %v9485_v15 = vadd.f32 %v9484_v11, %v9483_v48  ;;  %v9491_v11 = vadd.f32 %v9490_v50, %v9489_v17 }
 0x70a   :  { %v9538_v34 = vpop.f32.mrf.mxu1 }
 0x70b   :  { %v3982_v22 = vadd.f32 %v9537_v14, %v9473_v55 }
 0x70c   :  { %v9539_v5 = vpop.f32.mrf.mxu1  ;;  %9644 = vmatpush3.bf16.msra.mxu0 %v12913_v19 }
 0x70d   :  { %v4027_v2 = vpack.c.bf16 %v3982_v22, %v3979_v57  ;;  %9645 = vmatprep.subr.bf16.mxu0 %v12919_v30  ;;  %v9540_v40 = vadd.f32 %v9539_v5, %v9538_v34  ;;  %v11254_v34 = vld [vmem:[%s14054_s20 + $0x78] sm:$0xff]  }
 0x70e   :  { %v9541_v0 = vpop.f32.mrf.mxu1 }
 0x70f   :  { %10147 = vmatprep.mubr.msk.bf16.mxu0 %vm1240_vm1, %v4027_v2  ;;  %v3987_v12 = vadd.f32 %v9540_v40, %v9476_v60 }
 0x710   :  { %v9542_v9 = vpop.f32.mrf.mxu1  ;;  %9646 = vmatpush3.bf16.msra.mxu0 %v12926_v42  ;;  %v9493_v42 = vpop.f32.mrf.mxu0 }
 0x711   :  { %v9543_v4 = vadd.f32 %v9542_v9, %v9541_v0  ;;  %9647 = vmatprep.subr.bf16.mxu0 %v12936_v45  ;;  %v9482_v45 = vadd.f32 %v13182_v36, %v13180_v62 }
 0x712   :  { %v9544_v19 = vpop.f32.mrf.mxu1 }
 0x713   :  { %v3990_v30 = vadd.f32 %v9543_v4, %v9479_v10 }
 0x714   :  { %v9545_v31 = vpop.f32.mrf.mxu1  ;;  %9648 = vmatpush3.bf16.msra.mxu0 %v12942_v13  ;;  %v9495_v13 = vpop.f32.mrf.mxu0 }
 0x715   :  { %v4028_v35 = vpack.c.bf16 %v3990_v30, %v3987_v12  ;;  %9649 = vmatprep.subr.bf16.mxu0 %v12948_v46  ;;  %v9546_v51 = vadd.f32 %v9545_v31, %v9544_v19 }
 0x716   :  { %v9547_v7 = vpop.f32.mrf.mxu1  ;;  %v9496_v39 = vpop.f32.mrf.mxu0 }
 0x717   :  { %10148 = vmatmul.mubr.msk.bf16.gmra.mxu0 %vm1240_vm1, %v4028_v35  ;;  %v3995_v28 = vadd.f32 %v9546_v51, %v9482_v45  ;;  %v9497_v17 = vadd.f32 %v9496_v39, %v9495_v13  ;;  %v11030_v51 = vld [vmem:[#allocation2 + $0x72c] ss:$16 sps:$4 sm:$0xff]   ;;  %v11069_v13 = vld [vmem:[#allocation2 + $0x804] ss:$16 sps:$4 sm:$0xff]  }
 0x718   :  { %v9548_v8 = vpop.f32.mrf.mxu1  ;;  %9650 = vmatpush3.bf16.msra.mxu0 %v12955_v43  ;;  %v9498_v59 = vpop.f32.mrf.mxu0  ;;  %v11036_v45 = vld [vmem:[#allocation2 + $0x74c] ss:$16 sps:$4 sm:$0xff]  }
 0x719   :  { %v9549_v52 = vadd.f32 %v9548_v8, %v9547_v7  ;;  %9651 = vmatprep.subr.bf16.mxu0 %v12965_v21  ;;  %v9488_v21 = vadd.f32 %v9487_v41, %v13193_v38  ;;  %v11028_v8 = vld [vmem:[#allocation2 + $0x728] ss:$16 sps:$4 sm:$0xff]  }
 0x71a   :  { %v9550_v58 = vpop.f32.mrf.mxu1 }
 0x71b   :  { %v3998_v18 = vadd.f32 %v9549_v52, %v9485_v15  ;;  %v11034_v15 = vld [vmem:[#allocation2 + $0x748] ss:$16 sps:$4 sm:$0xff]   ;;  %v11042_v52 = vld [vmem:[#allocation2 + $0x76c] ss:$16 sps:$4 sm:$0xff]  }
 0x71c   :  { %v9551_v46 = vpop.f32.mrf.mxu1  ;;  %9652 = vmatpush3.bf16.msra.mxu0 %v12971_v24 }
 0x71d   :  { %v4029_v54 = vpack.c.bf16 %v3998_v18, %v3995_v28  ;;  %9653 = vmatprep.subr.bf16.mxu0 %v12977_v63  ;;  %v9552_v43 = vadd.f32 %v9551_v46, %v9550_v58  ;;  %v11067_v28 = vld [vmem:[#allocation2 + $0x800] ss:$16 sps:$4 sm:$0xff]  }
 0x71e   :  { %v9553_v49 = vpop.f32.mrf.mxu1 }
 0x71f   :  { %10151 = vmatprep.mubr.msk.bf16.mxu0 %vm1240_vm1, %v4029_v54  ;;  %v4003_v24 = vadd.f32 %v9552_v43, %v9488_v21  ;;  %v14151_v54 = vld [vmem:[#allocation50_spill] sm:$0xff]  ;;  %v14152_v43 = vld [vmem:[#allocation51_spill] sm:$0xff] }
 0x720   :  { %v9554_v36 = vpop.f32.mrf.mxu1  ;;  %9654 = vmatpush3.bf16.msra.mxu0 %v12984_v37  ;;  %v9499_v37 = vpop.f32.mrf.mxu0 }
 0x721   :  { %v9555_v48 = vadd.f32 %v9554_v36, %v9553_v49  ;;  %9655 = vmatprep.subr.bf16.mxu0 %v12992_v3  ;;  %v9494_v3 = vadd.f32 %v9493_v42, %v9492_v27  ;;  %v9500_v19 = vadd.f32 %v9499_v37, %v9498_v59  ;;  %v11024_v27 = vld [vmem:[#allocation2 + $0x70c] ss:$16 sps:$4 sm:$0xff]   ;;  %v11022_v42 = vld [vmem:[#allocation2 + $0x708] ss:$16 sps:$4 sm:$0xff]  }
 0x722   :  { %v9556_v62 = vpop.f32.mrf.mxu1  ;;  %v9501_v5 = vpop.f32.mrf.mxu0 }
 0x723   :  { %v4006_v55 = vadd.f32 %v9555_v48, %v9491_v11  ;;  %v11075_v48 = vld [vmem:[#allocation2 + $0x824] ss:$16 sps:$4 sm:$0xff]  }
 0x724   :  { %v9557_v14 = vpop.f32.mrf.mxu1  ;;  %9656 = vmatpush3.bf16.msra.mxu0 %v12998_v20  ;;  %v9502_v9 = vpop.f32.mrf.mxu0 }
 0x725   :  { %v4030_v63 = vpack.c.bf16 %v4006_v55, %v4003_v24  ;;  %9714 = vmatprep.subr.bf16.mxu0 %v11254_v34  ;;  %v9558_v38 = vadd.f32 %v9557_v14, %v9556_v62  ;;  %v9503_v12 = vadd.f32 %v9502_v9, %v9501_v5  ;;  %v14153_v62 = vld [vmem:[#allocation54_spill] sm:$0xff]  ;;  %v11073_v24 = vld [vmem:[#allocation2 + $0x820] ss:$16 sps:$4 sm:$0xff]  }
 0x726   :  { %v9559_v57 = vpop.f32.mrf.mxu1  ;;  %v11079_v34 = vld [vmem:[#allocation2 + $0x840] ss:$16 sps:$4 sm:$0xff]  }
 0x727   :  { %10152 = vmatmul.mubr.msk.bf16.gmra.mxu0 %vm1240_vm1, %v4030_v63  ;;  %v4011_v0 = vadd.f32 %v9558_v38, %v9494_v3  ;;  %v11081_v63 = vld [vmem:[#allocation2 + $0x844] ss:$16 sps:$4 sm:$0xff]   ;;  %v11085_v9 = vld [vmem:[#allocation2 + $0x860] ss:$16 sps:$4 sm:$0xff]  }
 0x728   :  { %v9560_v41 = vpop.f32.mrf.mxu1 }
 0x729   :  { %v9561_v22 = vadd.f32 %v9560_v41, %v9559_v57  ;;  %v14154_v41 = vld [vmem:[#allocation56_spill] sm:$0xff] }
 0x72a   :  { %v9562_v2 = vpop.f32.mrf.mxu1 }
 0x72b   :  { %v4014_v50 = vadd.f32 %v9561_v22, %v9497_v17  ;;  %v14155_v22 = vld [vmem:[#allocation58_spill] sm:$0xff] }
 0x72c   :  { %v9563_v20 = vpop.f32.mrf.mxu1 }
 0x72d   :  { %v4031_v40 = vpack.c.bf16 %v4014_v50, %v4011_v0  ;;  %v9564_v10 = vadd.f32 %v9563_v20, %v9562_v2  ;;  %v11087_v50 = vld [vmem:[#allocation2 + $0x864] ss:$16 sps:$4 sm:$0xff]   ;;  %v14156_v20 = vld [vmem:[#allocation59_spill] sm:$0xff] }
 0x72e   :  { %v9565_v60 = vpop.f32.mrf.mxu1 }
 0x72f   :  { %10155 = vmatprep.mubr.msk.bf16.mxu0 %vm1240_vm1, %v4031_v40  ;;  %v4019_v31 = vadd.f32 %v9564_v10, %v9500_v19  ;;  %v11091_v19 = vld [vmem:[#allocation2 + $0x880] ss:$16 sps:$4 sm:$0xff]  }
 0x730   :  { %v9566_v4 = vpop.f32.mrf.mxu1 }
 0x731   :  { %v9567_v30 = vadd.f32 %v9566_v4, %v9565_v60  ;;  %v11093_v4 = vld [vmem:[#allocation2 + $0x884] ss:$16 sps:$4 sm:$0xff]  }
 0x733   :  { %v4022_v35 = vadd.f32 %v9567_v30, %v9503_v12 }
 0x735   :  { %v4032_v7 = vpack.c.bf16 %v4022_v35, %v4019_v31  ;;  %v14157_v35 = vld [vmem:[#allocation62_spill] sm:$0xff] }
 0x737   :  { %10156 = vmatmul.mubr.msk.bf16.gmra.mxu0 %vm1240_vm1, %v4032_v7 }
 0x738   :  { %4497 = vmatprep.mubr.bf16.mxu0 %v11024_v27 }
 0x73f   :  { %4498 = vmatmul.mubr.bf16.vlgmr.msra.gmra.mxu0 %v11022_v42  ;;  %v14158_v42 = vld [vmem:[#allocation63_spill] sm:$0xff] }
 0x740   :  { %4505 = vmatprep.mubr.bf16.mxu0 %v11030_v51  ;;  %9715 = vmatpush3.bf16.msra.mxu0 %v13008_v29  ;;  %v11040_v29 = vld [vmem:[#allocation2 + $0x768] ss:$16 sps:$4 sm:$0xff]  }
 0x741   :  { %9716 = vmatprep.subr.bf16.mxu0 %v13014_v53  ;;  %v11048_v53 = vld [vmem:[#allocation2 + $0x78c] ss:$16 sps:$4 sm:$0xff]  }
 0x744   :  { %9717 = vmatpush3.bf16.msra.mxu0 %v13020_v25  ;;  %v11046_v25 = vld [vmem:[#allocation2 + $0x788] ss:$16 sps:$4 sm:$0xff]  }
 0x745   :  { %9718 = vmatprep.subr.bf16.mxu0 %v13026_v16  ;;  %v11054_v16 = vld [vmem:[#allocation2 + $0x7ac] ss:$16 sps:$4 sm:$0xff]  }
 0x747   :  { %4506 = vmatmul.mubr.bf16.gmra.mxu0 %v11028_v8 }
 0x748   :  { %4513 = vmatprep.mubr.bf16.mxu0 %v11036_v45  ;;  %9719 = vmatpush3.bf16.msra.mxu0 %v13032_v33  ;;  %v14149_v33 = vld [vmem:[#allocation46_spill] sm:$0xff] }
 0x749   :  { %9720 = vmatprep.subr.bf16.mxu0 %v13038_v47  ;;  %v11052_v47 = vld [vmem:[#allocation2 + $0x7a8] ss:$16 sps:$4 sm:$0xff]  }
 0x74c   :  { %9721 = vmatpush3.bf16.msra.mxu0 %v13044_v61  ;;  %v11060_v61 = vld [vmem:[#allocation2 + $0x7cc] ss:$16 sps:$4 sm:$0xff]  }
 0x74d   :  { %9722 = vmatprep.subr.bf16.mxu0 %v13050_v44  ;;  %v11058_v44 = vld [vmem:[#allocation2 + $0x7c8] ss:$16 sps:$4 sm:$0xff]  }
 0x74f   :  { %4514 = vmatmul.mubr.bf16.gmra.mxu0 %v11034_v15  ;;  %v11099_v15 = vld [vmem:[#allocation2 + $0x8a4] ss:$16 sps:$4 sm:$0xff]  }
 0x750   :  { %4521 = vmatprep.mubr.bf16.mxu0 %v11042_v52  ;;  %9723 = vmatpush3.bf16.msra.mxu0 %v13056_v56  ;;  %v11066_v56 = vld [vmem:[#allocation2 + $0x7ec] ss:$16 sps:$4 sm:$0xff]   ;;  %v14159_v52 = vld [vmem:[#allocation64_spill] sm:$0xff] }
 0x751   :  { %9724 = vmatprep.subr.bf16.mxu0 %v13062_v26  ;;  %v11064_v26 = vld [vmem:[#allocation2 + $0x7e8] ss:$16 sps:$4 sm:$0xff]  }
 0x754   :  { %9725 = vmatpush3.bf16.msra.mxu0 %v13068_v1  ;;  %v8476_v1 = vld [vmem:[%s14030_s2 + $0xe] sm:$0x3] }
 0x755   :  { %9726 = vmatprep.subr.bf16.mxu0 %v13074_v23  ;;  %10618 = vmatprep.subr.msk.bf16.mxu1 %vm1265_vm0, %v8476_v1  ;;  %v4597_v23 = vsel %vm1265_vm0, %v8476_v1, 0 }
 0x756   :  { %10160 = vmatpush3.bf16.msra.mxu1 %v4597_v23 }
 0x757   :  { %4522 = vmatmul.mubr.bf16.gmra.mxu0 %v11040_v29 }
 0x758   :  { %4529 = vmatprep.mubr.bf16.mxu0 %v11048_v53  ;;  %9727 = vmatpush3.bf16.msra.mxu0 %v13080_v32  ;;  %v14150_v32 = vld [vmem:[#allocation48_spill] sm:$0xff]  ;;  %v11097_v53 = vld [vmem:[#allocation2 + $0x8a0] ss:$16 sps:$4 sm:$0xff]  }
 0x759   :  { %9728 = vmatprep.subr.bf16.mxu0 %v13086_v6  ;;  %9778 = vmatprep.subr.bf16.mxu1 %v14150_v32  ;;  %v13251_v6 = vpop.f32.mrf.mxu1  ;;  %v14161_v32 = vld [vmem:[#allocation67_spill] sm:$0xff] }
 0x75b   :  { %v13253_v58 = vpop.f32.mrf.mxu1 }
 0x75c   :  { %9729 = vmatpush3.bf16.msra.mxu0 %v14149_v33  ;;  %v11105_v33 = vld [vmem:[#allocation2 + $0x8c4] ss:$16 sps:$4 sm:$0xff]  }
 0x75d   :  { %v13255_v46 = vpop.f32.mrf.mxu1 }
 0x75f   :  { %4530 = vmatmul.mubr.bf16.gmra.mxu0 %v11046_v25  ;;  %v13263_v11 = vpop.f32.mrf.mxu1 }
 0x760   :  { %4537 = vmatprep.mubr.bf16.mxu0 %v11054_v16 }
 0x761   :  { %v13268_v55 = vpop.f32.mrf.mxu1 }
 0x763   :  { %v13270_v14 = vpop.f32.mrf.mxu1 }
 0x765   :  { %v13274_v38 = vpop.f32.mrf.mxu1 }
 0x767   :  { %4538 = vmatmul.mubr.bf16.gmra.mxu0 %v11052_v47  ;;  %v13282_v0 = vpop.f32.mrf.mxu1  ;;  %v11103_v47 = vld [vmem:[#allocation2 + $0x8c0] ss:$16 sps:$4 sm:$0xff]  }
 0x768   :  { %4545 = vmatprep.mubr.bf16.mxu0 %v11060_v61 }
 0x76f   :  { %4546 = vmatmul.mubr.bf16.gmra.mxu0 %v11058_v44 }
 0x770   :  { %4553 = vmatprep.mubr.bf16.mxu0 %v11066_v56 }
 0x777   :  { %4554 = vmatmul.mubr.bf16.gmra.mxu0 %v11064_v26  ;;  %v14160_v26 = vld [vmem:[#allocation66_spill] sm:$0xff] }
 0x778   :  { %4937 = vmatprep.mubr.bf16.mxu0 %v11069_v13 }
 0x77d   :  { %v13287_v60 = vpop.f32.mrf.mxu1 }
 0x77f   :  { %4938 = vmatmul.mubr.bf16.vlgmr.msra.gmra.mxu0 %v11067_v28  ;;  %v13289_v10 = vpop.f32.mrf.mxu1 }
 0x780   :  { %4945 = vmatprep.mubr.bf16.mxu0 %v11075_v48 }
 0x781   :  { %v13293_v31 = vpop.f32.mrf.mxu1 }
 0x783   :  { %v13301_v45 = vpop.f32.mrf.mxu1 }
 0x785   :  { %v13306_v25 = vpop.f32.mrf.mxu1 }
 0x787   :  { %4946 = vmatmul.mubr.bf16.gmra.mxu0 %v11073_v24  ;;  %v13308_v16 = vpop.f32.mrf.mxu1 }
 0x788   :  { %4953 = vmatprep.mubr.bf16.mxu0 %v11081_v63 }
 0x789   :  { %v13312_v56 = vpop.f32.mrf.mxu1 }
 0x78f   :  { %4954 = vmatmul.mubr.bf16.gmra.mxu0 %v11079_v34 }
 0x790   :  { %4961 = vmatprep.mubr.bf16.mxu0 %v11087_v50 }
 0x797   :  { %4962 = vmatmul.mubr.bf16.gmra.mxu0 %v11085_v9 }
 0x798   :  { %4969 = vmatprep.mubr.bf16.mxu0 %v11093_v4 }
 0x79f   :  { %4970 = vmatmul.mubr.bf16.gmra.mxu0 %v11091_v19 }
 0x7a0   :  { %4977 = vmatprep.mubr.bf16.mxu0 %v11099_v15 }
 0x7a7   :  { %4978 = vmatmul.mubr.bf16.gmra.mxu0 %v11097_v53 }
 0x7a8   :  { %4985 = vmatprep.mubr.bf16.mxu0 %v11105_v33 }
 0x7af   :  { %4986 = vmatmul.mubr.bf16.gmra.mxu0 %v11103_v47 }
 0x7c7   :  { %v10145_v18 = vpop.f32.mrf.mxu0 }
 0x7c8   :  { %v13258_v49 = vadd.f32 %v10145_v18, %v14151_v54  ;;  %v13320_v18 = vpop.f32.mrf.mxu1  ;;  %v11111_v54 = vld [vmem:[#allocation2 + $0x8e4] ss:$16 sps:$4 sm:$0xff]  }
 0x7c9   :  { %v4096_v39 = vpop.f32.mrf.mxu0  ;;  %4993 = vmatprep.mubr.bf16.mxu0 %v11111_v54  ;;  %v11256_v54 = vld [vmem:[%s14054_s20 + $0xf0] sm:$0xff]  }
 0x7ca   :  { %v13261_v36 = vadd.f32 %v4096_v39, %v14152_v43  ;;  %v14162_v39 = vld [vmem:[#allocation68_spill] sm:$0xff]  ;;  %v13327_v24 = vpop.f32.mrf.mxu1 }
 0x7cb   :  { %v10146_v21 = vpop.f32.mrf.mxu0 }
 0x7cc   :  { %v13266_v59 = vadd.f32 %v10146_v21, %v14153_v62  ;;  %v11109_v21 = vld [vmem:[#allocation2 + $0x8e0] ss:$16 sps:$4 sm:$0xff]  }
 0x7cd   :  { %v13272_v37 = vpop.f32.mrf.mxu0  ;;  %4994 = vmatmul.mubr.bf16.gmra.mxu0 %v11109_v21 }
 0x7d7   :  { %v10149_v57 = vpop.f32.mrf.mxu0 }
 0x7d8   :  { %v13277_v3 = vadd.f32 %v10149_v57, %v14154_v41  ;;  %v13329_v57 = vpop.f32.mrf.mxu1 }
 0x7d9   :  { %v4112_v17 = vpop.f32.mrf.mxu0 }
 0x7da   :  { %v13280_v5 = vadd.f32 %v4112_v17, %v14155_v22  ;;  %v9595_v22 = vadd.f32 %v13253_v58, %v13251_v6  ;;  %v13335_v9 = vpop.f32.mrf.mxu1  ;;  %v9601_v6 = vadd.f32 %v13270_v14, %v13268_v55  ;;  %v9604_v58 = vadd.f32 %v13282_v0, %v13274_v38  ;;  %v11255_v55 = vld [vmem:[%s14054_s20 + $0xb8] sm:$0xff]  }
 0x7db   :  { %v10150_v2 = vpop.f32.mrf.mxu0  ;;  %v9607_v14 = vadd.f32 %v13289_v10, %v13287_v60  ;;  %v9610_v38 = vadd.f32 %v13301_v45, %v13293_v31  ;;  %v11258_v10 = vld [vmem:[%s14054_s20 + $0xe8] sm:$0xff]  }
 0x7dc   :  { %v13285_v40 = vadd.f32 %v10150_v2, %v14156_v20  ;;  %v9598_v2 = vadd.f32 %v13263_v11, %v13255_v46 }
 0x7dd   :  { %v13291_v12 = vpop.f32.mrf.mxu0 }
 0x7e7   :  { %v10153_v30 = vpop.f32.mrf.mxu0 }
 0x7e8   :  { %v13296_v27 = vadd.f32 %v10153_v30, %v14157_v35 }
 0x7e9   :  { %v4128_v7 = vpop.f32.mrf.mxu0 }
 0x7ea   :  { %v13299_v51 = vadd.f32 %v4128_v7, %v14158_v42  ;;  %v13337_v42 = vpop.f32.mrf.mxu1 }
 0x7eb   :  { %v10154_v8 = vpop.f32.mrf.mxu0 }
 0x7ec   :  { %v13304_v29 = vadd.f32 %v10154_v8, %v14159_v52  ;;  %v13344_v52 = vpop.f32.mrf.mxu1 }
 0x7ed   :  { %v13310_v61 = vpop.f32.mrf.mxu0 }
 0x7f7   :  { %v10157_v44 = vpop.f32.mrf.mxu0 }
 0x7f8   :  { %v13315_v1 = vadd.f32 %v10157_v44, %v14160_v26 }
 0x7f9   :  { %v4144_v23 = vpop.f32.mrf.mxu0 }
 0x7fa   :  { %v13318_v13 = vadd.f32 %v4144_v23, %v14161_v32  ;;  %v13346_v23 = vpop.f32.mrf.mxu1 }
 0x7fb   :  { %v10158_v28 = vpop.f32.mrf.mxu0 }
 0x7fc   :  { %v13323_v43 = vadd.f32 %v10158_v28, %v14162_v39  ;;  %v9626_v21 = vpop.f32.mrf.mxu1 }
 0x7fd   :  { %v13325_v48 = vpop.f32.mrf.mxu0 }
 0x7fe   :  { %v9627_v45 = vpop.f32.mrf.mxu1 }
 0x7ff   :  { %v9657_v62 = vpop.f32.mrf.mxu0 }
 0x801   :  { %v9658_v63 = vpop.f32.mrf.mxu0 }
 0x802   :  { %v9659_v41 = vadd.f32 %v9658_v63, %v9657_v62 }
 0x803   :  { %v9660_v34 = vpop.f32.mrf.mxu0 }
 0x804   :  { %v4500_v4 = vadd.f32 %v9659_v41, %v9595_v22  ;;  %v11257_v41 = vld [vmem:[%s14054_s20 + $0xb0] sm:$0xff]  }
 0x805   :  { %v9661_v17 = vpop.f32.mrf.mxu0 }
 0x806   :  { %v9662_v50 = vadd.f32 %v9661_v17, %v9660_v34 }
 0x807   :  { %v9663_v20 = vpop.f32.mrf.mxu0 }
 0x808   :  { %v4503_v19 = vadd.f32 %v9662_v50, %v9598_v2  ;;  %v11259_v2 = vld [vmem:[%s14054_s20 + $0xa8] sm:$0xff]   ;;  %v9613_v50 = vadd.f32 %v13308_v16, %v13306_v25  ;;  %v11262_v16 = vld [vmem:[%s14054_s20 + $0xd8] sm:$0xff]  }
 0x809   :  { %v9664_v30 = vpop.f32.mrf.mxu0 }
 0x80a   :  { %v4562_v35 = vpack.c.bf16 %v4503_v19, %v4500_v4  ;;  %v9665_v8 = vadd.f32 %v9664_v30, %v9663_v20  ;;  %v9616_v20 = vadd.f32 %v13320_v18, %v13312_v56  ;;  %v11260_v19 = vld [vmem:[%s14054_s20 + $0xe0] sm:$0xff]  }
 0x80b   :  { %v9666_v7 = vpop.f32.mrf.mxu0 }
 0x80c   :  { %10161 = vmatprep.mubr.msk.bf16.mxu1 %vm1240_vm1, %v4562_v35  ;;  %v4508_v53 = vadd.f32 %v9665_v8, %v9601_v6  ;;  %v9629_v35 = vpop.f32.mrf.mxu1  ;;  %v11261_v6 = vld [vmem:[%s14054_s20 + $0xa0] sm:$0xff]  }
 0x80d   :  { %v9667_v15 = vpop.f32.mrf.mxu0 }
 0x80e   :  { %v9668_v46 = vadd.f32 %v9667_v15, %v9666_v7  ;;  %v9630_v18 = vpop.f32.mrf.mxu1 }
 0x80f   :  { %v9669_v11 = vpop.f32.mrf.mxu0 }
 0x810   :  { %v4511_v33 = vadd.f32 %v9668_v46, %v9604_v58 }
 0x811   :  { %v9670_v47 = vpop.f32.mrf.mxu0 }
 0x812   :  { %v4563_v44 = vpack.c.bf16 %v4511_v33, %v4508_v53  ;;  %v9671_v32 = vadd.f32 %v9670_v47, %v9669_v11  ;;  %v11263_v11 = vld [vmem:[%s14054_s20 + $0x98] sm:$0xff]   ;;  %v9619_v53 = vadd.f32 %v13329_v57, %v13327_v24  ;;  %v9622_v33 = vadd.f32 %v13337_v42, %v13335_v9  ;;  %v11266_v57 = vld [vmem:[%s14054_s20 + $0xc8] sm:$0xff]  }
 0x813   :  { %v9672_v26 = vpop.f32.mrf.mxu0 }
 0x814   :  { %10162 = vmatmul.mubr.msk.bf16.vlgmr.msra.gmra.mxu1 %vm1240_vm1, %v4563_v44  ;;  %v4516_v62 = vadd.f32 %v9671_v32, %v9607_v14  ;;  %v11264_v44 = vld [vmem:[%s14054_s20 + $0xd0] sm:$0xff]   ;;  %v9632_v32 = vpop.f32.mrf.mxu1 }
 0x815   :  { %v9673_v28 = vpop.f32.mrf.mxu0  ;;  %9779 = vmatpush3.bf16.msra.mxu1 %v11255_v55 }
 0x816   :  { %v9674_v0 = vadd.f32 %v9673_v28, %v9672_v26  ;;  %9780 = vmatprep.subr.bf16.mxu1 %v11256_v54  ;;  %v9633_v42 = vpop.f32.mrf.mxu1 }
 0x817   :  { %v9675_v39 = vpop.f32.mrf.mxu0 }
 0x818   :  { %v4519_v63 = vadd.f32 %v9674_v0, %v9610_v38  ;;  %v11265_v38 = vld [vmem:[%s14054_s20 + $0x90] sm:$0xff]  }
 0x819   :  { %v9676_v34 = vpop.f32.mrf.mxu0  ;;  %9781 = vmatpush3.bf16.msra.mxu1 %v11257_v41  ;;  %v11268_v41 = vld [vmem:[%s14054_s20 + $0xc0] sm:$0xff]  }
 0x81a   :  { %v4564_v60 = vpack.c.bf16 %v4519_v63, %v4516_v62  ;;  %9782 = vmatprep.subr.bf16.mxu1 %v11258_v10  ;;  %v9677_v17 = vadd.f32 %v9676_v34, %v9675_v39  ;;  %v11267_v39 = vld [vmem:[%s14054_s20 + $0x88] sm:$0xff]   ;;  %v9625_v62 = vadd.f32 %v13346_v23, %v13344_v52  ;;  %v9628_v63 = vadd.f32 %v9627_v45, %v9626_v21  ;;  %v9635_v10 = vpop.f32.mrf.mxu1 }
 0x81b   :  { %v9678_v31 = vpop.f32.mrf.mxu0  ;;  %v9631_v45 = vadd.f32 %v9630_v18, %v9629_v35  ;;  %v11072_v35 = vld [vmem:[#allocation2 + $0x80c] ss:$16 sps:$4 sm:$0xff]  }
 0x81c   :  { %10165 = vmatprep.mubr.msk.bf16.mxu1 %vm1240_vm1, %v4564_v60  ;;  %v4524_v7 = vadd.f32 %v9677_v17, %v9613_v50 }
 0x81d   :  { %v9679_v22 = vpop.f32.mrf.mxu0  ;;  %9783 = vmatpush3.bf16.msra.mxu1 %v11259_v2  ;;  %v11269_v2 = vld [vmem:[%s14054_s20 + $0x80] sm:$0xff]  }
 0x81e   :  { %v9680_v4 = vadd.f32 %v9679_v22, %v9678_v31  ;;  %9784 = vmatprep.subr.bf16.mxu1 %v11260_v19 }
 0x81f   :  { %v9681_v30 = vpop.f32.mrf.mxu0 }
 0x820   :  { %v4527_v8 = vadd.f32 %v9680_v4, %v9616_v20  ;;  %v9636_v20 = vpop.f32.mrf.mxu1  ;;  %v9634_v4 = vadd.f32 %v9633_v42, %v9632_v32  ;;  %v11078_v32 = vld [vmem:[#allocation2 + $0x82c] ss:$16 sps:$4 sm:$0xff]  }
 0x821   :  { %v9682_v15 = vpop.f32.mrf.mxu0  ;;  %9785 = vmatpush3.bf16.msra.mxu1 %v11261_v6  ;;  %v11102_v42 = vld [vmem:[#allocation2 + $0x8ac] ss:$16 sps:$4 sm:$0xff]  }
 0x822   :  { %v4565_v25 = vpack.c.bf16 %v4527_v8, %v4524_v7  ;;  %9786 = vmatprep.subr.bf16.mxu1 %v11262_v16  ;;  %v9683_v58 = vadd.f32 %v9682_v15, %v9681_v30  ;;  %v9638_v30 = vpop.f32.mrf.mxu1 }
 0x823   :  { %v9684_v56 = vpop.f32.mrf.mxu0 }
 0x824   :  { %10166 = vmatmul.mubr.msk.bf16.gmra.mxu1 %vm1240_vm1, %v4565_v25  ;;  %v4532_v28 = vadd.f32 %v9683_v58, %v9619_v53  ;;  %v9639_v16 = vpop.f32.mrf.mxu1 }
 0x825   :  { %v9685_v46 = vpop.f32.mrf.mxu0  ;;  %9787 = vmatpush3.bf16.msra.mxu1 %v11263_v11  ;;  %v9637_v11 = vadd.f32 %v9636_v20, %v9635_v10  ;;  %v9640_v53 = vadd.f32 %v9639_v16, %v9638_v30 }
 0x826   :  { %v9686_v47 = vadd.f32 %v9685_v46, %v9684_v56  ;;  %9788 = vmatprep.subr.bf16.mxu1 %v11264_v44 }
 0x827   :  { %v9687_v26 = vpop.f32.mrf.mxu0 }
 0x828   :  { %v4535_v55 = vadd.f32 %v9686_v47, %v9622_v33 }
 0x829   :  { %v9688_v14 = vpop.f32.mrf.mxu0  ;;  %9789 = vmatpush3.bf16.msra.mxu1 %v11265_v38  ;;  %v11090_v38 = vld [vmem:[#allocation2 + $0x86c] ss:$16 sps:$4 sm:$0xff]  }
 0x82a   :  { %v4566_v24 = vpack.c.bf16 %v4535_v55, %v4532_v28  ;;  %9790 = vmatprep.subr.bf16.mxu1 %v11266_v57  ;;  %v9689_v0 = vadd.f32 %v9688_v14, %v9687_v26  ;;  %v11070_v26 = vld [vmem:[#allocation2 + $0x808] ss:$16 sps:$4 sm:$0xff]   ;;  %v11084_v55 = vld [vmem:[#allocation2 + $0x84c] ss:$16 sps:$4 sm:$0xff]  }
 0x82b   :  { %v9690_v9 = vpop.f32.mrf.mxu0  ;;  %v11076_v28 = vld [vmem:[#allocation2 + $0x828] ss:$16 sps:$4 sm:$0xff]   ;;  %v11096_v57 = vld [vmem:[#allocation2 + $0x88c] ss:$16 sps:$4 sm:$0xff]  }
 0x82c   :  { %10169 = vmatprep.mubr.msk.bf16.mxu1 %vm1240_vm1, %v4566_v24  ;;  %v4540_v31 = vadd.f32 %v9689_v0, %v9625_v62  ;;  %v11082_v14 = vld [vmem:[#allocation2 + $0x848] ss:$16 sps:$4 sm:$0xff]   ;;  %v11114_v62 = vld [vmem:[#allocation2 + $0x8ec] ss:$16 sps:$4 sm:$0xff]  }
 0x82d   :  { %v9691_v54 = vpop.f32.mrf.mxu0  ;;  %9791 = vmatpush3.bf16.msra.mxu1 %v11267_v39  ;;  %v11088_v24 = vld [vmem:[#allocation2 + $0x868] ss:$16 sps:$4 sm:$0xff]  }
 0x82e   :  { %v9692_v34 = vadd.f32 %v9691_v54, %v9690_v9  ;;  %9792 = vmatprep.subr.bf16.mxu1 %v11268_v41  ;;  %v11094_v9 = vld [vmem:[#allocation2 + $0x888] ss:$16 sps:$4 sm:$0xff]   ;;  %v11108_v54 = vld [vmem:[#allocation2 + $0x8cc] ss:$16 sps:$4 sm:$0xff]  }
 0x82f   :  { %v9693_v60 = vpop.f32.mrf.mxu0  ;;  %v11100_v0 = vld [vmem:[#allocation2 + $0x8a8] ss:$16 sps:$4 sm:$0xff]  }
 0x830   :  { %v4543_v17 = vadd.f32 %v9692_v34, %v9628_v63  ;;  %v11106_v39 = vld [vmem:[#allocation2 + $0x8c8] ss:$16 sps:$4 sm:$0xff]   ;;  %v8517_v34 = vld [vmem:[%s14030_s2 + $0x10] sm:$0x3] }
 0x831   :  { %v9694_v22 = vpop.f32.mrf.mxu0  ;;  %9793 = vmatpush3.bf16.msra.mxu1 %v11269_v2  ;;  %v11112_v63 = vld [vmem:[#allocation2 + $0x8e8] ss:$16 sps:$4 sm:$0xff]   ;;  %10619 = vmatprep.subr.msk.bf16.mxu0 %vm1265_vm0, %v8517_v34  ;;  %v5134_v41 = vsel %vm1265_vm0, %v8517_v34, 0 }
 0x832   :  { %v4567_v50 = vpack.c.bf16 %v4543_v17, %v4540_v31  ;;  %v9695_v23 = vadd.f32 %v9694_v22, %v9693_v60  ;;  %10178 = vmatpush3.bf16.msra.mxu0 %v5134_v41 }
 0x833   :  { %v9696_v52 = vpop.f32.mrf.mxu0 }
 0x834   :  { %10170 = vmatmul.mubr.msk.bf16.gmra.mxu1 %vm1240_vm1, %v4567_v50  ;;  %v4548_v8 = vadd.f32 %v9695_v23, %v9631_v45 }
 0x835   :  { %v9697_v21 = vpop.f32.mrf.mxu0 }
 0x836   :  { %v9698_v19 = vadd.f32 %v9697_v21, %v9696_v52 }
 0x837   :  { %v9699_v7 = vpop.f32.mrf.mxu0 }
 0x838   :  { %v4551_v15 = vadd.f32 %v9698_v19, %v9634_v4 }
 0x839   :  { %v9700_v6 = vpop.f32.mrf.mxu0 }
 0x83a   :  { %v4568_v25 = vpack.c.bf16 %v4551_v15, %v4548_v8  ;;  %v9701_v58 = vadd.f32 %v9700_v6, %v9699_v7 }
 0x83b   :  { %v9702_v56 = vpop.f32.mrf.mxu0 }
 0x83c   :  { %10173 = vmatprep.mubr.msk.bf16.mxu1 %vm1240_vm1, %v4568_v25  ;;  %v4556_v47 = vadd.f32 %v9701_v58, %v9637_v11 }
 0x83d   :  { %v9703_v46 = vpop.f32.mrf.mxu0 }
 0x83e   :  { %v9704_v33 = vadd.f32 %v9703_v46, %v9702_v56 }
 0x83f   :  { %v9730_v60 = vpop.f32.mrf.mxu0 }
 0x840   :  { %v4559_v44 = vadd.f32 %v9704_v33, %v9640_v53 }
 0x841   :  { %v9731_v10 = vpop.f32.mrf.mxu0 }
 0x842   :  { %v4569_v18 = vpack.c.bf16 %v4559_v44, %v4556_v47 }
 0x843   :  { %v9733_v17 = vpop.f32.mrf.mxu0 }
 0x844   :  { %10174 = vmatmul.mubr.msk.bf16.gmra.mxu1 %vm1240_vm1, %v4569_v18 }
 0x845   :  { %5034 = vmatprep.mubr.bf16.mxu1 %v11072_v35  ;;  %v9734_v52 = vpop.f32.mrf.mxu0 }
 0x847   :  { %v9736_v21 = vpop.f32.mrf.mxu0 }
 0x849   :  { %v9737_v45 = vpop.f32.mrf.mxu0 }
 0x84b   :  { %v9739_v30 = vpop.f32.mrf.mxu0 }
 0x84c   :  { %5035 = vmatmul.mubr.bf16.vlgmr.msra.gmra.mxu1 %v11070_v26 }
 0x84d   :  { %5042 = vmatprep.mubr.bf16.mxu1 %v11078_v32  ;;  %v9740_v15 = vpop.f32.mrf.mxu0 }
 0x854   :  { %5043 = vmatmul.mubr.bf16.gmra.mxu1 %v11076_v28 }
 0x855   :  { %5050 = vmatprep.mubr.bf16.mxu1 %v11084_v55 }
 0x85c   :  { %5051 = vmatmul.mubr.bf16.gmra.mxu1 %v11082_v14 }
 0x85d   :  { %5058 = vmatprep.mubr.bf16.mxu1 %v11090_v38 }
 0x864   :  { %5059 = vmatmul.mubr.bf16.gmra.mxu1 %v11088_v24 }
 0x865   :  { %5066 = vmatprep.mubr.bf16.mxu1 %v11096_v57 }
 0x86c   :  { %5067 = vmatmul.mubr.bf16.gmra.mxu1 %v11094_v9 }
 0x86d   :  { %5074 = vmatprep.mubr.bf16.mxu1 %v11102_v42 }
 0x874   :  { %5075 = vmatmul.mubr.bf16.gmra.mxu1 %v11100_v0 }
 0x875   :  { %5082 = vmatprep.mubr.bf16.mxu1 %v11108_v54  ;;  %v9735_v54 = vadd.f32 %v9734_v52, %v9733_v17 }
 0x87c   :  { %5083 = vmatmul.mubr.bf16.gmra.mxu1 %v11106_v39 }
 0x87d   :  { %5090 = vmatprep.mubr.bf16.mxu1 %v11114_v62 }
 0x884   :  { %5091 = vmatmul.mubr.bf16.gmra.mxu1 %v11112_v63 }
 0x8d4   :  { %v10163_v31 = vpop.f32.mrf.mxu1 }
 0x8d5   :  { %v13420_v22 = vadd.f32 %v10163_v31, %v13258_v49 }
 0x8d6   :  { %v4633_v2 = vpop.f32.mrf.mxu1 }
 0x8d7   :  { %v13423_v50 = vadd.f32 %v4633_v2, %v13261_v36 }
 0x8d8   :  { %v10164_v20 = vpop.f32.mrf.mxu1 }
 0x8d9   :  { %v13426_v23 = vadd.f32 %v10164_v20, %v13266_v59  ;;  %v9742_v59 = vpop.f32.mrf.mxu0 }
 0x8da   :  { %v13428_v4 = vpop.f32.mrf.mxu1 }
 0x8db   :  { %v9743_v25 = vpop.f32.mrf.mxu0 }
 0x8dd   :  { %v9745_v58 = vpop.f32.mrf.mxu0 }
 0x8df   :  { %v9746_v53 = vpop.f32.mrf.mxu0 }
 0x8e4   :  { %v10167_v19 = vpop.f32.mrf.mxu1 }
 0x8e5   :  { %v13431_v7 = vadd.f32 %v10167_v19, %v13277_v3 }
 0x8e6   :  { %v4649_v49 = vpop.f32.mrf.mxu1 }
 0x8e7   :  { %v13434_v8 = vadd.f32 %v4649_v49, %v13280_v5  ;;  %v9738_v49 = vadd.f32 %v9737_v45, %v9736_v21 }
 0x8e8   :  { %v10168_v36 = vpop.f32.mrf.mxu1 }
 0x8e9   :  { %v13437_v6 = vadd.f32 %v10168_v36, %v13285_v40  ;;  %v9748_v40 = vpop.f32.mrf.mxu0  ;;  %v9741_v36 = vadd.f32 %v9740_v15, %v9739_v30 }
 0x8ea   :  { %v13439_v16 = vpop.f32.mrf.mxu1 }
 0x8eb   :  { %v9749_v47 = vpop.f32.mrf.mxu0 }
 0x8ed   :  { %v9751_v18 = vpop.f32.mrf.mxu0 }
 0x8ef   :  { %v9752_v28 = vpop.f32.mrf.mxu0 }
 0x8f1   :  { %v9754_v38 = vpop.f32.mrf.mxu0 }
 0x8f3   :  { %v9755_v9 = vpop.f32.mrf.mxu0 }
 0x8f4   :  { %v10171_v56 = vpop.f32.mrf.mxu1 }
 0x8f5   :  { %v13442_v46 = vadd.f32 %v10171_v56, %v13296_v27 }
 0x8f6   :  { %v4665_v3 = vpop.f32.mrf.mxu1 }
 0x8f7   :  { %v13445_v11 = vadd.f32 %v4665_v3, %v13299_v51 }
 0x8f8   :  { %v10172_v5 = vpop.f32.mrf.mxu1 }
 0x8f9   :  { %v13448_v33 = vadd.f32 %v10172_v5, %v13304_v29 }
 0x8fa   :  { %v13450_v44 = vpop.f32.mrf.mxu1 }
 0x904   :  { %v10175_v35 = vpop.f32.mrf.mxu1 }
 0x905   :  { %v13453_v26 = vadd.f32 %v10175_v35, %v13315_v1  ;;  %v9732_v1 = vadd.f32 %v9731_v10, %v9730_v60 }
 0x906   :  { %v4681_v27 = vpop.f32.mrf.mxu1 }
 0x907   :  { %v13456_v32 = vadd.f32 %v4681_v27, %v13318_v13  ;;  %v9757_v13 = vpop.f32.mrf.mxu0 }
 0x908   :  { %v10176_v51 = vpop.f32.mrf.mxu1 }
 0x909   :  { %v13459_v55 = vadd.f32 %v10176_v51, %v13323_v43  ;;  %v9758_v2 = vpop.f32.mrf.mxu0 }
 0x90a   :  { %v13461_v29 = vpop.f32.mrf.mxu1 }
 0x90b   :  { %v9760_v5 = vpop.f32.mrf.mxu0 }
 0x90c   :  { %v9794_v14 = vpop.f32.mrf.mxu1 }
 0x90d   :  { %v9761_v27 = vpop.f32.mrf.mxu0 }
 0x90e   :  { %v9795_v24 = vpop.f32.mrf.mxu1 }
 0x90f   :  { %v9796_v42 = vadd.f32 %v9795_v24, %v9794_v14  ;;  %v9744_v24 = vadd.f32 %v9743_v25, %v9742_v59 }
 0x910   :  { %v9797_v57 = vpop.f32.mrf.mxu1 }
 0x911   :  { %v5037_v63 = vadd.f32 %v9796_v42, %v9732_v1  ;;  %v9763_v1 = vpop.f32.mrf.mxu0 }
 0x912   :  { %v9798_v0 = vpop.f32.mrf.mxu1 }
 0x913   :  { %v9799_v39 = vadd.f32 %v9798_v0, %v9797_v57  ;;  %v9747_v57 = vadd.f32 %v9746_v53, %v9745_v58 }
 0x914   :  { %v9800_v62 = vpop.f32.mrf.mxu1 }
 0x915   :  { %v5040_v34 = vadd.f32 %v9799_v39, %v9735_v54  ;;  %v9764_v39 = vpop.f32.mrf.mxu0 }
 0x916   :  { %v9801_v41 = vpop.f32.mrf.mxu1 }
 0x917   :  { %v5099_v31 = vpack.c.bf16 %v5040_v34, %v5037_v63  ;;  %v9802_v20 = vadd.f32 %v9801_v41, %v9800_v62  ;;  %v9750_v34 = vadd.f32 %v9749_v47, %v9748_v40  ;;  %v9753_v41 = vadd.f32 %v9752_v28, %v9751_v18 }
 0x918   :  { %v9803_v43 = vpop.f32.mrf.mxu1 }
 0x919   :  { %10179 = vmatprep.mubr.msk.bf16.mxu0 %vm1240_vm1, %v5099_v31  ;;  %v5045_v60 = vadd.f32 %v9802_v20, %v9738_v49  ;;  %v9766_v20 = vpop.f32.mrf.mxu0 }
 0x91a   :  { %v9804_v19 = vpop.f32.mrf.mxu1 }
 0x91b   :  { %v9805_v56 = vadd.f32 %v9804_v19, %v9803_v43  ;;  %v9767_v49 = vpop.f32.mrf.mxu0 }
 0x91c   :  { %v9806_v3 = vpop.f32.mrf.mxu1 }
 0x91d   :  { %v5048_v10 = vadd.f32 %v9805_v56, %v9741_v36 }
 0x91e   :  { %v9807_v17 = vpop.f32.mrf.mxu1 }
 0x91f   :  { %v5100_v52 = vpack.c.bf16 %v5048_v10, %v5045_v60  ;;  %v9808_v51 = vadd.f32 %v9807_v17, %v9806_v3  ;;  %v9756_v3 = vadd.f32 %v9755_v9, %v9754_v38  ;;  %v9759_v60 = vadd.f32 %v9758_v2, %v9757_v13 }
 0x920   :  { %v9809_v35 = vpop.f32.mrf.mxu1 }
 0x921   :  { %10180 = vmatmul.mubr.msk.bf16.vlgmr.msra.gmra.mxu0 %vm1240_vm1, %v5100_v52  ;;  %v5053_v21 = vadd.f32 %v9808_v51, %v9744_v24  ;;  %v9769_v52 = vpop.f32.mrf.mxu0 }
 0x922   :  { %v9810_v14 = vpop.f32.mrf.mxu1 }
 0x923   :  { %v9811_v42 = vadd.f32 %v9810_v14, %v9809_v35  ;;  %v9770_v51 = vpop.f32.mrf.mxu0 }
 0x924   :  { %v9812_v0 = vpop.f32.mrf.mxu1 }
 0x925   :  { %v5056_v45 = vadd.f32 %v9811_v42, %v9747_v57  ;;  %v9762_v57 = vadd.f32 %v9761_v27, %v9760_v5  ;;  %v9765_v42 = vadd.f32 %v9764_v39, %v9763_v1 }
 0x926   :  { %v9813_v30 = vpop.f32.mrf.mxu1 }
 0x927   :  { %v5101_v15 = vpack.c.bf16 %v5056_v45, %v5053_v21  ;;  %v9814_v62 = vadd.f32 %v9813_v30, %v9812_v0  ;;  %v9772_v45 = vpop.f32.mrf.mxu0 }
 0x928   :  { %v9815_v54 = vpop.f32.mrf.mxu1 }
 0x929   :  { %10183 = vmatprep.mubr.msk.bf16.mxu0 %vm1240_vm1, %v5101_v15  ;;  %v5061_v59 = vadd.f32 %v9814_v62, %v9750_v34  ;;  %v9773_v30 = vpop.f32.mrf.mxu0  ;;  %v9771_v34 = vadd.f32 %v9770_v51, %v9769_v52  ;;  %v14165_v52 = vld [vmem:[#allocation32_spill] sm:$0xff] }
 0x92a   :  { %v9816_v63 = vpop.f32.mrf.mxu1 }
 0x92b   :  { %v9817_v31 = vadd.f32 %v9816_v63, %v9815_v54  ;;  %v9768_v63 = vadd.f32 %v9767_v49, %v9766_v20  ;;  %v14163_v49 = vld [vmem:[#allocation41_spill] sm:$0xff] }
 0x92c   :  { %v9818_v43 = vpop.f32.mrf.mxu1 }
 0x92d   :  { %v5064_v25 = vadd.f32 %v9817_v31, %v9753_v41  ;;  %v9775_v31 = vpop.f32.mrf.mxu0 }
 0x92e   :  { %v9819_v58 = vpop.f32.mrf.mxu1 }
 0x92f   :  { %v5102_v53 = vpack.c.bf16 %v5064_v25, %v5061_v59  ;;  %v9820_v36 = vadd.f32 %v9819_v58, %v9818_v43  ;;  %v9776_v59 = vpop.f32.mrf.mxu0 }
 0x930   :  { %v9821_v19 = vpop.f32.mrf.mxu1 }
 0x931   :  { %10184 = vmatmul.mubr.msk.bf16.gmra.mxu0 %vm1240_vm1, %v5102_v53  ;;  %v5069_v40 = vadd.f32 %v9820_v36, %v9756_v3  ;;  %v9777_v36 = vadd.f32 %v9776_v59, %v9775_v31 }
 0x932   :  { %v9822_v56 = vpop.f32.mrf.mxu1 }
 0x933   :  { %v9823_v10 = vadd.f32 %v9822_v56, %v9821_v19  ;;  %v9774_v19 = vadd.f32 %v9773_v30, %v9772_v45  ;;  %v14171_v30 = vld [vmem:[#allocation33_spill] sm:$0xff] }
 0x934   :  { %v9824_v17 = vpop.f32.mrf.mxu1 }
 0x935   :  { %v5072_v47 = vadd.f32 %v9823_v10, %v9759_v60  ;;  %v14164_v10 = vld [vmem:[#allocation34_spill] sm:$0xff] }
 0x936   :  { %v9825_v18 = vpop.f32.mrf.mxu1 }
 0x937   :  { %v5103_v28 = vpack.c.bf16 %v5072_v47, %v5069_v40  ;;  %v9826_v14 = vadd.f32 %v9825_v18, %v9824_v17  ;;  %v1431_v17 = vadd.f32 %v14164_v10, %v14163_v49  ;;  %v14166_v47 = vld [vmem:[#allocation47_spill] sm:$0xff] }
 0x938   :  { %v9827_v35 = vpop.f32.mrf.mxu1 }
 0x939   :  { %10187 = vmatprep.mubr.msk.bf16.mxu0 %vm1240_vm1, %v5103_v28  ;;  %v5077_v38 = vadd.f32 %v9826_v14, %v9762_v57  ;;  %v2012_v40 = vadd.f32 %v14165_v52, %v1431_v17 }
 0x93a   :  { %v9828_v24 = vpop.f32.mrf.mxu1 }
 0x93b   :  { %v9829_v0 = vadd.f32 %v9828_v24, %v9827_v35  ;;  %v2549_v18 = vadd.f32 %v14166_v47, %v2012_v40  ;;  %v14167_v35 = vld [vmem:[#allocation40_spill] sm:$0xff]  ;;  %v14168_v24 = vld [vmem:[#allocation55_spill] sm:$0xff] }
 0x93c   :  { %v9830_v21 = vpop.f32.mrf.mxu1  ;;  %v14176_v40 = vld [vmem:[#allocation36_spill] sm:$0xff] }
 0x93d   :  { %v5080_v9 = vadd.f32 %v9829_v0, %v9765_v42  ;;  %v3086_v51 = vadd.f32 %v14167_v35, %v2549_v18 }
 0x93e   :  { %v9831_v13 = vpop.f32.mrf.mxu1 }
 0x93f   :  { %v5104_v2 = vpack.c.bf16 %v5080_v9, %v5077_v38  ;;  %v9832_v54 = vadd.f32 %v9831_v13, %v9830_v21  ;;  %v3623_v57 = vadd.f32 %v14168_v24, %v3086_v51  ;;  %v14169_v38 = vld [vmem:[#allocation45_spill] sm:$0xff]  ;;  %v14170_v9 = vld [vmem:[#allocation35_spill] sm:$0xff]  ;;  %v14177_v51 = vld [vmem:[#allocation38_spill] sm:$0xff] }
 0x940   :  { %v9833_v15 = vpop.f32.mrf.mxu1  ;;  %v1447_v13 = vadd.f32 %v14170_v9, %v14169_v38 }
 0x941   :  { %10188 = vmatmul.mubr.msk.bf16.gmra.mxu0 %vm1240_vm1, %v5104_v2  ;;  %v5085_v5 = vadd.f32 %v9832_v54, %v9768_v63  ;;  %v4160_v0 = vadd.f32 %v13272_v37, %v3623_v57 }
 0x942   :  { %v9834_v62 = vpop.f32.mrf.mxu1 }
 0x943   :  { %v9835_v41 = vadd.f32 %v9834_v62, %v9833_v15  ;;  %v4697_v45 = vadd.f32 %v13428_v4, %v4160_v0  ;;  %v2016_v15 = vadd.f32 %v14171_v30, %v1447_v13  ;;  %v14172_v62 = vld [vmem:[#allocation52_spill] sm:$0xff] }
 0x944   :  { %v9836_v43 = vpop.f32.mrf.mxu1 }
 0x945   :  { %v5088_v27 = vadd.f32 %v9835_v41, %v9771_v34  ;;  %v2553_v63 = vadd.f32 %v14172_v62, %v2016_v15  ;;  %v14173_v41 = vld [vmem:[#allocation42_spill] sm:$0xff]  ;;  %v11115_v15 = vld [vmem:[#allocation7 + $0x10] sm:$0xff]  }
 0x946   :  { %v9837_v1 = vpop.f32.mrf.mxu1  ;;  %v14179_v62 = vld [vmem:[#allocation43_spill] sm:$0xff] }
 0x947   :  { %v5105_v39 = vpack.c.bf16 %v5088_v27, %v5085_v5  ;;  %v9838_v58 = vadd.f32 %v9837_v1, %v9836_v43  ;;  %v3090_v37 = vadd.f32 %v14173_v41, %v2553_v63  ;;  %v14174_v5 = vld [vmem:[#allocation60_spill] sm:$0xff] }
 0x948   :  { %v9839_v25 = vpop.f32.mrf.mxu1 }
 0x949   :  { %10191 = vmatprep.mubr.msk.bf16.mxu0 %vm1240_vm1, %v5105_v39  ;;  %v5093_v3 = vadd.f32 %v9838_v58, %v9774_v19 }
 0x94a   :  { %v9840_v53 = vpop.f32.mrf.mxu1 }
 0x94b   :  { %v9841_v56 = vadd.f32 %v9840_v53, %v9839_v25 }
 0x94d   :  { %v5096_v60 = vadd.f32 %v9841_v56, %v9777_v36 }
 0x94f   :  { %v5106_v20 = vpack.c.bf16 %v5096_v60, %v5093_v3 }
 0x951   :  { %10192 = vmatmul.mubr.msk.bf16.gmra.mxu0 %vm1240_vm1, %v5106_v20 }
 0x952   :  { %10231 = vmatprep.mubr.bf16.mxu0 %v11115_v15 }
 0x9e1   :  { %v10181_v28 = vpop.f32.mrf.mxu0 }
 0x9e2   :  { %v13492_v4 = vadd.f32 %v10181_v28, %v13420_v22 }
 0x9e3   :  { %v5170_v14 = vpop.f32.mrf.mxu0 }
 0x9e4   :  { %v13485_v54 = vadd.f32 %v5170_v14, %v13423_v50  ;;  %v3627_v50 = vadd.f32 %v14174_v5, %v3090_v37  ;;  %v5290_v22 = vmul.f32 %v13492_v4, %v13492_v4 }
 0x9e5   :  { %v10182_v42 = vpop.f32.mrf.mxu0 }
 0x9e6   :  { %v5288_v31 = vmul.f32 %v13485_v54, %v13485_v54  ;;  %v5250_v1 = vsel %vm14052_vm2, %v13485_v54, 0.0  ;;  %v4164_v59 = vadd.f32 %v13291_v12, %v3627_v50  ;;  %v13507_v19 = vadd.f32 %v10182_v42, %v13426_v23 }
 0x9e7   :  { %v5173_v21 = vpop.f32.mrf.mxu0  ;;  %v5253_v12 = vsel %vm14052_vm2, %v13492_v4, 0.0  ;;  %v5307_v10 = vsel %vm14052_vm2, %v5290_v22, 0.0 }
 0x9e8   :  { %v13481_v2 = vadd.f32 %v5173_v21, %v4697_v45  ;;  %v5304_v53 = vsel %vm14052_vm2, %v5288_v31, 0.0  ;;  %v4701_v60 = vadd.f32 %v13439_v16, %v4164_v59  ;;  %v5291_v17 = vmul.f32 %v13507_v19, %v13507_v19  ;;  %v14178_v45 = vld [vmem:[#allocation57_spill] sm:$0xff] }
 0x9e9   :  { %v5255_v16 = vsel %vm14052_vm2, %v13507_v19, 0.0  ;;  %v11117_v31 = vld [vmem:[#allocation7] sm:$0xff]  }
 0x9ea   :  { %v5289_v34 = vmul.f32 %v13481_v2, %v13481_v2  ;;  %v5251_v43 = vsel %vm14052_vm2, %v13481_v2, 0.0  ;;  %v5309_v57 = vsel %vm14052_vm2, %v5291_v17, 0.0  ;;  %10211 = vmatprep.mubr.bf16.mxu1 %v11117_v31 }
 0x9eb   :  { %v5252_v25 = vadd.f32 %v5251_v43, %v5250_v1  ;;  %v14180_v43 = vld [vmem:[#allocation65_spill] sm:$0xff] }
 0x9ec   :  { %v5305_v39 = vsel %vm14052_vm2, %v5289_v34, 0.0 }
 0x9ed   :  { %v5306_v56 = vadd.f32 %v5305_v39, %v5304_v53  ;;  %v5254_v20 = vadd.f32 %v5253_v12, %v5252_v25 }
 0x9ef   :  { %v5308_v18 = vadd.f32 %v5307_v10, %v5306_v56  ;;  %v5256_v24 = vadd.f32 %v5255_v16, %v5254_v20 }
 0x9f1   :  { %v10185_v27 = vpop.f32.mrf.mxu0  ;;  %v5310_v13 = vadd.f32 %v5309_v57, %v5308_v18 }
 0x9f2   :  { %v13533_v42 = vadd.f32 %v10185_v27, %v13431_v7 }
 0x9f3   :  { %v5186_v58 = vpop.f32.mrf.mxu0 }
 0x9f4   :  { %v13510_v36 = vadd.f32 %v5186_v58, %v13434_v8  ;;  %v14175_v8 = vld [vmem:[#allocation49_spill] sm:$0xff]  ;;  %v5294_v7 = vmul.f32 %v13533_v42, %v13533_v42  ;;  %v5261_v1 = vsel %vm14052_vm2, %v13533_v42, 0.0 }
 0x9f5   :  { %v10186_v3 = vpop.f32.mrf.mxu0  ;;  %v1463_v47 = vadd.f32 %v14176_v40, %v14175_v8  ;;  %v14181_v40 = vld [vmem:[#allocation53_spill] sm:$0xff] }
 0x9f6   :  { %v5292_v23 = vmul.f32 %v13510_v36, %v13510_v36  ;;  %v5257_v28 = vsel %vm14052_vm2, %v13510_v36, 0.0  ;;  %v13544_v37 = vadd.f32 %v10186_v3, %v13437_v6  ;;  %v5315_v58 = vsel %vm14052_vm2, %v5294_v7, 0.0 }
 0x9f7   :  { %v5189_v49 = vpop.f32.mrf.mxu0  ;;  %v2020_v14 = vadd.f32 %v14177_v51, %v1463_v47  ;;  %v5258_v9 = vadd.f32 %v5257_v28, %v5256_v24  ;;  %v14182_v47 = vld [vmem:[#allocation37_spill] sm:$0xff] }
 0x9f8   :  { %v13520_v52 = vadd.f32 %v5189_v49, %v4701_v60  ;;  %v5311_v0 = vsel %vm14052_vm2, %v5292_v23, 0.0  ;;  %v5295_v6 = vmul.f32 %v13544_v37, %v13544_v37  ;;  %v5263_v60 = vsel %vm14052_vm2, %v13544_v37, 0.0 }
 0x9f9   :  { %v2557_v38 = vadd.f32 %v14178_v45, %v2020_v14  ;;  %v5312_v34 = vadd.f32 %v5311_v0, %v5310_v13  ;;  %v1479_v18 = vadd.f32 %v14182_v47, %v14181_v40 }
 0x9fa   :  { %v5293_v35 = vmul.f32 %v13520_v52, %v13520_v52  ;;  %v5259_v21 = vsel %vm14052_vm2, %v13520_v52, 0.0 }
 0x9fb   :  { %v3094_v63 = vadd.f32 %v14179_v62, %v2557_v38  ;;  %v5260_v41 = vadd.f32 %v5259_v21, %v5258_v9  ;;  %v14184_v9 = vld [vmem:[#allocation61_spill] sm:$0xff] }
 0x9fc   :  { %v5313_v30 = vsel %vm14052_vm2, %v5293_v35, 0.0 }
 0x9fd   :  { %v3631_v5 = vadd.f32 %v14180_v43, %v3094_v63  ;;  %v5314_v50 = vadd.f32 %v5313_v30, %v5312_v34  ;;  %v5262_v59 = vadd.f32 %v5261_v1, %v5260_v41  ;;  %v14185_v34 = vld [vmem:[#allocation44_spill] sm:$0xff] }
 0x9ff   :  { %v4168_v39 = vadd.f32 %v13310_v61, %v3631_v5  ;;  %v5316_v56 = vadd.f32 %v5315_v58, %v5314_v50  ;;  %v5264_v49 = vadd.f32 %v5263_v60, %v5262_v59  ;;  %v14186_v5 = vld [vmem:[#allocation69_spill] sm:$0xff] }
 0xa01   :  { %v10189_v27 = vpop.f32.mrf.mxu0  ;;  %v4705_v53 = vadd.f32 %v13450_v44, %v4168_v39 }
 0xa02   :  { %v13560_v12 = vadd.f32 %v10189_v27, %v13442_v46 }
 0xa03   :  { %v5202_v25 = vpop.f32.mrf.mxu0 }
 0xa04   :  { %v13554_v22 = vadd.f32 %v5202_v25, %v13445_v11  ;;  %v5317_v11 = vsel %vm14052_vm2, %v5295_v6, 0.0  ;;  %v5298_v16 = vmul.f32 %v13560_v12, %v13560_v12  ;;  %v5269_v57 = vsel %vm14052_vm2, %v13560_v12, 0.0 }
 0xa05   :  { %v10190_v3 = vpop.f32.mrf.mxu0  ;;  %v5318_v46 = vadd.f32 %v5317_v11, %v5316_v56 }
 0xa06   :  { %v5265_v61 = vsel %vm14052_vm2, %v13554_v22, 0.0  ;;  %v5296_v20 = vmul.f32 %v13554_v22, %v13554_v22  ;;  %v13569_v17 = vadd.f32 %v10190_v3, %v13448_v33  ;;  %v14183_v33 = vld [vmem:[#allocation39_spill] sm:$0xff]  ;;  %v5323_v30 = vsel %vm14052_vm2, %v5298_v16, 0.0 }
 0xa07   :  { %v5205_v10 = vpop.f32.mrf.mxu0  ;;  %v5266_v8 = vadd.f32 %v5265_v61, %v5264_v49  ;;  %v2024_v24 = vadd.f32 %v14183_v33, %v1479_v18 }
 0xa08   :  { %v5319_v44 = vsel %vm14052_vm2, %v5296_v20, 0.0  ;;  %v13571_v23 = vadd.f32 %v5205_v10, %v4705_v53  ;;  %v5299_v0 = vmul.f32 %v13569_v17, %v13569_v17  ;;  %v5271_v15 = vsel %vm14052_vm2, %v13569_v17, 0.0 }
 0xa09   :  { %v5320_v51 = vadd.f32 %v5319_v44, %v5318_v46  ;;  %v2561_v13 = vadd.f32 %v14184_v9, %v2024_v24 }
 0xa0a   :  { %v5267_v28 = vsel %vm14052_vm2, %v13571_v23, 0.0  ;;  %v5297_v35 = vmul.f32 %v13571_v23, %v13571_v23  ;;  %v5325_v7 = vsel %vm14052_vm2, %v5299_v0, 0.0 }
 0xa0b   :  { %v5268_v14 = vadd.f32 %v5267_v28, %v5266_v8  ;;  %v3098_v41 = vadd.f32 %v14185_v34, %v2561_v13 }
 0xa0c   :  { %v5321_v21 = vsel %vm14052_vm2, %v5297_v35, 0.0 }
 0xa0d   :  { %v5270_v45 = vadd.f32 %v5269_v57, %v5268_v14  ;;  %v5322_v38 = vadd.f32 %v5321_v21, %v5320_v51  ;;  %v3635_v50 = vadd.f32 %v14186_v5, %v3098_v41  ;;  %v5351_v41 = vlaneseq }
 0xa0f   :  { %v5324_v62 = vadd.f32 %v5323_v30, %v5322_v38  ;;  %v5272_v63 = vadd.f32 %v5271_v15, %v5270_v45  ;;  %v4172_v1 = vadd.f32 %v13325_v48, %v3635_v50 }
 0xa11   :  { %v10193_v31 = vpop.f32.mrf.mxu0  ;;  %v5326_v43 = vadd.f32 %v5325_v7, %v5324_v62  ;;  %v4709_v25 = vadd.f32 %v13461_v29, %v4172_v1  ;;  %v5352_v7 = vshrl.u32 %v5351_v41, 7 }
 0xa12   :  { %v5247_v58 = vadd.f32 %v10193_v31, %v13453_v26  ;;  %v5344_v31 = vld [vmem:[#allocation5] sm:$0x1] }
 0xa13   :  { %v5218_v27 = vpop.f32.mrf.mxu0 }
 0xa14   :  { %v5245_v39 = vadd.f32 %v5218_v27, %v13456_v32  ;;  %v5302_v10 = vmul.f32 %v5247_v58, %v5247_v58  ;;  %v5277_v29 = vsel %vm14052_vm2, %v5247_v58, 0.0  ;;  %v5348_v27 = vld [vmem:[#allocation5 + $0x1] sm:$0x1] }
 0xa15   :  { %v10194_v59 = vpop.f32.mrf.mxu0 }
 0xa16   :  { %v5273_v6 = vsel %vm14052_vm2, %v5245_v39, 0.0  ;;  %v5300_v53 = vmul.f32 %v5245_v39, %v5245_v39  ;;  %v5248_v61 = vadd.f32 %v10194_v59, %v13459_v55  ;;  %v5331_v40 = vsel %vm14052_vm2, %v5302_v10, 0.0 }
 0xa17   :  { %v5274_v56 = vadd.f32 %v5273_v6, %v5272_v63  ;;  %v5221_v3 = vpop.f32.mrf.mxu0 }
 0xa18   :  { %v5327_v60 = vsel %vm14052_vm2, %v5300_v53, 0.0  ;;  %v5246_v20 = vadd.f32 %v5221_v3, %v4709_v25  ;;  %v5303_v44 = vmul.f32 %v5248_v61, %v5248_v61  ;;  %v5279_v47 = vsel %vm14052_vm2, %v5248_v61, 0.0 }
 0xa19   :  { %v5328_v49 = vadd.f32 %v5327_v60, %v5326_v43  ;;  %v13607_v43 = vsub.s32 0, %v5352_v7 }
 0xa1a   :  { %v5275_v48 = vsel %vm14052_vm2, %v5246_v20, 0.0  ;;  %v5301_v32 = vmul.f32 %v5246_v20, %v5246_v20  ;;  %v5333_v16 = vsel %vm14052_vm2, %v5303_v44, 0.0 }
 0xa1b   :  { %v5276_v11 = vadd.f32 %v5275_v48, %v5274_v56 }
 0xa1c   :  { %v5329_v26 = vsel %vm14052_vm2, %v5301_v32, 0.0 }
 0xa1d   :  { %v5278_v8 = vadd.f32 %v5277_v29, %v5276_v11  ;;  %v5330_v46 = vadd.f32 %v5329_v26, %v5328_v49 }
 0xa1f   :  { %v5280_v18 = vadd.f32 %v5279_v47, %v5278_v8  ;;  %v5332_v55 = vadd.f32 %v5331_v40, %v5330_v46 }
 0xa21   :  { %v5281_v28 = vrot.slane %v5280_v18, 4  ;;  %v5334_v35 = vadd.f32 %v5333_v16, %v5332_v55 }
 0xa23   :  { %v5282_v51 = vadd.f32 %v5281_v28, %v5280_v18  ;;  %v5335_v14 = vrot.slane %v5334_v35, 4 }
 0xa25   :  { %v5283_v33 = vrot.slane %v5282_v51, 2  ;;  %v5336_v24 = vadd.f32 %v5335_v14, %v5334_v35 }
 0xa27   :  { %v5284_v57 = vadd.f32 %v5283_v33, %v5282_v51  ;;  %v5337_v0 = vrot.slane %v5336_v24, 2 }
 0xa29   :  { %v5285_v21 = vrot.slane %v5284_v57, 1  ;;  %v5338_v45 = vadd.f32 %v5337_v0, %v5336_v24 }
 0xa2b   :  { %v5286_v38 = vadd.f32 %v5285_v21, %v5284_v57  ;;  %v5339_v9 = vrot.slane %v5338_v45, 1 }
 0xa2d   :  { %v5287_v13 = vmul.f32 0.0078125, %v5286_v38  ;;  %v5340_v30 = vadd.f32 %v5339_v9, %v5338_v45 }
 0xa2f   :  { %v5341_v15 = vmul.f32 0.0078125, %v5340_v30  ;;  %v5342_v62 = vmul.f32 %v5287_v13, %v5287_v13 }
 0xa31   :  { %v5343_v63 = vsub.f32 %v5341_v15, %v5342_v62 }
 0xa33   :  { %v5345_v34 = vadd.f32 1e-05, %v5343_v63 }
 0xa35   :  { %11150 = vrsqrt.f32 %v5345_v34 }
 0xa42   :  { %v11151_v5 = vpop.eup %11150 }
 0xa43   :  { %v5347_v50 = vmul.f32 %v11151_v5, %v5344_v31 }
 0xa45   :  { %v5349_v1 = vmul.f32 %v5347_v50, %v5287_v13  ;;  %v5354_v59 = vrot.slane %v5347_v50, %v13607_v43 }
 0xa47   :  { %v5350_v25 = vsub.f32 %v5348_v27, %v5349_v1  ;;  %v5355_v6 = vmul.f32 %v5354_v59, %v13485_v54  ;;  %v5356_v53 = vmul.f32 %v5354_v59, %v13481_v2  ;;  %v5357_v56 = vmul.f32 %v5354_v59, %v13492_v4 }
 0xa48   :  { %v5364_v3 = vmul.f32 %v5354_v59, %v13571_v23  ;;  %v5365_v60 = vmul.f32 %v5354_v59, %v13560_v12  ;;  %v5358_v49 = vmul.f32 %v5354_v59, %v13507_v19  ;;  %v5366_v10 = vmul.f32 %v5354_v59, %v13569_v17 }
 0xa49   :  { %v5367_v48 = vmul.f32 %v5354_v59, %v5245_v39  ;;  %v5369_v32 = vmul.f32 %v5354_v59, %v5247_v58  ;;  %v5359_v11 = vmul.f32 %v5354_v59, %v13510_v36  ;;  %v5360_v29 = vmul.f32 %v5354_v59, %v13520_v52 }
 0xa4a   :  { %v5370_v44 = vmul.f32 %v5354_v59, %v5248_v61  ;;  %v5374_v54 = vrot.slane %v5350_v25, %v13607_v43  ;;  %v5361_v2 = vmul.f32 %v5354_v59, %v13533_v42  ;;  %v5362_v4 = vmul.f32 %v5354_v59, %v13544_v37 }
 0xa4b   :  { %v5363_v23 = vmul.f32 %v5354_v59, %v13554_v22  ;;  %v5368_v12 = vmul.f32 %v5354_v59, %v5246_v20 }
 0xa4c   :  { %v5375_v26 = vadd.f32 %v5374_v54, %v5355_v6  ;;  %v5376_v19 = vadd.f32 %v5374_v54, %v5356_v53  ;;  %v5377_v8 = vadd.f32 %v5374_v54, %v5357_v56  ;;  %v5378_v17 = vadd.f32 %v5374_v54, %v5358_v49 }
 0xa4d   :  { %v5379_v39 = vadd.f32 %v5374_v54, %v5359_v11  ;;  %v5380_v58 = vadd.f32 %v5374_v54, %v5360_v29  ;;  %v5381_v46 = vadd.f32 %v5374_v54, %v5361_v2  ;;  %v5382_v36 = vadd.f32 %v5374_v54, %v5362_v4  ;;  %v5771_v29 = vld [vmem:[#allocation8 + $0x8] sm:$0xf]  ;;  %v5584_v4 = vld [vmem:[#allocation8 + $0x4] sm:$0xf] }
 0xa4e   :  { %v5383_v40 = vadd.f32 %v5374_v54, %v5363_v23  ;;  %v5384_v52 = vadd.f32 %v5374_v54, %v5364_v3  ;;  %v5385_v61 = vadd.f32 %v5374_v54, %v5365_v60  ;;  %v5386_v47 = vadd.f32 %v5374_v54, %v5366_v10 }
 0xa4f   :  { %v5387_v18 = vadd.f32 %v5374_v54, %v5367_v48  ;;  %v5388_v55 = vadd.f32 %v5374_v54, %v5368_v12  ;;  %v5389_v42 = vadd.f32 %v5374_v54, %v5369_v32  ;;  %v5390_v16 = vadd.f32 %v5374_v54, %v5370_v44  ;;  %v11116_v44 = vld [vmem:[#allocation7 + $0x18] sm:$0xff]   ;;  %v11118_v54 = vld [vmem:[#allocation7 + $0x8] sm:$0xff]   ;;  %v5514_v12 = vld [vmem:[#allocation8] sm:$0xf] }
 0xa50   :  { %vm5391_vm3 = vcmp.ge.f32.partialorder %v5375_v26, 0.0  ;;  %vm5392_vm4 = vcmp.ge.f32.partialorder %v5376_v19, 0.0  ;;  %vm5393_vm5 = vcmp.ge.f32.partialorder %v5377_v8, 0.0  ;;  %vm5394_vm6 = vcmp.ge.f32.partialorder %v5378_v17, 0.0 }
 0xa51   :  { %vm5395_vm7 = vcmp.ge.f32.partialorder %v5379_v39, 0.0  ;;  %vm5396_vm8 = vcmp.ge.f32.partialorder %v5380_v58, 0.0  ;;  %vm5397_vm9 = vcmp.ge.f32.partialorder %v5381_v46, 0.0  ;;  %vm5398_vm10 = vcmp.ge.f32.partialorder %v5382_v36, 0.0 }
 0xa52   :  { %vm5399_vm11 = vcmp.ge.f32.partialorder %v5383_v40, 0.0  ;;  %vm5400_vm12 = vcmp.ge.f32.partialorder %v5384_v52, 0.0  ;;  %vm5401_vm13 = vcmp.ge.f32.partialorder %v5385_v61, 0.0  ;;  %vm5402_vm14 = vcmp.ge.f32.partialorder %v5386_v47, 0.0 }
 0xa53   :  { %vm5403_vm15 = vcmp.ge.f32.partialorder %v5387_v18, 0.0  ;;  %vm5404_vm0 = vcmp.ge.f32.partialorder %v5388_v55, 0.0  ;;  %vm5405_vm1 = vcmp.ge.f32.partialorder %v5389_v42, 0.0  ;;  %vm5406_vm2 = vcmp.ge.f32.partialorder %v5390_v16, 0.0 }
 0xa54   :  { %v5407_v37 = vmul.f32 0.01, %v5375_v26  ;;  %v5408_v22 = vmul.f32 0.01, %v5376_v19  ;;  %v5409_v20 = vmul.f32 0.01, %v5377_v8 }
 0xa55   :  { %v5410_v28 = vmul.f32 0.01, %v5378_v17  ;;  %v5411_v35 = vmul.f32 0.01, %v5379_v39  ;;  %v5412_v51 = vmul.f32 0.01, %v5380_v58 }
 0xa56   :  { %v5413_v14 = vmul.f32 0.01, %v5381_v46  ;;  %v5414_v33 = vmul.f32 0.01, %v5382_v36  ;;  %v5415_v24 = vmul.f32 0.01, %v5383_v40  ;;  %v5423_v57 = vsel %vm5391_vm3, %v5375_v26, %v5407_v37 }
 0xa57   :  { %v5416_v0 = vmul.f32 0.01, %v5384_v52  ;;  %v5417_v21 = vmul.f32 0.01, %v5385_v61  ;;  %v5418_v45 = vmul.f32 0.01, %v5386_v47  ;;  %v5424_v38 = vsel %vm5392_vm4, %v5376_v19, %v5408_v22 }
 0xa58   :  { %v5419_v9 = vmul.f32 0.01, %v5387_v18  ;;  %v5420_v13 = vmul.f32 0.01, %v5388_v55  ;;  %v5421_v30 = vmul.f32 0.01, %v5389_v42  ;;  %v5425_v15 = vsel %vm5393_vm5, %v5377_v8, %v5409_v20 }
 0xa59   :  { %v5422_v62 = vmul.f32 0.01, %v5390_v16  ;;  %v5426_v63 = vsel %vm5394_vm6, %v5378_v17, %v5410_v28  ;;  %v5427_v34 = vsel %vm5395_vm7, %v5379_v39, %v5411_v35  ;;  %v5428_v41 = vsel %vm5396_vm8, %v5380_v58, %v5412_v51 }
 0xa5a   :  { %v5429_v7 = vsel %vm5397_vm9, %v5381_v46, %v5413_v14  ;;  %v5430_v31 = vsel %vm5398_vm10, %v5382_v36, %v5414_v33  ;;  %v5431_v5 = vsel %vm5399_vm11, %v5383_v40, %v5415_v24  ;;  %v5432_v50 = vsel %vm5400_vm12, %v5384_v52, %v5416_v0 }
 0xa5b   :  { %v5433_v27 = vsel %vm5401_vm13, %v5385_v61, %v5417_v21  ;;  %v5434_v1 = vsel %vm5402_vm14, %v5386_v47, %v5418_v45  ;;  %v5435_v59 = vsel %vm5403_vm15, %v5387_v18, %v5419_v9  ;;  %v5436_v25 = vsel %vm5404_vm0, %v5388_v55, %v5420_v13  ;;  %v11119_v18 = vld [vmem:[#allocation7 + $0x20] sm:$0xff]  }
 0xa5c   :  { %v5437_v6 = vsel %vm5405_vm1, %v5389_v42, %v5421_v30  ;;  %v5438_v53 = vsel %vm5406_vm2, %v5390_v16, %v5422_v62  ;;  %v13639_v56 = vpack.c.bf16 %v5424_v38, %v5423_v57  ;;  %v13641_v3 = vpack.c.bf16 %v5426_v63, %v5425_v15  ;;  %v5903_v42 = vld [vmem:[#allocation8 + $0xc] sm:$0xf]  ;;  %v11120_v16 = vld [vmem:[#allocation7 + $0x28] sm:$0xff]   ;;  %v11121_v62 = vld [vmem:[#allocation7 + $0x30] sm:$0xff]  }
 0xa5d   :  { %v13643_v60 = vpack.c.bf16 %v5428_v41, %v5427_v34  ;;  %v13645_v49 = vpack.c.bf16 %v5430_v31, %v5429_v7  ;;  %v13647_v10 = vpack.c.bf16 %v5432_v50, %v5431_v5  ;;  %v13649_v48 = vpack.c.bf16 %v5434_v1, %v5433_v27  ;;  %v6035_v34 = vld [vmem:[#allocation8 + $0x10] sm:$0xf]  ;;  %v11122_v41 = vld [vmem:[#allocation7 + $0x38] sm:$0xff]  }
 0xa5e   :  { %v13651_v32 = vpack.c.bf16 %v5436_v25, %v5435_v59  ;;  %v13653_v11 = vpack.c.bf16 %v5438_v53, %v5437_v6  ;;  %vm5591_vm2 = vcmask 1043456   ;;  %vm14187_vm3 = vcmask 64512  }
 0xa5f   :  { %v5779_v2 = vsel %vm5591_vm2, %v5771_v29, 0  ;;  %v5593_v23 = vsel %vm5591_vm2, %v5584_v4, 0  ;;  %v5651_v47 = vsel %vm5591_vm2, %v5514_v12, 0  ;;  %vm14188_vm4 = vmmov %vm14187_vm3  ;;  %v5911_v37 = vsel %vm5591_vm2, %v5903_v42, 0 }
 0xa60   :  { %10195 = vmatprep.subr.bf16.mxu1 %v13653_v11  ;;  %10215 = vmatprep.subr.bf16.mxu0 %v13653_v11  ;;  %vm14189_vm5 = vmmov %vm14187_vm3  ;;  %v6043_v7 = vsel %vm5591_vm2, %v6035_v34, 0 }
 0xa61   :  { %10196 = vmatpush3.bf16.msra.mxu1 %v13653_v11  ;;  %10216 = vmatpush3.bf16.msra.mxu0 %v13653_v11  ;;  %vm14190_vm6 = vmmov %vm14187_vm3 }
 0xa62   :  { %10197 = vmatprep.subr.bf16.mxu1 %v13651_v32  ;;  %10217 = vmatprep.subr.bf16.mxu0 %v13651_v32  ;;  %vm14191_vm7 = vmmov %vm14187_vm3 }
 0xa63   :  { %vm14192_vm8 = vmmov %vm14187_vm3 }
 0xa64   :  { %vm14193_vm9 = vmmov %vm14187_vm3 }
 0xa65   :  { %10198 = vmatpush3.bf16.msra.mxu1 %v13651_v32  ;;  %10218 = vmatpush3.bf16.msra.mxu0 %v13651_v32  ;;  %vm14194_vm10 = vmmov %vm14187_vm3 }
 0xa66   :  { %10199 = vmatprep.subr.bf16.mxu1 %v13649_v48  ;;  %10219 = vmatprep.subr.bf16.mxu0 %v13649_v48  ;;  %vm14195_vm11 = vmmov %vm14187_vm3 }
 0xa67   :  { %vm14196_vm12 = vmmov %vm14187_vm3 }
 0xa68   :  { %vm14197_vm13 = vmmov %vm14187_vm3 }
 0xa69   :  { %10200 = vmatpush3.bf16.msra.mxu1 %v13649_v48  ;;  %10220 = vmatpush3.bf16.msra.mxu0 %v13649_v48  ;;  %vm14198_vm14 = vmmov %vm14187_vm3 }
 0xa6a   :  { %10201 = vmatprep.subr.bf16.mxu1 %v13647_v10  ;;  %10221 = vmatprep.subr.bf16.mxu0 %v13647_v10  ;;  %vm14199_vm15 = vmmov %vm14187_vm3 }
 0xa6b   :  { %vm14200_vm0 = vmmov %vm14187_vm3 }
 0xa6c   :  { %vm14201_vm1 = vmmov %vm14200_vm0 }
 0xa6d   :  { %10202 = vmatpush3.bf16.msra.mxu1 %v13647_v10  ;;  %10222 = vmatpush3.bf16.msra.mxu0 %v13647_v10 }
 0xa6e   :  { %10203 = vmatprep.subr.bf16.mxu1 %v13645_v49  ;;  %10223 = vmatprep.subr.bf16.mxu0 %v13645_v49 }
 0xa71   :  { %10204 = vmatpush3.bf16.msra.mxu1 %v13645_v49  ;;  %10224 = vmatpush3.bf16.msra.mxu0 %v13645_v49 }
 0xa72   :  { %10205 = vmatprep.subr.bf16.mxu1 %v13643_v60  ;;  %10225 = vmatprep.subr.bf16.mxu0 %v13643_v60 }
 0xa75   :  { %10206 = vmatpush3.bf16.msra.mxu1 %v13643_v60  ;;  %10226 = vmatpush3.bf16.msra.mxu0 %v13643_v60 }
 0xa76   :  { %10207 = vmatprep.subr.bf16.mxu1 %v13641_v3  ;;  %10227 = vmatprep.subr.bf16.mxu0 %v13641_v3 }
 0xa79   :  { %10208 = vmatpush3.bf16.msra.mxu1 %v13641_v3  ;;  %10228 = vmatpush3.bf16.msra.mxu0 %v13641_v3 }
 0xa7a   :  { %10209 = vmatprep.subr.bf16.mxu1 %v13639_v56  ;;  %10229 = vmatprep.subr.bf16.mxu0 %v13639_v56 }
 0xa7d   :  { %10210 = vmatpush3.bf16.msra.mxu1 %v13639_v56  ;;  %10230 = vmatpush3.bf16.msra.mxu0 %v13639_v56 }
 0xa7e   :  { %10622 = vmatprep.subr.msk.bf16.mxu0 %vm5591_vm2, %v5771_v29  ;;  %10620 = vmatprep.subr.msk.bf16.mxu1 %vm5591_vm2, %v5584_v4  ;;  %v11123_v4 = vld [vmem:[#allocation7 + $0x40] sm:$0xff]  }
 0xa80   :  { %10232 = vmatmul.mubr.bf16.vlgmr.msra.gmra.mxu0 %v11116_v44  ;;  %10212 = vmatmul.mubr.bf16.vlgmr.msra.gmra.mxu1 %v11118_v54 }
 0xa81   :  { %10268 = vmatpush3.bf16.msra.mxu0 %v5779_v2  ;;  %10236 = vmatpush3.bf16.msra.mxu1 %v5593_v23 }
 0xa82   :  { %10273 = vmatprep.subr.bf16.mxu0 %v13653_v11  ;;  %10621 = vmatprep.subr.msk.bf16.mxu1 %vm5591_vm2, %v5514_v12  ;;  %v6167_v12 = vld [vmem:[#allocation8 + $0x14] sm:$0xf] }
 0xb40   :  { %v10233_v26 = vpop.f32.mrf.mxu0  ;;  %v10213_v19 = vpop.f32.mrf.mxu1 }
 0xb42   :  { %v5566_v8 = vpop.f32.mrf.mxu0  ;;  %v5497_v17 = vpop.f32.mrf.mxu1 }
 0xb44   :  { %v10234_v39 = vpop.f32.mrf.mxu0  ;;  %v10214_v58 = vpop.f32.mrf.mxu1 }
 0xb45   :  { %v5582_v61 = vpack.c.bf16 %v10234_v39, %v10233_v26  ;;  %v5513_v55 = vpack.c.bf16 %v10214_v58, %v10213_v19  ;;  %v11124_v26 = vld [vmem:[#allocation7 + $0x48] sm:$0xff]   ;;  %v6175_v19 = vsel %vm5591_vm2, %v6167_v12, 0 }
 0xb46   :  { %v5569_v46 = vpop.f32.mrf.mxu0  ;;  %v5500_v36 = vpop.f32.mrf.mxu1 }
 0xb47   :  { %v5581_v40 = vpack.c.bf16 %v5569_v46, %v5566_v8  ;;  %v5512_v52 = vpack.c.bf16 %v5500_v36, %v5497_v17 }
 0xb49   :  { %10237 = vmatprep.mubr.msk.bf16.mxu1 %vm14187_vm3, %v5581_v40  ;;  %vm14202_vm3 = vmmov %vm14200_vm0 }
 0xb4a   :  { %10238 = vmatmul.mubr.msk.bf16.vlgmr.msra.gmra.mxu1 %vm14188_vm4, %v5582_v61  ;;  %vm14203_vm4 = vmmov %vm14200_vm0 }
 0xb4b   :  { %10242 = vmatpush3.bf16.msra.mxu1 %v5651_v47  ;;  %10243 = vmatprep.mubr.msk.bf16.mxu1 %vm14189_vm5, %v5512_v52  ;;  %vm14204_vm5 = vmmov %vm14200_vm0 }
 0xb4c   :  { %10247 = vmatprep.subr.bf16.mxu1 %v13653_v11 }
 0xb52   :  { %10244 = vmatmul.mubr.msk.bf16.vlgmr.msra.gmra.mxu1 %vm14190_vm6, %v5513_v55  ;;  %vm11583_vm6 = vmmov 0  }
 0xb53   :  { %10248 = vmatpush3.bf16.msra.mxu1 %v13653_v11  ;;  %10263 = vmatprep.mubr.bf16.mxu1 %v11119_v18 }
 0xb54   :  { %10249 = vmatprep.subr.bf16.mxu1 %v13651_v32 }
 0xb57   :  { %10250 = vmatpush3.bf16.msra.mxu1 %v13651_v32 }
 0xb58   :  { %10251 = vmatprep.subr.bf16.mxu1 %v13649_v48 }
 0xb5b   :  { %10252 = vmatpush3.bf16.msra.mxu1 %v13649_v48 }
 0xb5c   :  { %10253 = vmatprep.subr.bf16.mxu1 %v13647_v10 }
 0xb5f   :  { %10254 = vmatpush3.bf16.msra.mxu1 %v13647_v10 }
 0xb60   :  { %10255 = vmatprep.subr.bf16.mxu1 %v13645_v49 }
 0xb63   :  { %10256 = vmatpush3.bf16.msra.mxu1 %v13645_v49 }
 0xb64   :  { %10257 = vmatprep.subr.bf16.mxu1 %v13643_v60 }
 0xb67   :  { %10258 = vmatpush3.bf16.msra.mxu1 %v13643_v60 }
 0xb68   :  { %10259 = vmatprep.subr.bf16.mxu1 %v13641_v3 }
 0xb6b   :  { %10260 = vmatpush3.bf16.msra.mxu1 %v13641_v3 }
 0xb6c   :  { %10261 = vmatprep.subr.bf16.mxu1 %v13639_v56 }
 0xb6f   :  { %10262 = vmatpush3.bf16.msra.mxu1 %v13639_v56 }
 0xb70   :  { %10623 = vmatprep.subr.msk.bf16.mxu1 %vm5591_vm2, %v5903_v42 }
 0xb72   :  { %10264 = vmatmul.mubr.bf16.vlgmr.msra.gmra.mxu1 %v11120_v16  ;;  %v11125_v16 = vld [vmem:[#allocation7 + $0x50] sm:$0xff]  }
 0xb73   :  { %10294 = vmatpush3.bf16.msra.mxu1 %v5911_v37 }
 0xb74   :  { %10299 = vmatprep.subr.bf16.mxu1 %v13653_v11 }
 0xc0a   :  { %v10239_v22 = vpop.f32.mrf.mxu1 }
 0xc0c   :  { %v5629_v20 = vpop.f32.mrf.mxu1 }
 0xc0e   :  { %v10240_v28 = vpop.f32.mrf.mxu1 }
 0xc10   :  { %v5632_v35 = vpop.f32.mrf.mxu1 }
 0xc12   :  { %v10245_v51 = vpop.f32.mrf.mxu1 }
 0xc13   :  { %v5696_v14 = vadd.f32 %v10245_v51, %v10239_v22  ;;  %v6299_v22 = vld [vmem:[#allocation8 + $0x18] sm:$0xf] }
 0xc14   :  { %v5687_v33 = vpop.f32.mrf.mxu1 }
 0xc15   :  { %v5688_v24 = vadd.f32 %v5687_v33, %v5629_v20  ;;  %v11126_v20 = vld [vmem:[#allocation7 + $0x58] sm:$0xff]  }
 0xc16   :  { %v10246_v57 = vpop.f32.mrf.mxu1 }
 0xc17   :  { %v5699_v0 = vadd.f32 %v10246_v57, %v10240_v28  ;;  %v6307_v28 = vsel %vm5591_vm2, %v6299_v22, 0 }
 0xc18   :  { %v5690_v21 = vpop.f32.mrf.mxu1 }
 0xc19   :  { %v5691_v45 = vadd.f32 %v5690_v21, %v5632_v35 }
 0xc32   :  { %v10265_v38 = vpop.f32.mrf.mxu1 }
 0xc34   :  { %v5753_v9 = vpop.f32.mrf.mxu1 }
 0xc36   :  { %v10266_v13 = vpop.f32.mrf.mxu1 }
 0xc37   :  { %v5769_v63 = vpack.c.bf16 %v10266_v13, %v10265_v38 }
 0xc38   :  { %v5756_v30 = vpop.f32.mrf.mxu1 }
 0xc39   :  { %v5768_v15 = vpack.c.bf16 %v5756_v30, %v5753_v9 }
 0xc3b   :  { %10269 = vmatprep.mubr.msk.bf16.mxu0 %vm14191_vm7, %v5768_v15  ;;  %v11127_v15 = vld [vmem:[#allocation7 + $0x60] sm:$0xff]   ;;  %vm6626_vm7 = vcmask 130048  }
 0xc3c   :  { %10270 = vmatmul.mubr.msk.bf16.vlgmr.msra.gmra.mxu0 %vm14192_vm8, %v5769_v63  ;;  %v6431_v63 = vld [vmem:[#allocation8 + $0x1c] sm:$0xf] }
 0xc3d   :  { %10274 = vmatpush3.bf16.msra.mxu0 %v13653_v11  ;;  %10289 = vmatprep.mubr.bf16.mxu0 %v11121_v62 }
 0xc3e   :  { %10275 = vmatprep.subr.bf16.mxu0 %v13651_v32 }
 0xc41   :  { %10276 = vmatpush3.bf16.msra.mxu0 %v13651_v32 }
 0xc42   :  { %10277 = vmatprep.subr.bf16.mxu0 %v13649_v48 }
 0xc45   :  { %10278 = vmatpush3.bf16.msra.mxu0 %v13649_v48 }
 0xc46   :  { %10279 = vmatprep.subr.bf16.mxu0 %v13647_v10 }
 0xc49   :  { %10280 = vmatpush3.bf16.msra.mxu0 %v13647_v10 }
 0xc4a   :  { %10281 = vmatprep.subr.bf16.mxu0 %v13645_v49 }
 0xc4d   :  { %10282 = vmatpush3.bf16.msra.mxu0 %v13645_v49 }
 0xc4e   :  { %10283 = vmatprep.subr.bf16.mxu0 %v13643_v60 }
 0xc51   :  { %10284 = vmatpush3.bf16.msra.mxu0 %v13643_v60 }
 0xc52   :  { %10285 = vmatprep.subr.bf16.mxu0 %v13641_v3 }
 0xc55   :  { %10286 = vmatpush3.bf16.msra.mxu0 %v13641_v3 }
 0xc56   :  { %10287 = vmatprep.subr.bf16.mxu0 %v13639_v56 }
 0xc59   :  { %10288 = vmatpush3.bf16.msra.mxu0 %v13639_v56 }
 0xc5a   :  { %10624 = vmatprep.subr.msk.bf16.mxu0 %vm5591_vm2, %v6035_v34  ;;  %v11128_v34 = vld [vmem:[#allocation7 + $0x68] sm:$0xff]  }
 0xc5c   :  { %10290 = vmatmul.mubr.bf16.vlgmr.msra.gmra.mxu0 %v11122_v41  ;;  %v6439_v41 = vsel %vm5591_vm2, %v6431_v63, 0 }
 0xc5d   :  { %10320 = vmatpush3.bf16.msra.mxu0 %v6043_v7 }
 0xc5e   :  { %10325 = vmatprep.subr.bf16.mxu0 %v13653_v11 }
 0xcfc   :  { %v10271_v31 = vpop.f32.mrf.mxu0 }
 0xcfd   :  { %v5832_v5 = vadd.f32 %v10271_v31, %v5696_v14 }
 0xcfe   :  { %v5815_v50 = vpop.f32.mrf.mxu0 }
 0xcff   :  { %v5830_v27 = vadd.f32 %v5815_v50, %v5688_v24 }
 0xd00   :  { %v10272_v1 = vpop.f32.mrf.mxu0 }
 0xd01   :  { %v5833_v59 = vadd.f32 %v10272_v1, %v5699_v0 }
 0xd02   :  { %v5818_v25 = vpop.f32.mrf.mxu0 }
 0xd03   :  { %v5831_v6 = vadd.f32 %v5818_v25, %v5691_v45 }
 0xd1c   :  { %v10291_v53 = vpop.f32.mrf.mxu0 }
 0xd1e   :  { %v5885_v29 = vpop.f32.mrf.mxu0 }
 0xd20   :  { %v10292_v44 = vpop.f32.mrf.mxu0 }
 0xd21   :  { %v5901_v23 = vpack.c.bf16 %v10292_v44, %v10291_v53 }
 0xd22   :  { %v5888_v54 = vpop.f32.mrf.mxu0 }
 0xd23   :  { %v5900_v2 = vpack.c.bf16 %v5888_v54, %v5885_v29 }
 0xd25   :  { %10295 = vmatprep.mubr.msk.bf16.mxu1 %vm14193_vm9, %v5900_v2  ;;  %v11129_v2 = vld [vmem:[#allocation7 + $0x70] sm:$0xff]  }
 0xd26   :  { %10296 = vmatmul.mubr.msk.bf16.vlgmr.msra.gmra.mxu1 %vm14194_vm10, %v5901_v23  ;;  %v11130_v23 = vld [vmem:[#allocation7 + $0x78] sm:$0xff]  }
 0xd27   :  { %10300 = vmatpush3.bf16.msra.mxu1 %v13653_v11  ;;  %10315 = vmatprep.mubr.bf16.mxu1 %v11123_v4 }
 0xd28   :  { %10301 = vmatprep.subr.bf16.mxu1 %v13651_v32 }
 0xd2b   :  { %10302 = vmatpush3.bf16.msra.mxu1 %v13651_v32 }
 0xd2c   :  { %10303 = vmatprep.subr.bf16.mxu1 %v13649_v48 }
 0xd2f   :  { %10304 = vmatpush3.bf16.msra.mxu1 %v13649_v48 }
 0xd30   :  { %10305 = vmatprep.subr.bf16.mxu1 %v13647_v10 }
 0xd33   :  { %10306 = vmatpush3.bf16.msra.mxu1 %v13647_v10 }
 0xd34   :  { %10307 = vmatprep.subr.bf16.mxu1 %v13645_v49 }
 0xd37   :  { %10308 = vmatpush3.bf16.msra.mxu1 %v13645_v49 }
 0xd38   :  { %10309 = vmatprep.subr.bf16.mxu1 %v13643_v60 }
 0xd3b   :  { %10310 = vmatpush3.bf16.msra.mxu1 %v13643_v60 }
 0xd3c   :  { %10311 = vmatprep.subr.bf16.mxu1 %v13641_v3 }
 0xd3f   :  { %10312 = vmatpush3.bf16.msra.mxu1 %v13641_v3 }
 0xd40   :  { %10313 = vmatprep.subr.bf16.mxu1 %v13639_v56 }
 0xd43   :  { %10314 = vmatpush3.bf16.msra.mxu1 %v13639_v56 }
 0xd44   :  { %10625 = vmatprep.subr.msk.bf16.mxu1 %vm5591_vm2, %v6167_v12 }
 0xd46   :  { %10316 = vmatmul.mubr.bf16.vlgmr.msra.gmra.mxu1 %v11124_v26 }
 0xd47   :  { %10346 = vmatpush3.bf16.msra.mxu1 %v6175_v19 }
 0xd48   :  { %10351 = vmatprep.subr.bf16.mxu1 %v13653_v11 }
 0xde6   :  { %v10297_v8 = vpop.f32.mrf.mxu1 }
 0xde7   :  { %v5964_v17 = vadd.f32 %v10297_v8, %v5832_v5 }
 0xde8   :  { %v5947_v39 = vpop.f32.mrf.mxu1 }
 0xde9   :  { %v5962_v58 = vadd.f32 %v5947_v39, %v5830_v27 }
 0xdea   :  { %v10298_v46 = vpop.f32.mrf.mxu1 }
 0xdeb   :  { %v5965_v36 = vadd.f32 %v10298_v46, %v5833_v59 }
 0xdec   :  { %v5950_v40 = vpop.f32.mrf.mxu1 }
 0xded   :  { %v5963_v52 = vadd.f32 %v5950_v40, %v5831_v6 }
 0xe06   :  { %v10317_v61 = vpop.f32.mrf.mxu1 }
 0xe08   :  { %v6017_v47 = vpop.f32.mrf.mxu1 }
 0xe0a   :  { %v10318_v18 = vpop.f32.mrf.mxu1 }
 0xe0b   :  { %v6033_v37 = vpack.c.bf16 %v10318_v18, %v10317_v61  ;;  %v11131_v18 = vld [vmem:[#allocation7 + $0x80] sm:$0xff]  }
 0xe0c   :  { %v6020_v55 = vpop.f32.mrf.mxu1 }
 0xe0d   :  { %v6032_v42 = vpack.c.bf16 %v6020_v55, %v6017_v47 }
 0xe0f   :  { %10321 = vmatprep.mubr.msk.bf16.mxu0 %vm14195_vm11, %v6032_v42 }
 0xe10   :  { %10322 = vmatmul.mubr.msk.bf16.vlgmr.msra.gmra.mxu0 %vm14196_vm12, %v6033_v37  ;;  %vm6699_vm12 = vcmask 261120  }
 0xe11   :  { %10326 = vmatpush3.bf16.msra.mxu0 %v13653_v11  ;;  %10341 = vmatprep.mubr.bf16.mxu0 %v11125_v16 }
 0xe12   :  { %10327 = vmatprep.subr.bf16.mxu0 %v13651_v32 }
 0xe15   :  { %10328 = vmatpush3.bf16.msra.mxu0 %v13651_v32 }
 0xe16   :  { %10329 = vmatprep.subr.bf16.mxu0 %v13649_v48 }
 0xe19   :  { %10330 = vmatpush3.bf16.msra.mxu0 %v13649_v48 }
 0xe1a   :  { %10331 = vmatprep.subr.bf16.mxu0 %v13647_v10 }
 0xe1d   :  { %10332 = vmatpush3.bf16.msra.mxu0 %v13647_v10 }
 0xe1e   :  { %10333 = vmatprep.subr.bf16.mxu0 %v13645_v49 }
 0xe21   :  { %10334 = vmatpush3.bf16.msra.mxu0 %v13645_v49 }
 0xe22   :  { %10335 = vmatprep.subr.bf16.mxu0 %v13643_v60 }
 0xe25   :  { %10336 = vmatpush3.bf16.msra.mxu0 %v13643_v60 }
 0xe26   :  { %10337 = vmatprep.subr.bf16.mxu0 %v13641_v3 }
 0xe29   :  { %10338 = vmatpush3.bf16.msra.mxu0 %v13641_v3 }
 0xe2a   :  { %10339 = vmatprep.subr.bf16.mxu0 %v13639_v56 }
 0xe2d   :  { %10340 = vmatpush3.bf16.msra.mxu0 %v13639_v56 }
 0xe2e   :  { %10626 = vmatprep.subr.msk.bf16.mxu0 %vm5591_vm2, %v6299_v22 }
 0xe30   :  { %10342 = vmatmul.mubr.bf16.vlgmr.msra.gmra.mxu0 %v11126_v20 }
 0xe31   :  { %10372 = vmatpush3.bf16.msra.mxu0 %v6307_v28 }
 0xe32   :  { %10377 = vmatprep.subr.bf16.mxu0 %v13653_v11 }
 0xed0   :  { %v10323_v35 = vpop.f32.mrf.mxu0 }
 0xed1   :  { %v6096_v51 = vadd.f32 %v10323_v35, %v5964_v17 }
 0xed2   :  { %v6079_v14 = vpop.f32.mrf.mxu0 }
 0xed3   :  { %v6094_v33 = vadd.f32 %v6079_v14, %v5962_v58 }
 0xed4   :  { %v10324_v24 = vpop.f32.mrf.mxu0 }
 0xed5   :  { %v6097_v57 = vadd.f32 %v10324_v24, %v5965_v36 }
 0xed6   :  { %v6082_v0 = vpop.f32.mrf.mxu0 }
 0xed7   :  { %v6095_v21 = vadd.f32 %v6082_v0, %v5963_v52 }
 0xef0   :  { %v10343_v45 = vpop.f32.mrf.mxu0 }
 0xef2   :  { %v6149_v38 = vpop.f32.mrf.mxu0 }
 0xef4   :  { %v10344_v9 = vpop.f32.mrf.mxu0 }
 0xef5   :  { %v6165_v62 = vpack.c.bf16 %v10344_v9, %v10343_v45 }
 0xef6   :  { %v6152_v13 = vpop.f32.mrf.mxu0 }
 0xef7   :  { %v6164_v30 = vpack.c.bf16 %v6152_v13, %v6149_v38 }
 0xef9   :  { %10347 = vmatprep.mubr.msk.bf16.mxu1 %vm14197_vm13, %v6164_v30 }
 0xefa   :  { %10348 = vmatmul.mubr.msk.bf16.vlgmr.msra.gmra.mxu1 %vm14198_vm14, %v6165_v62  ;;  %vm14205_vm14 = vmmov %vm14200_vm0 }
 0xefb   :  { %10352 = vmatpush3.bf16.msra.mxu1 %v13653_v11  ;;  %10367 = vmatprep.mubr.bf16.mxu1 %v11127_v15 }
 0xefc   :  { %10353 = vmatprep.subr.bf16.mxu1 %v13651_v32 }
 0xeff   :  { %10354 = vmatpush3.bf16.msra.mxu1 %v13651_v32 }
 0xf00   :  { %10355 = vmatprep.subr.bf16.mxu1 %v13649_v48 }
 0xf03   :  { %10356 = vmatpush3.bf16.msra.mxu1 %v13649_v48 }
 0xf04   :  { %10357 = vmatprep.subr.bf16.mxu1 %v13647_v10 }
 0xf07   :  { %10358 = vmatpush3.bf16.msra.mxu1 %v13647_v10 }
 0xf08   :  { %10359 = vmatprep.subr.bf16.mxu1 %v13645_v49 }
 0xf0b   :  { %10360 = vmatpush3.bf16.msra.mxu1 %v13645_v49 }
 0xf0c   :  { %10361 = vmatprep.subr.bf16.mxu1 %v13643_v60 }
 0xf0f   :  { %10362 = vmatpush3.bf16.msra.mxu1 %v13643_v60 }
 0xf10   :  { %10363 = vmatprep.subr.bf16.mxu1 %v13641_v3 }
 0xf13   :  { %10364 = vmatpush3.bf16.msra.mxu1 %v13641_v3 }
 0xf14   :  { %10365 = vmatprep.subr.bf16.mxu1 %v13639_v56 }
 0xf17   :  { %10366 = vmatpush3.bf16.msra.mxu1 %v13639_v56 }
 0xf18   :  { %10627 = vmatprep.subr.msk.bf16.mxu1 %vm5591_vm2, %v6431_v63 }
 0xf1a   :  { %10368 = vmatmul.mubr.bf16.vlgmr.msra.gmra.mxu1 %v11128_v34 }
 0xf1b   :  { %10398 = vmatpush3.bf16.msra.mxu1 %v6439_v41 }
 0xf1c   :  { %10403 = vmatprep.subr.bf16.mxu1 %v13653_v11 }
 0xfba   :  { %v10349_v7 = vpop.f32.mrf.mxu1 }
 0xfbb   :  { %v6228_v31 = vadd.f32 %v10349_v7, %v6096_v51 }
 0xfbc   :  { %v6211_v5 = vpop.f32.mrf.mxu1 }
 0xfbd   :  { %v6226_v50 = vadd.f32 %v6211_v5, %v6094_v33  ;;  %v11582_v33 = vmov 0.0  }
 0xfbe   :  { %v10350_v27 = vpop.f32.mrf.mxu1 }
 0xfbf   :  { %v6229_v1 = vadd.f32 %v10350_v27, %v6097_v57 }
 0xfc0   :  { %v6214_v59 = vpop.f32.mrf.mxu1 }
 0xfc1   :  { %v6227_v25 = vadd.f32 %v6214_v59, %v6095_v21 }
 0xfda   :  { %v10369_v6 = vpop.f32.mrf.mxu1 }
 0xfdc   :  { %v6281_v53 = vpop.f32.mrf.mxu1 }
 0xfde   :  { %v10370_v29 = vpop.f32.mrf.mxu1 }
 0xfdf   :  { %v6297_v4 = vpack.c.bf16 %v10370_v29, %v10369_v6 }
 0xfe0   :  { %v6284_v44 = vpop.f32.mrf.mxu1 }
 0xfe1   :  { %v6296_v54 = vpack.c.bf16 %v6284_v44, %v6281_v53 }
 0xfe3   :  { %10373 = vmatprep.mubr.msk.bf16.mxu0 %vm14199_vm15, %v6296_v54  ;;  %vm14206_vm15 = vmmov %vm14200_vm0 }
 0xfe4   :  { %10374 = vmatmul.mubr.msk.bf16.vlgmr.msra.gmra.mxu0 %vm14200_vm0, %v6297_v4 }
 0xfe5   :  { %10378 = vmatpush3.bf16.msra.mxu0 %v13653_v11  ;;  %10393 = vmatprep.mubr.bf16.mxu0 %v11129_v2 }
 0xfe6   :  { %10379 = vmatprep.subr.bf16.mxu0 %v13651_v32 }
 0xfe9   :  { %10380 = vmatpush3.bf16.msra.mxu0 %v13651_v32 }
 0xfea   :  { %10381 = vmatprep.subr.bf16.mxu0 %v13649_v48 }
 0xfed   :  { %10382 = vmatpush3.bf16.msra.mxu0 %v13649_v48 }
 0xfee   :  { %10383 = vmatprep.subr.bf16.mxu0 %v13647_v10 }
 0xff1   :  { %10384 = vmatpush3.bf16.msra.mxu0 %v13647_v10 }
 0xff2   :  { %10385 = vmatprep.subr.bf16.mxu0 %v13645_v49 }
 0xff5   :  { %10386 = vmatpush3.bf16.msra.mxu0 %v13645_v49 }
 0xff6   :  { %10387 = vmatprep.subr.bf16.mxu0 %v13643_v60 }
 0xff9   :  { %10388 = vmatpush3.bf16.msra.mxu0 %v13643_v60 }
 0xffa   :  { %10389 = vmatprep.subr.bf16.mxu0 %v13641_v3 }
 0xffd   :  { %10390 = vmatpush3.bf16.msra.mxu0 %v13641_v3 }
 0xffe   :  { %10391 = vmatprep.subr.bf16.mxu0 %v13639_v56 }
0x1001   :  { %10392 = vmatpush3.bf16.msra.mxu0 %v13639_v56 }
0x1004   :  { %10394 = vmatmul.mubr.bf16.vlgmr.msra.gmra.mxu0 %v11130_v23 }
0x10a4   :  { %v10375_v12 = vpop.f32.mrf.mxu0 }
0x10a5   :  { %v6360_v26 = vadd.f32 %v10375_v12, %v6228_v31 }
0x10a6   :  { %v6343_v19 = vpop.f32.mrf.mxu0 }
0x10a7   :  { %v6358_v8 = vadd.f32 %v6343_v19, %v6226_v50 }
0x10a8   :  { %v10376_v17 = vpop.f32.mrf.mxu0 }
0x10a9   :  { %v6361_v39 = vadd.f32 %v10376_v17, %v6229_v1 }
0x10aa   :  { %v6346_v58 = vpop.f32.mrf.mxu0 }
0x10ab   :  { %v6359_v46 = vadd.f32 %v6346_v58, %v6227_v25 }
0x10c4   :  { %v10395_v36 = vpop.f32.mrf.mxu0 }
0x10c6   :  { %v6413_v40 = vpop.f32.mrf.mxu0 }
0x10c8   :  { %v10396_v52 = vpop.f32.mrf.mxu0 }
0x10c9   :  { %v6429_v55 = vpack.c.bf16 %v10396_v52, %v10395_v36 }
0x10ca   :  { %v6416_v61 = vpop.f32.mrf.mxu0 }
0x10cb   :  { %v6428_v47 = vpack.c.bf16 %v6416_v61, %v6413_v40 }
0x10cd   :  { %10399 = vmatprep.mubr.msk.bf16.mxu1 %vm14201_vm1, %v6428_v47  ;;  %vm8061_vm1 = vcmask 58368  }
0x10ce   :  { %10400 = vmatmul.mubr.msk.bf16.vlgmr.msra.gmra.mxu1 %vm14202_vm3, %v6429_v55 }
0x10cf   :  { %10404 = vmatpush3.bf16.msra.mxu1 %v13653_v11  ;;  %10419 = vmatprep.mubr.bf16.mxu1 %v11131_v18  ;;  %v6661_v18 = vld [vmem:[#allocation10] sm:$0x1] }
0x10d0   :  { %10405 = vmatprep.subr.bf16.mxu1 %v13651_v32 }
0x10d3   :  { %10406 = vmatpush3.bf16.msra.mxu1 %v13651_v32  ;;  %v11132_v32 = vld [vmem:[#allocation7 + $0x88] sm:$0xff]  }
0x10d4   :  { %10407 = vmatprep.subr.bf16.mxu1 %v13649_v48 }
0x10d7   :  { %10408 = vmatpush3.bf16.msra.mxu1 %v13649_v48  ;;  %v6563_v48 = vld [vmem:[#allocation8 + $0x20] sm:$0xf] }
0x10d8   :  { %10409 = vmatprep.subr.bf16.mxu1 %v13647_v10  ;;  %10628 = vmatprep.subr.msk.bf16.mxu0 %vm5591_vm2, %v6563_v48 }
0x10db   :  { %10410 = vmatpush3.bf16.msra.mxu1 %v13647_v10  ;;  %v6571_v10 = vsel %vm5591_vm2, %v6563_v48, 0  ;;  %v6665_v48 = vld [vmem:[#allocation10 + $0x1] sm:$0x1] }
0x10dc   :  { %10411 = vmatprep.subr.bf16.mxu1 %v13645_v49  ;;  %10424 = vmatpush3.bf16.msra.mxu0 %v6571_v10 }
0x10dd   :  { %10429 = vmatprep.subr.bf16.mxu0 %v11582_v33 }
0x10df   :  { %10412 = vmatpush3.bf16.msra.mxu1 %v13645_v49 }
0x10e0   :  { %10413 = vmatprep.subr.bf16.mxu1 %v13643_v60 }
0x10e3   :  { %10414 = vmatpush3.bf16.msra.mxu1 %v13643_v60 }
0x10e4   :  { %10415 = vmatprep.subr.bf16.mxu1 %v13641_v3 }
0x10e7   :  { %10416 = vmatpush3.bf16.msra.mxu1 %v13641_v3 }
0x10e8   :  { %10417 = vmatprep.subr.bf16.mxu1 %v13639_v56 }
0x10eb   :  { %10418 = vmatpush3.bf16.msra.mxu1 %v13639_v56 }
0x10ec   :  { %10445 = vmatprep.subr.bf16.mxu1 %v11582_v33 }
0x10ee   :  { %10420 = vmatmul.mubr.bf16.vlgmr.msra.gmra.mxu1 %v11132_v32 }
0x10ef   :  { %10447 = vmatprep.mubr.msk.bf16.mxu1 %vm11583_vm6, %v11582_v33 }
0x118e   :  { %v10401_v49 = vpop.f32.mrf.mxu1 }
0x118f   :  { %v6492_v11 = vadd.f32 %v10401_v49, %v6360_v26 }
0x1190   :  { %v6475_v42 = vpop.f32.mrf.mxu1 }
0x1191   :  { %v6490_v60 = vadd.f32 %v6475_v42, %v6358_v8 }
0x1192   :  { %v10402_v16 = vpop.f32.mrf.mxu1 }
0x1193   :  { %v6493_v37 = vadd.f32 %v10402_v16, %v6361_v39 }
0x1194   :  { %v6478_v22 = vpop.f32.mrf.mxu1 }
0x1195   :  { %v6491_v3 = vadd.f32 %v6478_v22, %v6359_v46 }
0x11ae   :  { %v10421_v20 = vpop.f32.mrf.mxu1 }
0x11b0   :  { %v6545_v28 = vpop.f32.mrf.mxu1 }
0x11b2   :  { %v10422_v35 = vpop.f32.mrf.mxu1 }
0x11b3   :  { %v6561_v14 = vpack.c.bf16 %v10422_v35, %v10421_v20 }
0x11b4   :  { %v6548_v51 = vpop.f32.mrf.mxu1 }
0x11b5   :  { %v6560_v56 = vpack.c.bf16 %v6548_v51, %v6545_v28 }
0x11b7   :  { %10425 = vmatprep.mubr.msk.bf16.mxu0 %vm14203_vm4, %v6560_v56 }
0x11b8   :  { %10426 = vmatmul.mubr.msk.bf16.vlgmr.msra.gmra.mxu0 %vm14204_vm5, %v6561_v14 }
0x11b9   :  { %10433 = vmatprep.mubr.msk.bf16.mxu0 %vm11583_vm6, %v11582_v33 }
0x1278   :  { %v10427_v24 = vpop.f32.mrf.mxu0 }
0x1279   :  { %v6624_v45 = vadd.f32 %v10427_v24, %v6492_v11 }
0x127a   :  { %v6607_v57 = vpop.f32.mrf.mxu0 }
0x127b   :  { %v6622_v0 = vadd.f32 %v6607_v57, %v6490_v60  ;;  %v6643_v15 = vmul.f32 %v6624_v45, %v6624_v45  ;;  %v6630_v7 = vsel %vm6626_vm7, %v6624_v45, 0.0 }
0x127c   :  { %v10428_v21 = vpop.f32.mrf.mxu0 }
0x127d   :  { %v6641_v9 = vmul.f32 %v6622_v0, %v6622_v0  ;;  %v6625_v13 = vadd.f32 %v10428_v21, %v6493_v37  ;;  %v6627_v62 = vsel %vm6626_vm7, %v6622_v0, 0.0  ;;  %v6648_v59 = vsel %vm6626_vm7, %v6643_v15, 0.0  ;;  %v11134_v15 = vld [vmem:[#allocation13] sm:$0xff]  }
0x127e   :  { %v6610_v38 = vpop.f32.mrf.mxu0 }
0x127f   :  { %v6623_v30 = vadd.f32 %v6610_v38, %v6491_v3  ;;  %v6645_v31 = vsel %vm6626_vm7, %v6641_v9, 0.0  ;;  %v6644_v5 = vmul.f32 %v6625_v13, %v6625_v13  ;;  %v6632_v25 = vsel %vm6626_vm7, %v6625_v13, 0.0 }
0x1281   :  { %v6628_v63 = vsel %vm6626_vm7, %v6623_v30, 0.0  ;;  %v6642_v34 = vmul.f32 %v6623_v30, %v6623_v30  ;;  %v6650_v29 = vsel %vm6626_vm7, %v6644_v5, 0.0 }
0x1282   :  { %v6629_v41 = vadd.f32 %v6628_v63, %v6627_v62  ;;  %v11133_v62 = vld [vmem:[#allocation13 + $0x8] sm:$0xff]  }
0x1283   :  { %v6646_v50 = vsel %vm6626_vm7, %v6642_v34, 0.0  ;;  %10446 = vmatpush3.bf16.msra.mxu1 %v11133_v62 }
0x1284   :  { %v6631_v27 = vadd.f32 %v6630_v7, %v6629_v41  ;;  %v6647_v1 = vadd.f32 %v6646_v50, %v6645_v31  ;;  %10457 = vmatprep.subr.bf16.mxu1 %v11582_v33 }
0x1286   :  { %v6633_v6 = vadd.f32 %v6632_v25, %v6631_v27  ;;  %v6649_v53 = vadd.f32 %v6648_v59, %v6647_v1  ;;  %v6894_v25 = vld [vmem:[#allocation11 + $0x8] sm:$0xf] }
0x1288   :  { %v6634_v44 = vrot.slane %v6633_v6, 4  ;;  %v6651_v54 = vadd.f32 %v6650_v29, %v6649_v53  ;;  %v7092_v53 = vld [vmem:[#allocation11 + $0x10] sm:$0xf]  ;;  %v7191_v29 = vld [vmem:[#allocation11 + $0x14] sm:$0xf] }
0x128a   :  { %v6635_v2 = vadd.f32 %v6634_v44, %v6633_v6  ;;  %v6652_v4 = vrot.slane %v6651_v54, 4  ;;  %v6993_v6 = vld [vmem:[#allocation11 + $0xc] sm:$0xf]  ;;  %v7290_v44 = vld [vmem:[#allocation11 + $0x18] sm:$0xf] }
0x128c   :  { %v6636_v23 = vrot.slane %v6635_v2, 2  ;;  %v6653_v12 = vadd.f32 %v6652_v4, %v6651_v54  ;;  %v7389_v54 = vld [vmem:[#allocation11 + $0x1c] sm:$0xf]  ;;  %v11135_v4 = vld [vmem:[#allocation13 + $0x10] sm:$0xff]  }
0x128e   :  { %v6637_v26 = vadd.f32 %v6636_v23, %v6635_v2  ;;  %v6654_v19 = vrot.slane %v6653_v12, 2  ;;  %v7488_v2 = vld [vmem:[#allocation11 + $0x20] sm:$0xf] }
0x1290   :  { %v6638_v8 = vrot.slane %v6637_v26, 1  ;;  %v6655_v17 = vadd.f32 %v6654_v19, %v6653_v12 }
0x1292   :  { %v6639_v39 = vadd.f32 %v6638_v8, %v6637_v26  ;;  %v6656_v58 = vrot.slane %v6655_v17, 1 }
0x1294   :  { %v6640_v46 = vmul.f32 0.03125, %v6639_v39  ;;  %v6657_v36 = vadd.f32 %v6656_v58, %v6655_v17 }
0x1296   :  { %v6658_v40 = vmul.f32 0.03125, %v6657_v36  ;;  %v6659_v52 = vmul.f32 %v6640_v46, %v6640_v46 }
0x1298   :  { %v6660_v61 = vsub.f32 %v6658_v40, %v6659_v52  ;;  %v11136_v40 = vld [vmem:[#allocation13 + $0x18] sm:$0xff]  }
0x129a   :  { %v6662_v47 = vadd.f32 1e-05, %v6660_v61 }
0x129c   :  { %11152 = vrsqrt.f32 %v6662_v47 }
0x12a9   :  { %v11153_v55 = vpop.eup %11152 }
0x12aa   :  { %v6664_v32 = vmul.f32 %v11153_v55, %v6661_v18 }
0x12ac   :  { %v6666_v10 = vmul.f32 %v6664_v32, %v6640_v46  ;;  %v6671_v49 = vrot.slane %v6664_v32, %v13607_v43  ;;  %v11137_v32 = vld [vmem:[#allocation13 + $0x20] sm:$0xff]  }
0x12ae   :  { %v6667_v11 = vsub.f32 %v6665_v48, %v6666_v10  ;;  %v6672_v42 = vmul.f32 %v6671_v49, %v6622_v0  ;;  %v6673_v60 = vmul.f32 %v6671_v49, %v6623_v30  ;;  %v6674_v16 = vmul.f32 %v6671_v49, %v6624_v45  ;;  %v6747_v30 = vld [vmem:[#allocation11 + $0x4] sm:$0xf] }
0x12af   :  { %v6675_v37 = vmul.f32 %v6671_v49, %v6625_v13  ;;  %v6698_v13 = vld [vmem:[#allocation11] sm:$0xf] }
0x12b0   :  { %v6679_v22 = vrot.slane %v6667_v11, %v13607_v43 }
0x12b2   :  { %v6680_v3 = vadd.f32 %v6679_v22, %v6672_v42  ;;  %v6681_v20 = vadd.f32 %v6679_v22, %v6673_v60  ;;  %v6682_v28 = vadd.f32 %v6679_v22, %v6674_v16  ;;  %v6683_v35 = vadd.f32 %v6679_v22, %v6675_v37  ;;  %v11138_v60 = vld [vmem:[#allocation13 + $0x28] sm:$0xff]  }
0x12b4   :  { %vm6684_vm8 = vcmp.ge.f32.partialorder %v6680_v3, 0.0  ;;  %vm6685_vm9 = vcmp.ge.f32.partialorder %v6681_v20, 0.0  ;;  %vm6686_vm10 = vcmp.ge.f32.partialorder %v6682_v28, 0.0  ;;  %vm6687_vm11 = vcmp.ge.f32.partialorder %v6683_v35, 0.0 }
0x12b5   :  { %v6688_v51 = vmul.f32 0.01, %v6680_v3  ;;  %v6689_v56 = vmul.f32 0.01, %v6681_v20  ;;  %v6690_v14 = vmul.f32 0.01, %v6682_v28 }
0x12b6   :  { %v6691_v24 = vmul.f32 0.01, %v6683_v35 }
0x12b7   :  { %v6692_v57 = vsel %vm6684_vm8, %v6680_v3, %v6688_v51  ;;  %v6693_v21 = vsel %vm6685_vm9, %v6681_v20, %v6689_v56  ;;  %v6694_v0 = vsel %vm6686_vm10, %v6682_v28, %v6690_v14  ;;  %v11139_v28 = vld [vmem:[#allocation13 + $0x30] sm:$0xff]  }
0x12b8   :  { %v6695_v38 = vsel %vm6687_vm11, %v6683_v35, %v6691_v24  ;;  %v13851_v45 = vpack.c.bf16 %v6693_v21, %v6692_v57  ;;  %v11140_v57 = vld [vmem:[#allocation13 + $0x38] sm:$0xff]  }
0x12b9   :  { %v13853_v9 = vpack.c.bf16 %v6695_v38, %v6694_v0 }
0x12bb   :  { %10430 = vmatpush3.bf16.msra.mxu0 %v13853_v9 }
0x12bc   :  { %10431 = vmatprep.subr.bf16.mxu0 %v11582_v33 }
0x12bf   :  { %10432 = vmatpush3.bf16.msra.mxu0 %v13851_v45 }
0x12c0   :  { %10437 = vmatprep.subr.bf16.mxu0 %v11582_v33 }
0x12c2   :  { %10434 = vmatmul.mubr.msk.bf16.vlgmr.msra.gmra.mxu0 %vm6699_vm12, %v6698_v13  ;;  %v11141_v13 = vld [vmem:[#allocation13 + $0x40] sm:$0xff]  }
0x12c3   :  { %10438 = vmatpush3.bf16.msra.mxu0 %v13853_v9  ;;  %10441 = vmatprep.mubr.msk.bf16.mxu0 %vm11583_vm6, %v11582_v33 }
0x12c4   :  { %10439 = vmatprep.subr.bf16.mxu0 %v11582_v33 }
0x12c7   :  { %10440 = vmatpush3.bf16.msra.mxu0 %v13851_v45 }
0x12c8   :  { %10451 = vmatprep.subr.bf16.mxu0 %v11582_v33 }
0x12ca   :  { %10442 = vmatmul.mubr.msk.bf16.vlgmr.msra.gmra.mxu0 %vm6699_vm12, %v6747_v30 }
0x12cb   :  { %10453 = vmatprep.mubr.msk.bf16.mxu0 %vm11583_vm6, %v11582_v33  ;;  %10452 = vmatpush3.bf16.msra.mxu0 %v11134_v15 }
0x12cc   :  { %10465 = vmatprep.subr.bf16.mxu0 %v11582_v33 }
0x1382   :  { %v6737_v63 = vpop.f32.mrf.mxu0 }
0x1383   :  { %v6743_v34 = vpack.c.bf16 %v6737_v63, %v6737_v63 }
0x1384   :  { %v10435_v41 = vpop.f32.mrf.mxu0 }
0x1385   :  { %10454 = vmatmul.mubr.msk.bf16.vlgmr.msra.gmra.mxu0 %vm6626_vm7, %v6743_v34 }
0x1386   :  { %v6740_v7 = vpop.f32.mrf.mxu0  ;;  %10467 = vmatprep.mubr.msk.bf16.mxu0 %vm11583_vm6, %v11582_v33  ;;  %10466 = vmatpush3.bf16.msra.mxu0 %v11135_v4 }
0x1387   :  { %10479 = vmatprep.subr.bf16.mxu0 %v11582_v33 }
0x1388   :  { %v10436_v31 = vpop.f32.mrf.mxu0 }
0x138a   :  { %v6785_v5 = vpop.f32.mrf.mxu0 }
0x138b   :  { %v6791_v50 = vpack.c.bf16 %v6785_v5, %v6785_v5 }
0x138c   :  { %v10443_v27 = vpop.f32.mrf.mxu0 }
0x138d   :  { %10448 = vmatmul.mubr.msk.bf16.vlgmr.msra.gmra.mxu1 %vm6626_vm7, %v6791_v50 }
0x138e   :  { %10458 = vmatpush3.bf16.msra.mxu1 %v13853_v9  ;;  %10461 = vmatprep.mubr.msk.bf16.mxu1 %vm11583_vm6, %v11582_v33  ;;  %v6788_v1 = vpop.f32.mrf.mxu0 }
0x138f   :  { %10459 = vmatprep.subr.bf16.mxu1 %v11582_v33 }
0x1390   :  { %v10444_v59 = vpop.f32.mrf.mxu0 }
0x1392   :  { %10460 = vmatpush3.bf16.msra.mxu1 %v13851_v45 }
0x1393   :  { %10471 = vmatprep.subr.bf16.mxu1 %v11582_v33 }
0x1395   :  { %10462 = vmatmul.mubr.msk.bf16.vlgmr.msra.gmra.mxu1 %vm6699_vm12, %v6894_v25 }
0x1396   :  { %10472 = vmatpush3.bf16.msra.mxu1 %v13853_v9  ;;  %10475 = vmatprep.mubr.msk.bf16.mxu1 %vm11583_vm6, %v11582_v33 }
0x1397   :  { %10473 = vmatprep.subr.bf16.mxu1 %v11582_v33 }
0x139a   :  { %10474 = vmatpush3.bf16.msra.mxu1 %v13851_v45 }
0x139b   :  { %10485 = vmatprep.subr.bf16.mxu1 %v11582_v33 }
0x139d   :  { %10476 = vmatmul.mubr.msk.bf16.vlgmr.msra.gmra.mxu1 %vm6699_vm12, %v6993_v6 }
0x139e   :  { %10486 = vmatpush3.bf16.msra.mxu1 %v13853_v9  ;;  %10489 = vmatprep.mubr.msk.bf16.mxu1 %vm11583_vm6, %v11582_v33 }
0x139f   :  { %10487 = vmatprep.subr.bf16.mxu1 %v11582_v33 }
0x13a2   :  { %10488 = vmatpush3.bf16.msra.mxu1 %v13851_v45 }
0x13a3   :  { %10499 = vmatprep.subr.bf16.mxu1 %v11582_v33 }
0x13a5   :  { %10490 = vmatmul.mubr.msk.bf16.vlgmr.msra.gmra.mxu1 %vm6699_vm12, %v7092_v53 }
0x13a6   :  { %10500 = vmatpush3.bf16.msra.mxu1 %v13853_v9  ;;  %10503 = vmatprep.mubr.msk.bf16.mxu1 %vm11583_vm6, %v11582_v33 }
0x13a7   :  { %10501 = vmatprep.subr.bf16.mxu1 %v11582_v33 }
0x13aa   :  { %10502 = vmatpush3.bf16.msra.mxu1 %v13851_v45 }
0x13ab   :  { %10513 = vmatprep.subr.bf16.mxu1 %v11582_v33 }
0x13ad   :  { %10504 = vmatmul.mubr.msk.bf16.vlgmr.msra.gmra.mxu1 %vm6699_vm12, %v7191_v29 }
0x13ae   :  { %10514 = vmatpush3.bf16.msra.mxu1 %v13853_v9  ;;  %10517 = vmatprep.mubr.msk.bf16.mxu1 %vm11583_vm6, %v11582_v33 }
0x13af   :  { %10515 = vmatprep.subr.bf16.mxu1 %v11582_v33 }
0x13b2   :  { %10516 = vmatpush3.bf16.msra.mxu1 %v13851_v45 }
0x13b3   :  { %10527 = vmatprep.subr.bf16.mxu1 %v11582_v33 }
0x13b5   :  { %10518 = vmatmul.mubr.msk.bf16.vlgmr.msra.gmra.mxu1 %vm6699_vm12, %v7290_v44 }
0x13b6   :  { %10528 = vmatpush3.bf16.msra.mxu1 %v13853_v9  ;;  %10531 = vmatprep.mubr.msk.bf16.mxu1 %vm11583_vm6, %v11582_v33 }
0x13b7   :  { %10529 = vmatprep.subr.bf16.mxu1 %v11582_v33 }
0x13ba   :  { %10530 = vmatpush3.bf16.msra.mxu1 %v13851_v45 }
0x13bb   :  { %10541 = vmatprep.subr.bf16.mxu1 %v11582_v33 }
0x13bd   :  { %10532 = vmatmul.mubr.msk.bf16.vlgmr.msra.gmra.mxu1 %vm6699_vm12, %v7389_v54 }
0x13be   :  { %10542 = vmatpush3.bf16.msra.mxu1 %v13853_v9  ;;  %10545 = vmatprep.mubr.msk.bf16.mxu1 %vm11583_vm6, %v11582_v33 }
0x13bf   :  { %10543 = vmatprep.subr.bf16.mxu1 %v11582_v33 }
0x13c2   :  { %10544 = vmatpush3.bf16.msra.mxu1 %v13851_v45 }
0x13c3   :  { %10555 = vmatprep.subr.bf16.mxu1 %v11582_v33 }
0x13c5   :  { %10546 = vmatmul.mubr.msk.bf16.vlgmr.msra.gmra.mxu1 %vm6699_vm12, %v7488_v2 }
0x13c6   :  { %10557 = vmatprep.mubr.msk.bf16.mxu1 %vm11583_vm6, %v11582_v33 }
0x1445   :  { %v6887_v23 = vpop.f32.mrf.mxu0 }
0x1447   :  { %v10455_v12 = vpop.f32.mrf.mxu0 }
0x1449   :  { %v6890_v26 = vpop.f32.mrf.mxu0 }
0x144b   :  { %v10456_v19 = vpop.f32.mrf.mxu0 }
0x144d   :  { %v6838_v8 = vpop.f32.mrf.mxu1 }
0x144e   :  { %v13927_v17 = vadd.f32 %v6887_v23, %v6838_v8 }
0x144f   :  { %v10449_v39 = vpop.f32.mrf.mxu1 }
0x1451   :  { %v6841_v58 = vpop.f32.mrf.mxu1 }
0x1453   :  { %v10450_v46 = vpop.f32.mrf.mxu1 }
0x1455   :  { %v6932_v36 = vpop.f32.mrf.mxu1 }
0x1456   :  { %v6938_v52 = vpack.c.bf16 %v6932_v36, %v6932_v36 }
0x1457   :  { %v10463_v61 = vpop.f32.mrf.mxu1 }
0x1458   :  { %10468 = vmatmul.mubr.msk.bf16.vlgmr.msra.gmra.mxu0 %vm6626_vm7, %v6938_v52 }
0x1459   :  { %v6935_v47 = vpop.f32.mrf.mxu1  ;;  %10480 = vmatpush3.bf16.msra.mxu0 %v11136_v40  ;;  %10481 = vmatprep.mubr.msk.bf16.mxu0 %vm11583_vm6, %v11582_v33 }
0x145a   :  { %10493 = vmatprep.subr.bf16.mxu0 %v11582_v33 }
0x145b   :  { %v10464_v18 = vpop.f32.mrf.mxu1 }
0x145d   :  { %v7031_v55 = vpop.f32.mrf.mxu1 }
0x145e   :  { %v7037_v48 = vpack.c.bf16 %v7031_v55, %v7031_v55 }
0x145f   :  { %v10477_v10 = vpop.f32.mrf.mxu1 }
0x1460   :  { %10482 = vmatmul.mubr.msk.bf16.vlgmr.msra.gmra.mxu0 %vm6626_vm7, %v7037_v48 }
0x1461   :  { %v7034_v49 = vpop.f32.mrf.mxu1  ;;  %10494 = vmatpush3.bf16.msra.mxu0 %v11137_v32  ;;  %10495 = vmatprep.mubr.msk.bf16.mxu0 %vm11583_vm6, %v11582_v33 }
0x1462   :  { %10507 = vmatprep.subr.bf16.mxu0 %v11582_v33 }
0x1463   :  { %v10478_v11 = vpop.f32.mrf.mxu1 }
0x1465   :  { %v7130_v42 = vpop.f32.mrf.mxu1 }
0x1466   :  { %v7136_v16 = vpack.c.bf16 %v7130_v42, %v7130_v42 }
0x1467   :  { %v10491_v37 = vpop.f32.mrf.mxu1 }
0x1468   :  { %10496 = vmatmul.mubr.msk.bf16.vlgmr.msra.gmra.mxu0 %vm6626_vm7, %v7136_v16 }
0x1469   :  { %v7133_v22 = vpop.f32.mrf.mxu1  ;;  %10508 = vmatpush3.bf16.msra.mxu0 %v11138_v60  ;;  %10509 = vmatprep.mubr.msk.bf16.mxu0 %vm11583_vm6, %v11582_v33 }
0x146a   :  { %10521 = vmatprep.subr.bf16.mxu0 %v11582_v33 }
0x146b   :  { %v10492_v3 = vpop.f32.mrf.mxu1 }
0x146d   :  { %v7229_v20 = vpop.f32.mrf.mxu1 }
0x146e   :  { %v7235_v35 = vpack.c.bf16 %v7229_v20, %v7229_v20 }
0x146f   :  { %v10505_v51 = vpop.f32.mrf.mxu1 }
0x1470   :  { %10510 = vmatmul.mubr.msk.bf16.vlgmr.msra.gmra.mxu0 %vm6626_vm7, %v7235_v35 }
0x1471   :  { %v7232_v56 = vpop.f32.mrf.mxu1  ;;  %10522 = vmatpush3.bf16.msra.mxu0 %v11139_v28  ;;  %10523 = vmatprep.mubr.msk.bf16.mxu0 %vm11583_vm6, %v11582_v33 }
0x1472   :  { %10535 = vmatprep.subr.bf16.mxu0 %v11582_v33 }
0x1473   :  { %v10506_v14 = vpop.f32.mrf.mxu1 }
0x1475   :  { %v7328_v24 = vpop.f32.mrf.mxu1 }
0x1476   :  { %v7334_v21 = vpack.c.bf16 %v7328_v24, %v7328_v24 }
0x1477   :  { %v10519_v0 = vpop.f32.mrf.mxu1 }
0x1478   :  { %10524 = vmatmul.mubr.msk.bf16.vlgmr.msra.gmra.mxu0 %vm6626_vm7, %v7334_v21 }
0x1479   :  { %v7331_v38 = vpop.f32.mrf.mxu1  ;;  %10536 = vmatpush3.bf16.msra.mxu0 %v11140_v57  ;;  %10537 = vmatprep.mubr.msk.bf16.mxu0 %vm11583_vm6, %v11582_v33 }
0x147a   :  { %10549 = vmatprep.subr.bf16.mxu0 %v11582_v33 }
0x147b   :  { %v10520_v45 = vpop.f32.mrf.mxu1 }
0x147d   :  { %v7427_v9 = vpop.f32.mrf.mxu1 }
0x147e   :  { %v7433_v30 = vpack.c.bf16 %v7427_v9, %v7427_v9 }
0x147f   :  { %v10533_v15 = vpop.f32.mrf.mxu1 }
0x1480   :  { %10538 = vmatmul.mubr.msk.bf16.vlgmr.msra.gmra.mxu0 %vm6626_vm7, %v7433_v30 }
0x1481   :  { %v7430_v62 = vpop.f32.mrf.mxu1  ;;  %10550 = vmatpush3.bf16.msra.mxu0 %v11141_v13  ;;  %10551 = vmatprep.mubr.msk.bf16.mxu0 %vm11583_vm6, %v11582_v33 }
0x1482   :  { %10561 = vmatprep.subr.bf16.mxu0 %v11582_v33  ;;  %v7605_v62 = vld [vmem:[#allocation14] sm:$0x1] }
0x1483   :  { %v10534_v63 = vpop.f32.mrf.mxu1 }
0x1485   :  { %v7526_v34 = vpop.f32.mrf.mxu1 }
0x1486   :  { %v7532_v41 = vpack.c.bf16 %v7526_v34, %v7526_v34 }
0x1487   :  { %v10547_v7 = vpop.f32.mrf.mxu1 }
0x1488   :  { %10552 = vmatmul.mubr.msk.bf16.vlgmr.msra.gmra.mxu0 %vm6626_vm7, %v7532_v41  ;;  %v7609_v41 = vld [vmem:[#allocation14 + $0x1] sm:$0x1] }
0x1489   :  { %v7529_v31 = vpop.f32.mrf.mxu1  ;;  %10563 = vmatprep.mubr.msk.bf16.mxu0 %vm11583_vm6, %v11582_v33 }
0x148b   :  { %v10548_v5 = vpop.f32.mrf.mxu1 }
0x1518   :  { %v6985_v50 = vpop.f32.mrf.mxu0 }
0x1519   :  { %v6991_v46 = vadd.f32 %v6985_v50, %v13927_v17 }
0x151a   :  { %v10469_v27 = vpop.f32.mrf.mxu0 }
0x151c   :  { %v6988_v1 = vpop.f32.mrf.mxu0 }
0x151e   :  { %v10470_v59 = vpop.f32.mrf.mxu0 }
0x1520   :  { %v7084_v25 = vpop.f32.mrf.mxu0 }
0x1521   :  { %v7090_v40 = vadd.f32 %v7084_v25, %v6991_v46 }
0x1522   :  { %v10483_v6 = vpop.f32.mrf.mxu0 }
0x1524   :  { %v7087_v53 = vpop.f32.mrf.mxu0 }
0x1526   :  { %v10484_v29 = vpop.f32.mrf.mxu0 }
0x1527   :  { %v7679_v29 = vld [vmem:[#allocation16 + $0x1] sm:$0x1] }
0x1528   :  { %v7183_v44 = vpop.f32.mrf.mxu0 }
0x1529   :  { %v7189_v61 = vadd.f32 %v7183_v44, %v7090_v40  ;;  %v7626_v44 = vld [vmem:[#allocation16] sm:$0x1] }
0x152a   :  { %v10497_v54 = vpop.f32.mrf.mxu0 }
0x152b   :  { %v11142_v54 = vld [vmem:[%s14039_s11 + $0x18] sm:$0xff]  }
0x152c   :  { %v7186_v2 = vpop.f32.mrf.mxu0 }
0x152d   :  { %v11144_v2 = vld [vmem:[%s14039_s11 + $0x8] sm:$0xff]  }
0x152e   :  { %v10498_v4 = vpop.f32.mrf.mxu0 }
0x152f   :  { %v11145_v4 = vld [vmem:[%s14039_s11] sm:$0xff]  }
0x1530   :  { %v7282_v23 = vpop.f32.mrf.mxu0 }
0x1531   :  { %v7288_v18 = vadd.f32 %v7282_v23, %v7189_v61  ;;  %v7947_v61 = vld [vmem:[#allocation16 + $0x3] sm:$0x1] }
0x1532   :  { %v10511_v12 = vpop.f32.mrf.mxu0 }
0x1534   :  { %v7285_v26 = vpop.f32.mrf.mxu0 }
0x1536   :  { %v10512_v19 = vpop.f32.mrf.mxu0 }
0x1538   :  { %v7381_v8 = vpop.f32.mrf.mxu0 }
0x1539   :  { %v7387_v32 = vadd.f32 %v7381_v8, %v7288_v18  ;;  %v11147_v18 = vld [vmem:[%s14039_s11 + $0x20] sm:$0xff]  }
0x153a   :  { %v10525_v39 = vpop.f32.mrf.mxu0 }
0x153c   :  { %v7384_v58 = vpop.f32.mrf.mxu0 }
0x153e   :  { %v10526_v36 = vpop.f32.mrf.mxu0 }
0x1540   :  { %v7480_v52 = vpop.f32.mrf.mxu0 }
0x1541   :  { %v7486_v10 = vadd.f32 %v7480_v52, %v7387_v32  ;;  %v7840_v52 = vld [vmem:[#allocation16 + $0x2] sm:$0x1] }
0x1542   :  { %v10539_v47 = vpop.f32.mrf.mxu0 }
0x1543   :  { %v11146_v47 = vld [vmem:[%s14039_s11 + $0x28] sm:$0xff]  }
0x1544   :  { %v7483_v55 = vpop.f32.mrf.mxu0 }
0x1546   :  { %v10540_v48 = vpop.f32.mrf.mxu0 }
0x1548   :  { %v7579_v49 = vpop.f32.mrf.mxu0 }
0x1549   :  { %v7585_v11 = vadd.f32 %v7579_v49, %v7486_v10 }
0x154a   :  { %v10553_v42 = vpop.f32.mrf.mxu0 }
0x154b   :  { %v7586_v60 = vsel %vm6699_vm12, %v7585_v11, 0.0  ;;  %v7594_v16 = vmul.f32 %v7585_v11, %v7585_v11 }
0x154c   :  { %v7587_v37 = vrot.slane %v7586_v60, 4  ;;  %v7582_v22 = vpop.f32.mrf.mxu0 }
0x154d   :  { %v7595_v17 = vsel %vm6699_vm12, %v7594_v16, 0.0  ;;  %v11148_v22 = vld [vmem:[%s14039_s11 + $0x38] sm:$0xff]  }
0x154e   :  { %v7588_v3 = vadd.f32 %v7587_v37, %v7586_v60  ;;  %v7596_v20 = vrot.slane %v7595_v17, 4  ;;  %v10554_v28 = vpop.f32.mrf.mxu0 }
0x154f   :  { %v11149_v28 = vld [vmem:[%s14039_s11 + $0x30] sm:$0xff]  }
0x1550   :  { %v7589_v35 = vrot.slane %v7588_v3, 2  ;;  %v7597_v51 = vadd.f32 %v7596_v20, %v7595_v17 }
0x1552   :  { %v7590_v56 = vadd.f32 %v7589_v35, %v7588_v3  ;;  %v7598_v14 = vrot.slane %v7597_v51, 2 }
0x1554   :  { %v7591_v24 = vrot.slane %v7590_v56, 1  ;;  %v7599_v57 = vadd.f32 %v7598_v14, %v7597_v51 }
0x1556   :  { %v7592_v21 = vadd.f32 %v7591_v24, %v7590_v56  ;;  %v7600_v0 = vrot.slane %v7599_v57, 1 }
0x1558   :  { %v7593_v38 = vmul.f32 0.125, %v7592_v21  ;;  %v7601_v45 = vadd.f32 %v7600_v0, %v7599_v57 }
0x155a   :  { %v7602_v9 = vmul.f32 0.125, %v7601_v45  ;;  %v7603_v13 = vmul.f32 %v7593_v38, %v7593_v38 }
0x155c   :  { %v7604_v30 = vsub.f32 %v7602_v9, %v7603_v13 }
0x155e   :  { %v7606_v15 = vadd.f32 1e-05, %v7604_v30  ;;  %v8617_v30 = vld [vmem:[#allocation17] ss:$0 sm:$0xff] }
0x1560   :  { %11154 = vrsqrt.f32 %v7606_v15 }
0x156d   :  { %v11155_v63 = vpop.eup %11154 }
0x156e   :  { %v7608_v34 = vmul.f32 %v11155_v63, %v7605_v62 }
0x1570   :  { %v7610_v7 = vmul.f32 %v7608_v34, %v7593_v38  ;;  %v7615_v31 = vrot.slane %v7608_v34, %v13607_v43 }
0x1572   :  { %v7611_v5 = vsub.f32 %v7609_v41, %v7610_v7  ;;  %v7616_v50 = vmul.f32 %v7615_v31, %v7585_v11 }
0x1574   :  { %v7620_v27 = vrot.slane %v7611_v5, %v13607_v43  ;;  %v11143_v43 = vld [vmem:[%s14039_s11 + $0x10] sm:$0xff]   ;;  %s11584_s11 = smov [#allocation20]  }
0x1575   :  { %s8085_s24 = sshll.u32 %s11584_s11, 4  ;;  %s8086_s24 = int_to_ptr.vmem [resolvable:$true] %s8085_s24 }
0x1576   :  { %v7621_v1 = vadd.f32 %v7620_v27, %v7616_v50  ;;  %s11490_s12 = scalar_lea.vmem %s8086_s24, 32  ;;  %p11495_p0 = scmp.lt.s32.totalorder %s8086_s24, %s8086_s24 }
0x1577   :  { %p11491_p13 = scmp.ne.s32.totalorder %s8086_s24, %s11490_s12  ;;  %p11496_p1 = scmp.lt.s32.totalorder %s11490_s12, %s11490_s12 }
0x1578   :  { %vm7622_vm13 = vcmp.ge.f32.partialorder %v7621_v1, 0.0  ;;  %v7623_v59 = vmul.f32 0.01, %v7621_v1 }
0x1579   :  { %p11497_p2 = por %p11496_p1, %p11495_p0 }
0x157a   :  { %v7624_v25 = vsel %vm7622_vm13, %v7621_v1, %v7623_v59 }
0x157b   :  { %v7625_v6 = vpack.c.bf16 %v7624_v25, %v7624_v25  ;;  %p11498_p3 = pnand %p11497_p2, %p11491_p13 }
0x157d   :  { %v7631_v53 = vsel %vm5591_vm2, %v7625_v6, 0  ;;  %vm14207_vm2 = vmmov %vm14200_vm0 }
0x157e   :  { %10556 = vmatpush3.bf16.msra.mxu1 %v7631_v53  ;;  %10562 = vmatpush3.bf16.msra.mxu0 %v7631_v53 }
0x157f   :  { %10567 = vmatprep.subr.bf16.mxu1 %v11582_v33  ;;  %10575 = vmatprep.subr.bf16.mxu0 %v11582_v33 }
0x1581   :  { %10564 = vmatmul.mubr.msk.bf16.vlgmr.msra.gmra.mxu0 %vm14205_vm14, %v7679_v29  ;;  %10558 = vmatmul.mubr.msk.bf16.vlgmr.msra.gmra.mxu1 %vm14206_vm15, %v7626_v44 }
0x1582   :  { %10568 = vmatpush3.bf16.msra.mxu1 %v11142_v54  ;;  %10571 = vmatprep.mubr.msk.bf16.mxu1 %vm11583_vm6, %v11582_v33 }
0x1583   :  { %10569 = vmatprep.subr.bf16.mxu1 %v11582_v33  ;;  %10579 = vmatprep.mubr.msk.bf16.mxu0 %vm11583_vm6, %v11582_v33 }
0x1584   :  { %10576 = vmatpush3.bf16.msra.mxu0 %v11144_v2 }
0x1585   :  { %10577 = vmatprep.subr.bf16.mxu0 %v11582_v33 }
0x1586   :  { %10570 = vmatpush3.bf16.msra.mxu1 %v11143_v43 }
0x1587   :  { %10583 = vmatprep.subr.bf16.mxu1 %v11582_v33 }
0x1588   :  { %10578 = vmatpush3.bf16.msra.mxu0 %v11145_v4 }
0x1589   :  { %10589 = vmatprep.subr.bf16.mxu0 %v11582_v33 }
0x1641   :  { %v7717_v23 = vpop.f32.mrf.mxu0  ;;  %v7667_v12 = vpop.f32.mrf.mxu1 }
0x1642   :  { %v7723_v26 = vpack.c.bf16 %v7717_v23, %v7717_v23  ;;  %v7673_v19 = vpack.c.bf16 %v7667_v12, %v7667_v12 }
0x1643   :  { %v10565_v8 = vpop.f32.mrf.mxu0  ;;  %v10559_v39 = vpop.f32.mrf.mxu1 }
0x1644   :  { %10572 = vmatmul.mubr.msk.bf16.vlgmr.msra.gmra.mxu1 %vm6699_vm12, %v7723_v26  ;;  %10580 = vmatmul.mubr.msk.bf16.vlgmr.msra.gmra.mxu0 %vm6699_vm12, %v7673_v19 }
0x1645   :  { %10584 = vmatpush3.bf16.msra.mxu1 %v7631_v53  ;;  %10585 = vmatprep.mubr.msk.bf16.mxu1 %vm11583_vm6, %v11582_v33  ;;  %v7720_v58 = vpop.f32.mrf.mxu0  ;;  %v7670_v46 = vpop.f32.mrf.mxu1 }
0x1646   :  { %10597 = vmatprep.subr.bf16.mxu1 %v11582_v33  ;;  %10593 = vmatprep.mubr.msk.bf16.mxu0 %vm11583_vm6, %v11582_v33 }
0x1647   :  { %v10566_v36 = vpop.f32.mrf.mxu0  ;;  %v10560_v40 = vpop.f32.mrf.mxu1  ;;  %10590 = vmatpush3.bf16.msra.mxu0 %v11146_v47 }
0x1648   :  { %10591 = vmatprep.subr.bf16.mxu0 %v11582_v33 }
0x164b   :  { %10592 = vmatpush3.bf16.msra.mxu0 %v11147_v18 }
0x164c   :  { %10586 = vmatmul.mubr.msk.bf16.vlgmr.msra.gmra.mxu1 %vm14207_vm2, %v7840_v52  ;;  %10603 = vmatprep.subr.bf16.mxu0 %v11582_v33 }
0x164d   :  { %10598 = vmatpush3.bf16.msra.mxu1 %v7631_v53  ;;  %10599 = vmatprep.mubr.msk.bf16.mxu1 %vm11583_vm6, %v11582_v33 }
0x1654   :  { %10600 = vmatmul.mubr.msk.bf16.vlgmr.msra.gmra.mxu1 %vm14200_vm0, %v7947_v61 }
0x1704   :  { %v7778_v55 = vpop.f32.mrf.mxu1  ;;  %v7833_v32 = vpop.f32.mrf.mxu0 }
0x1705   :  { %v7834_v48 = vadd.f32 %v7833_v32, %v7778_v55 }
0x1706   :  { %v10573_v10 = vpop.f32.mrf.mxu1  ;;  %v10581_v49 = vpop.f32.mrf.mxu0 }
0x1708   :  { %v7781_v11 = vpop.f32.mrf.mxu1  ;;  %v7836_v42 = vpop.f32.mrf.mxu0 }
0x170a   :  { %v10574_v60 = vpop.f32.mrf.mxu1  ;;  %v10582_v16 = vpop.f32.mrf.mxu0 }
0x170c   :  { %v7878_v37 = vpop.f32.mrf.mxu1 }
0x170d   :  { %v7884_v17 = vpack.c.bf16 %v7878_v37, %v7878_v37 }
0x170e   :  { %v10587_v3 = vpop.f32.mrf.mxu1 }
0x170f   :  { %10594 = vmatmul.mubr.msk.bf16.vlgmr.msra.gmra.mxu0 %vm6699_vm12, %v7884_v17 }
0x1710   :  { %v7881_v20 = vpop.f32.mrf.mxu1  ;;  %10604 = vmatpush3.bf16.msra.mxu0 %v11148_v22  ;;  %10607 = vmatprep.mubr.msk.bf16.mxu0 %vm11583_vm6, %v11582_v33 }
0x1711   :  { %10605 = vmatprep.subr.bf16.mxu0 %v11582_v33 }
0x1712   :  { %v10588_v35 = vpop.f32.mrf.mxu1 }
0x1714   :  { %v7985_v51 = vpop.f32.mrf.mxu1  ;;  %10606 = vmatpush3.bf16.msra.mxu0 %v11149_v28 }
0x1715   :  { %v7991_v56 = vpack.c.bf16 %v7985_v51, %v7985_v51 }
0x1716   :  { %v10601_v14 = vpop.f32.mrf.mxu1 }
0x1717   :  { %10608 = vmatmul.mubr.msk.bf16.vlgmr.msra.gmra.mxu0 %vm6699_vm12, %v7991_v56 }
0x1718   :  { %v7988_v24 = vpop.f32.mrf.mxu1 }
0x171a   :  { %v10602_v57 = vpop.f32.mrf.mxu1 }
0x17cf   :  { %v7939_v21 = vpop.f32.mrf.mxu0 }
0x17d0   :  { %v7945_v9 = vadd.f32 %v7939_v21, %v7834_v48 }
0x17d1   :  { %v10595_v0 = vpop.f32.mrf.mxu0 }
0x17d3   :  { %v7942_v38 = vpop.f32.mrf.mxu0 }
0x17d5   :  { %v10596_v45 = vpop.f32.mrf.mxu0 }
0x17d7   :  { %v8046_v13 = vpop.f32.mrf.mxu0 }
0x17d8   :  { %v8052_v15 = vadd.f32 %v8046_v13, %v7945_v9 }
0x17d9   :  { %v10609_v62 = vpop.f32.mrf.mxu0 }
0x17da   :  { %v8060_v33 = vadd.f32 %v8617_v30, %v8052_v15 }
0x17db   :  { %v8049_v63 = vpop.f32.mrf.mxu0 }
0x17dc   :  { %v8069_v34 = vmul.f32 0.5, %v8060_v33  ;;  %8062 = vst.msk [vmem:[#allocation20] sm:$0x3] %vm8061_vm1, %v8060_v33 }
0x17dd   :  { %v10610_v41 = vpop.f32.mrf.mxu0 }
0x17de   :  { %v8070_v7 = vmul.f32 1.442695, %v8069_v34 }
0x17e0   :  { %11156 = vpow2.f32 %v8070_v7 }
0x17e1   :  { %11501 = shalt.err (!%p11498_p3)
}
0x17e2   :  { %8088 = dma.vmem_to_hbm [thread:$0]  %s8086_s24, 32, %s14042_s14, [#allocation4]   ;;  %v8068_v5 = vld [vmem:[#allocation19] sm:$0x3] }
0x17e3   :  { %s11585_s0 = smov 120   ;;  %s11586_s10 = smov [#allocation21]  }
0x17e4   :  { %s8095_s17 = sshll.u32 %s11586_s10, 4  ;;  %s11587_s25 = smov [#allocation23]   ;;  %s8096_s17 = int_to_ptr.vmem [resolvable:$true] %s8095_s17 }
0x17e5   :  { %s8105_s26 = sshll.u32 %s11587_s25, 4  ;;  %s11510_s14 = scalar_lea.vmem %s8096_s17, 32  ;;  %s8106_s26 = int_to_ptr.vmem [resolvable:$true] %s8105_s26 }
0x17e6   :  { %p11511_p4 = scmp.ne.s32.totalorder %s8096_s17, %s11510_s14  ;;  %p11515_p5 = scmp.lt.s32.totalorder %s8096_s17, %s8096_s17 }
0x17e7   :  { %p11516_p6 = scmp.lt.s32.totalorder %s11510_s14, %s11510_s14 }
0x17e9   :  { %p11517_p7 = por %p11516_p6, %p11515_p5 }
0x17eb   :  { %p11518_p8 = pnand %p11517_p7, %p11511_p4 }
0x17ed   :  { %v11157_v31 = vpop.eup %11156 }
0x17ee   :  { %8073 = vrot.lane.b32.xlu0 %v11157_v31, %s11585_s0 }
0x17f2   :  { %8064 = vrot.lane.b32.xlu0 %v8060_v33, %s11585_s0 }
0x1860   :  { %v8074_v50 = vpop.permute.xlu0 %8073 }
0x1861   :  { %v8076_v27 = vmul.f32 %v8074_v50, %v8068_v5 }
0x1863   :  { %v8077_v1 = vadd.f32 %v8076_v27, %v8060_v33 }
0x1864   :  { %v8065_v59 = vpop.permute.xlu0 %8064 }
0x1865   :  { %8067 = vst.msk [vmem:[#allocation21] sm:$0x3] %vm8061_vm1, %v8065_v59  ;;  %8078 = vst.msk [vmem:[#allocation23] sm:$0x3] %vm8061_vm1, %v8077_v1 }
0x1866   :  { %11521 = shalt.err (!%p11518_p8)
}
0x1867   :  { %8098 = dma.vmem_to_hbm [thread:$0]  %s8096_s17, 32, %s14043_s15, [#allocation22]  }
0x1868   :  { %s11530_s2 = scalar_lea.vmem %s8106_s26, 32  ;;  %p11535_p10 = scmp.lt.s32.totalorder %s8106_s26, %s8106_s26 }
0x1869   :  { %p11531_p9 = scmp.ne.s32.totalorder %s8106_s26, %s11530_s2  ;;  %p11536_p11 = scmp.lt.s32.totalorder %s11530_s2, %s11530_s2 }
0x186b   :  { %p11537_p12 = por %p11536_p11, %p11535_p10 }
0x186d   :  { %p11538_p13 = pnand %p11537_p12, %p11531_p9 }
0x186f   :  { %11541 = shalt.err (!%p11538_p13)
}
0x1870   :  { %8108 = dma.vmem_to_hbm [thread:$0]  %s8106_s26, 32, %s14044_s16, [#allocation22]  }
0x1871   :  { %11562 = dma.done.wait [#allocation4], 32  }
0x1872   :  { %11563 = vsyncadd [#allocation4], 4294967264 }
0x1873   :  { %11564 = dma.done.wait [#allocation22], 64  }
0x1874   :  { %11565 = vsyncadd [#allocation22], 4294967232 }
0x1875   :  { %8118 = vsyncpa [#allocation3], 1 }
0x1876   :  { %8119 = vsyncpa [#allocation6], 1 }
0x1877   :  { %8120 = vsyncpa [#allocation9], 1 }
0x1878   :  { %8121 = vsyncpa [#allocation12], 1 }
0x1879   :  { %8122 = vsyncpa [#allocation15], 1 }
0x187a   :  { %8123 = vsyncpa [#allocation18], 1 }
0x187b   :  { %8124 = vsyncpa [#allocation4], 1 }
0x187c   :  { %8125 = vsyncpa [#allocation22], 1 }

</bundles_post_ra>
